<compile_context>
chip_gen: v7x
topology: tpu7x:2x2x1
jax: 0.10.0
libtpu: 0.0.40
codegen_flags: <defaults>
</compile_context>

<pallas_src>
import functools

import jax
import jax.numpy as jnp
from jax.experimental import pallas as pl
from jax.experimental.pallas import tpu as pltpu

NEG_SLOPE = 0.2
_NEG_INF = -1e30


# ---------------------------------------------------------------------------
# Fused ExitBlock kernel (one sample per grid step)
# ---------------------------------------------------------------------------
def _exit_block_kernel(
        x_ref, sel_ref, wl1_ref, wr1_ref, wl2_ref, wr2_ref,
        dir_w_ref, dir_sc_ref, dir_bi_ref,
        r1_dw_ref, r1_pw_ref, r1_sc_ref, r1_bi_ref,
        r2_dw_ref, r2_pw_ref, r2_sc_ref, r2_bi_ref,
        c1_dw_ref, c1_pw_ref, c1_sc_ref, c1_bi_ref,
        c2_dw_ref, c2_pw_ref, c2_sc_ref, c2_bi_ref,
        o_ref, pad1, padm, pad2, *, H, W):
    H2, W2 = H // 2, W // 2
    HW, HW2 = H * W, H2 * W2

    x = x_ref[0]                                   # (HW, 256) f32, spatial flattened
    sel = sel_ref[...]                             # (HW2, HW) 0/1 stride-2 selector
    wl1, wr1 = wl1_ref[...], wr1_ref[...]          # (HW, 1) edge masks (w>0 / w<W-1)
    wl2, wr2 = wl2_ref[...], wr2_ref[...]          # (HW2, 1)

    def leaky(v):                                  # LeakyReLU(0.2): single vmul+vmax
        return jnp.maximum(v, NEG_SLOPE * v)

    def dw3x3(pad_ref, a, dw_ref, wl, wr, w_row):
        """Depthwise 3x3 conv (zero padding) on row-flattened (h*w, C) data."""
        rows, cc = a.shape
        pad_ref[...] = jnp.zeros(pad_ref.shape, jnp.float32)
        pad_ref[pl.ds(w_row + 1, rows), :] = a
        acc = jnp.zeros((rows, cc), jnp.float32)   # keep depthwise accumulation in f32
        k = 0
        for dy in (-1, 0, 1):
            for dx in (-1, 0, 1):
                t = pad_ref[pl.ds(w_row + 1 + dy * w_row + dx, rows), :]
                if dx == -1:
                    t = t * wl                     # kill wrap-around across w boundary
                elif dx == 1:
                    t = t * wr
                acc = acc + t * dw_ref[pl.ds(k, 1), :]
                k += 1
        return acc

    def pw_bn(a, w_ref, sc_ref, bi_ref):
        """1x1 conv as bf16 channel matmul (MXU) + folded eval-mode BatchNorm."""
        y = jnp.dot(a.astype(jnp.bfloat16), w_ref[...],
                    preferred_element_type=jnp.float32)
        return y * sc_ref[...] + bi_ref[...]

    # ---- direct branch: Conv2d(256,512,1,stride=2) + BN (stride-2 pick via sel matmul)
    xs = jnp.dot(sel, x, preferred_element_type=jnp.float32)          # (HW2, 256)
    direct = pw_bn(xs, dir_w_ref, dir_sc_ref, dir_bi_ref)             # (HW2, 512)

    # ---- residual: LReLU -> DWSep(256,256) -> BN -> LReLU -> DWSep(256,512) -> BN
    a = leaky(x)
    a = dw3x3(pad1, a, r1_dw_ref, wl1, wr1, W)
    a = leaky(pw_bn(a, r1_pw_ref, r1_sc_ref, r1_bi_ref))              # (HW, 256)
    a = dw3x3(pad1, a, r2_dw_ref, wl1, wr1, W)
    a = pw_bn(a, r2_pw_ref, r2_sc_ref, r2_bi_ref)                     # (HW, 512)

    # ---- MaxPool2d(3, stride=2, padding=1): full-res 3x3 max, then stride-2 selection
    bl1 = wl1 > 0.5
    br1 = wr1 > 0.5
    padm[...] = jnp.full(padm.shape, _NEG_INF, jnp.float32)
    padm[pl.ds(W + 1, HW), :] = a
    m = None
    for dy in (-1, 0, 1):
        for dx in (-1, 0, 1):
            t = padm[pl.ds(W + 1 + dy * W + dx, HW), :]
            if dx == -1:
                t = jnp.where(bl1, t, _NEG_INF)
            elif dx == 1:
                t = jnp.where(br1, t, _NEG_INF)
            m = t if m is None else jnp.maximum(m, t)
    pooled = jnp.dot(sel, m, preferred_element_type=jnp.float32)      # (HW2, 512)

    y = direct + pooled

    # ---- conv head: DWSep(512,512)+BN+LReLU -> DWSep(512,1024)+BN+LReLU
    a = dw3x3(pad2, y, c1_dw_ref, wl2, wr2, W2)
    a = leaky(pw_bn(a, c1_pw_ref, c1_sc_ref, c1_bi_ref))              # (HW2, 512)
    a = dw3x3(pad2, a, c2_dw_ref, wl2, wr2, W2)
    a = leaky(pw_bn(a, c2_pw_ref, c2_sc_ref, c2_bi_ref))              # (HW2, 1024)

    # ---- AdaptiveAvgPool2d((1,1)); Dropout(0.3) is identity in eval mode.
    o_ref[0] = jnp.sum(a, axis=0, keepdims=True) * (1.0 / HW2)        # (1, 1024)


# ---------------------------------------------------------------------------
# Host-side constant helpers (tiny, computed once in the wrapper)
# ---------------------------------------------------------------------------
def _stride2_selector(h, w):
    """0/1 matrix picking positions (2i, 2j) out of the flattened h*w grid."""
    h2, w2 = h // 2, w // 2
    rows = jnp.arange(h2 * w2)
    cols = (rows // w2) * (2 * w) + (rows % w2) * 2
    return (cols[:, None] == jnp.arange(h * w)[None, :]).astype(jnp.float32)


def _edge_masks(h, w):
    col = jnp.arange(h * w) % w
    wl = (col != 0).astype(jnp.float32)[:, None]          # left neighbour valid
    wr = (col != (w - 1)).astype(jnp.float32)[:, None]    # right neighbour valid
    return wl, wr


# ---------------------------------------------------------------------------
# Public wrapper: NCHW in, NCHW out (N, 1024, 1, 1)
# ---------------------------------------------------------------------------
@jax.jit
def exit_block_forward(x_nchw, p):
    n, c, h, w = x_nchw.shape
    h2, w2 = h // 2, w // 2
    hw, hw2 = h * w, h2 * w2

    # NCHW -> (N, H*W, C): channels on lanes, flattened spatial on sublanes.
    x = jnp.transpose(x_nchw, (0, 2, 3, 1)).astype(jnp.float32).reshape(n, hw, c)

    sel = _stride2_selector(h, w)
    wl1, wr1 = _edge_masks(h, w)
    wl2, wr2 = _edge_masks(h2, w2)

    inputs = (x, sel, wl1, wr1, wl2, wr2,
              p["direct_w"], p["direct_scale"], p["direct_bias"],
              p["r1_dw"], p["r1_pw"], p["r1_scale"], p["r1_bias"],
              p["r2_dw"], p["r2_pw"], p["r2_scale"], p["r2_bias"],
              p["c1_dw"], p["c1_pw"], p["c1_scale"], p["c1_bias"],
              p["c2_dw"], p["c2_pw"], p["c2_scale"], p["c2_bias"])

    def _const(a):
        return pl.BlockSpec(a.shape, lambda i, _z=(0,) * a.ndim: _z)

    in_specs = [pl.BlockSpec((1, hw, c), lambda i: (i, 0, 0))] + \
               [_const(a) for a in inputs[1:]]

    kern = functools.partial(_exit_block_kernel, H=h, W=w)

    out = pl.pallas_call(
        kern,
        out_shape=jax.ShapeDtypeStruct((n, 1, 1024), jnp.float32),
        grid=(n,),
        in_specs=in_specs,
        out_specs=pl.BlockSpec((1, 1, 1024), lambda i: (i, 0, 0)),
        scratch_shapes=[
            pltpu.VMEM((hw + 2 * w + 2, 256), jnp.float32),    # zero-padded rows (256 ch)
            pltpu.VMEM((hw + 2 * w + 2, 512), jnp.float32),    # -inf-padded rows (maxpool)
            pltpu.VMEM((hw2 + 2 * w2 + 2, 512), jnp.float32),  # zero-padded rows (4x4 stage)
        ],
        compiler_params=pltpu.CompilerParams(
            dimension_semantics=("parallel",)),
    )(*inputs)

    return jnp.transpose(out.reshape(n, 1, 1, 1024), (0, 3, 1, 2))


# ---------------------------------------------------------------------------
# Parameter construction (deterministic, synthetic)
# ---------------------------------------------------------------------------
def _fold_bn(gamma, beta, mean, var, eps=1e-5):
    scale = gamma / jnp.sqrt(var + eps)
    bias = beta - mean * scale
    return (scale.reshape(1, -1).astype(jnp.float32),
            bias.reshape(1, -1).astype(jnp.float32))


def init_params(key):
    keys = iter(jax.random.split(key, 32))

    def dw(c):
        # depthwise 3x3 kernel, stored flat as (9, c): row k = tap (ky, kx) = (k//3, k%3)
        return 0.3 * jax.random.normal(next(keys), (9, c), jnp.float32)

    def pw(ci, co):
        w = jax.random.normal(next(keys), (ci, co), jnp.float32) / jnp.sqrt(ci)
        return w.astype(jnp.bfloat16)      # bf16 MXU operands (f32 accumulate in-kernel)

    def bn(c):
        g = 1.0 + 0.1 * jax.random.normal(next(keys), (c,), jnp.float32)
        b = 0.1 * jax.random.normal(next(keys), (c,), jnp.float32)
        m = 0.1 * jax.random.normal(next(keys), (c,), jnp.float32)
        v = jax.random.uniform(next(keys), (c,), jnp.float32, 0.5, 1.5)
        return _fold_bn(g, b, m, v)

    p = {}
    p["direct_w"] = pw(256, 512)           # Conv2d(256,512,1,stride=2); bias folded into BN bias
    p["direct_scale"], p["direct_bias"] = bn(512)
    p["r1_dw"], p["r1_pw"] = dw(256), pw(256, 256)     # DWSep(256,256,3,pad=1)
    p["r1_scale"], p["r1_bias"] = bn(256)
    p["r2_dw"], p["r2_pw"] = dw(256), pw(256, 512)     # DWSep(256,512,3,pad=1)
    p["r2_scale"], p["r2_bias"] = bn(512)
    p["c1_dw"], p["c1_pw"] = dw(512), pw(512, 512)     # DWSep(512,512,3,pad=1)
    p["c1_scale"], p["c1_bias"] = bn(512)
    p["c2_dw"], p["c2_pw"] = dw(512), pw(512, 1024)    # DWSep(512,1024,3,pad=1)
    p["c2_scale"], p["c2_bias"] = bn(1024)
    return p


# ---------------------------------------------------------------------------
# Pure-JAX reference (for a sanity check)
# ---------------------------------------------------------------------------
def reference_forward(x_nchw, p):
    x = jnp.transpose(x_nchw, (0, 2, 3, 1)).astype(jnp.float32)
    lr = lambda z: jnp.maximum(z, NEG_SLOPE * z)

    def conv(z, w_hwio, stride=1, padding=0, groups=1):
        return jax.lax.conv_general_dilated(
            z, w_hwio, (stride, stride),
            [(padding, padding), (padding, padding)],
            dimension_numbers=("NHWC", "HWIO", "NHWC"),
            feature_group_count=groups)

    def dwsep(z, dwk, pwk):
        c = z.shape[-1]
        z = conv(z, dwk.reshape(3, 3, 1, c), padding=1, groups=c)
        pwf = pwk.astype(jnp.float32)
        return conv(z, pwf.reshape(1, 1, *pwf.shape))

    def bn(z, s, b):
        return z * s.reshape(-1) + b.reshape(-1)

    direct = bn(conv(x, p["direct_w"].astype(jnp.float32).reshape(1, 1, 256, 512),
                     stride=2),
                p["direct_scale"], p["direct_bias"])
    r = lr(x)
    r = lr(bn(dwsep(r, p["r1_dw"], p["r1_pw"]), p["r1_scale"], p["r1_bias"]))
    r = bn(dwsep(r, p["r2_dw"], p["r2_pw"]), p["r2_scale"], p["r2_bias"])
    r = jax.lax.reduce_window(r, -jnp.inf, jax.lax.max,
                              (1, 3, 3, 1), (1, 2, 2, 1),
                              [(0, 0), (1, 1), (1, 1), (0, 0)])
    y = direct + r
    y = lr(bn(dwsep(y, p["c1_dw"], p["c1_pw"]), p["c1_scale"], p["c1_bias"]))
    y = lr(bn(dwsep(y, p["c2_dw"], p["c2_pw"]), p["c2_scale"], p["c2_bias"]))
    y = jnp.mean(y, axis=(1, 2))
    return y.reshape(y.shape[0], -1, 1, 1)


if __name__ == "__main__":
    key = jax.random.PRNGKey(0)
    pkey, xkey = jax.random.split(key)
    params = init_params(pkey)

    # NCHW input; ExitBlock fixes channels at 256.  Small 8x8 spatial, batch 2.
    x = jax.random.normal(xkey, (2, 256, 8, 8), jnp.float32)

    out = jax.block_until_ready(exit_block_forward(x, params))
    assert out.shape == (2, 1024, 1, 1), out.shape
    assert bool(jnp.all(jnp.isfinite(out)))

    ref = jax.block_until_ready(reference_forward(x, params))
    max_err = float(jnp.max(jnp.abs(out - ref)))
    assert max_err < 3e-2, f"max abs err {max_err}"

    print("KERNEL_OK")
</pallas_src>

<mosaic_0001>
module attributes {stable_mosaic.version = 11 : i64} {
  func.func @_exit_block_kernel(%arg0: i32, %arg1: memref<1x64x256xf32, #tpu.memory_space<vmem>>, %arg2: memref<16x64xf32, #tpu.memory_space<vmem>>, %arg3: memref<64x1xf32, #tpu.memory_space<vmem>>, %arg4: memref<64x1xf32, #tpu.memory_space<vmem>>, %arg5: memref<16x1xf32, #tpu.memory_space<vmem>>, %arg6: memref<16x1xf32, #tpu.memory_space<vmem>>, %arg7: memref<256x512xbf16, #tpu.memory_space<vmem>>, %arg8: memref<1x512xf32, #tpu.memory_space<vmem>>, %arg9: memref<1x512xf32, #tpu.memory_space<vmem>>, %arg10: memref<9x256xf32, #tpu.memory_space<vmem>>, %arg11: memref<256x256xbf16, #tpu.memory_space<vmem>>, %arg12: memref<1x256xf32, #tpu.memory_space<vmem>>, %arg13: memref<1x256xf32, #tpu.memory_space<vmem>>, %arg14: memref<9x256xf32, #tpu.memory_space<vmem>>, %arg15: memref<256x512xbf16, #tpu.memory_space<vmem>>, %arg16: memref<1x512xf32, #tpu.memory_space<vmem>>, %arg17: memref<1x512xf32, #tpu.memory_space<vmem>>, %arg18: memref<9x512xf32, #tpu.memory_space<vmem>>, %arg19: memref<512x512xbf16, #tpu.memory_space<vmem>>, %arg20: memref<1x512xf32, #tpu.memory_space<vmem>>, %arg21: memref<1x512xf32, #tpu.memory_space<vmem>>, %arg22: memref<9x512xf32, #tpu.memory_space<vmem>>, %arg23: memref<512x1024xbf16, #tpu.memory_space<vmem>>, %arg24: memref<1x1024xf32, #tpu.memory_space<vmem>>, %arg25: memref<1x1024xf32, #tpu.memory_space<vmem>>, %arg26: memref<1x1x1024xf32, #tpu.memory_space<vmem>>, %arg27: memref<82x256xf32, #tpu.memory_space<vmem>>, %arg28: memref<82x512xf32, #tpu.memory_space<vmem>>, %arg29: memref<26x512xf32, #tpu.memory_space<vmem>>) attributes {dimension_semantics = [#tpu.dimension_semantics<parallel>], iteration_bounds = array<i64: 2>, scalar_prefetch = 0 : i64, scratch_operands = 3 : i64, tpu.core_type = #tpu.core_type<tc>, window_params = [{transform_indices = @transform_0, window_bounds = array<i64: 1, 64, 256>}, {pipeline_mode = #tpu.pipeline_mode<synchronous>, transform_indices = @transform_1, window_bounds = array<i64: 16, 64>}, {pipeline_mode = #tpu.pipeline_mode<synchronous>, transform_indices = @transform_2, window_bounds = array<i64: 64, 1>}, {pipeline_mode = #tpu.pipeline_mode<synchronous>, transform_indices = @transform_3, window_bounds = array<i64: 64, 1>}, {pipeline_mode = #tpu.pipeline_mode<synchronous>, transform_indices = @transform_4, window_bounds = array<i64: 16, 1>}, {pipeline_mode = #tpu.pipeline_mode<synchronous>, transform_indices = @transform_5, window_bounds = array<i64: 16, 1>}, {pipeline_mode = #tpu.pipeline_mode<synchronous>, transform_indices = @transform_6, window_bounds = array<i64: 256, 512>}, {pipeline_mode = #tpu.pipeline_mode<synchronous>, transform_indices = @transform_7, window_bounds = array<i64: 1, 512>}, {pipeline_mode = #tpu.pipeline_mode<synchronous>, transform_indices = @transform_8, window_bounds = array<i64: 1, 512>}, {pipeline_mode = #tpu.pipeline_mode<synchronous>, transform_indices = @transform_9, window_bounds = array<i64: 9, 256>}, {pipeline_mode = #tpu.pipeline_mode<synchronous>, transform_indices = @transform_10, window_bounds = array<i64: 256, 256>}, {pipeline_mode = #tpu.pipeline_mode<synchronous>, transform_indices = @transform_11, window_bounds = array<i64: 1, 256>}, {pipeline_mode = #tpu.pipeline_mode<synchronous>, transform_indices = @transform_12, window_bounds = array<i64: 1, 256>}, {pipeline_mode = #tpu.pipeline_mode<synchronous>, transform_indices = @transform_13, window_bounds = array<i64: 9, 256>}, {pipeline_mode = #tpu.pipeline_mode<synchronous>, transform_indices = @transform_14, window_bounds = array<i64: 256, 512>}, {pipeline_mode = #tpu.pipeline_mode<synchronous>, transform_indices = @transform_15, window_bounds = array<i64: 1, 512>}, {pipeline_mode = #tpu.pipeline_mode<synchronous>, transform_indices = @transform_16, window_bounds = array<i64: 1, 512>}, {pipeline_mode = #tpu.pipeline_mode<synchronous>, transform_indices = @transform_17, window_bounds = array<i64: 9, 512>}, {pipeline_mode = #tpu.pipeline_mode<synchronous>, transform_indices = @transform_18, window_bounds = array<i64: 512, 512>}, {pipeline_mode = #tpu.pipeline_mode<synchronous>, transform_indices = @transform_19, window_bounds = array<i64: 1, 512>}, {pipeline_mode = #tpu.pipeline_mode<synchronous>, transform_indices = @transform_20, window_bounds = array<i64: 1, 512>}, {pipeline_mode = #tpu.pipeline_mode<synchronous>, transform_indices = @transform_21, window_bounds = array<i64: 9, 512>}, {pipeline_mode = #tpu.pipeline_mode<synchronous>, transform_indices = @transform_22, window_bounds = array<i64: 512, 1024>}, {pipeline_mode = #tpu.pipeline_mode<synchronous>, transform_indices = @transform_23, window_bounds = array<i64: 1, 1024>}, {pipeline_mode = #tpu.pipeline_mode<synchronous>, transform_indices = @transform_24, window_bounds = array<i64: 1, 1024>}, {transform_indices = @transform_25, window_bounds = array<i64: 1, 1, 1024>}]} {
    %c0 = arith.constant 0 : index
    %c0_0 = arith.constant 0 : index
    %c0_1 = arith.constant 0 : index
    %0 = vector.load %arg1[%c0, %c0_0, %c0_1] : memref<1x64x256xf32, #tpu.memory_space<vmem>>, vector<1x64x256xf32>
    %1 = vector.shape_cast %0 : vector<1x64x256xf32> to vector<64x256xf32>
    %c0_2 = arith.constant 0 : index
    %c0_3 = arith.constant 0 : index
    %2 = vector.load %arg2[%c0_2, %c0_3] : memref<16x64xf32, #tpu.memory_space<vmem>>, vector<16x64xf32>
    %c0_4 = arith.constant 0 : index
    %c0_5 = arith.constant 0 : index
    %3 = vector.load %arg3[%c0_4, %c0_5] : memref<64x1xf32, #tpu.memory_space<vmem>>, vector<64x1xf32>
    %c0_6 = arith.constant 0 : index
    %c0_7 = arith.constant 0 : index
    %4 = vector.load %arg4[%c0_6, %c0_7] : memref<64x1xf32, #tpu.memory_space<vmem>>, vector<64x1xf32>
    %c0_8 = arith.constant 0 : index
    %c0_9 = arith.constant 0 : index
    %5 = vector.load %arg5[%c0_8, %c0_9] : memref<16x1xf32, #tpu.memory_space<vmem>>, vector<16x1xf32>
    %c0_10 = arith.constant 0 : index
    %c0_11 = arith.constant 0 : index
    %6 = vector.load %arg6[%c0_10, %c0_11] : memref<16x1xf32, #tpu.memory_space<vmem>>, vector<16x1xf32>
    %cst = arith.constant dense<0.000000e+00> : vector<16x256xf32>
    %7 = tpu.matmul %2, %1, %cst {dimension_numbers = #tpu.dot_dimension_numbers<[1], [0], [0], [1], [0, 0, 1, 1], [], []>} : vector<16x64xf32>, vector<64x256xf32>, vector<16x256xf32> -> vector<16x256xf32>
    %8 = arith.truncf %7 : vector<16x256xf32> to vector<16x256xbf16>
    %c0_12 = arith.constant 0 : index
    %c0_13 = arith.constant 0 : index
    %9 = vector.load %arg7[%c0_12, %c0_13] : memref<256x512xbf16, #tpu.memory_space<vmem>>, vector<256x512xbf16>
    %cst_14 = arith.constant dense<0.000000e+00> : vector<16x512xf32>
    %10 = tpu.matmul %8, %9, %cst_14 {dimension_numbers = #tpu.dot_dimension_numbers<[1], [0], [0], [1], [0, 0, 1, 1], [], []>} : vector<16x256xbf16>, vector<256x512xbf16>, vector<16x512xf32> -> vector<16x512xf32>
    %c0_15 = arith.constant 0 : index
    %c0_16 = arith.constant 0 : index
    %11 = vector.load %arg8[%c0_15, %c0_16] : memref<1x512xf32, #tpu.memory_space<vmem>>, vector<1x512xf32>
    %12 = vector.broadcast %11 : vector<1x512xf32> to vector<16x512xf32>
    %13 = arith.mulf %10, %12 : vector<16x512xf32>
    %c0_17 = arith.constant 0 : index
    %c0_18 = arith.constant 0 : index
    %14 = vector.load %arg9[%c0_17, %c0_18] : memref<1x512xf32, #tpu.memory_space<vmem>>, vector<1x512xf32>
    %15 = vector.broadcast %14 : vector<1x512xf32> to vector<16x512xf32>
    %16 = arith.addf %13, %15 : vector<16x512xf32>
    %cst_19 = arith.constant 2.000000e-01 : f32
    %17 = vector.broadcast %cst_19 : f32 to vector<64x256xf32>
    %18 = arith.mulf %17, %1 : vector<64x256xf32>
    %19 = arith.maximumf %1, %18 : vector<64x256xf32>
    %cst_20 = arith.constant 0.000000e+00 : f32
    %20 = vector.broadcast %cst_20 : f32 to vector<82x256xf32>
    %c0_21 = arith.constant 0 : index
    %c0_22 = arith.constant 0 : index
    %21 = vector.load %arg27[%c0_21, %c0_22] : memref<82x256xf32, #tpu.memory_space<vmem>>, vector<82x256xf32>
    tpu.vector_store %arg27[%c0_21, %c0_22], %20 {strides = array<i32>} : memref<82x256xf32, #tpu.memory_space<vmem>>, vector<82x256xf32>,
    %c9 = arith.constant 9 : index
    %c0_23 = arith.constant 0 : index
    %22 = vector.load %arg27[%c9, %c0_23] : memref<82x256xf32, #tpu.memory_space<vmem>>, vector<64x256xf32>
    tpu.vector_store %arg27[%c9, %c0_23], %19 {strides = array<i32>} : memref<82x256xf32, #tpu.memory_space<vmem>>, vector<64x256xf32>,
    %cst_24 = arith.constant 0.000000e+00 : f32
    %23 = vector.broadcast %cst_24 : f32 to vector<64x256xf32>
    %c0_25 = arith.constant 0 : index
    %c0_26 = arith.constant 0 : index
    %24 = vector.load %arg27[%c0_25, %c0_26] : memref<82x256xf32, #tpu.memory_space<vmem>>, vector<64x256xf32>
    %25 = vector.broadcast %3 : vector<64x1xf32> to vector<64x256xf32>
    %26 = arith.mulf %24, %25 : vector<64x256xf32>
    %c0_27 = arith.constant 0 : index
    %c0_28 = arith.constant 0 : index
    %27 = vector.load %arg10[%c0_27, %c0_28] : memref<9x256xf32, #tpu.memory_space<vmem>>, vector<1x256xf32>
    %28 = vector.broadcast %27 : vector<1x256xf32> to vector<64x256xf32>
    %29 = arith.mulf %26, %28 : vector<64x256xf32>
    %30 = arith.addf %23, %29 : vector<64x256xf32>
    %c1 = arith.constant 1 : index
    %c0_29 = arith.constant 0 : index
    %31 = vector.load %arg27[%c1, %c0_29] : memref<82x256xf32, #tpu.memory_space<vmem>>, vector<64x256xf32>
    %c1_30 = arith.constant 1 : index
    %c0_31 = arith.constant 0 : index
    %32 = vector.load %arg10[%c1_30, %c0_31] : memref<9x256xf32, #tpu.memory_space<vmem>>, vector<1x256xf32>
    %33 = vector.broadcast %32 : vector<1x256xf32> to vector<64x256xf32>
    %34 = arith.mulf %31, %33 : vector<64x256xf32>
    %35 = arith.addf %30, %34 : vector<64x256xf32>
    %c2 = arith.constant 2 : index
    %c0_32 = arith.constant 0 : index
    %36 = vector.load %arg27[%c2, %c0_32] : memref<82x256xf32, #tpu.memory_space<vmem>>, vector<64x256xf32>
    %37 = vector.broadcast %4 : vector<64x1xf32> to vector<64x256xf32>
    %38 = arith.mulf %36, %37 : vector<64x256xf32>
    %c2_33 = arith.constant 2 : index
    %c0_34 = arith.constant 0 : index
    %39 = vector.load %arg10[%c2_33, %c0_34] : memref<9x256xf32, #tpu.memory_space<vmem>>, vector<1x256xf32>
    %40 = vector.broadcast %39 : vector<1x256xf32> to vector<64x256xf32>
    %41 = arith.mulf %38, %40 : vector<64x256xf32>
    %42 = arith.addf %35, %41 : vector<64x256xf32>
    %c8 = arith.constant 8 : index
    %c0_35 = arith.constant 0 : index
    %43 = vector.load %arg27[%c8, %c0_35] : memref<82x256xf32, #tpu.memory_space<vmem>>, vector<64x256xf32>
    %44 = vector.broadcast %3 : vector<64x1xf32> to vector<64x256xf32>
    %45 = arith.mulf %43, %44 : vector<64x256xf32>
    %c3 = arith.constant 3 : index
    %c0_36 = arith.constant 0 : index
    %46 = vector.load %arg10[%c3, %c0_36] : memref<9x256xf32, #tpu.memory_space<vmem>>, vector<1x256xf32>
    %47 = vector.broadcast %46 : vector<1x256xf32> to vector<64x256xf32>
    %48 = arith.mulf %45, %47 : vector<64x256xf32>
    %49 = arith.addf %42, %48 : vector<64x256xf32>
    %c9_37 = arith.constant 9 : index
    %c0_38 = arith.constant 0 : index
    %50 = vector.load %arg27[%c9_37, %c0_38] : memref<82x256xf32, #tpu.memory_space<vmem>>, vector<64x256xf32>
    %c4 = arith.constant 4 : index
    %c0_39 = arith.constant 0 : index
    %51 = vector.load %arg10[%c4, %c0_39] : memref<9x256xf32, #tpu.memory_space<vmem>>, vector<1x256xf32>
    %52 = vector.broadcast %51 : vector<1x256xf32> to vector<64x256xf32>
    %53 = arith.mulf %50, %52 : vector<64x256xf32>
    %54 = arith.addf %49, %53 : vector<64x256xf32>
    %c10 = arith.constant 10 : index
    %c0_40 = arith.constant 0 : index
    %55 = vector.load %arg27[%c10, %c0_40] : memref<82x256xf32, #tpu.memory_space<vmem>>, vector<64x256xf32>
    %56 = vector.broadcast %4 : vector<64x1xf32> to vector<64x256xf32>
    %57 = arith.mulf %55, %56 : vector<64x256xf32>
    %c5 = arith.constant 5 : index
    %c0_41 = arith.constant 0 : index
    %58 = vector.load %arg10[%c5, %c0_41] : memref<9x256xf32, #tpu.memory_space<vmem>>, vector<1x256xf32>
    %59 = vector.broadcast %58 : vector<1x256xf32> to vector<64x256xf32>
    %60 = arith.mulf %57, %59 : vector<64x256xf32>
    %61 = arith.addf %54, %60 : vector<64x256xf32>
    %c16 = arith.constant 16 : index
    %c0_42 = arith.constant 0 : index
    %62 = vector.load %arg27[%c16, %c0_42] : memref<82x256xf32, #tpu.memory_space<vmem>>, vector<64x256xf32>
    %63 = vector.broadcast %3 : vector<64x1xf32> to vector<64x256xf32>
    %64 = arith.mulf %62, %63 : vector<64x256xf32>
    %c6 = arith.constant 6 : index
    %c0_43 = arith.constant 0 : index
    %65 = vector.load %arg10[%c6, %c0_43] : memref<9x256xf32, #tpu.memory_space<vmem>>, vector<1x256xf32>
    %66 = vector.broadcast %65 : vector<1x256xf32> to vector<64x256xf32>
    %67 = arith.mulf %64, %66 : vector<64x256xf32>
    %68 = arith.addf %61, %67 : vector<64x256xf32>
    %c17 = arith.constant 17 : index
    %c0_44 = arith.constant 0 : index
    %69 = vector.load %arg27[%c17, %c0_44] : memref<82x256xf32, #tpu.memory_space<vmem>>, vector<64x256xf32>
    %c7 = arith.constant 7 : index
    %c0_45 = arith.constant 0 : index
    %70 = vector.load %arg10[%c7, %c0_45] : memref<9x256xf32, #tpu.memory_space<vmem>>, vector<1x256xf32>
    %71 = vector.broadcast %70 : vector<1x256xf32> to vector<64x256xf32>
    %72 = arith.mulf %69, %71 : vector<64x256xf32>
    %73 = arith.addf %68, %72 : vector<64x256xf32>
    %c18 = arith.constant 18 : index
    %c0_46 = arith.constant 0 : index
    %74 = vector.load %arg27[%c18, %c0_46] : memref<82x256xf32, #tpu.memory_space<vmem>>, vector<64x256xf32>
    %75 = vector.broadcast %4 : vector<64x1xf32> to vector<64x256xf32>
    %76 = arith.mulf %74, %75 : vector<64x256xf32>
    %c8_47 = arith.constant 8 : index
    %c0_48 = arith.constant 0 : index
    %77 = vector.load %arg10[%c8_47, %c0_48] : memref<9x256xf32, #tpu.memory_space<vmem>>, vector<1x256xf32>
    %78 = vector.broadcast %77 : vector<1x256xf32> to vector<64x256xf32>
    %79 = arith.mulf %76, %78 : vector<64x256xf32>
    %80 = arith.addf %73, %79 : vector<64x256xf32>
    %81 = arith.truncf %80 : vector<64x256xf32> to vector<64x256xbf16>
    %c0_49 = arith.constant 0 : index
    %c0_50 = arith.constant 0 : index
    %82 = vector.load %arg11[%c0_49, %c0_50] : memref<256x256xbf16, #tpu.memory_space<vmem>>, vector<256x256xbf16>
    %cst_51 = arith.constant dense<0.000000e+00> : vector<64x256xf32>
    %83 = tpu.matmul %81, %82, %cst_51 {dimension_numbers = #tpu.dot_dimension_numbers<[1], [0], [0], [1], [0, 0, 1, 1], [], []>} : vector<64x256xbf16>, vector<256x256xbf16>, vector<64x256xf32> -> vector<64x256xf32>
    %c0_52 = arith.constant 0 : index
    %c0_53 = arith.constant 0 : index
    %84 = vector.load %arg12[%c0_52, %c0_53] : memref<1x256xf32, #tpu.memory_space<vmem>>, vector<1x256xf32>
    %85 = vector.broadcast %84 : vector<1x256xf32> to vector<64x256xf32>
    %86 = arith.mulf %83, %85 : vector<64x256xf32>
    %c0_54 = arith.constant 0 : index
    %c0_55 = arith.constant 0 : index
    %87 = vector.load %arg13[%c0_54, %c0_55] : memref<1x256xf32, #tpu.memory_space<vmem>>, vector<1x256xf32>
    %88 = vector.broadcast %87 : vector<1x256xf32> to vector<64x256xf32>
    %89 = arith.addf %86, %88 : vector<64x256xf32>
    %cst_56 = arith.constant 2.000000e-01 : f32
    %90 = vector.broadcast %cst_56 : f32 to vector<64x256xf32>
    %91 = arith.mulf %90, %89 : vector<64x256xf32>
    %92 = arith.maximumf %89, %91 : vector<64x256xf32>
    %cst_57 = arith.constant 0.000000e+00 : f32
    %93 = vector.broadcast %cst_57 : f32 to vector<82x256xf32>
    %c0_58 = arith.constant 0 : index
    %c0_59 = arith.constant 0 : index
    %94 = vector.load %arg27[%c0_58, %c0_59] : memref<82x256xf32, #tpu.memory_space<vmem>>, vector<82x256xf32>
    tpu.vector_store %arg27[%c0_58, %c0_59], %93 {strides = array<i32>} : memref<82x256xf32, #tpu.memory_space<vmem>>, vector<82x256xf32>,
    %c9_60 = arith.constant 9 : index
    %c0_61 = arith.constant 0 : index
    %95 = vector.load %arg27[%c9_60, %c0_61] : memref<82x256xf32, #tpu.memory_space<vmem>>, vector<64x256xf32>
    tpu.vector_store %arg27[%c9_60, %c0_61], %92 {strides = array<i32>} : memref<82x256xf32, #tpu.memory_space<vmem>>, vector<64x256xf32>,
    %cst_62 = arith.constant 0.000000e+00 : f32
    %96 = vector.broadcast %cst_62 : f32 to vector<64x256xf32>
    %c0_63 = arith.constant 0 : index
    %c0_64 = arith.constant 0 : index
    %97 = vector.load %arg27[%c0_63, %c0_64] : memref<82x256xf32, #tpu.memory_space<vmem>>, vector<64x256xf32>
    %98 = vector.broadcast %3 : vector<64x1xf32> to vector<64x256xf32>
    %99 = arith.mulf %97, %98 : vector<64x256xf32>
    %c0_65 = arith.constant 0 : index
    %c0_66 = arith.constant 0 : index
    %100 = vector.load %arg14[%c0_65, %c0_66] : memref<9x256xf32, #tpu.memory_space<vmem>>, vector<1x256xf32>
    %101 = vector.broadcast %100 : vector<1x256xf32> to vector<64x256xf32>
    %102 = arith.mulf %99, %101 : vector<64x256xf32>
    %103 = arith.addf %96, %102 : vector<64x256xf32>
    %c1_67 = arith.constant 1 : index
    %c0_68 = arith.constant 0 : index
    %104 = vector.load %arg27[%c1_67, %c0_68] : memref<82x256xf32, #tpu.memory_space<vmem>>, vector<64x256xf32>
    %c1_69 = arith.constant 1 : index
    %c0_70 = arith.constant 0 : index
    %105 = vector.load %arg14[%c1_69, %c0_70] : memref<9x256xf32, #tpu.memory_space<vmem>>, vector<1x256xf32>
    %106 = vector.broadcast %105 : vector<1x256xf32> to vector<64x256xf32>
    %107 = arith.mulf %104, %106 : vector<64x256xf32>
    %108 = arith.addf %103, %107 : vector<64x256xf32>
    %c2_71 = arith.constant 2 : index
    %c0_72 = arith.constant 0 : index
    %109 = vector.load %arg27[%c2_71, %c0_72] : memref<82x256xf32, #tpu.memory_space<vmem>>, vector<64x256xf32>
    %110 = vector.broadcast %4 : vector<64x1xf32> to vector<64x256xf32>
    %111 = arith.mulf %109, %110 : vector<64x256xf32>
    %c2_73 = arith.constant 2 : index
    %c0_74 = arith.constant 0 : index
    %112 = vector.load %arg14[%c2_73, %c0_74] : memref<9x256xf32, #tpu.memory_space<vmem>>, vector<1x256xf32>
    %113 = vector.broadcast %112 : vector<1x256xf32> to vector<64x256xf32>
    %114 = arith.mulf %111, %113 : vector<64x256xf32>
    %115 = arith.addf %108, %114 : vector<64x256xf32>
    %c8_75 = arith.constant 8 : index
    %c0_76 = arith.constant 0 : index
    %116 = vector.load %arg27[%c8_75, %c0_76] : memref<82x256xf32, #tpu.memory_space<vmem>>, vector<64x256xf32>
    %117 = vector.broadcast %3 : vector<64x1xf32> to vector<64x256xf32>
    %118 = arith.mulf %116, %117 : vector<64x256xf32>
    %c3_77 = arith.constant 3 : index
    %c0_78 = arith.constant 0 : index
    %119 = vector.load %arg14[%c3_77, %c0_78] : memref<9x256xf32, #tpu.memory_space<vmem>>, vector<1x256xf32>
    %120 = vector.broadcast %119 : vector<1x256xf32> to vector<64x256xf32>
    %121 = arith.mulf %118, %120 : vector<64x256xf32>
    %122 = arith.addf %115, %121 : vector<64x256xf32>
    %c9_79 = arith.constant 9 : index
    %c0_80 = arith.constant 0 : index
    %123 = vector.load %arg27[%c9_79, %c0_80] : memref<82x256xf32, #tpu.memory_space<vmem>>, vector<64x256xf32>
    %c4_81 = arith.constant 4 : index
    %c0_82 = arith.constant 0 : index
    %124 = vector.load %arg14[%c4_81, %c0_82] : memref<9x256xf32, #tpu.memory_space<vmem>>, vector<1x256xf32>
    %125 = vector.broadcast %124 : vector<1x256xf32> to vector<64x256xf32>
    %126 = arith.mulf %123, %125 : vector<64x256xf32>
    %127 = arith.addf %122, %126 : vector<64x256xf32>
    %c10_83 = arith.constant 10 : index
    %c0_84 = arith.constant 0 : index
    %128 = vector.load %arg27[%c10_83, %c0_84] : memref<82x256xf32, #tpu.memory_space<vmem>>, vector<64x256xf32>
    %129 = vector.broadcast %4 : vector<64x1xf32> to vector<64x256xf32>
    %130 = arith.mulf %128, %129 : vector<64x256xf32>
    %c5_85 = arith.constant 5 : index
    %c0_86 = arith.constant 0 : index
    %131 = vector.load %arg14[%c5_85, %c0_86] : memref<9x256xf32, #tpu.memory_space<vmem>>, vector<1x256xf32>
    %132 = vector.broadcast %131 : vector<1x256xf32> to vector<64x256xf32>
    %133 = arith.mulf %130, %132 : vector<64x256xf32>
    %134 = arith.addf %127, %133 : vector<64x256xf32>
    %c16_87 = arith.constant 16 : index
    %c0_88 = arith.constant 0 : index
    %135 = vector.load %arg27[%c16_87, %c0_88] : memref<82x256xf32, #tpu.memory_space<vmem>>, vector<64x256xf32>
    %136 = vector.broadcast %3 : vector<64x1xf32> to vector<64x256xf32>
    %137 = arith.mulf %135, %136 : vector<64x256xf32>
    %c6_89 = arith.constant 6 : index
    %c0_90 = arith.constant 0 : index
    %138 = vector.load %arg14[%c6_89, %c0_90] : memref<9x256xf32, #tpu.memory_space<vmem>>, vector<1x256xf32>
    %139 = vector.broadcast %138 : vector<1x256xf32> to vector<64x256xf32>
    %140 = arith.mulf %137, %139 : vector<64x256xf32>
    %141 = arith.addf %134, %140 : vector<64x256xf32>
    %c17_91 = arith.constant 17 : index
    %c0_92 = arith.constant 0 : index
    %142 = vector.load %arg27[%c17_91, %c0_92] : memref<82x256xf32, #tpu.memory_space<vmem>>, vector<64x256xf32>
    %c7_93 = arith.constant 7 : index
    %c0_94 = arith.constant 0 : index
    %143 = vector.load %arg14[%c7_93, %c0_94] : memref<9x256xf32, #tpu.memory_space<vmem>>, vector<1x256xf32>
    %144 = vector.broadcast %143 : vector<1x256xf32> to vector<64x256xf32>
    %145 = arith.mulf %142, %144 : vector<64x256xf32>
    %146 = arith.addf %141, %145 : vector<64x256xf32>
    %c18_95 = arith.constant 18 : index
    %c0_96 = arith.constant 0 : index
    %147 = vector.load %arg27[%c18_95, %c0_96] : memref<82x256xf32, #tpu.memory_space<vmem>>, vector<64x256xf32>
    %148 = vector.broadcast %4 : vector<64x1xf32> to vector<64x256xf32>
    %149 = arith.mulf %147, %148 : vector<64x256xf32>
    %c8_97 = arith.constant 8 : index
    %c0_98 = arith.constant 0 : index
    %150 = vector.load %arg14[%c8_97, %c0_98] : memref<9x256xf32, #tpu.memory_space<vmem>>, vector<1x256xf32>
    %151 = vector.broadcast %150 : vector<1x256xf32> to vector<64x256xf32>
    %152 = arith.mulf %149, %151 : vector<64x256xf32>
    %153 = arith.addf %146, %152 : vector<64x256xf32>
    %154 = arith.truncf %153 : vector<64x256xf32> to vector<64x256xbf16>
    %c0_99 = arith.constant 0 : index
    %c0_100 = arith.constant 0 : index
    %155 = vector.load %arg15[%c0_99, %c0_100] : memref<256x512xbf16, #tpu.memory_space<vmem>>, vector<256x512xbf16>
    %cst_101 = arith.constant dense<0.000000e+00> : vector<64x512xf32>
    %156 = tpu.matmul %154, %155, %cst_101 {dimension_numbers = #tpu.dot_dimension_numbers<[1], [0], [0], [1], [0, 0, 1, 1], [], []>} : vector<64x256xbf16>, vector<256x512xbf16>, vector<64x512xf32> -> vector<64x512xf32>
    %c0_102 = arith.constant 0 : index
    %c0_103 = arith.constant 0 : index
    %157 = vector.load %arg16[%c0_102, %c0_103] : memref<1x512xf32, #tpu.memory_space<vmem>>, vector<1x512xf32>
    %158 = vector.broadcast %157 : vector<1x512xf32> to vector<64x512xf32>
    %159 = arith.mulf %156, %158 : vector<64x512xf32>
    %c0_104 = arith.constant 0 : index
    %c0_105 = arith.constant 0 : index
    %160 = vector.load %arg17[%c0_104, %c0_105] : memref<1x512xf32, #tpu.memory_space<vmem>>, vector<1x512xf32>
    %161 = vector.broadcast %160 : vector<1x512xf32> to vector<64x512xf32>
    %162 = arith.addf %159, %161 : vector<64x512xf32>
    %cst_106 = arith.constant 5.000000e-01 : f32
    %163 = vector.broadcast %cst_106 : f32 to vector<64x1xf32>
    %164 = arith.cmpf ogt, %3, %163 : vector<64x1xf32>
    %cst_107 = arith.constant 5.000000e-01 : f32
    %165 = vector.broadcast %cst_107 : f32 to vector<64x1xf32>
    %166 = arith.cmpf ogt, %4, %165 : vector<64x1xf32>
    %cst_108 = arith.constant -1.000000e+30 : f32
    %167 = vector.broadcast %cst_108 : f32 to vector<82x512xf32>
    %c0_109 = arith.constant 0 : index
    %c0_110 = arith.constant 0 : index
    %168 = vector.load %arg28[%c0_109, %c0_110] : memref<82x512xf32, #tpu.memory_space<vmem>>, vector<82x512xf32>
    tpu.vector_store %arg28[%c0_109, %c0_110], %167 {strides = array<i32>} : memref<82x512xf32, #tpu.memory_space<vmem>>, vector<82x512xf32>,
    %c9_111 = arith.constant 9 : index
    %c0_112 = arith.constant 0 : index
    %169 = vector.load %arg28[%c9_111, %c0_112] : memref<82x512xf32, #tpu.memory_space<vmem>>, vector<64x512xf32>
    tpu.vector_store %arg28[%c9_111, %c0_112], %162 {strides = array<i32>} : memref<82x512xf32, #tpu.memory_space<vmem>>, vector<64x512xf32>,
    %c0_113 = arith.constant 0 : index
    %c0_114 = arith.constant 0 : index
    %170 = vector.load %arg28[%c0_113, %c0_114] : memref<82x512xf32, #tpu.memory_space<vmem>>, vector<64x512xf32>
    %cst_115 = arith.constant -1.000000e+30 : f32
    %171 = vector.shape_cast %164 : vector<64x1xi1> to vector<64x1xi1>
    %172 = vector.broadcast %171 : vector<64x1xi1> to vector<64x512xi1>
    %173 = vector.broadcast %cst_115 : f32 to vector<64x512xf32>
    %174 = arith.select %172, %170, %173 : vector<64x512xi1>, vector<64x512xf32>
    %c1_116 = arith.constant 1 : index
    %c0_117 = arith.constant 0 : index
    %175 = vector.load %arg28[%c1_116, %c0_117] : memref<82x512xf32, #tpu.memory_space<vmem>>, vector<64x512xf32>
    %176 = arith.maximumf %174, %175 : vector<64x512xf32>
    %c2_118 = arith.constant 2 : index
    %c0_119 = arith.constant 0 : index
    %177 = vector.load %arg28[%c2_118, %c0_119] : memref<82x512xf32, #tpu.memory_space<vmem>>, vector<64x512xf32>
    %cst_120 = arith.constant -1.000000e+30 : f32
    %178 = vector.shape_cast %166 : vector<64x1xi1> to vector<64x1xi1>
    %179 = vector.broadcast %178 : vector<64x1xi1> to vector<64x512xi1>
    %180 = vector.broadcast %cst_120 : f32 to vector<64x512xf32>
    %181 = arith.select %179, %177, %180 : vector<64x512xi1>, vector<64x512xf32>
    %182 = arith.maximumf %176, %181 : vector<64x512xf32>
    %c8_121 = arith.constant 8 : index
    %c0_122 = arith.constant 0 : index
    %183 = vector.load %arg28[%c8_121, %c0_122] : memref<82x512xf32, #tpu.memory_space<vmem>>, vector<64x512xf32>
    %cst_123 = arith.constant -1.000000e+30 : f32
    %184 = vector.shape_cast %164 : vector<64x1xi1> to vector<64x1xi1>
    %185 = vector.broadcast %184 : vector<64x1xi1> to vector<64x512xi1>
    %186 = vector.broadcast %cst_123 : f32 to vector<64x512xf32>
    %187 = arith.select %185, %183, %186 : vector<64x512xi1>, vector<64x512xf32>
    %188 = arith.maximumf %182, %187 : vector<64x512xf32>
    %c9_124 = arith.constant 9 : index
    %c0_125 = arith.constant 0 : index
    %189 = vector.load %arg28[%c9_124, %c0_125] : memref<82x512xf32, #tpu.memory_space<vmem>>, vector<64x512xf32>
    %190 = arith.maximumf %188, %189 : vector<64x512xf32>
    %c10_126 = arith.constant 10 : index
    %c0_127 = arith.constant 0 : index
    %191 = vector.load %arg28[%c10_126, %c0_127] : memref<82x512xf32, #tpu.memory_space<vmem>>, vector<64x512xf32>
    %cst_128 = arith.constant -1.000000e+30 : f32
    %192 = vector.shape_cast %166 : vector<64x1xi1> to vector<64x1xi1>
    %193 = vector.broadcast %192 : vector<64x1xi1> to vector<64x512xi1>
    %194 = vector.broadcast %cst_128 : f32 to vector<64x512xf32>
    %195 = arith.select %193, %191, %194 : vector<64x512xi1>, vector<64x512xf32>
    %196 = arith.maximumf %190, %195 : vector<64x512xf32>
    %c16_129 = arith.constant 16 : index
    %c0_130 = arith.constant 0 : index
    %197 = vector.load %arg28[%c16_129, %c0_130] : memref<82x512xf32, #tpu.memory_space<vmem>>, vector<64x512xf32>
    %cst_131 = arith.constant -1.000000e+30 : f32
    %198 = vector.shape_cast %164 : vector<64x1xi1> to vector<64x1xi1>
    %199 = vector.broadcast %198 : vector<64x1xi1> to vector<64x512xi1>
    %200 = vector.broadcast %cst_131 : f32 to vector<64x512xf32>
    %201 = arith.select %199, %197, %200 : vector<64x512xi1>, vector<64x512xf32>
    %202 = arith.maximumf %196, %201 : vector<64x512xf32>
    %c17_132 = arith.constant 17 : index
    %c0_133 = arith.constant 0 : index
    %203 = vector.load %arg28[%c17_132, %c0_133] : memref<82x512xf32, #tpu.memory_space<vmem>>, vector<64x512xf32>
    %204 = arith.maximumf %202, %203 : vector<64x512xf32>
    %c18_134 = arith.constant 18 : index
    %c0_135 = arith.constant 0 : index
    %205 = vector.load %arg28[%c18_134, %c0_135] : memref<82x512xf32, #tpu.memory_space<vmem>>, vector<64x512xf32>
    %cst_136 = arith.constant -1.000000e+30 : f32
    %206 = vector.shape_cast %166 : vector<64x1xi1> to vector<64x1xi1>
    %207 = vector.broadcast %206 : vector<64x1xi1> to vector<64x512xi1>
    %208 = vector.broadcast %cst_136 : f32 to vector<64x512xf32>
    %209 = arith.select %207, %205, %208 : vector<64x512xi1>, vector<64x512xf32>
    %210 = arith.maximumf %204, %209 : vector<64x512xf32>
    %cst_137 = arith.constant dense<0.000000e+00> : vector<16x512xf32>
    %211 = tpu.matmul %2, %210, %cst_137 {dimension_numbers = #tpu.dot_dimension_numbers<[1], [0], [0], [1], [0, 0, 1, 1], [], []>} : vector<16x64xf32>, vector<64x512xf32>, vector<16x512xf32> -> vector<16x512xf32>
    %212 = arith.addf %16, %211 : vector<16x512xf32>
    %cst_138 = arith.constant 0.000000e+00 : f32
    %213 = vector.broadcast %cst_138 : f32 to vector<26x512xf32>
    %c0_139 = arith.constant 0 : index
    %c0_140 = arith.constant 0 : index
    %214 = vector.load %arg29[%c0_139, %c0_140] : memref<26x512xf32, #tpu.memory_space<vmem>>, vector<26x512xf32>
    tpu.vector_store %arg29[%c0_139, %c0_140], %213 {strides = array<i32>} : memref<26x512xf32, #tpu.memory_space<vmem>>, vector<26x512xf32>,
    %c5_141 = arith.constant 5 : index
    %c0_142 = arith.constant 0 : index
    %215 = vector.load %arg29[%c5_141, %c0_142] : memref<26x512xf32, #tpu.memory_space<vmem>>, vector<16x512xf32>
    tpu.vector_store %arg29[%c5_141, %c0_142], %212 {strides = array<i32>} : memref<26x512xf32, #tpu.memory_space<vmem>>, vector<16x512xf32>,
    %cst_143 = arith.constant 0.000000e+00 : f32
    %216 = vector.broadcast %cst_143 : f32 to vector<16x512xf32>
    %c0_144 = arith.constant 0 : index
    %c0_145 = arith.constant 0 : index
    %217 = vector.load %arg29[%c0_144, %c0_145] : memref<26x512xf32, #tpu.memory_space<vmem>>, vector<16x512xf32>
    %218 = vector.broadcast %5 : vector<16x1xf32> to vector<16x512xf32>
    %219 = arith.mulf %217, %218 : vector<16x512xf32>
    %c0_146 = arith.constant 0 : index
    %c0_147 = arith.constant 0 : index
    %220 = vector.load %arg18[%c0_146, %c0_147] : memref<9x512xf32, #tpu.memory_space<vmem>>, vector<1x512xf32>
    %221 = vector.broadcast %220 : vector<1x512xf32> to vector<16x512xf32>
    %222 = arith.mulf %219, %221 : vector<16x512xf32>
    %223 = arith.addf %216, %222 : vector<16x512xf32>
    %c1_148 = arith.constant 1 : index
    %c0_149 = arith.constant 0 : index
    %224 = vector.load %arg29[%c1_148, %c0_149] : memref<26x512xf32, #tpu.memory_space<vmem>>, vector<16x512xf32>
    %c1_150 = arith.constant 1 : index
    %c0_151 = arith.constant 0 : index
    %225 = vector.load %arg18[%c1_150, %c0_151] : memref<9x512xf32, #tpu.memory_space<vmem>>, vector<1x512xf32>
    %226 = vector.broadcast %225 : vector<1x512xf32> to vector<16x512xf32>
    %227 = arith.mulf %224, %226 : vector<16x512xf32>
    %228 = arith.addf %223, %227 : vector<16x512xf32>
    %c2_152 = arith.constant 2 : index
    %c0_153 = arith.constant 0 : index
    %229 = vector.load %arg29[%c2_152, %c0_153] : memref<26x512xf32, #tpu.memory_space<vmem>>, vector<16x512xf32>
    %230 = vector.broadcast %6 : vector<16x1xf32> to vector<16x512xf32>
    %231 = arith.mulf %229, %230 : vector<16x512xf32>
    %c2_154 = arith.constant 2 : index
    %c0_155 = arith.constant 0 : index
    %232 = vector.load %arg18[%c2_154, %c0_155] : memref<9x512xf32, #tpu.memory_space<vmem>>, vector<1x512xf32>
    %233 = vector.broadcast %232 : vector<1x512xf32> to vector<16x512xf32>
    %234 = arith.mulf %231, %233 : vector<16x512xf32>
    %235 = arith.addf %228, %234 : vector<16x512xf32>
    %c4_156 = arith.constant 4 : index
    %c0_157 = arith.constant 0 : index
    %236 = vector.load %arg29[%c4_156, %c0_157] : memref<26x512xf32, #tpu.memory_space<vmem>>, vector<16x512xf32>
    %237 = vector.broadcast %5 : vector<16x1xf32> to vector<16x512xf32>
    %238 = arith.mulf %236, %237 : vector<16x512xf32>
    %c3_158 = arith.constant 3 : index
    %c0_159 = arith.constant 0 : index
    %239 = vector.load %arg18[%c3_158, %c0_159] : memref<9x512xf32, #tpu.memory_space<vmem>>, vector<1x512xf32>
    %240 = vector.broadcast %239 : vector<1x512xf32> to vector<16x512xf32>
    %241 = arith.mulf %238, %240 : vector<16x512xf32>
    %242 = arith.addf %235, %241 : vector<16x512xf32>
    %c5_160 = arith.constant 5 : index
    %c0_161 = arith.constant 0 : index
    %243 = vector.load %arg29[%c5_160, %c0_161] : memref<26x512xf32, #tpu.memory_space<vmem>>, vector<16x512xf32>
    %c4_162 = arith.constant 4 : index
    %c0_163 = arith.constant 0 : index
    %244 = vector.load %arg18[%c4_162, %c0_163] : memref<9x512xf32, #tpu.memory_space<vmem>>, vector<1x512xf32>
    %245 = vector.broadcast %244 : vector<1x512xf32> to vector<16x512xf32>
    %246 = arith.mulf %243, %245 : vector<16x512xf32>
    %247 = arith.addf %242, %246 : vector<16x512xf32>
    %c6_164 = arith.constant 6 : index
    %c0_165 = arith.constant 0 : index
    %248 = vector.load %arg29[%c6_164, %c0_165] : memref<26x512xf32, #tpu.memory_space<vmem>>, vector<16x512xf32>
    %249 = vector.broadcast %6 : vector<16x1xf32> to vector<16x512xf32>
    %250 = arith.mulf %248, %249 : vector<16x512xf32>
    %c5_166 = arith.constant 5 : index
    %c0_167 = arith.constant 0 : index
    %251 = vector.load %arg18[%c5_166, %c0_167] : memref<9x512xf32, #tpu.memory_space<vmem>>, vector<1x512xf32>
    %252 = vector.broadcast %251 : vector<1x512xf32> to vector<16x512xf32>
    %253 = arith.mulf %250, %252 : vector<16x512xf32>
    %254 = arith.addf %247, %253 : vector<16x512xf32>
    %c8_168 = arith.constant 8 : index
    %c0_169 = arith.constant 0 : index
    %255 = vector.load %arg29[%c8_168, %c0_169] : memref<26x512xf32, #tpu.memory_space<vmem>>, vector<16x512xf32>
    %256 = vector.broadcast %5 : vector<16x1xf32> to vector<16x512xf32>
    %257 = arith.mulf %255, %256 : vector<16x512xf32>
    %c6_170 = arith.constant 6 : index
    %c0_171 = arith.constant 0 : index
    %258 = vector.load %arg18[%c6_170, %c0_171] : memref<9x512xf32, #tpu.memory_space<vmem>>, vector<1x512xf32>
    %259 = vector.broadcast %258 : vector<1x512xf32> to vector<16x512xf32>
    %260 = arith.mulf %257, %259 : vector<16x512xf32>
    %261 = arith.addf %254, %260 : vector<16x512xf32>
    %c9_172 = arith.constant 9 : index
    %c0_173 = arith.constant 0 : index
    %262 = vector.load %arg29[%c9_172, %c0_173] : memref<26x512xf32, #tpu.memory_space<vmem>>, vector<16x512xf32>
    %c7_174 = arith.constant 7 : index
    %c0_175 = arith.constant 0 : index
    %263 = vector.load %arg18[%c7_174, %c0_175] : memref<9x512xf32, #tpu.memory_space<vmem>>, vector<1x512xf32>
    %264 = vector.broadcast %263 : vector<1x512xf32> to vector<16x512xf32>
    %265 = arith.mulf %262, %264 : vector<16x512xf32>
    %266 = arith.addf %261, %265 : vector<16x512xf32>
    %c10_176 = arith.constant 10 : index
    %c0_177 = arith.constant 0 : index
    %267 = vector.load %arg29[%c10_176, %c0_177] : memref<26x512xf32, #tpu.memory_space<vmem>>, vector<16x512xf32>
    %268 = vector.broadcast %6 : vector<16x1xf32> to vector<16x512xf32>
    %269 = arith.mulf %267, %268 : vector<16x512xf32>
    %c8_178 = arith.constant 8 : index
    %c0_179 = arith.constant 0 : index
    %270 = vector.load %arg18[%c8_178, %c0_179] : memref<9x512xf32, #tpu.memory_space<vmem>>, vector<1x512xf32>
    %271 = vector.broadcast %270 : vector<1x512xf32> to vector<16x512xf32>
    %272 = arith.mulf %269, %271 : vector<16x512xf32>
    %273 = arith.addf %266, %272 : vector<16x512xf32>
    %274 = arith.truncf %273 : vector<16x512xf32> to vector<16x512xbf16>
    %c0_180 = arith.constant 0 : index
    %c0_181 = arith.constant 0 : index
    %275 = vector.load %arg19[%c0_180, %c0_181] : memref<512x512xbf16, #tpu.memory_space<vmem>>, vector<512x512xbf16>
    %cst_182 = arith.constant dense<0.000000e+00> : vector<16x512xf32>
    %276 = tpu.matmul %274, %275, %cst_182 {dimension_numbers = #tpu.dot_dimension_numbers<[1], [0], [0], [1], [0, 0, 1, 1], [], []>} : vector<16x512xbf16>, vector<512x512xbf16>, vector<16x512xf32> -> vector<16x512xf32>
    %c0_183 = arith.constant 0 : index
    %c0_184 = arith.constant 0 : index
    %277 = vector.load %arg20[%c0_183, %c0_184] : memref<1x512xf32, #tpu.memory_space<vmem>>, vector<1x512xf32>
    %278 = vector.broadcast %277 : vector<1x512xf32> to vector<16x512xf32>
    %279 = arith.mulf %276, %278 : vector<16x512xf32>
    %c0_185 = arith.constant 0 : index
    %c0_186 = arith.constant 0 : index
    %280 = vector.load %arg21[%c0_185, %c0_186] : memref<1x512xf32, #tpu.memory_space<vmem>>, vector<1x512xf32>
    %281 = vector.broadcast %280 : vector<1x512xf32> to vector<16x512xf32>
    %282 = arith.addf %279, %281 : vector<16x512xf32>
    %cst_187 = arith.constant 2.000000e-01 : f32
    %283 = vector.broadcast %cst_187 : f32 to vector<16x512xf32>
    %284 = arith.mulf %283, %282 : vector<16x512xf32>
    %285 = arith.maximumf %282, %284 : vector<16x512xf32>
    %cst_188 = arith.constant 0.000000e+00 : f32
    %286 = vector.broadcast %cst_188 : f32 to vector<26x512xf32>
    %c0_189 = arith.constant 0 : index
    %c0_190 = arith.constant 0 : index
    %287 = vector.load %arg29[%c0_189, %c0_190] : memref<26x512xf32, #tpu.memory_space<vmem>>, vector<26x512xf32>
    tpu.vector_store %arg29[%c0_189, %c0_190], %286 {strides = array<i32>} : memref<26x512xf32, #tpu.memory_space<vmem>>, vector<26x512xf32>,
    %c5_191 = arith.constant 5 : index
    %c0_192 = arith.constant 0 : index
    %288 = vector.load %arg29[%c5_191, %c0_192] : memref<26x512xf32, #tpu.memory_space<vmem>>, vector<16x512xf32>
    tpu.vector_store %arg29[%c5_191, %c0_192], %285 {strides = array<i32>} : memref<26x512xf32, #tpu.memory_space<vmem>>, vector<16x512xf32>,
    %cst_193 = arith.constant 0.000000e+00 : f32
    %289 = vector.broadcast %cst_193 : f32 to vector<16x512xf32>
    %c0_194 = arith.constant 0 : index
    %c0_195 = arith.constant 0 : index
    %290 = vector.load %arg29[%c0_194, %c0_195] : memref<26x512xf32, #tpu.memory_space<vmem>>, vector<16x512xf32>
    %291 = vector.broadcast %5 : vector<16x1xf32> to vector<16x512xf32>
    %292 = arith.mulf %290, %291 : vector<16x512xf32>
    %c0_196 = arith.constant 0 : index
    %c0_197 = arith.constant 0 : index
    %293 = vector.load %arg22[%c0_196, %c0_197] : memref<9x512xf32, #tpu.memory_space<vmem>>, vector<1x512xf32>
    %294 = vector.broadcast %293 : vector<1x512xf32> to vector<16x512xf32>
    %295 = arith.mulf %292, %294 : vector<16x512xf32>
    %296 = arith.addf %289, %295 : vector<16x512xf32>
    %c1_198 = arith.constant 1 : index
    %c0_199 = arith.constant 0 : index
    %297 = vector.load %arg29[%c1_198, %c0_199] : memref<26x512xf32, #tpu.memory_space<vmem>>, vector<16x512xf32>
    %c1_200 = arith.constant 1 : index
    %c0_201 = arith.constant 0 : index
    %298 = vector.load %arg22[%c1_200, %c0_201] : memref<9x512xf32, #tpu.memory_space<vmem>>, vector<1x512xf32>
    %299 = vector.broadcast %298 : vector<1x512xf32> to vector<16x512xf32>
    %300 = arith.mulf %297, %299 : vector<16x512xf32>
    %301 = arith.addf %296, %300 : vector<16x512xf32>
    %c2_202 = arith.constant 2 : index
    %c0_203 = arith.constant 0 : index
    %302 = vector.load %arg29[%c2_202, %c0_203] : memref<26x512xf32, #tpu.memory_space<vmem>>, vector<16x512xf32>
    %303 = vector.broadcast %6 : vector<16x1xf32> to vector<16x512xf32>
    %304 = arith.mulf %302, %303 : vector<16x512xf32>
    %c2_204 = arith.constant 2 : index
    %c0_205 = arith.constant 0 : index
    %305 = vector.load %arg22[%c2_204, %c0_205] : memref<9x512xf32, #tpu.memory_space<vmem>>, vector<1x512xf32>
    %306 = vector.broadcast %305 : vector<1x512xf32> to vector<16x512xf32>
    %307 = arith.mulf %304, %306 : vector<16x512xf32>
    %308 = arith.addf %301, %307 : vector<16x512xf32>
    %c4_206 = arith.constant 4 : index
    %c0_207 = arith.constant 0 : index
    %309 = vector.load %arg29[%c4_206, %c0_207] : memref<26x512xf32, #tpu.memory_space<vmem>>, vector<16x512xf32>
    %310 = vector.broadcast %5 : vector<16x1xf32> to vector<16x512xf32>
    %311 = arith.mulf %309, %310 : vector<16x512xf32>
    %c3_208 = arith.constant 3 : index
    %c0_209 = arith.constant 0 : index
    %312 = vector.load %arg22[%c3_208, %c0_209] : memref<9x512xf32, #tpu.memory_space<vmem>>, vector<1x512xf32>
    %313 = vector.broadcast %312 : vector<1x512xf32> to vector<16x512xf32>
    %314 = arith.mulf %311, %313 : vector<16x512xf32>
    %315 = arith.addf %308, %314 : vector<16x512xf32>
    %c5_210 = arith.constant 5 : index
    %c0_211 = arith.constant 0 : index
    %316 = vector.load %arg29[%c5_210, %c0_211] : memref<26x512xf32, #tpu.memory_space<vmem>>, vector<16x512xf32>
    %c4_212 = arith.constant 4 : index
    %c0_213 = arith.constant 0 : index
    %317 = vector.load %arg22[%c4_212, %c0_213] : memref<9x512xf32, #tpu.memory_space<vmem>>, vector<1x512xf32>
    %318 = vector.broadcast %317 : vector<1x512xf32> to vector<16x512xf32>
    %319 = arith.mulf %316, %318 : vector<16x512xf32>
    %320 = arith.addf %315, %319 : vector<16x512xf32>
    %c6_214 = arith.constant 6 : index
    %c0_215 = arith.constant 0 : index
    %321 = vector.load %arg29[%c6_214, %c0_215] : memref<26x512xf32, #tpu.memory_space<vmem>>, vector<16x512xf32>
    %322 = vector.broadcast %6 : vector<16x1xf32> to vector<16x512xf32>
    %323 = arith.mulf %321, %322 : vector<16x512xf32>
    %c5_216 = arith.constant 5 : index
    %c0_217 = arith.constant 0 : index
    %324 = vector.load %arg22[%c5_216, %c0_217] : memref<9x512xf32, #tpu.memory_space<vmem>>, vector<1x512xf32>
    %325 = vector.broadcast %324 : vector<1x512xf32> to vector<16x512xf32>
    %326 = arith.mulf %323, %325 : vector<16x512xf32>
    %327 = arith.addf %320, %326 : vector<16x512xf32>
    %c8_218 = arith.constant 8 : index
    %c0_219 = arith.constant 0 : index
    %328 = vector.load %arg29[%c8_218, %c0_219] : memref<26x512xf32, #tpu.memory_space<vmem>>, vector<16x512xf32>
    %329 = vector.broadcast %5 : vector<16x1xf32> to vector<16x512xf32>
    %330 = arith.mulf %328, %329 : vector<16x512xf32>
    %c6_220 = arith.constant 6 : index
    %c0_221 = arith.constant 0 : index
    %331 = vector.load %arg22[%c6_220, %c0_221] : memref<9x512xf32, #tpu.memory_space<vmem>>, vector<1x512xf32>
    %332 = vector.broadcast %331 : vector<1x512xf32> to vector<16x512xf32>
    %333 = arith.mulf %330, %332 : vector<16x512xf32>
    %334 = arith.addf %327, %333 : vector<16x512xf32>
    %c9_222 = arith.constant 9 : index
    %c0_223 = arith.constant 0 : index
    %335 = vector.load %arg29[%c9_222, %c0_223] : memref<26x512xf32, #tpu.memory_space<vmem>>, vector<16x512xf32>
    %c7_224 = arith.constant 7 : index
    %c0_225 = arith.constant 0 : index
    %336 = vector.load %arg22[%c7_224, %c0_225] : memref<9x512xf32, #tpu.memory_space<vmem>>, vector<1x512xf32>
    %337 = vector.broadcast %336 : vector<1x512xf32> to vector<16x512xf32>
    %338 = arith.mulf %335, %337 : vector<16x512xf32>
    %339 = arith.addf %334, %338 : vector<16x512xf32>
    %c10_226 = arith.constant 10 : index
    %c0_227 = arith.constant 0 : index
    %340 = vector.load %arg29[%c10_226, %c0_227] : memref<26x512xf32, #tpu.memory_space<vmem>>, vector<16x512xf32>
    %341 = vector.broadcast %6 : vector<16x1xf32> to vector<16x512xf32>
    %342 = arith.mulf %340, %341 : vector<16x512xf32>
    %c8_228 = arith.constant 8 : index
    %c0_229 = arith.constant 0 : index
    %343 = vector.load %arg22[%c8_228, %c0_229] : memref<9x512xf32, #tpu.memory_space<vmem>>, vector<1x512xf32>
    %344 = vector.broadcast %343 : vector<1x512xf32> to vector<16x512xf32>
    %345 = arith.mulf %342, %344 : vector<16x512xf32>
    %346 = arith.addf %339, %345 : vector<16x512xf32>
    %347 = arith.truncf %346 : vector<16x512xf32> to vector<16x512xbf16>
    %c0_230 = arith.constant 0 : index
    %c0_231 = arith.constant 0 : index
    %348 = vector.load %arg23[%c0_230, %c0_231] : memref<512x1024xbf16, #tpu.memory_space<vmem>>, vector<512x1024xbf16>
    %cst_232 = arith.constant dense<0.000000e+00> : vector<16x1024xf32>
    %349 = tpu.matmul %347, %348, %cst_232 {dimension_numbers = #tpu.dot_dimension_numbers<[1], [0], [0], [1], [0, 0, 1, 1], [], []>} : vector<16x512xbf16>, vector<512x1024xbf16>, vector<16x1024xf32> -> vector<16x1024xf32>
    %c0_233 = arith.constant 0 : index
    %c0_234 = arith.constant 0 : index
    %350 = vector.load %arg24[%c0_233, %c0_234] : memref<1x1024xf32, #tpu.memory_space<vmem>>, vector<1x1024xf32>
    %351 = vector.broadcast %350 : vector<1x1024xf32> to vector<16x1024xf32>
    %352 = arith.mulf %349, %351 : vector<16x1024xf32>
    %c0_235 = arith.constant 0 : index
    %c0_236 = arith.constant 0 : index
    %353 = vector.load %arg25[%c0_235, %c0_236] : memref<1x1024xf32, #tpu.memory_space<vmem>>, vector<1x1024xf32>
    %354 = vector.broadcast %353 : vector<1x1024xf32> to vector<16x1024xf32>
    %355 = arith.addf %352, %354 : vector<16x1024xf32>
    %cst_237 = arith.constant 2.000000e-01 : f32
    %356 = vector.broadcast %cst_237 : f32 to vector<16x1024xf32>
    %357 = arith.mulf %356, %355 : vector<16x1024xf32>
    %358 = arith.maximumf %355, %357 : vector<16x1024xf32>
    %cst_238 = arith.constant dense<0.000000e+00> : vector<1024xf32>
    %359 = vector.multi_reduction <add>, %358, %cst_238 [0] : vector<16x1024xf32> to vector<1024xf32>
    %360 = vector.shape_cast %359 : vector<1024xf32> to vector<1x1024xf32>
    %cst_239 = arith.constant 6.250000e-02 : f32
    %361 = vector.broadcast %cst_239 : f32 to vector<1x1024xf32>
    %362 = arith.mulf %360, %361 : vector<1x1024xf32>
    %c0_240 = arith.constant 0 : index
    %c0_241 = arith.constant 0 : index
    %c0_242 = arith.constant 0 : index
    %363 = vector.load %arg26[%c0_240, %c0_241, %c0_242] : memref<1x1x1024xf32, #tpu.memory_space<vmem>>, vector<1x1x1024xf32>
    %364 = vector.shape_cast %363 : vector<1x1x1024xf32> to vector<1x1024xf32>
    %365 = vector.shape_cast %362 : vector<1x1024xf32> to vector<1x1x1024xf32>
    tpu.vector_store %arg26[%c0_240, %c0_241, %c0_242], %365 {strides = array<i32>} : memref<1x1x1024xf32, #tpu.memory_space<vmem>>, vector<1x1x1024xf32>,
    return
  }
  func.func @transform_0(%arg0: i32) -> (i32, i32, i32) {
    %c0_i32 = arith.constant 0 : i32
    %c0_i32_0 = arith.constant 0 : i32
    %c0_i32_1 = arith.constant 0 : i32
    return %arg0, %c0_i32, %c0_i32_0 : i32, i32, i32
  }
  func.func @transform_1(%arg0: i32) -> (i32, i32) {
    %c0_i32 = arith.constant 0 : i32
    %c0_i32_0 = arith.constant 0 : i32
    %c0_i32_1 = arith.constant 0 : i32
    return %c0_i32, %c0_i32_0 : i32, i32
  }
  func.func @transform_2(%arg0: i32) -> (i32, i32) {
    %c0_i32 = arith.constant 0 : i32
    %c0_i32_0 = arith.constant 0 : i32
    %c0_i32_1 = arith.constant 0 : i32
    return %c0_i32, %c0_i32_0 : i32, i32
  }
  func.func @transform_3(%arg0: i32) -> (i32, i32) {
    %c0_i32 = arith.constant 0 : i32
    %c0_i32_0 = arith.constant 0 : i32
    %c0_i32_1 = arith.constant 0 : i32
    return %c0_i32, %c0_i32_0 : i32, i32
  }
  func.func @transform_4(%arg0: i32) -> (i32, i32) {
    %c0_i32 = arith.constant 0 : i32
    %c0_i32_0 = arith.constant 0 : i32
    %c0_i32_1 = arith.constant 0 : i32
    return %c0_i32, %c0_i32_0 : i32, i32
  }
  func.func @transform_5(%arg0: i32) -> (i32, i32) {
    %c0_i32 = arith.constant 0 : i32
    %c0_i32_0 = arith.constant 0 : i32
    %c0_i32_1 = arith.constant 0 : i32
    return %c0_i32, %c0_i32_0 : i32, i32
  }
  func.func @transform_6(%arg0: i32) -> (i32, i32) {
    %c0_i32 = arith.constant 0 : i32
    %c0_i32_0 = arith.constant 0 : i32
    %c0_i32_1 = arith.constant 0 : i32
    return %c0_i32, %c0_i32_0 : i32, i32
  }
  func.func @transform_7(%arg0: i32) -> (i32, i32) {
    %c0_i32 = arith.constant 0 : i32
    %c0_i32_0 = arith.constant 0 : i32
    %c0_i32_1 = arith.constant 0 : i32
    return %c0_i32, %c0_i32_0 : i32, i32
  }
  func.func @transform_8(%arg0: i32) -> (i32, i32) {
    %c0_i32 = arith.constant 0 : i32
    %c0_i32_0 = arith.constant 0 : i32
    %c0_i32_1 = arith.constant 0 : i32
    return %c0_i32, %c0_i32_0 : i32, i32
  }
  func.func @transform_9(%arg0: i32) -> (i32, i32) {
    %c0_i32 = arith.constant 0 : i32
    %c0_i32_0 = arith.constant 0 : i32
    %c0_i32_1 = arith.constant 0 : i32
    return %c0_i32, %c0_i32_0 : i32, i32
  }
  func.func @transform_10(%arg0: i32) -> (i32, i32) {
    %c0_i32 = arith.constant 0 : i32
    %c0_i32_0 = arith.constant 0 : i32
    %c0_i32_1 = arith.constant 0 : i32
    return %c0_i32, %c0_i32_0 : i32, i32
  }
  func.func @transform_11(%arg0: i32) -> (i32, i32) {
    %c0_i32 = arith.constant 0 : i32
    %c0_i32_0 = arith.constant 0 : i32
    %c0_i32_1 = arith.constant 0 : i32
    return %c0_i32, %c0_i32_0 : i32, i32
  }
  func.func @transform_12(%arg0: i32) -> (i32, i32) {
    %c0_i32 = arith.constant 0 : i32
    %c0_i32_0 = arith.constant 0 : i32
    %c0_i32_1 = arith.constant 0 : i32
    return %c0_i32, %c0_i32_0 : i32, i32
  }
  func.func @transform_13(%arg0: i32) -> (i32, i32) {
    %c0_i32 = arith.constant 0 : i32
    %c0_i32_0 = arith.constant 0 : i32
    %c0_i32_1 = arith.constant 0 : i32
    return %c0_i32, %c0_i32_0 : i32, i32
  }
  func.func @transform_14(%arg0: i32) -> (i32, i32) {
    %c0_i32 = arith.constant 0 : i32
    %c0_i32_0 = arith.constant 0 : i32
    %c0_i32_1 = arith.constant 0 : i32
    return %c0_i32, %c0_i32_0 : i32, i32
  }
  func.func @transform_15(%arg0: i32) -> (i32, i32) {
    %c0_i32 = arith.constant 0 : i32
    %c0_i32_0 = arith.constant 0 : i32
    %c0_i32_1 = arith.constant 0 : i32
    return %c0_i32, %c0_i32_0 : i32, i32
  }
  func.func @transform_16(%arg0: i32) -> (i32, i32) {
    %c0_i32 = arith.constant 0 : i32
    %c0_i32_0 = arith.constant 0 : i32
    %c0_i32_1 = arith.constant 0 : i32
    return %c0_i32, %c0_i32_0 : i32, i32
  }
  func.func @transform_17(%arg0: i32) -> (i32, i32) {
    %c0_i32 = arith.constant 0 : i32
    %c0_i32_0 = arith.constant 0 : i32
    %c0_i32_1 = arith.constant 0 : i32
    return %c0_i32, %c0_i32_0 : i32, i32
  }
  func.func @transform_18(%arg0: i32) -> (i32, i32) {
    %c0_i32 = arith.constant 0 : i32
    %c0_i32_0 = arith.constant 0 : i32
    %c0_i32_1 = arith.constant 0 : i32
    return %c0_i32, %c0_i32_0 : i32, i32
  }
  func.func @transform_19(%arg0: i32) -> (i32, i32) {
    %c0_i32 = arith.constant 0 : i32
    %c0_i32_0 = arith.constant 0 : i32
    %c0_i32_1 = arith.constant 0 : i32
    return %c0_i32, %c0_i32_0 : i32, i32
  }
  func.func @transform_20(%arg0: i32) -> (i32, i32) {
    %c0_i32 = arith.constant 0 : i32
    %c0_i32_0 = arith.constant 0 : i32
    %c0_i32_1 = arith.constant 0 : i32
    return %c0_i32, %c0_i32_0 : i32, i32
  }
  func.func @transform_21(%arg0: i32) -> (i32, i32) {
    %c0_i32 = arith.constant 0 : i32
    %c0_i32_0 = arith.constant 0 : i32
    %c0_i32_1 = arith.constant 0 : i32
    return %c0_i32, %c0_i32_0 : i32, i32
  }
  func.func @transform_22(%arg0: i32) -> (i32, i32) {
    %c0_i32 = arith.constant 0 : i32
    %c0_i32_0 = arith.constant 0 : i32
    %c0_i32_1 = arith.constant 0 : i32
    return %c0_i32, %c0_i32_0 : i32, i32
  }
  func.func @transform_23(%arg0: i32) -> (i32, i32) {
    %c0_i32 = arith.constant 0 : i32
    %c0_i32_0 = arith.constant 0 : i32
    %c0_i32_1 = arith.constant 0 : i32
    return %c0_i32, %c0_i32_0 : i32, i32
  }
  func.func @transform_24(%arg0: i32) -> (i32, i32) {
    %c0_i32 = arith.constant 0 : i32
    %c0_i32_0 = arith.constant 0 : i32
    %c0_i32_1 = arith.constant 0 : i32
    return %c0_i32, %c0_i32_0 : i32, i32
  }
  func.func @transform_25(%arg0: i32) -> (i32, i32, i32) {
    %c0_i32 = arith.constant 0 : i32
    %c0_i32_0 = arith.constant 0 : i32
    %c0_i32_1 = arith.constant 0 : i32
    return %arg0, %c0_i32, %c0_i32_0 : i32, i32, i32
  }
}

</mosaic_0001>

<bundles_post_ra>
// kernel: exit_block_forward.1
= control target key start
LH: loop header
LB: loop body
LE: loop exit
PB: predicated region body
PF: predicated region fallthrough
CT: control target
= control target key end

     0   :  { %s18980_s0 = inlined_call_operand.hbm [shape: f32[2,64,256], index: 0, kind: input, shape index: {}]   ;;  %s18981_s1 = inlined_call_operand.vmem [shape: f32[16,64], index: 1, kind: input, shape index: {}]   ;;  %s18982_s2 = inlined_call_operand.vmem [shape: f32[64,1], index: 2, kind: input, shape index: {}]   ;;  %s18983_s3 = inlined_call_operand.vmem [shape: f32[64,1], index: 3, kind: input, shape index: {}]   ;;  %s18984_s4 = inlined_call_operand.vmem [shape: f32[16,1], index: 4, kind: input, shape index: {}]   ;;  %s18985_s5 = inlined_call_operand.vmem [shape: f32[16,1], index: 5, kind: input, shape index: {}]   ;;  %s18986_s6 = inlined_call_operand.hbm [shape: bf16[256,512], index: 6, kind: input, shape index: {}]   ;;  %s18987_s7 = inlined_call_operand.vmem [shape: f32[1,512], index: 7, kind: input, shape index: {}]   ;;  %s18988_s8 = inlined_call_operand.vmem [shape: f32[1,512], index: 8, kind: input, shape index: {}]   ;;  %s18989_s9 = inlined_call_operand.vmem [shape: f32[9,256], index: 9, kind: input, shape index: {}]   ;;  %s18990_s10 = inlined_call_operand.hbm [shape: bf16[256,256], index: 10, kind: input, shape index: {}]   ;;  %s18991_s11 = inlined_call_operand.vmem [shape: f32[1,256], index: 11, kind: input, shape index: {}]   ;;  %s18992_s12 = inlined_call_operand.vmem [shape: f32[1,256], index: 12, kind: input, shape index: {}]   ;;  %s18993_s13 = inlined_call_operand.vmem [shape: f32[9,256], index: 13, kind: input, shape index: {}]   ;;  %s18994_s14 = inlined_call_operand.hbm [shape: bf16[256,512], index: 14, kind: input, shape index: {}]   ;;  %s18995_s15 = inlined_call_operand.vmem [shape: f32[1,512], index: 15, kind: input, shape index: {}]   ;;  %s18996_s16 = inlined_call_operand.vmem [shape: f32[1,512], index: 16, kind: input, shape index: {}]   ;;  %s18997_s17 = inlined_call_operand.vmem [shape: f32[9,512], index: 17, kind: input, shape index: {}]   ;;  %s18998_s18 = inlined_call_operand.hbm [shape: bf16[512,512], index: 18, kind: input, shape index: {}]   ;;  %s18999_s19 = inlined_call_operand.hbm [shape: f32[1,512], index: 19, kind: input, shape index: {}]   ;;  %s19000_s20 = inlined_call_operand.hbm [shape: f32[1,512], index: 20, kind: input, shape index: {}]   ;;  %s19001_s21 = inlined_call_operand.vmem [shape: f32[9,512], index: 21, kind: input, shape index: {}]   ;;  %s19002_s22 = inlined_call_operand.hbm [shape: bf16[512,1024], index: 22, kind: input, shape index: {}]   ;;  %s19003_s23 = inlined_call_operand.vmem [shape: f32[1,1024], index: 23, kind: input, shape index: {}]   ;;  %s19004_s24 = inlined_call_operand.vmem [shape: f32[1,1024], index: 24, kind: input, shape index: {}]   ;;  %s19005_s25 = inlined_call_operand.hbm [shape: f32[2,1,1024], index: 25, kind: output, shape index: {}]  }
   0x1   :  { %19408 = sst [smem:[#allocation99_spill]] %s18980_s0 }
   0x2   :  { %19409 = sst [smem:[#allocation100_spill]] %s18981_s1 }
   0x3   :  { %19410 = sst [smem:[#allocation101_spill]] %s18982_s2 }
   0x4   :  { %19411 = sst [smem:[#allocation102_spill]] %s18983_s3 }
   0x5   :  { %19412 = sst [smem:[#allocation103_spill]] %s18984_s4 }
   0x6   :  { %19413 = sst [smem:[#allocation104_spill]] %s18985_s5 }
   0x7   :  { %19414 = sst [smem:[#allocation105_spill]] %s18986_s6 }
   0x8   :  { %19415 = sst [smem:[#allocation106_spill]] %s18987_s7 }
   0x9   :  { %19416 = sst [smem:[#allocation107_spill]] %s18988_s8 }
   0xa   :  { %19417 = sst [smem:[#allocation108_spill]] %s18989_s9 }
   0xb   :  { %19418 = sst [smem:[#allocation109_spill]] %s18990_s10 }
   0xc   :  { %19419 = sst [smem:[#allocation110_spill]] %s18991_s11 }
   0xd   :  { %19420 = sst [smem:[#allocation111_spill]] %s18992_s12 }
   0xe   :  { %19421 = sst [smem:[#allocation112_spill]] %s18994_s14 }
   0xf   :  { %19422 = sst [smem:[#allocation113_spill]] %s18995_s15 }
  0x10   :  { %19423 = sst [smem:[#allocation114_spill]] %s18996_s16 }
  0x11   :  { %19424 = sst [smem:[#allocation115_spill]] %s19001_s21 }
  0x12   :  { %19425 = sst [smem:[#allocation116_spill]] %s19003_s23 }
  0x13   :  { %19426 = sst [smem:[#allocation117_spill]] %s19004_s24 }
  0x14   :  { %19427 = sst [smem:[#allocation118_spill]] %s19005_s25 }
  0x15   :  { %30 = vsyncpa [#allocation6], 0 }
  0x16   :  { %32 = vsyncpa [#allocation6 + $0x1], 0 }
  0x17   :  { %33 = vsyncpa [#allocation9], 0 }
  0x18   :  { %34 = vsyncpa [#allocation12], 0 }
  0x19   :  { %35 = vsyncpa [#allocation15], 0 }
  0x1a   :  { %36 = vsyncpa [#allocation18], 0 }
  0x1b   :  { %37 = vsyncpa [#allocation7], 0 }
  0x1c   :  { %39 = vsyncpa [#allocation7 + $0x1], 0  ;;  %s13267_s29 = smov 0   ;;  %s13269_s2 = smov 0  }
  0x1d   :  { %s13271_s6 = smov 0   ;;  %s13273_s30 = smov 0  }
  0x1e LB: > { %s13118_s7 = smov [#allocation8]   ;;  %s13288_s26 = sadd.s32 4294967295, %s13116_s30   ;;  %s13116_s30 = sphi %s13273_s30, %s20151_s30   ;;  %s13112_s6 = sphi %s13271_s6, %s20150_s6   ;;  %s13108_s2 = sphi %s13269_s2, %s20149_s2   ;;  %s13104_s29 = sphi %s13267_s29, %s20148_s29  }
  0x1f   : > { %s633_s3 = sshll.u32 %s13118_s7, 4  ;;  %p11553_p0 = scmp.ge.s32.totalorder %s13116_s30, 1  ;;  %s13293_s3 = int_to_ptr.vmem [resolvable:$true] %s633_s3 }
  0x20   : > { %p19016_p1 = scmp.eq.s32.totalorder %s13288_s26, 0  ;;  %p606_p2 = scmp.lt.s32.totalorder %s13116_s30, 3 }
  0x21   : > { %s13119_s8 = smov [#allocation11]   ;;  %s13120_s28 = smov [#allocation14]  }
  0x22   : > { %p13295_p3 = pnand %p11553_p0, %p606_p2  ;;  %s677_s27 = sshll.u32 %s13119_s8, 4  ;;  %s13308_s27 = int_to_ptr.vmem [resolvable:$true] %s677_s27 }
  0x23   : > { %s713_s9 = sshll.u32 %s13120_s28, 4  ;;  %s19430_s7 = sld [smem:[#allocation105_spill]]  ;;  %s13310_s9 = int_to_ptr.vmem [resolvable:$true] %s713_s9 }
  0x24   : > { %s19428_s1 = scalar_select %p13295_p3, 1, 0 }
  0x25   : > { %p12268_p5 = pneg %p13295_p3 }
  0x27   : > { %p13304_p6 = pnand %p12268_p5, %p19016_p1 }
  0x29   : > { %s12808_s25 = scalar_lea.hbm %s19430_s7, 8192  ;;  %p13320_p8 = pneg %p13304_p6 }
  0x2a   : > { %p12809_p7 = scmp.ne.s32.totalorder %s19430_s7, %s12808_s25  ;;  %p12815_p11 = scmp.lt.u32.totalorder %s12808_s25, %s19430_s7 }
  0x2c   : > { %p12811_p9 = pnand %p13320_p8, %p12809_p7 }
  0x2e   : > { %p12812_p10 = pneg %p12811_p9 }
  0x30   : > { %p12817_p12 = pnand %p12815_p11, %p12812_p10 }
  0x32   : > { %12820 = shalt.err (!%p12817_p12)
}
  0x33   : > { %s12821_s23 = scalar_lea.vmem %s13293_s3, 8192  ;;  %p12829_p5 = scmp.lt.s32.totalorder %s13293_s3, %s13293_s3 }
  0x34   : > { %p12822_p13 = scmp.ne.s32.totalorder %s13293_s3, %s12821_s23  ;;  %p12830_p4 = scmp.lt.s32.totalorder %s12821_s23, %s12821_s23 }
  0x36   : > { %p12824_p0 = pnand %p12822_p13, %p13320_p8  ;;  %p12831_p7 = por %p12830_p4, %p12829_p5 }
  0x38   : > { %p12825_p2 = pneg %p12824_p0 }
  0x3a   : > { %p12832_p9 = pnand %p12831_p7, %p12825_p2 }
  0x3c   : > { %12835 = shalt.err (!%p12832_p9)
}
  0x3d   : > { %s19018_s24 = smov 256   ;;  %s19020_s21 = smov 16  }
  0x3e   : > { %12271 = dma.hbm_to_vmem [thread:$0]  (!%p13304_p6), %s19430_s7, 8192, %s13293_s3, [#allocation9], %s19018_s24, %s19018_s24, %s19020_s21  }
  0x3f   : > { %s19432_s14 = sld [smem:[#allocation112_spill]] }
  0x45   : > { %s12836_s23 = scalar_lea.hbm %s19432_s14, 8192 }
  0x46   : > { %p12837_p4 = scmp.ne.s32.totalorder %s19432_s14, %s12836_s23  ;;  %p12843_p12 = scmp.lt.u32.totalorder %s12836_s23, %s19432_s14 }
  0x48   : > { %p12839_p10 = pnand %p12837_p4, %p13320_p8 }
  0x4a   : > { %p12840_p11 = pneg %p12839_p10 }
  0x4c   : > { %p12845_p13 = pnand %p12843_p12, %p12840_p11 }
  0x4e   : > { %12848 = shalt.err (!%p12845_p13)
}
  0x4f   : > { %s12849_s3 = scalar_lea.vmem %s13308_s27, 8192  ;;  %p12857_p7 = scmp.lt.s32.totalorder %s13308_s27, %s13308_s27 }
  0x50   : > { %p12850_p0 = scmp.ne.s32.totalorder %s13308_s27, %s12849_s3  ;;  %p12858_p9 = scmp.lt.s32.totalorder %s12849_s3, %s12849_s3 }
  0x52   : > { %p12852_p2 = pnand %p12850_p0, %p13320_p8  ;;  %p12859_p4 = por %p12858_p9, %p12857_p7 }
  0x54   : > { %p12853_p5 = pneg %p12852_p2 }
  0x56   : > { %p12860_p10 = pnand %p12859_p4, %p12853_p5 }
  0x58   : > { %12863 = shalt.err (!%p12860_p10)
}
  0x59   : > { %12277 = dma.hbm_to_vmem [thread:$0]  (!%p13304_p6), %s19432_s14, 8192, %s13308_s27, [#allocation12], %s19018_s24, %s19018_s24, %s19020_s21  }
  0x5a   : > { %s12864_s25 = scalar_lea.hbm %s18999_s19, 64 }
  0x5b   : > { %p12865_p11 = scmp.ne.s32.totalorder %s18999_s19, %s12864_s25  ;;  %p12871_p0 = scmp.lt.u32.totalorder %s12864_s25, %s18999_s19 }
  0x5d   : > { %p12867_p12 = pnand %p12865_p11, %p13320_p8 }
  0x5f   : > { %p12868_p13 = pneg %p12867_p12 }
  0x61   : > { %p12873_p2 = pnand %p12871_p0, %p12868_p13 }
  0x63   : > { %12876 = shalt.err (!%p12873_p2)
}
  0x64   : > { %s12877_s27 = scalar_lea.vmem %s13310_s9, 64  ;;  %p12885_p4 = scmp.lt.s32.totalorder %s13310_s9, %s13310_s9 }
  0x65   : > { %p12878_p5 = scmp.ne.s32.totalorder %s13310_s9, %s12877_s27  ;;  %p12886_p10 = scmp.lt.s32.totalorder %s12877_s27, %s12877_s27 }
  0x67   : > { %p12880_p7 = pnand %p12878_p5, %p13320_p8  ;;  %p12887_p11 = por %p12886_p10, %p12885_p4 }
  0x69   : > { %p12881_p9 = pneg %p12880_p7 }
  0x6b   : > { %p12888_p12 = pnand %p12887_p11, %p12881_p9 }
  0x6d   : > { %12891 = shalt.err (!%p12888_p12)
}
  0x6e   : > { %12283 = dma.hbm_to_vmem [thread:$0]  (!%p13304_p6), %s18999_s19, 64, %s13310_s9, [#allocation15]  }
  0x6f   : > { %s13123_s12 = smov [#allocation10]   ;;  %s19433_s10 = sld [smem:[#allocation109_spill]] }
  0x70   : > { %s655_s15 = sshll.u32 %s13123_s12, 4  ;;  %s656_s15 = int_to_ptr.vmem [resolvable:$true] %s655_s15 }
  0x75   : > { %s12892_s5 = scalar_lea.hbm %s19433_s10, 4096 }
  0x76   : > { %p12893_p13 = scmp.ne.s32.totalorder %s19433_s10, %s12892_s5  ;;  %p12899_p5 = scmp.lt.u32.totalorder %s12892_s5, %s19433_s10 }
  0x78   : > { %p12895_p0 = pnand %p12893_p13, %p13320_p8 }
  0x7a   : > { %p12896_p2 = pneg %p12895_p0 }
  0x7c   : > { %p12901_p7 = pnand %p12899_p5, %p12896_p2 }
  0x7e   : > { %12904 = shalt.err (!%p12901_p7)
}
  0x7f   : > { %s12905_s9 = scalar_lea.vmem %s656_s15, 4096  ;;  %p12913_p11 = scmp.lt.s32.totalorder %s656_s15, %s656_s15 }
  0x80   : > { %p12906_p9 = scmp.ne.s32.totalorder %s656_s15, %s12905_s9  ;;  %p12914_p12 = scmp.lt.s32.totalorder %s12905_s9, %s12905_s9 }
  0x82   : > { %p12908_p4 = pnand %p12906_p9, %p13320_p8  ;;  %p12915_p1 = por %p12914_p12, %p12913_p11 }
  0x84   : > { %p12909_p10 = pneg %p12908_p4 }
  0x86   : > { %p12916_p3 = pnand %p12915_p1, %p12909_p10 }
  0x88   : > { %12919 = shalt.err (!%p12916_p3)
}
  0x89   : > { %s13124_s3 = smov 128   ;;  %s13125_s11 = smov 8  }
  0x8a   : > { %12274 = dma.hbm_to_vmem [thread:$0]  (!%p13304_p6), %s19433_s10, 4096, %s656_s15, [#allocation9], %s13124_s3, %s13124_s3, %s13125_s11  }
  0x8b   : > { %s13126_s25 = smov [#allocation13]   ;;  %s13127_s0 = smov [#allocation16]  }
  0x8c   : > { %s699_s5 = sshll.u32 %s13126_s25, 4  ;;  %s724_s28 = sshll.u32 %s13127_s0, 4  ;;  %s700_s5 = int_to_ptr.vmem [resolvable:$true] %s699_s5  ;;  %s13411_s28 = int_to_ptr.vmem [resolvable:$true] %s724_s28 }
  0x8d   : > { %s12920_s9 = scalar_lea.hbm %s18998_s18, 16384 }
  0x8e   : > { %p12921_p1 = scmp.ne.s32.totalorder %s18998_s18, %s12920_s9  ;;  %p12927_p0 = scmp.lt.u32.totalorder %s12920_s9, %s18998_s18 }
  0x90   : > { %p12923_p3 = pnand %p12921_p1, %p13320_p8 }
  0x92   : > { %p12924_p13 = pneg %p12923_p3 }
  0x94   : > { %p12929_p2 = pnand %p12927_p0, %p12924_p13 }
  0x96   : > { %12932 = shalt.err (!%p12929_p2)
}
  0x97   : > { %s12933_s3 = scalar_lea.vmem %s700_s5, 16384  ;;  %p12941_p4 = scmp.lt.s32.totalorder %s700_s5, %s700_s5 }
  0x98   : > { %p12934_p5 = scmp.ne.s32.totalorder %s700_s5, %s12933_s3  ;;  %p12942_p10 = scmp.lt.s32.totalorder %s12933_s3, %s12933_s3 }
  0x9a   : > { %p12936_p7 = pnand %p12934_p5, %p13320_p8  ;;  %p12943_p11 = por %p12942_p10, %p12941_p4 }
  0x9c   : > { %p12937_p9 = pneg %p12936_p7 }
  0x9e   : > { %p12944_p12 = pnand %p12943_p11, %p12937_p9 }
  0xa0   : > { %12947 = shalt.err (!%p12944_p12)
}
  0xa1   : > { %s19434_s24 = smov 16   ;;  %s19435_s21 = smov 256  }
  0xa2   : > { %12280 = dma.hbm_to_vmem [thread:$0]  (!%p13304_p6), %s18998_s18, 16384, %s700_s5, [#allocation12], %s19435_s21, %s19435_s21, %s19434_s24  }
  0xa3   : > { %s12948_s23 = scalar_lea.hbm %s19000_s20, 64 }
  0xa4   : > { %p12949_p1 = scmp.ne.s32.totalorder %s19000_s20, %s12948_s23  ;;  %p12955_p0 = scmp.lt.u32.totalorder %s12948_s23, %s19000_s20 }
  0xa6   : > { %p12951_p3 = pnand %p12949_p1, %p13320_p8 }
  0xa8   : > { %p12952_p13 = pneg %p12951_p3 }
  0xaa   : > { %p12957_p2 = pnand %p12955_p0, %p12952_p13 }
  0xac   : > { %12960 = shalt.err (!%p12957_p2)
}
  0xad   : > { %s12961_s5 = scalar_lea.vmem %s13411_s28, 64  ;;  %p12969_p4 = scmp.lt.s32.totalorder %s13411_s28, %s13411_s28 }
  0xae   : > { %p12962_p5 = scmp.ne.s32.totalorder %s13411_s28, %s12961_s5  ;;  %p12970_p10 = scmp.lt.s32.totalorder %s12961_s5, %s12961_s5 }
  0xb0   : > { %p12964_p7 = pnand %p12962_p5, %p13320_p8  ;;  %p12971_p11 = por %p12970_p10, %p12969_p4 }
  0xb2   : > { %p12965_p9 = pneg %p12964_p7 }
  0xb4   : > { %p12972_p12 = pnand %p12971_p11, %p12965_p9 }
  0xb6   : > { %12975 = shalt.err (!%p12972_p12)
}
  0xb7   : > { %12286 = dma.hbm_to_vmem [thread:$0]  (!%p13304_p6), %s19000_s20, 64, %s13411_s28, [#allocation15]  }
  0xb8   : > { %s13128_s16 = smov [#allocation17]   ;;  %s12976_s27 = scalar_lea.hbm %s19002_s22, 32768 }
  0xb9   : > { %s737_s25 = sshll.u32 %s13128_s16, 4  ;;  %p12977_p1 = scmp.ne.s32.totalorder %s19002_s22, %s12976_s27  ;;  %s738_s25 = int_to_ptr.vmem [resolvable:$true] %s737_s25 }
  0xba   : > { %p12983_p0 = scmp.lt.u32.totalorder %s12976_s27, %s19002_s22 }
  0xbb   : > { %p12979_p3 = pnand %p12977_p1, %p13320_p8 }
  0xbd   : > { %p12980_p13 = pneg %p12979_p3 }
  0xbf   : > { %p12985_p2 = pnand %p12983_p0, %p12980_p13 }
  0xc1   : > { %12988 = shalt.err (!%p12985_p2)
}
  0xc2   : > { %s12989_s28 = scalar_lea.vmem %s738_s25, 32768  ;;  %p12997_p4 = scmp.lt.s32.totalorder %s738_s25, %s738_s25 }
  0xc3   : > { %p12990_p5 = scmp.ne.s32.totalorder %s738_s25, %s12989_s28  ;;  %p12998_p10 = scmp.lt.s32.totalorder %s12989_s28, %s12989_s28 }
  0xc5   : > { %p12992_p7 = pnand %p12990_p5, %p13320_p8  ;;  %p12999_p11 = por %p12998_p10, %p12997_p4 }
  0xc7   : > { %p12993_p9 = pneg %p12992_p7 }
  0xc9   : > { %p13000_p12 = pnand %p12999_p11, %p12993_p9 }
  0xcb   : > { %13003 = shalt.err (!%p13000_p12)
}
  0xcc   : > { %s13129_s3 = smov 512   ;;  %s13130_s8 = smov 32  }
  0xcd   : > { %12289 = dma.hbm_to_vmem [thread:$0]  (!%p13304_p6), %s19002_s22, 32768, %s738_s25, [#allocation18], %s13129_s3, %s13129_s3, %s13130_s8  }
  0xce   : > { %s11552_s0 = sadd.s32 4294967294, %s13116_s30   ;;  %s13477_s23 = sadd.s32 1, %s13116_s30  }
  0xcf   : > { %s52_s27 = sadd.s32 1, %s13112_s6  ;;  %s49_s9 = ssub.s32 %s13116_s30, %s13477_s23 }
  0xd0   : > { %p59_p8 = scmp.ne.s32.totalorder %s13112_s6, %s13108_s2  ;;  %p50_p1 = scmp.eq.s32.totalorder %s49_s9, 0 }
  0xd1   : > { %p60_p3 = scmp.eq.s32.totalorder %s13116_s30, 0  ;;  %p65_p13 = scmp.ne.s32.totalorder %s13108_s2, %s13104_s29 }
  0xd2   : > { %p593_p0 = scmp.eq.s32.totalorder %s13288_s26, 1  ;;  %p19436_p5 = scmp.eq.s32.totalorder %s13288_s26, 0 }
  0xd3   : > { %s13489_s12 = scalar_select %p50_p1, %s13112_s6, %s52_s27  }
  0xd4   : > { %p61_p2 = por %p60_p3, %p59_p8  ;;  %p13493_p7 = por %p19436_p5, %p65_p13 }
  0xd5   : > { %p13497_p6 = por %p593_p0, %p59_p8  ;;  %p599_p9 = scmp.eq.s32.totalorder %s11552_s0, 1 }
  0xd6   : > { %p12305_p4 = scmp.lt.s32.totalorder %s13116_s30, 2  ;;  %s757_s15 = sand.u32 1, %s13112_s6  }
  0xd7   : > { %s19438_s25 = scalar_select %p13497_p6, 1, 0 }
  0xd8   : > { %p13503_p10 = por %p599_p9, %p65_p13  ;;  %s11562_s28 = sshll.u32 %s757_s15, 7 }
  0xd9   : > { %s12162_s3 = sshll.u32 %s13116_s30, 11  ;;  %s19440_s16 = sld [smem:[#allocation99_spill]] }
  0xda   : > { %s19439_s5 = scalar_select %p13503_p10, 1, 0 }
  0xdb   : > { %s761_s9 = scalar_lea.vmem [#allocation5], %s11562_s28  ;;  %p13513_p11 = pnand %p12305_p4, %p61_p2 }
  0xdc   : > { %s768_s7 = sshll.u32 %s761_s9, 4  ;;  %s13519_s10 = scalar_lea.sflag [#allocation6], %s757_s15  ;;  %s13517_s7 = int_to_ptr.vmem [resolvable:$true] %s768_s7 }
  0xdd   : > { %p13006_p8 = pneg %p13513_p11 }
  0xdf   : > { %s13511_s27 = scalar_lea.hbm %s19440_s16, %s12162_s3  ;;  %s13009_s8 = scalar_lea.hbm %s19440_s16, 4096 }
  0xe0   : > { %s13004_s14 = scalar_lea.hbm %s13511_s27, 2048  ;;  %p13010_p13 = scmp.lt.u32.totalorder %s13511_s27, %s19440_s16 }
  0xe1   : > { %p13005_p12 = scmp.ne.s32.totalorder %s13511_s27, %s13004_s14  ;;  %p13011_p0 = scmp.lt.u32.totalorder %s13009_s8, %s13004_s14 }
  0xe2   : > { %p13013_p5 = scmp.lt.u32.totalorder %s13004_s14, %s13511_s27 }
  0xe3   : > { %p13007_p1 = pnand %p13006_p8, %p13005_p12  ;;  %p13012_p2 = por %p13011_p0, %p13010_p13 }
  0xe5   : > { %p13008_p3 = pneg %p13007_p1  ;;  %p13014_p9 = por %p13013_p5, %p13012_p2 }
  0xe7   : > { %p13015_p4 = pnand %p13014_p9, %p13008_p3 }
  0xe9   : > { %13018 = shalt.err (!%p13015_p4)
}
  0xea   : > { %s13019_s15 = scalar_lea.vmem %s13517_s7, 2048  ;;  %s13131_s28 = smov [#allocation5]  }
  0xeb   : > { %p13020_p12 = scmp.ne.s32.totalorder %s13517_s7, %s13019_s15  ;;  %s13024_s3 = sshll.u32 %s13131_s28, 4  ;;  %s13025_s3 = int_to_ptr.vmem [resolvable:$false] %s13024_s3 }
  0xec   : > { %s13026_s11 = scalar_lea.vmem %s13025_s3, 4096  ;;  %p13027_p6 = scmp.lt.s32.totalorder %s13517_s7, %s13025_s3 }
  0xed   : > { %p13022_p1 = pnand %p13020_p12, %p13006_p8  ;;  %p13028_p13 = scmp.lt.s32.totalorder %s13026_s11, %s13019_s15 }
  0xef   : > { %p13023_p10 = pneg %p13022_p1  ;;  %p13029_p0 = por %p13028_p13, %p13027_p6 }
  0xf1   : > { %p13030_p2 = pnand %p13029_p0, %p13023_p10 }
  0xf3   : > { %13033 = shalt.err (!%p13030_p2)
}
  0xf4   : > { %12293 = dma.hbm_to_vmem [thread:$0]  (!%p13513_p11), %s13511_s27, 2048, %s13517_s7, %s13519_s10, %s19435_s21, %s19435_s21, %s19434_s24  }
  0xf5   : > { %p19442_p8 = scmp.ne.s32.totalorder %s19428_s1, 0 }
  0xf7   : > { %780 = sbr.rel (%p19442_p8) target bundleno = 2343 (0x927), region = 120 }
  0xfe   : > { %s13553_s14 = sand.u32 1, %s13108_s2  }
  0xff   : > { %s11566_s8 = sshll.u32 %s13553_s14, 7  ;;  %s783_s9 = scalar_lea.sflag [#allocation6], %s13553_s14 }
 0x100   : > { %s13557_s15 = scalar_lea.vmem [#allocation5], %s11566_s8 }
 0x101   : > { %13079 = dma.done.wait (%p13493_p7), %s783_s9, 2048  }
 0x102   : > { %13081 = vsyncadd (%p13493_p7), %s783_s9, 4294965248  ;;  %p19443_p6 = scmp.eq.s32.totalorder %s13288_s26, 0 }
 0x104   : > { %13083 = dma.done.wait (%p19443_p6), [#allocation9], 12288   ;;  %p19444_p10 = pmov %p19443_p6 }
 0x105   : > { %p19445_p11 = pmov %p19443_p6 }
 0x106   : > { %13085 = vsyncadd (%p19444_p10), [#allocation9], 4294955008 }
 0x107   : > { %13087 = dma.done.wait (%p19445_p11), [#allocation12], 24576   ;;  %p19446_p3 = pmov %p19443_p6 }
 0x109   : > { %13089 = vsyncadd (%p19446_p3), [#allocation12], 4294942720  ;;  %p19447_p5 = pmov %p19446_p3 }
 0x10a   : > { %p19448_p9 = pmov %p19446_p3 }
 0x10b   : > { %13091 = dma.done.wait (%p19447_p5), [#allocation15], 128  }
 0x10c   : > { %13093 = vsyncadd (%p19448_p9), [#allocation15], 4294967168  ;;  %p19449_p7 = pmov %p19446_p3 }
 0x10d   : > { %p19450_p4 = pmov %p19446_p3 }
 0x10e   : > { %13095 = dma.done.wait (%p19449_p7), [#allocation18], 32768  }
 0x10f   : > { %13097 = vsyncadd (%p19450_p4), [#allocation18], 4294934528  ;;  %v13132_v0 = vmov 0.0   ;;  %v13133_v1 = vmov 0   ;;  %v882_v2 = vld [vmem:[%s13557_s15 + $0x8] sm:$0xff]  ;;  %v884_v3 = vld [vmem:[%s13557_s15 + $0x18] sm:$0xff] }
 0x110   : > { %1570 = vst [vmem:[#allocation2 + $0x18] sm:$0xff] %v13132_v0  ;;  %1567 = vst [vmem:[#allocation2] sm:$0xff] %v13132_v0  ;;  %990 = vmatprep.mubr.f32.mxu0 %v13132_v0  ;;  %12364 = vset.pattern.permute.xlu1 %v13133_v1  ;;  %vm1605_vm0 = vcmask 1040384   ;;  %v881_v4 = vld [vmem:[%s13557_s15] sm:$0xff]  ;;  %v12164_v5 = vpack.c.bf16 %v884_v3, %v882_v2  ;;  %v1536_v6 = vmul.f32 0.2, %v882_v2 }
 0x111   : > { %1568 = vst [vmem:[#allocation2 + $0x8] sm:$0xff] %v13132_v0  ;;  %1569 = vst [vmem:[#allocation2 + $0x10] sm:$0xff] %v13132_v0  ;;  %12363 = vset.pattern.permute.xlu0 %v13133_v1  ;;  %v1538_v7 = vmul.f32 0.2, %v884_v3  ;;  %v883_v8 = vld [vmem:[%s13557_s15 + $0x10] sm:$0xff]  ;;  %v886_v9 = vld [vmem:[%s13557_s15 + $0x28] sm:$0xff] }
 0x112   : > { %1585 = vst [vmem:[#allocation2 + $0x90] sm:$0xff] %v13132_v0  ;;  %1586 = vst [vmem:[#allocation2 + $0x98] sm:$0xff] %v13132_v0  ;;  %v12166_v10 = vpack.c.bf16 %v883_v8, %v881_v4  ;;  %v1535_v11 = vmul.f32 0.2, %v881_v4  ;;  %v1537_v12 = vmul.f32 0.2, %v883_v8  ;;  %12165 = vmatprep.subr.bf16.mxu0 %v12164_v5  ;;  %v1552_v15 = vmax.f32 %v882_v2, %v1536_v6 }
 0x113   : > { %1587 = vst [vmem:[#allocation2 + $0xa0] sm:$0x3] %v13132_v0  ;;  %1588 = vst [vmem:[#allocation2 + $0xa8] sm:$0x3] %v13132_v0  ;;  %v888_v13 = vld [vmem:[%s13557_s15 + $0x38] sm:$0xff]  ;;  %v885_v14 = vld [vmem:[%s13557_s15 + $0x20] sm:$0xff]  ;;  %v1554_v16 = vmax.f32 %v884_v3, %v1538_v7 }
 0x114   : > { %6482 = vst [vmem:[#allocation4] sm:$0xff] %v13132_v0  ;;  %6483 = vst [vmem:[#allocation4 + $0x8] sm:$0xff] %v13132_v0  ;;  %v12168_v17 = vpack.c.bf16 %v888_v13, %v886_v9  ;;  %v1540_v18 = vmul.f32 0.2, %v886_v9  ;;  %v887_v19 = vld [vmem:[%s13557_s15 + $0x30] sm:$0xff]  ;;  %12167 = vmatpush1.bf16.msra.mxu0 %v12166_v10  ;;  %v1551_v20 = vmax.f32 %v881_v4, %v1535_v11  ;;  %v890_v24 = vld [vmem:[%s13557_s15 + $0x48] sm:$0xff] }
 0x115   : > { %6484 = vst [vmem:[#allocation4 + $0x10] sm:$0xff] %v13132_v0  ;;  %6485 = vst [vmem:[#allocation4 + $0x18] sm:$0xff] %v13132_v0  ;;  %v1553_v21 = vmax.f32 %v883_v8, %v1537_v12  ;;  %v1542_v22 = vmul.f32 0.2, %v888_v13  ;;  %v12170_v23 = vpack.c.bf16 %v887_v19, %v885_v14  ;;  %v892_v25 = vld [vmem:[%s13557_s15 + $0x58] sm:$0xff]  ;;  %v1607_v26 = vrot.slane %v1552_v15, 7 }
 0x116   : > { %6490 = vst [vmem:[#allocation4 + $0x40] sm:$0xff] %v13132_v0  ;;  %6491 = vst [vmem:[#allocation4 + $0x48] sm:$0xff] %v13132_v0  ;;  %v1610_v27 = vrot.slane %v1554_v16, 7  ;;  %12169 = vmatprep.subr.bf16.mxu0 %v12168_v17  ;;  %v1556_v28 = vmax.f32 %v886_v9, %v1540_v18  ;;  %v1539_v29 = vmul.f32 0.2, %v885_v14  ;;  %v1606_v30 = vrot.slane %v1551_v20, 7 }
 0x117   : > { %6492 = vst [vmem:[#allocation4 + $0x50] sm:$0xff] %v13132_v0  ;;  %6493 = vst [vmem:[#allocation4 + $0x58] sm:$0xff] %v13132_v0  ;;  %v1608_v31 = vrot.slane %v1553_v21, 7  ;;  %v1558_v32 = vmax.f32 %v888_v13, %v1542_v22  ;;  %v1541_v33 = vmul.f32 0.2, %v887_v19  ;;  %v889_v34 = vld [vmem:[%s13557_s15 + $0x40] sm:$0xff]  ;;  %v12172_v39 = vpack.c.bf16 %v892_v25, %v890_v24 }
 0x118   : > { %6494 = vst [vmem:[#allocation4 + $0x60] sm:$0x3] %v13132_v0  ;;  %6495 = vst [vmem:[#allocation4 + $0x68] sm:$0x3] %v13132_v0  ;;  %v13614_v35 = vld [vmem:[%s13557_s15 + $0x50] sm:$0xff]  ;;  %v1611_v36 = vsel %vm1605_vm0, %v1607_v26, %v1610_v27  ;;  %v1614_v37 = vrot.slane %v1556_v28, 7  ;;  %v1555_v38 = vmax.f32 %v885_v14, %v1539_v29  ;;  %12171 = vmatpush1.bf16.msra.mxu0 %v12170_v23 }
 0x119   : > { %6496 = vst [vmem:[#allocation4 + $0x70] sm:$0x3] %v13132_v0  ;;  %6497 = vst [vmem:[#allocation4 + $0x78] sm:$0x3] %v13132_v0  ;;  %s19451_s7 = sld [smem:[#allocation102_spill]]  ;;  %v1609_v42 = vsel %vm1605_vm0, %v1606_v30, %v1608_v31  ;;  %v1618_v43 = vrot.slane %v1558_v32, 7  ;;  %v1557_v44 = vmax.f32 %v887_v19, %v1541_v33  ;;  %12173 = vmatprep.subr.bf16.mxu0 %v12172_v39 }
 0x11a   : > { %1655 = vst [vmem:[#allocation2 + $0x18] sm:$0xfe] %v1607_v26  ;;  %1657 = vst [vmem:[#allocation2 + $0x28] sm:$0xff] %v1611_v36  ;;  %v1544_v45 = vmul.f32 0.2, %v890_v24  ;;  %v894_v46 = vld [vmem:[%s13557_s15 + $0x68] sm:$0xff]  ;;  %v1615_v48 = vsel %vm1605_vm0, %v1610_v27, %v1614_v37  ;;  %v12174_v51 = vpack.c.bf16 %v13614_v35, %v889_v34 }
 0x11b   : > { %1654 = vst [vmem:[#allocation2 + $0x10] sm:$0xfe] %v1606_v30  ;;  %v896_v47 = vld [vmem:[%s13557_s15 + $0x78] sm:$0xff]  ;;  %vm19232_vm1 = vcmask 523264   ;;  %1656 = vst [vmem:[#allocation2 + $0x20] sm:$0xff] %v1609_v42  ;;  %v1612_v49 = vrot.slane %v1555_v38, 7  ;;  %v1619_v53 = vsel %vm1605_vm0, %v1614_v37, %v1618_v43 }
 0x11c   : > { %v1546_v50 = vmul.f32 0.2, %v892_v25  ;;  %s19452_s0 = sld [smem:[#allocation101_spill]]  ;;  %1659 = vst [vmem:[#allocation2 + $0x38] sm:$0xff] %v1615_v48  ;;  %v1616_v54 = vrot.slane %v1557_v44, 7  ;;  %v1560_v55 = vmax.f32 %v890_v24, %v1544_v45  ;;  %v893_v57 = vld [vmem:[%s13557_s15 + $0x60] sm:$0xff]  ;;  %v12176_v63 = vpack.c.bf16 %v896_v47, %v894_v46  ;;  %12175 = vmatpush1.bf16.msra.mxu0 %v12174_v51 }
 0x11d   : > { %v1543_v56 = vmul.f32 0.2, %v889_v34  ;;  %v895_v58 = vld [vmem:[%s13557_s15 + $0x70] sm:$0xff]  ;;  %1661 = vst [vmem:[#allocation2 + $0x48] sm:$0xff] %v1619_v53  ;;  %v1613_v60 = vsel %vm1605_vm0, %v1608_v31, %v1612_v49  ;;  %v1545_v62 = vmul.f32 0.2, %v13614_v35 }
 0x11e   : > { %v1562_v61 = vmax.f32 %v892_v25, %v1546_v50  ;;  %v1617_v2 = vsel %vm1605_vm0, %v1612_v49, %v1616_v54  ;;  %1658 = vst [vmem:[#allocation2 + $0x30] sm:$0xff] %v1613_v60  ;;  %v1622_v3 = vrot.slane %v1560_v55, 7  ;;  %v1548_v5 = vmul.f32 0.2, %v894_v46  ;;  %12177 = vmatprep.subr.bf16.mxu0 %v12176_v63  ;;  %s19453_s24 = sld [smem:[#allocation100_spill]]  ;;  %s19454_s27 = sld [smem:[#allocation104_spill]] }
 0x11f   : > { %v13620_v40 = vld [vmem:[%s19451_s7 + $0x10] sm:$0xff]  ;;  %v13625_v41 = vld [vmem:[%s19451_s7] sm:$0xff]  ;;  %v13645_v59 = vld [vmem:[%s19451_s7 + $0x8] sm:$0xff]  ;;  %v1559_v4 = vmax.f32 %v889_v34, %v1543_v56  ;;  %1660 = vst [vmem:[#allocation2 + $0x40] sm:$0xff] %v1617_v2  ;;  %v1561_v7 = vmax.f32 %v13614_v35, %v1545_v62  ;;  %v1550_v8 = vmul.f32 0.2, %v896_v47  ;;  %v12178_v9 = vpack.c.bf16 %v895_v58, %v893_v57 }
 0x120   : > { %1936 = vperm.xlu1 %12364, %v13620_v40   ;;  %1928 = vperm.xlu0 %12363, %v13625_v41   ;;  %v1626_v6 = vrot.slane %v1562_v61, 7  ;;  %v13661_v11 = vld [vmem:[%s19451_s7 + $0x18] sm:$0xff]  ;;  %v1623_v12 = vsel %vm1605_vm0, %v1618_v43, %v1622_v3  ;;  %v1564_v14 = vmax.f32 %v894_v46, %v1548_v5  ;;  %v1547_v15 = vmul.f32 0.2, %v893_v57  ;;  %v12365_v21 = vld [vmem:[#allocation8 + $0x4] ss:$16 sps:$4 sm:$0xff]  }
 0x121   : > { %v1620_v13 = vrot.slane %v1559_v4, 7  ;;  %1663 = vst [vmem:[#allocation2 + $0x58] sm:$0xff] %v1623_v12  ;;  %v1624_v18 = vrot.slane %v1561_v7, 7  ;;  %v1566_v19 = vmax.f32 %v896_v47, %v1550_v8  ;;  %v1549_v20 = vmul.f32 0.2, %v895_v58  ;;  %12179 = vmatpush1.bf16.msra.mxu0 %v12178_v9  ;;  %1389 = vmatprep.subr.bf16.mxu1 %v12365_v21  ;;  %v13681_v34 = vld [vmem:[%s19451_s7 + $0x20] sm:$0xff] }
 0x122   : > { %v13637_v52 = vld [vmem:[%s19452_s0] sm:$0xff]  ;;  %v13656_v10 = vld [vmem:[%s19452_s0 + $0x8] sm:$0xff]  ;;  %v1627_v17 = vsel %vm1605_vm0, %v1622_v3, %v1626_v6  ;;  %v1630_v23 = vrot.slane %v1564_v14, 7  ;;  %v1563_v24 = vmax.f32 %v893_v57, %v1547_v15  ;;  %v13673_v25 = vld [vmem:[%s19452_s0 + $0x10] sm:$0xff]  ;;  %vm4857_vm4 = vcmp.gt.f32.partialorder %v13645_v59, 0.5  ;;  %s19455_s9 = sld [smem:[#allocation103_spill]] }
 0x123   : > { %1665 = vst [vmem:[#allocation2 + $0x68] sm:$0xff] %v1627_v17  ;;  %v1621_v22 = vsel %vm1605_vm0, %v1616_v54, %v1620_v13  ;;  %v12367_v26 = vld [vmem:[#allocation8] ss:$16 sps:$4 sm:$0xff]   ;;  %v12368_v27 = vld [vmem:[#allocation8 + $0x8] ss:$16 sps:$4 sm:$0xff]   ;;  %v1625_v28 = vsel %vm1605_vm0, %v1620_v13, %v1624_v18  ;;  %v1634_v29 = vrot.slane %v1566_v19, 7  ;;  %v1565_v30 = vmax.f32 %v895_v58, %v1549_v20 }
 0x124   : > { %1690 = vperm.xlu1 %12364, %v13637_v52   ;;  %1932 = vperm.xlu0 %12363, %v13645_v59   ;;  %v897_v16 = vld [vmem:[%s19453_s24] sm:$0xff]  ;;  %1662 = vst [vmem:[#allocation2 + $0x50] sm:$0xff] %v1621_v22  ;;  %v12370_v31 = vld [vmem:[#allocation8 + $0xc] ss:$16 sps:$4 sm:$0xff]   ;;  %1664 = vst [vmem:[#allocation2 + $0x60] sm:$0xff] %v1625_v28  ;;  %v1631_v32 = vsel %vm1605_vm0, %v1626_v6, %v1630_v23  ;;  %v1628_v33 = vrot.slane %v1563_v24, 7 }
 0x125   : > { %1390 = vmatpush1.bf16.msra.mxu1 %v12367_v26  ;;  %v12371_v35 = vld [vmem:[#allocation8 + $0x24] ss:$16 sps:$4 sm:$0xff]   ;;  %v1635_v36 = vsel %vm1605_vm0, %v1630_v23, %v1634_v29  ;;  %1667 = vst [vmem:[#allocation2 + $0x78] sm:$0xff] %v1631_v32  ;;  %1671 = vst [vmem:[#allocation2 + $0x98] sm:$0x1] %v1634_v29  ;;  %v1632_v37 = vrot.slane %v1565_v30, 7  ;;  %11575 = vmatmul.mubr.msk.f32.vlgmr.msra.gmra.mrb[0].mxu0 %vm19232_vm1, %v897_v16 }
 0x126   : > { %1432 = vmatprep.subr.bf16.mxu0 %v12370_v31  ;;  %v12373_v38 = vld [vmem:[#allocation8 + $0x20] ss:$16 sps:$4 sm:$0xff]   ;;  %1669 = vst [vmem:[#allocation2 + $0x88] sm:$0xff] %v1635_v36  ;;  %v1629_v39 = vsel %vm1605_vm0, %v1624_v18, %v1628_v33  ;;  %996 = vmatprep.mubr.f32.mxu0 %v13132_v0  ;;  %v898_v42 = vld [vmem:[%s19453_s24 + $0x8] sm:$0xff]  ;;  %v13701_v46 = vld [vmem:[%s19452_s0 + $0x18] sm:$0xff]  ;;  %vm4849_vm2 = vcmp.gt.f32.partialorder %v13656_v10, 0.5 }
 0x127   : > { %v13694_v43 = vld [vmem:[%s19451_s7 + $0x28] sm:$0xff]  ;;  %v1633_v44 = vsel %vm1605_vm0, %v1628_v33, %v1632_v37  ;;  %1666 = vst [vmem:[#allocation2 + $0x70] sm:$0xff] %v1629_v39  ;;  %1670 = vst [vmem:[#allocation2 + $0x90] sm:$0x1] %v1632_v37  ;;  %1433 = vmatpush1.bf16.msra.mxu0 %v12368_v27  ;;  %1391 = vmatprep.subr.bf16.mxu1 %v12371_v35  ;;  %v12377_v47 = vld [vmem:[#allocation8 + $0x44] ss:$16 sps:$4 sm:$0xff]  }
 0x128   : > { %1940 = vperm.xlu1 %12364, %v13661_v11   ;;  %1695 = vperm.xlu0 %12363, %v13656_v10   ;;  %v12374_v45 = vld [vmem:[#allocation8 + $0x28] ss:$16 sps:$4 sm:$0xff]   ;;  %v12376_v0 = vld [vmem:[#allocation8 + $0x2c] ss:$16 sps:$4 sm:$0xff]   ;;  %1668 = vst [vmem:[#allocation2 + $0x80] sm:$0xff] %v1633_v44  ;;  %v13709_v49 = vld [vmem:[%s19452_s0 + $0x20] sm:$0xff] }
 0x129   : > { %11576 = vmatmul.mubr.msk.f32.gmra.mrb[2].mxu0 %vm19232_vm1, %v898_v42  ;;  %1392 = vmatpush1.bf16.msra.mxu1 %v12373_v38  ;;  %v12379_v48 = vld [vmem:[#allocation8 + $0x40] ss:$16 sps:$4 sm:$0xff]   ;;  %v12380_v50 = vld [vmem:[#allocation8 + $0x48] ss:$16 sps:$4 sm:$0xff]   ;;  %v12382_v53 = vld [vmem:[#allocation8 + $0x4c] ss:$16 sps:$4 sm:$0xff]  }
 0x12a   : > { %1434 = vmatprep.subr.bf16.mxu0 %v12376_v0  ;;  %v13714_v51 = vld [vmem:[%s19451_s7 + $0x30] sm:$0xff]  ;;  %1393 = vmatprep.subr.bf16.mxu1 %v12377_v47  ;;  %v13719_v54 = vld [vmem:[%s19451_s7 + $0x38] sm:$0xff]  ;;  %v13726_v60 = vld [vmem:[%s19452_s0 + $0x28] sm:$0xff]  ;;  %vm4848_vm3 = vcmp.gt.f32.partialorder %v13637_v52, 0.5  ;;  %v5105_v9 = vsel %vm4849_vm2, 1, %v13133_v1  ;;  %vm4856_vm5 = vcmp.gt.f32.partialorder %v13625_v41, 0.5 }
 0x12b   : > { %1435 = vmatpush1.bf16.msra.mxu0 %v12374_v45  ;;  %v12383_v55 = vld [vmem:[#allocation8 + $0x64] ss:$16 sps:$4 sm:$0xff]   ;;  %v12385_v56 = vld [vmem:[#allocation8 + $0x60] ss:$16 sps:$4 sm:$0xff]   ;;  %v12386_v57 = vld [vmem:[#allocation8 + $0x68] ss:$16 sps:$4 sm:$0xff]  }
 0x12c   : > { %1700 = vperm.xlu1 %12364, %v13673_v25   ;;  %1944 = vperm.xlu0 %12363, %v13681_v34   ;;  %v12388_v58 = vld [vmem:[#allocation8 + $0x6c] ss:$16 sps:$4 sm:$0xff]   ;;  %v12389_v61 = vld [vmem:[#allocation8 + $0x84] ss:$16 sps:$4 sm:$0xff]   ;;  %v12391_v63 = vld [vmem:[#allocation8 + $0x80] ss:$16 sps:$4 sm:$0xff]  }
 0x12d   : > { %1394 = vmatpush1.bf16.msra.mxu1 %v12379_v48  ;;  %1436 = vmatprep.subr.bf16.mxu0 %v12382_v53  ;;  %v13731_v62 = vld [vmem:[%s19452_s0 + $0x38] sm:$0xff]  ;;  %v12395_v3 = vld [vmem:[#allocation8 + $0xa4] ss:$16 sps:$4 sm:$0xff]   ;;  %v12397_v7 = vld [vmem:[#allocation8 + $0xa0] ss:$16 sps:$4 sm:$0xff]   ;;  %v5104_v13 = vsel %vm4848_vm3, 1, %v13133_v1 }
 0x12e   : > { %1395 = vmatprep.subr.bf16.mxu1 %v12383_v55  ;;  %v12394_v2 = vld [vmem:[#allocation8 + $0x8c] ss:$16 sps:$4 sm:$0xff]   ;;  %v12392_v4 = vld [vmem:[#allocation8 + $0x88] ss:$16 sps:$4 sm:$0xff]   ;;  %v13738_v5 = vld [vmem:[%s19452_s0 + $0x30] sm:$0xff]  ;;  %v5389_v15 = vsel %vm4857_vm4, 1, %v13133_v1 }
 0x12f   : > { %1437 = vmatpush1.bf16.msra.mxu0 %v12380_v50  ;;  %v12400_v6 = vld [vmem:[#allocation8 + $0xac] ss:$16 sps:$4 sm:$0xff]   ;;  %v12401_v8 = vld [vmem:[#allocation8 + $0xc4] ss:$16 sps:$4 sm:$0xff]   ;;  %v12398_v12 = vld [vmem:[#allocation8 + $0xa8] ss:$16 sps:$4 sm:$0xff]  }
 0x130   : > { %1948 = vperm.xlu1 %12364, %v13694_v43   ;;  %1705 = vperm.xlu0 %12363, %v13701_v46   ;;  %v12406_v10 = vld [vmem:[#allocation8 + $0xcc] ss:$16 sps:$4 sm:$0xff]   ;;  %v12403_v52 = vld [vmem:[#allocation8 + $0xc0] ss:$16 sps:$4 sm:$0xff]   ;;  %v12407_v14 = vld [vmem:[#allocation8 + $0xe4] ss:$16 sps:$4 sm:$0xff]  }
 0x131   : > { %1396 = vmatpush1.bf16.msra.mxu1 %v12385_v56  ;;  %1438 = vmatprep.subr.bf16.mxu0 %v12388_v58  ;;  %v12404_v16 = vld [vmem:[#allocation8 + $0xc8] ss:$16 sps:$4 sm:$0xff]   ;;  %v5388_v17 = vsel %vm4856_vm5, 1, %v13133_v1  ;;  %vm4851_vm6 = vcmp.gt.f32.partialorder %v13701_v46, 0.5  ;;  %v12412_v59 = vld [vmem:[#allocation8 + $0xec] ss:$16 sps:$4 sm:$0xff]  }
 0x132   : > { %1397 = vmatprep.subr.bf16.mxu1 %v12389_v61  ;;  %vm4850_vm7 = vcmp.gt.f32.partialorder %v13673_v25, 0.5  ;;  %v12409_v41 = vld [vmem:[#allocation8 + $0xe0] ss:$16 sps:$4 sm:$0xff]   ;;  %v12413_v18 = vld [vmem:[#allocation8 + $0x104] ss:$16 sps:$4 sm:$0xff]   ;;  %v5107_v19 = vsel %vm4851_vm6, 1, %v13133_v1 }
 0x133   : > { %1439 = vmatpush1.bf16.msra.mxu0 %v12386_v57  ;;  %v12410_v20 = vld [vmem:[#allocation8 + $0xe8] ss:$16 sps:$4 sm:$0xff]   ;;  %v5106_v21 = vsel %vm4850_vm7, 1, %v13133_v1  ;;  %vm4859_vm8 = vcmp.gt.f32.partialorder %v13661_v11, 0.5  ;;  %v12418_v22 = vld [vmem:[#allocation8 + $0x10c] ss:$16 sps:$4 sm:$0xff]  }
 0x134   : > { %1710 = vperm.xlu1 %12364, %v13709_v49   ;;  %1952 = vperm.xlu0 %12363, %v13714_v51   ;;  %vm4858_vm9 = vcmp.gt.f32.partialorder %v13620_v40, 0.5  ;;  %v12415_v23 = vld [vmem:[#allocation8 + $0x100] ss:$16 sps:$4 sm:$0xff]   ;;  %v12419_v24 = vld [vmem:[#allocation8 + $0x124] ss:$16 sps:$4 sm:$0xff]   ;;  %v5391_v25 = vsel %vm4859_vm8, 1, %v13133_v1 }
 0x135   : > { %1440 = vmatprep.subr.bf16.mxu0 %v12394_v2  ;;  %1398 = vmatpush1.bf16.msra.mxu1 %v12391_v63  ;;  %v12416_v26 = vld [vmem:[#allocation8 + $0x108] ss:$16 sps:$4 sm:$0xff]   ;;  %v5390_v27 = vsel %vm4858_vm9, 1, %v13133_v1  ;;  %vm4853_vm10 = vcmp.gt.f32.partialorder %v13726_v60, 0.5  ;;  %v12424_v11 = vld [vmem:[#allocation8 + $0x12c] ss:$16 sps:$4 sm:$0xff]  }
 0x136   : > { %1399 = vmatprep.subr.bf16.mxu1 %v12395_v3  ;;  %vm4852_vm11 = vcmp.gt.f32.partialorder %v13709_v49, 0.5  ;;  %v12421_v40 = vld [vmem:[#allocation8 + $0x120] ss:$16 sps:$4 sm:$0xff]   ;;  %v12425_v28 = vld [vmem:[#allocation8 + $0x144] ss:$16 sps:$4 sm:$0xff]   ;;  %v5109_v29 = vsel %vm4853_vm10, 1, %v13133_v1 }
 0x137   : > { %1441 = vmatpush1.bf16.msra.mxu0 %v12392_v4  ;;  %vm4861_vm12 = vcmp.gt.f32.partialorder %v13694_v43, 0.5  ;;  %v12422_v30 = vld [vmem:[#allocation8 + $0x128] ss:$16 sps:$4 sm:$0xff]   ;;  %v5108_v31 = vsel %vm4852_vm11, 1, %v13133_v1  ;;  %v12427_v32 = vld [vmem:[#allocation8 + $0x140] ss:$16 sps:$4 sm:$0xff]  }
 0x138   : > { %1956 = vperm.xlu1 %12364, %v13719_v54   ;;  %1715 = vperm.xlu0 %12363, %v13726_v60   ;;  %v12430_v33 = vld [vmem:[#allocation8 + $0x14c] ss:$16 sps:$4 sm:$0xff]   ;;  %vm4860_vm13 = vcmp.gt.f32.partialorder %v13681_v34, 0.5  ;;  %v12428_v35 = vld [vmem:[#allocation8 + $0x148] ss:$16 sps:$4 sm:$0xff]   ;;  %v5393_v38 = vsel %vm4861_vm12, 1, %v13133_v1 }
 0x139   : > { %1442 = vmatprep.subr.bf16.mxu0 %v12400_v6  ;;  %1400 = vmatpush1.bf16.msra.mxu1 %v12397_v7  ;;  %v12431_v36 = vld [vmem:[#allocation8 + $0x164] ss:$16 sps:$4 sm:$0xff]   ;;  %v12436_v37 = vld [vmem:[#allocation8 + $0x16c] ss:$16 sps:$4 sm:$0xff]   ;;  %v12433_v39 = vld [vmem:[#allocation8 + $0x160] ss:$16 sps:$4 sm:$0xff]   ;;  %v1477_v6 = vlaneseq }
 0x13a   : > { %1401 = vmatprep.subr.bf16.mxu1 %v12401_v8  ;;  %v5392_v42 = vsel %vm4860_vm13, 1, %v13133_v1  ;;  %vm4855_vm14 = vcmp.gt.f32.partialorder %v13731_v62, 0.5  ;;  %v12437_v43 = vld [vmem:[#allocation8 + $0x184] ss:$16 sps:$4 sm:$0xff]   ;;  %vm4854_vm15 = vcmp.gt.f32.partialorder %v13738_v5, 0.5  ;;  %vm4863_vm2 = vcmp.gt.f32.partialorder %v13719_v54, 0.5 }
 0x13b   : > { %1443 = vmatpush1.bf16.msra.mxu0 %v12398_v12  ;;  %v12434_v34 = vld [vmem:[#allocation8 + $0x168] ss:$16 sps:$4 sm:$0xff]   ;;  %v12442_v44 = vld [vmem:[#allocation8 + $0x18c] ss:$16 sps:$4 sm:$0xff]   ;;  %v5111_v45 = vsel %vm4855_vm14, 1, %v13133_v1  ;;  %v5110_v46 = vsel %vm4854_vm15, 1, %v13133_v1 }
 0x13c   : > { %1725 = vperm.xlu1 %12364, %v13731_v62   ;;  %1720 = vperm.xlu0 %12363, %v13738_v5   ;;  %v12439_v0 = vld [vmem:[#allocation8 + $0x180] ss:$16 sps:$4 sm:$0xff]   ;;  %v12443_v47 = vld [vmem:[#allocation8 + $0x1a4] ss:$16 sps:$4 sm:$0xff]   ;;  %vm4862_vm3 = vcmp.gt.f32.partialorder %v13714_v51, 0.5  ;;  %v5395_v50 = vsel %vm4863_vm2, 1, %v13133_v1 }
 0x13d   : > { %1444 = vmatprep.subr.bf16.mxu0 %v12406_v10  ;;  %1402 = vmatpush1.bf16.msra.mxu1 %v12403_v52  ;;  %v12440_v48 = vld [vmem:[#allocation8 + $0x188] ss:$16 sps:$4 sm:$0xff]   ;;  %v12448_v49 = vld [vmem:[#allocation8 + $0x1ac] ss:$16 sps:$4 sm:$0xff]   ;;  %v12445_v53 = vld [vmem:[#allocation8 + $0x1a0] ss:$16 sps:$4 sm:$0xff]  }
 0x13e   : > { %1403 = vmatprep.subr.bf16.mxu1 %v12407_v14  ;;  %v5394_v55 = vsel %vm4862_vm3, 1, %v13133_v1  ;;  %v12449_v56 = vld [vmem:[#allocation8 + $0x1c4] ss:$16 sps:$4 sm:$0xff]   ;;  %v918_v54 = vld [vmem:[%s19454_s27 + $0x8] sm:$0xff]  ;;  %v12451_v60 = vld [vmem:[#allocation8 + $0x1c0] ss:$16 sps:$4 sm:$0xff]  }
 0x13f   : > { %1445 = vmatpush1.bf16.msra.mxu0 %v12404_v16  ;;  %v12446_v51 = vld [vmem:[#allocation8 + $0x1a8] ss:$16 sps:$4 sm:$0xff]   ;;  %v917_v57 = vld [vmem:[%s19454_s27] sm:$0xff]  ;;  %v12454_v61 = vld [vmem:[#allocation8 + $0x1cc] ss:$16 sps:$4 sm:$0xff]   ;;  %v13786_v7 = vshrl.u32 %v1477_v6, 7 }
 0x140   : > { %5116 = vperm.xlu1 %12364, %v5105_v9   ;;  %5113 = vperm.xlu0 %12363, %v5104_v13   ;;  %v916_v1 = vld [vmem:[%s19455_s9 + $0x8] sm:$0xff]  ;;  %v915_v58 = vld [vmem:[%s19455_s9] sm:$0xff]  ;;  %v12463_v5 = vld [vmem:[#allocation10 + $0x4] ss:$8 sps:$4 sm:$0xff]   ;;  %s19458_s4 = sld [smem:[#allocation108_spill]]  ;;  %vm1855_vm4 = vcmask 1046528  }
 0x141   : > { %1446 = vmatprep.subr.bf16.mxu0 %v12412_v59  ;;  %1404 = vmatpush1.bf16.msra.mxu1 %v12409_v41  ;;  %v12452_v62 = vld [vmem:[#allocation8 + $0x1c8] ss:$16 sps:$4 sm:$0xff]   ;;  %v12455_v63 = vld [vmem:[#allocation8 + $0x1e4] ss:$16 sps:$4 sm:$0xff]   ;;  %v12457_v2 = vld [vmem:[#allocation8 + $0x1e0] ss:$16 sps:$4 sm:$0xff]  }
 0x142   : > { %1405 = vmatprep.subr.bf16.mxu1 %v12413_v18  ;;  %v12460_v3 = vld [vmem:[#allocation8 + $0x1ec] ss:$16 sps:$4 sm:$0xff]   ;;  %v12458_v4 = vld [vmem:[#allocation8 + $0x1e8] ss:$16 sps:$4 sm:$0xff]   ;;  %19456 = vst [vmem:[#allocation26_spill] sm:$0xff] %v13786_v7  ;;  %v13789_v8 = vsub.s32 1, %v13786_v7 }
 0x143   : > { %1447 = vmatpush1.bf16.msra.mxu0 %v12410_v20  ;;  %v1675_v13 = vld [vmem:[#allocation2 + $0x18] sm:$0xff]  ;;  %v1789_v10 = vld [vmem:[#allocation2 + $0x8] sm:$0xfe]  ;;  %v13820_v20 = vld [vmem:[#allocation2] sm:$0xff]  ;;  %vm19228_vm5 = vcmask 1041408   ;;  %vm2050_vm6 = vcmask 1045504  }
 0x144   : > { %5400 = vperm.xlu1 %12364, %v5389_v15   ;;  %5397 = vperm.xlu0 %12363, %v5388_v17   ;;  %19457 = vst [vmem:[#allocation27_spill] sm:$0xff] %v13789_v8  ;;  %v13800_v52 = vld [vmem:[#allocation2 + $0x28] sm:$0xff]  ;;  %s19627_s1 = sld [smem:[#allocation110_spill]]  ;;  %s19631_s10 = sld [smem:[#allocation111_spill]] }
 0x145   : > { %1448 = vmatprep.subr.bf16.mxu0 %v12418_v22  ;;  %1406 = vmatpush1.bf16.msra.mxu1 %v12415_v23  ;;  %v1923_v59 = vld [vmem:[#allocation2 + $0x8] sm:$0xfc]  ;;  %s19702_s15 = sld [smem:[#allocation113_spill]]  ;;  %s19705_s21 = sld [smem:[#allocation114_spill]] }
 0x146   : > { %1407 = vmatprep.subr.bf16.mxu1 %v12419_v24  ;;  %v13794_v9 = vld [vmem:[%s19458_s4 + $0x1] ss:$8 sm:$0x3]  ;;  %v13806_v15 = vld [vmem:[%s19458_s4] ss:$8 sm:$0x3] }
 0x147   : > { %1449 = vmatpush1.bf16.msra.mxu0 %v12416_v26  ;;  %v13798_v12 = vrot.slane %v13794_v9, %v13789_v8  ;;  %3129 = vst [vmem:[#allocation2 + $0x8] sm:$0xff] %v13820_v20  ;;  %s19848_s3 = sld [smem:[#allocation107_spill]]  ;;  %s20137_s8 = sld [smem:[#allocation116_spill]] }
 0x148   : > { %5122 = vperm.xlu1 %12364, %v5107_v19   ;;  %5119 = vperm.xlu0 %12363, %v5106_v21   ;;  %v13818_v19 = vld [vmem:[%s19458_s4 + $0x2] ss:$8 sm:$0x3]  ;;  %s11574_s28 = sshll.u32 %s13553_s14, 3  ;;  %p20145_p1 = scmp.ne.s32.totalorder %s19438_s25, 0 }
 0x149   : > { %1450 = vmatprep.subr.bf16.mxu0 %v12424_v11  ;;  %1408 = vmatpush1.bf16.msra.mxu1 %v12421_v40  ;;  %19459 = vst [vmem:[#allocation28_spill] sm:$0xff] %v13798_v12  ;;  %v1822_v14 = vmul.f32 %v13798_v12, %v1675_v13  ;;  %v1820_v16 = vmul.f32 %v13798_v12, %v1789_v10  ;;  %v13842_v11 = vld [vmem:[%s19458_s4 + $0x4] ss:$8 sm:$0x3]  ;;  %s880_s11 = scalar_lea.vmem [#allocation19], %s11574_s28 }
 0x14a   : > { %1409 = vmatprep.subr.bf16.mxu1 %v12425_v28  ;;  %v13811_v17 = vmul.f32 %v13798_v12, %v13800_v52  ;;  %v13832_v26 = vrot.slane %v13818_v19, %v13789_v8 }
 0x14b   : > { %1451 = vmatpush1.bf16.msra.mxu0 %v12422_v30  ;;  %v1860_v18 = vrot.slane %v1822_v14, 1  ;;  %v1859_v23 = vrot.slane %v1820_v16, 1 }
 0x14c   : > { %5406 = vperm.xlu1 %12364, %v5391_v25   ;;  %5403 = vperm.xlu0 %12363, %v5390_v27   ;;  %v19026_v24 = vrot.slane %v13811_v17, 1  ;;  %v13828_v25 = vrot.slane %v13806_v15, %v13789_v8  ;;  %v13837_v27 = vld [vmem:[%s19458_s4 + $0x3] ss:$8 sm:$0x3] }
 0x14d   : > { %1452 = vmatprep.subr.bf16.mxu0 %v12430_v33  ;;  %1410 = vmatpush1.bf16.msra.mxu1 %v12427_v32  ;;  %v2312_v32 = vld [vmem:[#allocation2 + $0x18] sm:$0xfc] }
 0x14e   : > { %1411 = vmatprep.subr.bf16.mxu1 %v12431_v36  ;;  %v13855_v36 = vrot.slane %v13842_v11, %v13789_v8 }
 0x14f   : > { %1453 = vmatpush1.bf16.msra.mxu0 %v12428_v35 }
 0x150   : > { %5128 = vperm.xlu1 %12364, %v5109_v29   ;;  %5125 = vperm.xlu0 %12363, %v5108_v31   ;;  %v1861_v29 = vsel %vm1855_vm4, %v1859_v23, %v1860_v18  ;;  %v2181_v31 = vld [vmem:[#allocation2 + $0x18] sm:$0xfe]  ;;  %19462 = vst [vmem:[#allocation31_spill] sm:$0xff] %v13855_v36 }
 0x151   : > { %1454 = vmatprep.subr.bf16.mxu0 %v12436_v37  ;;  %1412 = vmatpush1.bf16.msra.mxu1 %v12433_v39  ;;  %3131 = vst [vmem:[#allocation2 + $0x18] sm:$0xff] %v13820_v20  ;;  %v13858_v37 = vld [vmem:[#allocation2] sm:$0xfe] }
 0x152   : > { %1413 = vmatprep.subr.bf16.mxu1 %v12437_v43 }
 0x153   : > { %1455 = vmatpush1.bf16.msra.mxu0 %v12434_v34  ;;  %v13868_v34 = vrot.slane %v13837_v27, %v13789_v8 }
 0x154   : > { %5412 = vperm.xlu1 %12364, %v5393_v38   ;;  %5409 = vperm.xlu0 %12363, %v5392_v42   ;;  %v13860_v38 = vld [vmem:[#allocation2] sm:$0xfc]  ;;  %v13863_v42 = vsub.s32 0, %v13786_v7 }
 0x155   : > { %1456 = vmatprep.subr.bf16.mxu0 %v12442_v44  ;;  %1414 = vmatpush1.bf16.msra.mxu1 %v12439_v0  ;;  %v13873_v44 = vld [vmem:[%s19458_s4 + $0x5] ss:$8 sm:$0x3]  ;;  %3128 = vst [vmem:[#allocation2] sm:$0xff] %v13820_v20  ;;  %v1865_v0 = vsel %vm1855_vm4, %v1860_v18, %v19026_v24 }
 0x156   : > { %1415 = vmatprep.subr.bf16.mxu1 %v12443_v47  ;;  %19463 = vst [vmem:[#allocation32_spill] sm:$0xff] %v13863_v42  ;;  %v13882_v47 = vld [vmem:[#allocation2 + $0x10] sm:$0xff] }
 0x157   : > { %1457 = vmatpush1.bf16.msra.mxu0 %v12440_v48  ;;  %v13884_v48 = vld [vmem:[#allocation2 + $0x10] sm:$0xfe] }
 0x158   : > { %5134 = vperm.xlu1 %12364, %v5111_v45   ;;  %5131 = vperm.xlu0 %12363, %v5110_v46  }
 0x159   : > { %1458 = vmatprep.subr.bf16.mxu0 %v12448_v49  ;;  %1416 = vmatpush1.bf16.msra.mxu1 %v12445_v53  ;;  %v13886_v49 = vld [vmem:[#allocation2 + $0x10] sm:$0xfc] }
 0x15a   : > { %1417 = vmatprep.subr.bf16.mxu1 %v12449_v56  ;;  %v2210_v56 = vmul.f32 %v13855_v36, %v2181_v31  ;;  %3130 = vst [vmem:[#allocation2 + $0x10] sm:$0xff] %v13820_v20 }
 0x15b   : > { %1459 = vmatpush1.bf16.msra.mxu0 %v12446_v51 }
 0x15c   : > { %5418 = vperm.xlu1 %12364, %v5395_v50   ;;  %5415 = vperm.xlu0 %12363, %v5394_v55   ;;  %v13897_v55 = vld [vmem:[#allocation2 + $0x38] sm:$0xff]  ;;  %v2248_v14 = vrot.slane %v2210_v56, 1 }
 0x15d   : > { %1418 = vmatpush1.bf16.msra.mxu1 %v12451_v60  ;;  %1460 = vmatprep.subr.bf16.mxu0 %v12454_v61  ;;  %v13956_v56 = vld [vmem:[#allocation2 + $0x98] sm:$0x1] }
 0x15e   : > { %1419 = vmatprep.subr.bf16.mxu1 %v12455_v63  ;;  %19467 = vst [vmem:[#allocation36_spill] sm:$0xff] %v13956_v56 }
 0x15f   : > { %1461 = vmatpush1.bf16.msra.mxu0 %v12452_v62 }
 0x160   : > { %6716 = vperm.xlu1 %12364, %v918_v54   ;;  %6712 = vperm.xlu0 %12363, %v917_v57   ;;  %v2212_v54 = vmul.f32 %v13855_v36, %v13800_v52 }
 0x161   : > { %1420 = vmatpush1.bf16.msra.mxu1 %v12457_v2  ;;  %1462 = vmatprep.subr.bf16.mxu0 %v12460_v3  ;;  %v13919_v2 = vrot.slane %v13873_v44, %v13789_v8 }
 0x162   : > { %2967 = vmatprep.subr.bf16.mxu1 %v12463_v5 }
 0x163   : > { %1463 = vmatpush1.bf16.msra.mxu0 %v12458_v4 }
 0x164   : > { %6558 = vperm.xlu1 %12364, %v916_v1   ;;  %6553 = vperm.xlu0 %12363, %v915_v58   ;;  %v13910_v58 = vmul.f32 %v13855_v36, %v13897_v55 }
 0x19f   : > { %v13813_v41 = vpop.permute.xlu1 %1936  ;;  %v1929_v21 = vpop.permute.xlu0 %1928 }
 0x1a0   : > { %v13823_v22 = vrot.slane %v1929_v21, 6  ;;  %v19028_v40 = vrot.slane %v13813_v41, 6  ;;  %v19024_v21 = vrot.slane %v13910_v58, 1 }
 0x1a2   : > { %19460 = vst [vmem:[#allocation29_spill] sm:$0xff] %v13823_v22  ;;  %v1984_v30 = vmul.f32 %v13823_v22, %v1923_v59  ;;  %v2316_v60 = vmul.f32 %v2312_v32, %v13823_v22 }
 0x1a3   : > { %v13845_v28 = vpop.permute.xlu1 %1690  ;;  %v1933_v33 = vpop.permute.xlu0 %1932 }
 0x1a4   : > { %19461 = vst [vmem:[#allocation30_spill] sm:$0xff] %v13845_v28  ;;  %v13851_v35 = vmul.f32 %v13820_v20, %v13845_v28  ;;  %v1960_v39 = vrot.slane %v1933_v33, 6  ;;  %v2120_v43 = vmul.f32 %v13845_v28, %v1675_v13  ;;  %v2015_v46 = vmul.f32 %v13832_v26, %v1984_v30  ;;  %v13938_v33 = vld [vmem:[%s19458_s4 + $0x6] ss:$8 sm:$0x3] }
 0x1a5   : > { %v2347_v31 = vmul.f32 %v13919_v2, %v2316_v60 }
 0x1a6   : > { %v1757_v45 = vmul.f32 %v13828_v25, %v13851_v35  ;;  %v13890_v50 = vsel %vm19228_vm5, %v13823_v22, %v1960_v39  ;;  %v13895_v53 = vsel %vm19228_vm5, %v1960_v39, %v19028_v40  ;;  %v2149_v63 = vmul.f32 %v13868_v34, %v2120_v43  ;;  %v13943_v39 = vld [vmem:[%s19458_s4 + $0x7] ss:$8 sm:$0x3] }
 0x1a7   : > { %19464 = vst [vmem:[#allocation33_spill] sm:$0xff] %v13890_v50  ;;  %19465 = vst [vmem:[#allocation34_spill] sm:$0xff] %v13895_v53  ;;  %v13903_v51 = vpop.permute.xlu0 %1695  ;;  %v1986_v57 = vmul.f32 %v13890_v50, %v1675_v13  ;;  %v1988_v1 = vmul.f32 %v13895_v53, %v13800_v52  ;;  %v2054_v6 = vrot.slane %v2015_v46, 2  ;;  %v2318_v16 = vmul.f32 %v13890_v50, %v13800_v52 }
 0x1a8   : > { %19466 = vst [vmem:[#allocation35_spill] sm:$0xff] %v13903_v51  ;;  %v1731_v61 = vmul.f32 %v13903_v51, %v1675_v13  ;;  %v2122_v62 = vmul.f32 %v13800_v52, %v13903_v51  ;;  %v1907_v3 = vadd.f32 %v1861_v29, %v1757_v45  ;;  %v2249_v13 = vrot.slane %v2212_v54, 1  ;;  %v13958_v54 = vld [vmem:[#allocation2 + $0x98] sm:$0x3] }
 0x1a9   : > { %v2017_v4 = vmul.f32 %v13832_v26, %v1986_v57  ;;  %v13923_v5 = vmul.f32 %v13832_v26, %v1988_v1  ;;  %v2320_v23 = vmul.f32 %v13897_v55, %v13895_v53  ;;  %v2349_v32 = vmul.f32 %v13919_v2, %v2318_v16  ;;  %19468 = vst [vmem:[#allocation37_spill] sm:$0xff] %v13958_v54 }
 0x1aa   : > { %v1759_v10 = vmul.f32 %v13828_v25, %v1731_v61  ;;  %v2151_v30 = vmul.f32 %v13868_v34, %v2122_v62  ;;  %v13947_v43 = vrot.slane %v13794_v9, %v13863_v42  ;;  %v2385_v60 = vrot.slane %v2347_v31, 2  ;;  %v13962_v61 = vld [vmem:[#allocation2 + $0x98] sm:$0xff]  ;;  %v13964_v62 = vld [vmem:[#allocation2 + $0xa8] sm:$0x1] }
 0x1ab   : > { %v2055_v59 = vrot.slane %v2017_v4, 2  ;;  %v19025_v18 = vrot.slane %v13923_v5, 2  ;;  %v13954_v46 = vmul.f32 %v13919_v2, %v2320_v23  ;;  %v2451_v9 = vmul.f32 %v13800_v52, %v13845_v28  ;;  %19469 = vst [vmem:[#allocation38_spill] sm:$0xff] %v13962_v61  ;;  %19470 = vst [vmem:[#allocation39_spill] sm:$0xff] %v13964_v62  ;;  %v13966_v4 = vld [vmem:[#allocation2 + $0xa8] sm:$0x3] }
 0x1ac   : > { %v1909_v29 = vadd.f32 %v1865_v0, %v1759_v10  ;;  %19471 = vst [vmem:[#allocation40_spill] sm:$0xff] %v13966_v4  ;;  %v2254_v10 = vsel %vm1855_vm4, %v2249_v13, %v19024_v21  ;;  %v2386_v16 = vrot.slane %v2349_v32, 2  ;;  %3149 = vst [vmem:[#allocation2 + $0xa8] sm:$0x3] %v13820_v20  ;;  %v13985_v32 = vrot.slane %v13806_v15, %v13863_v42 }
 0x1ad   : > { %v2056_v45 = vsel %vm2050_vm6, %v2054_v6, %v2055_v59  ;;  %v2060_v0 = vsel %vm2050_vm6, %v2055_v59, %v19025_v18  ;;  %v2250_v6 = vsel %vm1855_vm4, %v2248_v14, %v2249_v13  ;;  %3147 = vst [vmem:[#allocation2 + $0x98] sm:$0xff] %v13820_v20  ;;  %v19027_v31 = vrot.slane %v13954_v46, 2  ;;  %v2631_v13 = vld [vmem:[#allocation2 + $0x28] sm:$0xfc] }
 0x1ae   : > { %v2102_v57 = vadd.f32 %v2056_v45, %v1907_v3  ;;  %v2104_v1 = vadd.f32 %v2060_v0, %v1909_v29  ;;  %v2453_v3 = vmul.f32 %v13897_v55, %v13903_v51  ;;  %v13976_v29 = vld [vmem:[#allocation2 + $0x48] sm:$0xff]  ;;  %v13981_v14 = vrot.slane %v13938_v33, %v13789_v8 }
 0x1af   : > { %v2512_v45 = vld [vmem:[#allocation2 + $0x28] sm:$0xfe]  ;;  %v13989_v0 = vrot.slane %v13818_v19, %v13863_v42  ;;  %v2391_v21 = vsel %vm2050_vm6, %v2386_v16, %v19027_v31  ;;  %v2635_v31 = vmul.f32 %v2631_v13, %v13823_v22  ;;  %v2637_v4 = vmul.f32 %v13897_v55, %v13890_v50 }
 0x1b0   : > { %v2165_v59 = vadd.f32 %v2149_v63, %v2102_v57  ;;  %v2167_v23 = vadd.f32 %v2151_v30, %v2104_v1  ;;  %v2387_v63 = vsel %vm2050_vm6, %v2385_v60, %v2386_v16  ;;  %v13994_v30 = vrot.slane %v13943_v39, %v13789_v8 }
 0x1b1   : > { %v2480_v18 = vmul.f32 %v13981_v14, %v2451_v9  ;;  %v2482_v15 = vmul.f32 %v13981_v14, %v2453_v3  ;;  %v1819_v9 = vmul.f32 %v13947_v43, %v13858_v37  ;;  %v1821_v3 = vmul.f32 %v13947_v43, %v13882_v47 }
 0x1b2   : > { %19472 = vst [vmem:[#allocation41_spill] sm:$0xff] %v13994_v30  ;;  %v2296_v57 = vadd.f32 %v2250_v6, %v2165_v59  ;;  %v2298_v1 = vadd.f32 %v2254_v10, %v2167_v23  ;;  %v2529_v24 = vmul.f32 %v13994_v30, %v2512_v45  ;;  %v2531_v19 = vmul.f32 %v13994_v30, %v13897_v55  ;;  %v14011_v6 = vld [vmem:[%s19458_s4 + $0x10] ss:$8 sm:$0x3] }
 0x1b3   : > { %v14006_v60 = vmul.f32 %v13994_v30, %v13976_v29  ;;  %v14027_v37 = vrot.slane %v13837_v27, %v13863_v42  ;;  %v1730_v27 = vmul.f32 %v13903_v51, %v13882_v47 }
 0x1b4   : > { %v2433_v10 = vadd.f32 %v2387_v63, %v2296_v57  ;;  %v2435_v16 = vadd.f32 %v2391_v21, %v2298_v1  ;;  %v2567_v59 = vrot.slane %v2529_v24, 1  ;;  %v2568_v23 = vrot.slane %v2531_v19, 1  ;;  %v14023_v63 = vld [vmem:[#allocation2 + $0x20] sm:$0xff]  ;;  %v14043_v19 = vld [vmem:[#allocation2 + $0x90] sm:$0x1] }
 0x1b5   : > { %v19031_v45 = vrot.slane %v14006_v60, 1  ;;  %v2639_v21 = vmul.f32 %v13976_v29, %v13895_v53  ;;  %19473 = vst [vmem:[#allocation42_spill] sm:$0xff] %v14027_v37  ;;  %v14031_v24 = vrot.slane %v13842_v11, %v13863_v42  ;;  %19476 = vst [vmem:[#allocation45_spill] sm:$0xff] %v14043_v19  ;;  %v14047_v11 = vld [vmem:[#allocation2 + $0xa0] sm:$0x1]  ;;  %v2315_v19 = vmul.f32 %v13886_v49, %v13823_v22 }
 0x1b6   : > { %v2496_v40 = vadd.f32 %v2480_v18, %v2433_v10  ;;  %v2498_v7 = vadd.f32 %v2482_v15, %v2435_v16  ;;  %v2569_v13 = vsel %vm1855_vm4, %v2567_v59, %v2568_v23  ;;  %v14039_v15 = vrot.slane %v14011_v6, %v13789_v8  ;;  %v14045_v10 = vld [vmem:[#allocation2 + $0x90] sm:$0x3]  ;;  %19478 = vst [vmem:[#allocation47_spill] sm:$0xff] %v14047_v11  ;;  %v14049_v16 = vld [vmem:[#allocation2 + $0xa0] sm:$0x3] }
 0x1b7   : > { %19474 = vst [vmem:[#allocation43_spill] sm:$0xff] %v14031_v24  ;;  %v2573_v18 = vsel %vm1855_vm4, %v2568_v23, %v19031_v45  ;;  %19477 = vst [vmem:[#allocation46_spill] sm:$0xff] %v14045_v10  ;;  %v1756_v59 = vmul.f32 %v13985_v32, %v13851_v35  ;;  %v1857_v23 = vrot.slane %v1821_v3, 1  ;;  %v1758_v8 = vmul.f32 %v13985_v32, %v1730_v27 }
 0x1b8   : > { %v2615_v57 = vadd.f32 %v2569_v13, %v2496_v40  ;;  %v2617_v1 = vadd.f32 %v2573_v18, %v2498_v7  ;;  %19475 = vst [vmem:[#allocation44_spill] sm:$0xff] %v14039_v15  ;;  %19479 = vst [vmem:[#allocation48_spill] sm:$0xff] %v14049_v16  ;;  %v14055_v7 = vmul.f32 %v13947_v43, %v14023_v63  ;;  %v1856_v40 = vrot.slane %v1819_v9, 1  ;;  %v14064_v16 = vld [vmem:[#allocation2 + $0x90] sm:$0xff] }
 0x1b9   : > { %3148 = vst [vmem:[#allocation2 + $0xa0] sm:$0x3] %v13820_v20  ;;  %v2666_v13 = vmul.f32 %v14039_v15, %v2635_v31  ;;  %v2668_v18 = vmul.f32 %v14039_v15, %v2637_v4  ;;  %v14061_v45 = vmul.f32 %v14039_v15, %v2639_v21  ;;  %19480 = vst [vmem:[#allocation49_spill] sm:$0xff] %v14064_v16 }
 0x1ba   : > { %v1858_v35 = vsel %vm1855_vm4, %v1856_v40, %v1857_v23  ;;  %v19035_v11 = vrot.slane %v14055_v7, 1  ;;  %v1983_v9 = vmul.f32 %v13823_v22, %v13860_v38  ;;  %v1985_v3 = vmul.f32 %v13890_v50, %v13882_v47  ;;  %3146 = vst [vmem:[#allocation2 + $0x90] sm:$0xff] %v13820_v20 }
 0x1bb   : > { %v2704_v4 = vrot.slane %v2666_v13, 2  ;;  %v2705_v31 = vrot.slane %v2668_v18, 2  ;;  %v19036_v21 = vrot.slane %v14061_v45, 2  ;;  %v1906_v62 = vadd.f32 %v1858_v35, %v1756_v59 }
 0x1bc   : > { %v1863_v27 = vsel %vm1855_vm4, %v1857_v23, %v19035_v11  ;;  %v1987_v40 = vmul.f32 %v13895_v53, %v14023_v63  ;;  %v2014_v16 = vmul.f32 %v13989_v0, %v1983_v9  ;;  %v2016_v38 = vmul.f32 %v13989_v0, %v1985_v3 }
 0x1bd   : > { %v2706_v10 = vsel %vm2050_vm6, %v2704_v4, %v2705_v31  ;;  %v2710_v20 = vsel %vm2050_vm6, %v2705_v31, %v19036_v21  ;;  %v2119_v59 = vmul.f32 %v13845_v28, %v13882_v47  ;;  %v14089_v13 = vrot.slane %v13873_v44, %v13863_v42 }
 0x1be   : > { %v14091_v23 = vadd.f32 %v2706_v10, %v2615_v57  ;;  %v14093_v18 = vadd.f32 %v2710_v20, %v2617_v1  ;;  %v14096_v35 = vmul.f32 %v13989_v0, %v1987_v40  ;;  %v1908_v9 = vadd.f32 %v1863_v27, %v1758_v8  ;;  %v14104_v57 = vld [vmem:[#allocation2 + $0x30] sm:$0xff] }
 0x1bf   : > { %19481 = vst [vmem:[#allocation50_spill] sm:$0xff] %v14089_v13  ;;  %v2051_v3 = vrot.slane %v2014_v16, 2  ;;  %v2052_v4 = vrot.slane %v2016_v38, 2  ;;  %v2121_v31 = vmul.f32 %v14023_v63, %v13903_v51  ;;  %v2148_v44 = vmul.f32 %v14027_v37, %v2119_v59 }
 0x1c0   : > { %v19038_v11 = vrot.slane %v14096_v35, 2  ;;  %v2209_v1 = vmul.f32 %v14031_v24, %v13884_v48  ;;  %v2211_v16 = vmul.f32 %v14031_v24, %v14023_v63  ;;  %v14114_v27 = vmul.f32 %v14031_v24, %v14104_v57 }
 0x1c1   : > { %v2053_v10 = vsel %vm2050_vm6, %v2051_v3, %v2052_v4  ;;  %v2150_v8 = vmul.f32 %v14027_v37, %v2121_v31  ;;  %v14118_v40 = vrot.slane %v13938_v33, %v13863_v42  ;;  %v14125_v59 = vrot.slane %v13943_v39, %v13863_v42 }
 0x1c2   : > { %v2058_v38 = vsel %vm2050_vm6, %v2052_v4, %v19038_v11  ;;  %v2101_v48 = vadd.f32 %v2053_v10, %v1906_v62  ;;  %v2245_v20 = vrot.slane %v2209_v1, 1  ;;  %v2246_v31 = vrot.slane %v2211_v16, 1  ;;  %v14134_v62 = vpop.permute.xlu1 %1940  ;;  %v2511_v10 = vld [vmem:[#allocation2 + $0x20] sm:$0xfe] }
 0x1c3   : > { %v2103_v3 = vadd.f32 %v2058_v38, %v1908_v9  ;;  %v19037_v47 = vrot.slane %v14114_v27, 1  ;;  %v2317_v33 = vmul.f32 %v13890_v50, %v14023_v63  ;;  %v2319_v4 = vmul.f32 %v14104_v57, %v13895_v53 }
 0x1c4   : > { %v2164_v21 = vadd.f32 %v2148_v44, %v2101_v48  ;;  %v2247_v39 = vsel %vm1855_vm4, %v2245_v20, %v2246_v31  ;;  %v2450_v44 = vmul.f32 %v14023_v63, %v13845_v28  ;;  %v1964_v49 = vrot.slane %v14134_v62, 6 }
 0x1c5   : > { %v2166_v1 = vadd.f32 %v2150_v8, %v2103_v3  ;;  %v2252_v9 = vsel %vm1855_vm4, %v2246_v31, %v19037_v47  ;;  %v2346_v16 = vmul.f32 %v14089_v13, %v2315_v19  ;;  %v2348_v38 = vmul.f32 %v14089_v13, %v2317_v33  ;;  %v2630_v31 = vld [vmem:[#allocation2 + $0x20] sm:$0xfc] }
 0x1c6   : > { %v14147_v48 = vrot.slane %v14011_v6, %v13863_v42  ;;  %v2295_v8 = vadd.f32 %v2247_v39, %v2164_v21  ;;  %v14150_v20 = vmul.f32 %v14089_v13, %v2319_v4  ;;  %v2452_v3 = vmul.f32 %v14104_v57, %v13903_v51  ;;  %v14154_v47 = vld [vmem:[#allocation2 + $0x40] sm:$0xff]  ;;  %v14175_v42 = vpop.permute.xlu1 %1700 }
 0x1c7   : > { %v2297_v11 = vadd.f32 %v2252_v9, %v2166_v1  ;;  %v2382_v62 = vrot.slane %v2346_v16, 2  ;;  %v2383_v28 = vrot.slane %v2348_v38, 2  ;;  %v2528_v19 = vmul.f32 %v14125_v59, %v2511_v10  ;;  %19482 = vst [vmem:[#allocation51_spill] sm:$0xff] %v14175_v42 }
 0x1c8   : > { %v19046_v33 = vrot.slane %v14150_v20, 2  ;;  %v2479_v6 = vmul.f32 %v14118_v40, %v2450_v44  ;;  %v2530_v21 = vmul.f32 %v14125_v59, %v14104_v57  ;;  %v14163_v4 = vmul.f32 %v14125_v59, %v14154_v47 }
 0x1c9   : > { %v2384_v39 = vsel %vm2050_vm6, %v2382_v62, %v2383_v28  ;;  %v2481_v51 = vmul.f32 %v14118_v40, %v2452_v3  ;;  %v2564_v1 = vrot.slane %v2528_v19, 1  ;;  %v2634_v9 = vmul.f32 %v2630_v31, %v13823_v22 }
 0x1ca   : > { %v2389_v10 = vsel %vm2050_vm6, %v2383_v28, %v19046_v33  ;;  %v2432_v16 = vadd.f32 %v2384_v39, %v2295_v8  ;;  %v2565_v44 = vrot.slane %v2530_v21, 1  ;;  %v14173_v38 = vmul.f32 %v13897_v55, %v13798_v12 }
 0x1cb   : > { %v2434_v61 = vadd.f32 %v2389_v10, %v2297_v11  ;;  %v19052_v62 = vrot.slane %v14163_v4, 1  ;;  %v2636_v3 = vmul.f32 %v14104_v57, %v13890_v50  ;;  %v2638_v31 = vmul.f32 %v14154_v47, %v13895_v53 }
 0x1cc   : > { %v2495_v19 = vadd.f32 %v2479_v6, %v2432_v16  ;;  %v2566_v28 = vsel %vm1855_vm4, %v2564_v1, %v2565_v44  ;;  %v2665_v8 = vmul.f32 %v14147_v48, %v2634_v9  ;;  %v1733_v21 = vmul.f32 %v13800_v52, %v14175_v42 }
 0x1cd   : > { %v19483_v39 = vrot.slane %v13813_v41, 6  ;;  %v2497_v10 = vadd.f32 %v2481_v51, %v2434_v61  ;;  %v2571_v33 = vsel %vm1855_vm4, %v2565_v44, %v19052_v62  ;;  %v2667_v50 = vmul.f32 %v14147_v48, %v2636_v3  ;;  %v14203_v61 = vpop.permute.xlu0 %1944 }
 0x1ce   : > { %v2614_v6 = vadd.f32 %v2566_v28, %v2495_v19  ;;  %v14196_v1 = vmul.f32 %v14147_v48, %v2638_v31  ;;  %v2701_v9 = vrot.slane %v2665_v8, 2  ;;  %v1761_v41 = vmul.f32 %v13828_v25, %v1733_v21 }
 0x1cf   : > { %v14189_v11 = vsel %vm19228_vm5, %v19483_v39, %v1964_v49  ;;  %v2616_v16 = vadd.f32 %v2571_v33, %v2497_v10  ;;  %v2702_v53 = vrot.slane %v2667_v50, 2  ;;  %v1868_v39 = vrot.slane %v14173_v38, 1 }
 0x1d0   : > { %19484 = vst [vmem:[#allocation52_spill] sm:$0xff] %v14189_v11  ;;  %v19051_v52 = vrot.slane %v14196_v1, 2  ;;  %v1990_v51 = vmul.f32 %v13897_v55, %v14189_v11  ;;  %v19053_v3 = vrot.slane %v14203_v61, 6  ;;  %v19486_v31 = vrot.slane %v13811_v17, 1 }
 0x1d1   : > { %v2703_v44 = vsel %vm2050_vm6, %v2701_v9, %v2702_v53  ;;  %v2124_v21 = vmul.f32 %v13897_v55, %v14175_v42 }
 0x1d2   : > { %v2708_v33 = vsel %vm2050_vm6, %v2702_v53, %v19051_v52  ;;  %v14210_v50 = vadd.f32 %v2703_v44, %v2614_v6  ;;  %v1869_v19 = vsel %vm1855_vm4, %v19486_v31, %v1868_v39  ;;  %v2021_v28 = vmul.f32 %v13832_v26, %v1990_v51 }
 0x1d3   : > { %v14215_v38 = vadd.f32 %v2708_v33, %v2616_v16  ;;  %v1911_v8 = vadd.f32 %v1869_v19, %v1761_v41  ;;  %v2216_v53 = vmul.f32 %v13855_v36, %v13976_v29  ;;  %v14227_v17 = vsel %vm19228_vm5, %v1964_v49, %v19053_v3 }
 0x1d4   : > { %19485 = vst [vmem:[#allocation53_spill] sm:$0xff] %v14210_v50  ;;  %v2063_v9 = vrot.slane %v2021_v28, 2  ;;  %19488 = vst [vmem:[#allocation55_spill] sm:$0xff] %v14227_v17  ;;  %v2153_v6 = vmul.f32 %v13868_v34, %v2124_v21  ;;  %v19489_v16 = vrot.slane %v13923_v5, 2  ;;  %v2322_v44 = vmul.f32 %v13976_v29, %v14189_v11 }
 0x1d5   : > { %19487 = vst [vmem:[#allocation54_spill] sm:$0xff] %v14215_v38  ;;  %v2257_v51 = vrot.slane %v2216_v53, 1  ;;  %v14237_v31 = vmul.f32 %v13976_v29, %v13798_v12  ;;  %v1992_v19 = vmul.f32 %v13976_v29, %v14227_v17  ;;  %v19490_v49 = vrot.slane %v13910_v58, 1 }
 0x1d6   : > { %v2064_v41 = vsel %vm2050_vm6, %v19489_v16, %v2063_v9  ;;  %v2455_v5 = vmul.f32 %v13976_v29, %v14175_v42  ;;  %v2353_v53 = vmul.f32 %v13919_v2, %v2322_v44  ;;  %v14247_v16 = vpop.permute.xlu0 %1705  ;;  %v19492_v44 = vrot.slane %v13954_v46, 2 }
 0x1d7   : > { %v2106_v33 = vadd.f32 %v2064_v41, %v1911_v8  ;;  %v2258_v28 = vsel %vm1855_vm4, %v19490_v49, %v2257_v51  ;;  %19491 = vst [vmem:[#allocation56_spill] sm:$0xff] %v14247_v16  ;;  %v14249_v8 = vld [vmem:[#allocation2 + $0x58] sm:$0xff]  ;;  %v1735_v41 = vmul.f32 %v13897_v55, %v14247_v16  ;;  %v19058_v49 = vrot.slane %v14237_v31, 1 }
 0x1d8   : > { %v2394_v52 = vrot.slane %v2353_v53, 2  ;;  %v14255_v58 = vmul.f32 %v13994_v30, %v14249_v8  ;;  %v14259_v62 = vmul.f32 %v13832_v26, %v1992_v19  ;;  %v19493_v46 = vrot.slane %v14006_v60, 1 }
 0x1d9   : > { %v2169_v21 = vadd.f32 %v2153_v6, %v2106_v33  ;;  %v2484_v6 = vmul.f32 %v13981_v14, %v2455_v5  ;;  %v1873_v53 = vsel %vm1855_vm4, %v1868_v39, %v19058_v49  ;;  %v2324_v60 = vmul.f32 %v14249_v8, %v14227_v17 }
 0x1da   : > { %v2395_v33 = vsel %vm2050_vm6, %v19492_v44, %v2394_v52  ;;  %v19061_v55 = vrot.slane %v14255_v58, 1  ;;  %v19057_v19 = vrot.slane %v14259_v62, 2 }
 0x1db   : > { %v2300_v10 = vadd.f32 %v2258_v28, %v2169_v21  ;;  %v1763_v28 = vmul.f32 %v13828_v25, %v1735_v41  ;;  %v2641_v21 = vmul.f32 %v14249_v8, %v14189_v11 }
 0x1dc   : > { %v2068_v39 = vsel %vm2050_vm6, %v2063_v9, %v19057_v19  ;;  %v1989_v19 = vmul.f32 %v14104_v57, %v14189_v11 }
 0x1dd   : > { %v2437_v3 = vadd.f32 %v2395_v33, %v2300_v10  ;;  %v2577_v10 = vsel %vm1855_vm4, %v19493_v46, %v19061_v55  ;;  %v14279_v5 = vmul.f32 %v14039_v15, %v2641_v21  ;;  %v1913_v44 = vadd.f32 %v1873_v53, %v1763_v28 }
 0x1de   : > { %v2126_v33 = vmul.f32 %v13976_v29, %v14247_v16  ;;  %v14303_v46 = vmul.f32 %v13919_v2, %v2324_v60  ;;  %v1991_v60 = vmul.f32 %v14154_v47, %v14227_v17 }
 0x1df   : > { %v2500_v22 = vadd.f32 %v2484_v6, %v2437_v3  ;;  %v19060_v50 = vrot.slane %v14279_v5, 2  ;;  %v14289_v3 = vmul.f32 %v13855_v36, %v14249_v8  ;;  %v2108_v21 = vadd.f32 %v2068_v39, %v1913_v44 }
 0x1e0   : > { %v2155_v53 = vmul.f32 %v13868_v34, %v2126_v33  ;;  %v1732_v44 = vmul.f32 %v14023_v63, %v14175_v42  ;;  %v14317_v33 = vmul.f32 %v14154_v47, %v13947_v43 }
 0x1e1   : > { %v2619_v41 = vadd.f32 %v2577_v10, %v2500_v22  ;;  %v19494_v22 = vrot.slane %v14061_v45, 2  ;;  %v19059_v9 = vrot.slane %v14289_v3, 1  ;;  %v1825_v10 = vmul.f32 %v14104_v57, %v13947_v43 }
 0x1e2   : > { %v2171_v49 = vadd.f32 %v2155_v53, %v2108_v21  ;;  %19496 = vst [vmem:[#allocation58_spill] sm:$0xff] %v14317_v33 }
 0x1e3   : > { %v2714_v6 = vsel %vm2050_vm6, %v19494_v22, %v19060_v50  ;;  %v2262_v45 = vsel %vm1855_vm4, %v2257_v51, %v19059_v9  ;;  %v1866_v39 = vrot.slane %v1825_v10, 1  ;;  %v2020_v22 = vmul.f32 %v13989_v0, %v1989_v19 }
 0x1e4   : > { %v14298_v28 = vadd.f32 %v2714_v6, %v2619_v41  ;;  %v19062_v41 = vrot.slane %v14303_v46, 2  ;;  %v14322_v6 = vld [vmem:[#allocation2 + $0x68] sm:$0xff]  ;;  %v2302_v21 = vadd.f32 %v2262_v45, %v2171_v49  ;;  %v2457_v51 = vmul.f32 %v14249_v8, %v14247_v16 }
 0x1e5   : > { %v14331_v53 = vmul.f32 %v13994_v30, %v14322_v6  ;;  %v1734_v10 = vmul.f32 %v14104_v57, %v14247_v16  ;;  %v1760_v9 = vmul.f32 %v13985_v32, %v1732_v44  ;;  %v19498_v49 = vrot.slane %v14055_v7, 1  ;;  %v14354_v30 = vld [vmem:[#allocation2 + $0x50] sm:$0xff] }
 0x1e6   : > { %19495 = vst [vmem:[#allocation57_spill] sm:$0xff] %v14298_v28  ;;  %v2399_v63 = vsel %vm2050_vm6, %v2394_v52, %v19062_v41  ;;  %v14341_v50 = vmul.f32 %v13989_v0, %v1991_v60  ;;  %v2061_v55 = vrot.slane %v2020_v22, 2  ;;  %v1949_v52 = vpop.permute.xlu1 %1948  ;;  %v14343_v41 = vpop.permute.xlu0 %1952  ;;  %v2486_v54 = vmul.f32 %v13981_v14, %v2457_v51 }
 0x1e7   : > { %19497 = vst [vmem:[#allocation59_spill] sm:$0xff] %v14331_v53  ;;  %v1867_v45 = vsel %vm1855_vm4, %v19498_v49, %v1866_v39  ;;  %19500 = vst [vmem:[#allocation61_spill] sm:$0xff] %v14343_v41  ;;  %v2439_v38 = vadd.f32 %v2399_v63, %v2302_v21  ;;  %v1968_v56 = vrot.slane %v1949_v52, 6  ;;  %v19070_v28 = vrot.slane %v14343_v41, 6 }
 0x1e8   : > { %19499 = vst [vmem:[#allocation60_spill] sm:$0xff] %v14341_v50  ;;  %v19072_v44 = vrot.slane %v14331_v53, 1  ;;  %v1762_v19 = vmul.f32 %v13985_v32, %v1734_v10  ;;  %v19501_v7 = vrot.slane %v14317_v33, 1  ;;  %v1910_v60 = vadd.f32 %v1867_v45, %v1760_v9 }
 0x1e9   : > { %v2123_v22 = vmul.f32 %v14104_v57, %v14175_v42  ;;  %v2215_v21 = vmul.f32 %v14031_v24, %v14154_v47  ;;  %v19502_v51 = vrot.slane %v14096_v35, 2  ;;  %v14364_v10 = vmul.f32 %v14031_v24, %v14354_v30 }
 0x1ea   : > { %v1871_v49 = vsel %vm1855_vm4, %v1866_v39, %v19501_v7  ;;  %v2321_v9 = vmul.f32 %v14154_v47, %v14189_v11  ;;  %v2502_v39 = vadd.f32 %v2486_v54, %v2439_v38  ;;  %v2643_v57 = vmul.f32 %v14322_v6, %v14227_v17 }
 0x1eb   : > { %v2062_v63 = vsel %vm2050_vm6, %v19502_v51, %v2061_v55  ;;  %19503 = vst [vmem:[#allocation62_spill] sm:$0xff] %v14364_v10  ;;  %v19504_v45 = vrot.slane %v14203_v61, 6  ;;  %v14378_v35 = vsel %vm19228_vm5, %v1968_v56, %v19070_v28  ;;  %v19507_v51 = vrot.slane %v14255_v58, 1 }
 0x1ec   : > { %19506 = vst [vmem:[#allocation64_spill] sm:$0xff] %v14378_v35  ;;  %v2125_v54 = vmul.f32 %v14154_v47, %v14247_v16  ;;  %v1912_v38 = vadd.f32 %v1871_v49, %v1762_v19  ;;  %v2105_v24 = vadd.f32 %v2062_v63, %v1910_v60  ;;  %v2152_v61 = vmul.f32 %v14027_v37, %v2123_v22 }
 0x1ed   : > { %v14373_v7 = vsel %vm19228_vm5, %v19504_v45, %v1968_v56  ;;  %v2581_v52 = vsel %vm1855_vm4, %v19507_v51, %v19072_v44  ;;  %v2323_v45 = vmul.f32 %v14354_v30, %v14227_v17  ;;  %v19508_v56 = vrot.slane %v14341_v50, 2  ;;  %v14395_v44 = vpop.permute.xlu1 %1710 }
 0x1ee   : > { %19505 = vst [vmem:[#allocation63_spill] sm:$0xff] %v14373_v7  ;;  %v2255_v53 = vrot.slane %v2215_v21, 1  ;;  %v2352_v51 = vmul.f32 %v14089_v13, %v2321_v9  ;;  %19509 = vst [vmem:[#allocation65_spill] sm:$0xff] %v14395_v44  ;;  %v14397_v19 = vadd.f32 %v2581_v52, %v2502_v39  ;;  %v14400_v49 = vmul.f32 %v14039_v15, %v2643_v57 }
 0x1ef   : > { %v2066_v28 = vsel %vm2050_vm6, %v2061_v55, %v19508_v56  ;;  %v1830_v60 = vmul.f32 %v14249_v8, %v13798_v12  ;;  %v2154_v22 = vmul.f32 %v14027_v37, %v2125_v54  ;;  %v14407_v55 = vmul.f32 %v14322_v6, %v13798_v12  ;;  %v14418_v56 = vpop.permute.xlu0 %1715 }
 0x1f0   : > { %v1994_v21 = vmul.f32 %v14249_v8, %v14373_v7  ;;  %v1996_v63 = vmul.f32 %v14322_v6, %v14378_v35  ;;  %v2107_v52 = vadd.f32 %v2066_v28, %v1912_v38  ;;  %v2168_v9 = vadd.f32 %v2152_v61, %v2105_v24  ;;  %19510 = vst [vmem:[#allocation66_spill] sm:$0xff] %v14418_v56 }
 0x1f1   : > { %v14414_v39 = vmul.f32 %v14089_v13, %v2323_v45  ;;  %v2454_v57 = vmul.f32 %v14154_v47, %v14175_v42  ;;  %v19511_v58 = vrot.slane %v14114_v27, 1  ;;  %v19512_v37 = vrot.slane %v14364_v10, 1  ;;  %v12461_v13 = vld [vmem:[#allocation10] ss:$8 sps:$4 sm:$0xff]  }
 0x1f2   : > { %v2392_v15 = vrot.slane %v2352_v51, 2  ;;  %v2456_v24 = vmul.f32 %v14354_v30, %v14247_v16  ;;  %v1737_v61 = vmul.f32 %v13976_v29, %v14395_v44  ;;  %v1739_v45 = vmul.f32 %v14249_v8, %v14418_v56  ;;  %v12466_v51 = vld [vmem:[#allocation10 + $0x14] ss:$8 sps:$4 sm:$0xff]  }
 0x1f3   : > { %v2256_v12 = vsel %vm1855_vm4, %v19511_v58, %v2255_v53  ;;  %v2260_v50 = vsel %vm1855_vm4, %v2255_v53, %v19512_v37  ;;  %v1876_v42 = vrot.slane %v1830_v60, 1  ;;  %v19091_v58 = vrot.slane %v14407_v55, 1  ;;  %v1957_v53 = vpop.permute.xlu1 %1956 }
 0x1f4   : > { %v2025_v10 = vmul.f32 %v13832_v26, %v1994_v21  ;;  %v14435_v37 = vmul.f32 %v13832_v26, %v1996_v63  ;;  %v2299_v16 = vadd.f32 %v2256_v12, %v2168_v9  ;;  %v14442_v60 = vmul.f32 %v14125_v59, %v14354_v30 }
 0x1f5   : > { %v19515_v21 = vrot.slane %v14150_v20, 2  ;;  %v2483_v9 = vmul.f32 %v14118_v40, %v2454_v57  ;;  %v12464_v20 = vld [vmem:[#allocation10 + $0x10] ss:$8 sps:$4 sm:$0xff]  }
 0x1f6   : > { %19513 = vst [vmem:[#allocation67_spill] sm:$0xff] %v14435_v37  ;;  %v19090_v57 = vrot.slane %v14435_v37, 2 }
 0x1f7   : > { %v2393_v63 = vsel %vm2050_vm6, %v19515_v21, %v2392_v15  ;;  %v19517_v21 = vrot.slane %v14237_v31, 1  ;;  %v2574_v31 = vrot.slane %v14442_v60, 1  ;;  %v12467_v60 = vld [vmem:[#allocation10 + $0x20] ss:$8 sps:$4 sm:$0xff]  }
 0x1f8   : > { %v992_v41 = vpop.f32.mrb[0].mxu0 }
 0x1f9   : > { %v994_v33 = vpop.f32.mrb[1].mxu0  ;;  %v1877_v29 = vsel %vm1855_vm4, %v19517_v21, %v1876_v42 }
 0x1fc   : > { %v998_v54 = vpop.f32.mrb[2].mxu0 }
 0x1fd   : > { %v1003_v28 = vpack.c.bf16 %v998_v54, %v992_v41  ;;  %v1000_v38 = vpop.f32.mrb[3].mxu0  ;;  %v2170_v41 = vadd.f32 %v2154_v22, %v2107_v52  ;;  %v14437_v54 = vld [vmem:[#allocation2 + $0x60] sm:$0xff]  ;;  %v2640_v22 = vmul.f32 %v14354_v30, %v14189_v11  ;;  %v2071_v52 = vrot.slane %v2025_v10, 2 }
 0x1fe   : > { %v1004_v27 = vpack.c.bf16 %v1000_v38, %v994_v33  ;;  %v14444_v33 = vrot.slane %v1957_v53, 6  ;;  %v2642_v12 = vmul.f32 %v14437_v54, %v14227_v17  ;;  %v1765_v38 = vmul.f32 %v13828_v25, %v1737_v61  ;;  %v12469_v61 = vld [vmem:[#allocation10 + $0x24] ss:$8 sps:$4 sm:$0xff]   ;;  %v12470_v11 = vld [vmem:[#allocation10 + $0x30] ss:$8 sps:$4 sm:$0xff]  }
 0x1ff   : > { %v19516_v53 = vpack.c.bf16 %v14093_v18, %v14091_v23  ;;  %v2436_v23 = vadd.f32 %v2393_v63, %v2299_v16  ;;  %v14472_v18 = vmul.f32 %v14125_v59, %v14437_v54  ;;  %v2128_v10 = vmul.f32 %v14249_v8, %v14395_v44  ;;  %v14483_v16 = vld [vmem:[#allocation2 + $0x78] sm:$0xff] }
 0x200   : > { %19514 = vst [vmem:[#allocation68_spill] sm:$0xff] %v14444_v33  ;;  %1421 = vmatprep.mubr.bf16.mxu1 %v1004_v27  ;;  %1464 = vmatprep.mubr.bf16.mxu0 %v1004_v27  ;;  %v1767_v27 = vmul.f32 %v13828_v25, %v1739_v45  ;;  %v2301_v45 = vadd.f32 %v2260_v50, %v2170_v41  ;;  %v19520_v63 = vrot.slane %v14259_v62, 2 }
 0x201   : > { %1422 = vmatmul.mubr.bf16.vlgmr.msra.gmra.mrb[0].mxu1 %v1003_v28  ;;  %1465 = vmatmul.mubr.bf16.vlgmr.msra.gmra.mrb[4].mxu0 %v1003_v28  ;;  %v1881_v28 = vsel %vm1855_vm4, %v1876_v42, %v19091_v58  ;;  %v14477_v42 = vmul.f32 %v14147_v48, %v2642_v12  ;;  %v1915_v50 = vadd.f32 %v1877_v29, %v1765_v38  ;;  %v12472_v38 = vld [vmem:[#allocation10 + $0x34] ss:$8 sps:$4 sm:$0xff]  }
 0x202   : > { %2968 = vmatpush1.bf16.msra.mxu1 %v12461_v13  ;;  %2999 = vmatprep.mubr.bf16.mxu1 %v19516_v53  ;;  %v19518_v13 = vrot.slane %v14414_v39, 2  ;;  %v2671_v53 = vmul.f32 %v14147_v48, %v2640_v22  ;;  %v2220_v41 = vmul.f32 %v13855_v36, %v14322_v6  ;;  %v2072_v22 = vsel %vm2050_vm6, %v19520_v63, %v2071_v52 }
 0x203   : > { %2969 = vmatprep.subr.bf16.mxu1 %v12466_v51  ;;  %19519 = vst [vmem:[#allocation69_spill] sm:$0xff] %v14477_v42  ;;  %v1917_v51 = vadd.f32 %v1881_v28, %v1767_v27  ;;  %v2076_v8 = vsel %vm2050_vm6, %v2071_v52, %v19090_v57  ;;  %v14495_v29 = vmul.f32 %v13855_v36, %v14483_v16  ;;  %v19521_v28 = vrot.slane %v14400_v49, 2 }
 0x204   : > { %v2397_v17 = vsel %vm2050_vm6, %v2392_v15, %v19518_v13  ;;  %v2130_v15 = vmul.f32 %v14322_v6, %v14418_v56  ;;  %v2326_v12 = vmul.f32 %v14322_v6, %v14373_v7  ;;  %v2328_v21 = vmul.f32 %v14483_v16, %v14378_v35 }
 0x205   : > { %v2438_v27 = vadd.f32 %v2397_v17, %v2301_v45  ;;  %v19522_v52 = vrot.slane %v14279_v5, 2  ;;  %v2499_v63 = vadd.f32 %v2483_v9, %v2436_v23  ;;  %v19523_v57 = vrot.slane %v14163_v4, 1  ;;  %v12475_v4 = vld [vmem:[#allocation10 + $0x44] ss:$8 sps:$4 sm:$0xff]  }
 0x206   : > { %2970 = vmatpush1.bf16.msra.mxu1 %v12464_v20  ;;  %v2485_v20 = vmul.f32 %v14118_v40, %v2456_v24  ;;  %v2711_v58 = vrot.slane %v2671_v53, 2  ;;  %v2110_v17 = vadd.f32 %v2072_v22, %v1915_v50  ;;  %v2112_v45 = vadd.f32 %v2076_v8, %v1917_v51 }
 0x207   : > { %2971 = vmatprep.subr.bf16.mxu1 %v12469_v61  ;;  %v2718_v13 = vsel %vm2050_vm6, %v19522_v52, %v19521_v28  ;;  %v2575_v61 = vsel %vm1855_vm4, %v19523_v57, %v2574_v31  ;;  %v2157_v24 = vmul.f32 %v13868_v34, %v2128_v10  ;;  %v2159_v62 = vmul.f32 %v13868_v34, %v2130_v15  ;;  %v12478_v28 = vld [vmem:[#allocation10 + $0x54] ss:$8 sps:$4 sm:$0xff]  }
 0x208   : > { %v19097_v37 = vrot.slane %v14477_v42, 2  ;;  %v2265_v36 = vrot.slane %v2220_v41, 1  ;;  %v19099_v5 = vrot.slane %v14495_v29, 1  ;;  %v2357_v9 = vmul.f32 %v13919_v2, %v2326_v12  ;;  %v19534_v42 = vld [vmem:[#allocation44_spill] sm:$0xff] }
 0x209   : > { %v14517_v57 = vadd.f32 %v2718_v13, %v14397_v19  ;;  %v2501_v23 = vadd.f32 %v2485_v20, %v2438_v27  ;;  %v19524_v53 = vrot.slane %v14472_v18, 1  ;;  %v14523_v50 = vmul.f32 %v13919_v2, %v2328_v21 }
 0x20a   : > { %2972 = vmatpush1.bf16.msra.mxu1 %v12467_v60  ;;  %v2618_v51 = vadd.f32 %v2575_v61, %v2499_v63  ;;  %v19526_v15 = vrot.slane %v14196_v1, 2  ;;  %v1829_v60 = vmul.f32 %v14354_v30, %v13947_v43  ;;  %v1993_v19 = vmul.f32 %v14354_v30, %v14373_v7 }
 0x20b   : > { %2973 = vmatprep.subr.bf16.mxu1 %v12472_v38  ;;  %v2579_v10 = vsel %vm1855_vm4, %v2574_v31, %v19524_v53  ;;  %19525 = vst [vmem:[#allocation70_spill] sm:$0xff] %v14523_v50  ;;  %v2173_v22 = vadd.f32 %v2157_v24, %v2110_v17  ;;  %v2175_v8 = vadd.f32 %v2159_v62, %v2112_v45  ;;  %v12473_v38 = vld [vmem:[#allocation10 + $0x40] ss:$8 sps:$4 sm:$0xff]   ;;  %v19527_v27 = vrot.slane %v14289_v3, 1  ;;  %v14557_v17 = vld [vmem:[#allocation2 + $0x88] sm:$0xff] }
 0x20c   : > { %v2712_v41 = vsel %vm2050_vm6, %v19526_v15, %v2711_v58  ;;  %v14534_v12 = vmul.f32 %v14437_v54, %v13947_v43  ;;  %v1995_v31 = vmul.f32 %v14437_v54, %v14378_v35  ;;  %v2716_v1 = vsel %vm2050_vm6, %v2711_v58, %v19097_v37 }
 0x20d   : > { %v2266_v20 = vsel %vm1855_vm4, %v19527_v27, %v2265_v36  ;;  %v2270_v62 = vsel %vm1855_vm4, %v2265_v36, %v19099_v5  ;;  %v2402_v21 = vrot.slane %v2357_v9, 2  ;;  %v2620_v52 = vadd.f32 %v2579_v10, %v2501_v23  ;;  %v19530_v10 = vld [vmem:[#allocation41_spill] sm:$0xff] }
 0x20e   : > { %2974 = vmatpush1.bf16.msra.mxu1 %v12470_v11  ;;  %v19098_v13 = vrot.slane %v14523_v50, 2  ;;  %v2459_v11 = vmul.f32 %v14322_v6, %v14395_v44  ;;  %v1736_v58 = vmul.f32 %v14154_v47, %v14395_v44  ;;  %v2461_v3 = vmul.f32 %v14483_v16, %v14418_v56  ;;  %v12476_v47 = vld [vmem:[#allocation10 + $0x50] ss:$8 sps:$4 sm:$0xff]  }
 0x20f   : > { %2975 = vmatprep.subr.bf16.mxu1 %v12475_v4  ;;  %v1738_v63 = vmul.f32 %v14354_v30, %v14418_v56  ;;  %v1874_v61 = vrot.slane %v1829_v60, 1  ;;  %v2024_v36 = vmul.f32 %v13989_v0, %v1993_v19  ;;  %v2304_v45 = vadd.f32 %v2266_v20, %v2173_v22  ;;  %v12481_v22 = vld [vmem:[#allocation10 + $0x64] ss:$8 sps:$4 sm:$0xff]  }
 0x210   : > { %v2306_v24 = vadd.f32 %v2270_v62, %v2175_v8  ;;  %v19101_v9 = vrot.slane %v14534_v12, 1  ;;  %v14561_v4 = vmul.f32 %v13989_v0, %v1995_v31  ;;  %v19529_v23 = vrot.slane %v14303_v46, 2  ;;  %v19532_v62 = vld [vmem:[#allocation58_spill] sm:$0xff] }
 0x211   : > { %v2539_v15 = vmul.f32 %v19530_v10, %v14483_v16  ;;  %v14570_v60 = vmul.f32 %v19530_v10, %v14557_v17  ;;  %v2645_v19 = vmul.f32 %v14483_v16, %v14373_v7  ;;  %v14574_v8 = vadd.f32 %v2712_v41, %v2618_v51 }
 0x212   : > { %19528 = vst [vmem:[#allocation71_spill] sm:$0xff] %v14561_v4  ;;  %2976 = vmatpush1.bf16.msra.mxu1 %v12473_v38  ;;  %v2403_v53 = vsel %vm2050_vm6, %v19529_v23, %v2402_v21  ;;  %v2407_v46 = vsel %vm2050_vm6, %v2402_v21, %v19098_v13  ;;  %v2647_v31 = vmul.f32 %v14557_v17, %v14378_v35  ;;  %v19533_v23 = vrot.slane %v19532_v62, 1 }
 0x213   : > { %2977 = vmatprep.subr.bf16.mxu1 %v12478_v28  ;;  %19531 = vst [vmem:[#allocation72_spill] sm:$0xff] %v14574_v8  ;;  %v1764_v38 = vmul.f32 %v13985_v32, %v1736_v58  ;;  %v2488_v27 = vmul.f32 %v13981_v14, %v2459_v11  ;;  %v1766_v20 = vmul.f32 %v13985_v32, %v1738_v63  ;;  %v2069_v37 = vrot.slane %v2024_v36, 2  ;;  %v12479_v58 = vld [vmem:[#allocation10 + $0x60] ss:$8 sps:$4 sm:$0xff]  }
 0x214   : > { %v1875_v28 = vsel %vm1855_vm4, %v19533_v23, %v1874_v61  ;;  %v2441_v51 = vadd.f32 %v2403_v53, %v2304_v45  ;;  %v2490_v41 = vmul.f32 %v13981_v14, %v2461_v3  ;;  %v1879_v21 = vsel %vm1855_vm4, %v1874_v61, %v19101_v9  ;;  %v12484_v23 = vld [vmem:[#allocation10 + $0x74] ss:$8 sps:$4 sm:$0xff]   ;;  %v19535_v53 = vld [vmem:[#allocation60_spill] sm:$0xff]  ;;  %v19538_v9 = vld [vmem:[#allocation59_spill] sm:$0xff] }
 0x215   : > { %v19103_v13 = vrot.slane %v14561_v4, 2  ;;  %v2443_v5 = vadd.f32 %v2407_v46, %v2306_v24  ;;  %v2584_v11 = vrot.slane %v2539_v15, 1  ;;  %v2676_v62 = vmul.f32 %v19534_v42, %v2645_v19  ;;  %v14604_v46 = vld [vmem:[#allocation2 + $0x70] sm:$0xff]  ;;  %v19541_v4 = vld [vmem:[#allocation42_spill] sm:$0xff] }
 0x216   : > { %2978 = vmatpush1.bf16.msra.mxu1 %v12476_v47  ;;  %v14595_v36 = vmul.f32 %v19534_v42, %v2647_v31  ;;  %v1914_v3 = vadd.f32 %v1875_v28, %v1764_v38  ;;  %v2127_v45 = vmul.f32 %v14354_v30, %v14395_v44  ;;  %v2129_v61 = vmul.f32 %v14437_v54, %v14418_v56  ;;  %v19537_v19 = vld [vmem:[#allocation43_spill] sm:$0xff] }
 0x217   : > { %2979 = vmatprep.subr.bf16.mxu1 %v12481_v22  ;;  %v1916_v47 = vadd.f32 %v1879_v21, %v1766_v20  ;;  %v19536_v24 = vrot.slane %v19535_v53, 2  ;;  %v2219_v22 = vmul.f32 %v19537_v19, %v14437_v54  ;;  %v2325_v31 = vmul.f32 %v14437_v54, %v14373_v7  ;;  %v12482_v21 = vld [vmem:[#allocation10 + $0x70] ss:$8 sps:$4 sm:$0xff]   ;;  %v12487_v42 = vld [vmem:[#allocation10 + $0x84] ss:$8 sps:$4 sm:$0xff]  }
 0x218   : > { %v2504_v38 = vadd.f32 %v2488_v27, %v2441_v51  ;;  %v2074_v30 = vsel %vm2050_vm6, %v2069_v37, %v19103_v13  ;;  %v14615_v20 = vmul.f32 %v19537_v19, %v14604_v46  ;;  %v2327_v28 = vmul.f32 %v14604_v46, %v14378_v35 }
 0x219   : > { %v2070_v15 = vsel %vm2050_vm6, %v19536_v24, %v2069_v37  ;;  %v14619_v53 = vadd.f32 %v2716_v1, %v2620_v52  ;;  %v2506_v24 = vadd.f32 %v2490_v41, %v2443_v5  ;;  %v19539_v63 = vrot.slane %v19538_v9, 1  ;;  %v19542_v52 = vld [vmem:[#allocation50_spill] sm:$0xff] }
 0x21a   : > { %2980 = vmatpush1.bf16.msra.mxu1 %v12479_v58  ;;  %v2721_v51 = vrot.slane %v2676_v62, 2  ;;  %v19540_v37 = vrot.slane %v14570_v60, 1  ;;  %v19108_v50 = vrot.slane %v14595_v36, 2  ;;  %v2109_v10 = vadd.f32 %v2070_v15, %v1914_v3 }
 0x21b   : > { %v2585_v27 = vsel %vm1855_vm4, %v19539_v63, %v2584_v11  ;;  %2981 = vmatprep.subr.bf16.mxu1 %v12484_v23  ;;  %v2156_v58 = vmul.f32 %v19541_v4, %v2127_v45  ;;  %v2111_v19 = vadd.f32 %v2074_v30, %v1916_v47  ;;  %v2158_v1 = vmul.f32 %v19541_v4, %v2129_v61  ;;  %v12485_v23 = vld [vmem:[#allocation10 + $0x80] ss:$8 sps:$4 sm:$0xff]   ;;  %v12490_v61 = vld [vmem:[#allocation10 + $0x94] ss:$8 sps:$4 sm:$0xff]  }
 0x21c   : > { %v2589_v13 = vsel %vm1855_vm4, %v2584_v11, %v19540_v37  ;;  %v2263_v5 = vrot.slane %v2219_v22, 1  ;;  %v2356_v9 = vmul.f32 %v19542_v52, %v2325_v31  ;;  %v2623_v41 = vadd.f32 %v2585_v27, %v2504_v38  ;;  %v19543_v11 = vld [vmem:[#allocation57_spill] sm:$0xff]  ;;  %v1805_v31 = vld [vmem:[#allocation2 + $0x88] sm:$0x1] }
 0x21d   : > { %v19109_v63 = vrot.slane %v14615_v20, 1  ;;  %v14633_v62 = vmul.f32 %v19542_v52, %v2327_v28  ;;  %v19544_v3 = vrot.slane %v14400_v49, 2  ;;  %v2625_v15 = vadd.f32 %v2589_v13, %v2506_v24  ;;  %v1925_v38 = vld [vmem:[#allocation2 + $0x88] sm:$0x3]  ;;  %v19545_v30 = vld [vmem:[#allocation61_spill] sm:$0xff] }
 0x21e   : > { %2982 = vmatpush1.bf16.msra.mxu1 %v12482_v21  ;;  %v2172_v22 = vadd.f32 %v2156_v58, %v2109_v10  ;;  %v19546_v28 = vrot.slane %v19545_v30, 6  ;;  %v2726_v49 = vsel %vm2050_vm6, %v2721_v51, %v19108_v50  ;;  %v2174_v27 = vadd.f32 %v2158_v1, %v2111_v19  ;;  %v12488_v30 = vld [vmem:[#allocation10 + $0x90] ss:$8 sps:$4 sm:$0xff]   ;;  %v19551_v19 = vld [vmem:[#allocation28_spill] sm:$0xff]  ;;  %v14678_v50 = vpop.permute.xlu0 %1720 }
 0x21f   : > { %v2722_v45 = vsel %vm2050_vm6, %v19544_v3, %v2721_v51  ;;  %2983 = vmatprep.subr.bf16.mxu1 %v12487_v42  ;;  %v19548_v42 = vld [vmem:[#allocation62_spill] sm:$0xff]  ;;  %v2400_v47 = vrot.slane %v2356_v9, 2  ;;  %v2268_v10 = vsel %vm1855_vm4, %v2263_v5, %v19109_v63  ;;  %v19116_v24 = vrot.slane %v14633_v62, 2  ;;  %v14662_v51 = vld [vmem:[#allocation2 + $0x80] sm:$0xff]  ;;  %19553 = vst [vmem:[#allocation42_spill] sm:$0xff] %v14678_v50 }
 0x220   : > { %v14646_v21 = vsel %vm19228_vm5, %v19546_v28, %v14444_v33  ;;  %v19549_v3 = vrot.slane %v19548_v42, 1  ;;  %v14654_v13 = vadd.f32 %v2722_v45, %v2623_v41  ;;  %v2538_v58 = vmul.f32 %v14125_v59, %v14604_v46 }
 0x221   : > { %19547 = vst [vmem:[#allocation58_spill] sm:$0xff] %v14646_v21  ;;  %v1834_v1 = vmul.f32 %v14483_v16, %v19551_v19  ;;  %v1836_v9 = vmul.f32 %v19551_v19, %v1805_v31  ;;  %v1998_v41 = vmul.f32 %v14483_v16, %v14646_v21  ;;  %v2000_v45 = vmul.f32 %v14444_v33, %v1925_v38  ;;  %v14680_v31 = vpop.permute.xlu1 %1725 }
 0x222   : > { %v2264_v37 = vsel %vm1855_vm4, %v19549_v3, %v2263_v5  ;;  %19550 = vst [vmem:[#allocation60_spill] sm:$0xff] %v14654_v13  ;;  %2984 = vmatpush1.bf16.msra.mxu1 %v12485_v23  ;;  %v12493_v5 = vld [vmem:[#allocation10 + $0xa4] ss:$8 sps:$4 sm:$0xff]   ;;  %v14670_v28 = vadd.f32 %v2726_v49, %v2625_v15  ;;  %v2458_v23 = vmul.f32 %v14437_v54, %v14395_v44  ;;  %19554 = vst [vmem:[#allocation50_spill] sm:$0xff] %v14680_v31 }
 0x223   : > { %2985 = vmatprep.subr.bf16.mxu1 %v12490_v61  ;;  %v2303_v42 = vadd.f32 %v2264_v37, %v2172_v22  ;;  %v14676_v3 = vmul.f32 %v14125_v59, %v14662_v51  ;;  %v2305_v19 = vadd.f32 %v2268_v10, %v2174_v27  ;;  %v19555_v63 = vrot.slane %v14414_v39, 2  ;;  %v12491_v39 = vld [vmem:[#allocation10 + $0xa0] ss:$8 sps:$4 sm:$0xff]  }
 0x224   : > { %v2460_v15 = vmul.f32 %v14604_v46, %v14418_v56  ;;  %v2644_v37 = vmul.f32 %v14604_v46, %v14373_v7  ;;  %v2405_v22 = vsel %vm2050_vm6, %v2400_v47, %v19116_v24  ;;  %v2582_v38 = vrot.slane %v2538_v58, 1  ;;  %v12496_v7 = vld [vmem:[#allocation10 + $0xb4] ss:$8 sps:$4 sm:$0xff]  }
 0x225   : > { %19552 = vst [vmem:[#allocation59_spill] sm:$0xff] %v14676_v3  ;;  %v2401_v61 = vsel %vm2050_vm6, %v19555_v63, %v2400_v47  ;;  %v1741_v49 = vmul.f32 %v14322_v6, %v14678_v50  ;;  %v1743_v27 = vmul.f32 %v14483_v16, %v14680_v31  ;;  %v1884_v63 = vrot.slane %v1834_v1, 1  ;;  %v12499_v47 = vld [vmem:[#allocation10 + $0xc4] ss:$8 sps:$4 sm:$0xff]  }
 0x226   : > { %2986 = vmatpush1.bf16.msra.mxu1 %v12488_v30  ;;  %v1888_v10 = vrot.slane %v1836_v9, 1  ;;  %v2029_v56 = vmul.f32 %v13832_v26, %v1998_v41  ;;  %v2031_v44 = vmul.f32 %v13832_v26, %v2000_v45  ;;  %v2440_v58 = vadd.f32 %v2401_v61, %v2303_v42  ;;  %v12494_v61 = vld [vmem:[#allocation10 + $0xb0] ss:$8 sps:$4 sm:$0xff]  }
 0x227   : > { %2987 = vmatprep.subr.bf16.mxu1 %v12493_v5  ;;  %v2487_v24 = vmul.f32 %v14118_v40, %v2458_v23  ;;  %v19118_v6 = vrot.slane %v14676_v3, 1  ;;  %v14702_v8 = vadd.f32 %v2405_v22, %v2305_v19  ;;  %v14705_v30 = vmul.f32 %v14118_v40, %v2460_v15  ;;  %v1804_v23 = vld [vmem:[#allocation2 + $0x80] sm:$0x1] }
 0x228   : > { %v2646_v1 = vmul.f32 %v14662_v51, %v14378_v35  ;;  %v14710_v26 = vmul.f32 %v14147_v48, %v2644_v37  ;;  %v19556_v9 = vrot.slane %v14472_v18, 1  ;;  %v1769_v45 = vmul.f32 %v13828_v25, %v1741_v49  ;;  %v1924_v19 = vld [vmem:[#allocation2 + $0x80] sm:$0x3] }
 0x229   : > { %v1771_v5 = vmul.f32 %v13828_v25, %v1743_v27  ;;  %v2132_v42 = vmul.f32 %v14483_v16, %v14678_v50  ;;  %v19557_v15 = vrot.slane %v14407_v55, 1  ;;  %v1889_v18 = vsel %vm1855_vm4, %v1884_v63, %v1888_v10  ;;  %v19558_v55 = vld [vmem:[#allocation31_spill] sm:$0xff]  ;;  %v19559_v10 = vld [vmem:[#allocation36_spill] sm:$0xff] }
 0x22a   : > { %v14715_v41 = vsel %vm1855_vm4, %v19556_v9, %v2582_v38  ;;  %2988 = vmatpush1.bf16.msra.mxu1 %v12491_v39  ;;  %v2079_v22 = vrot.slane %v2029_v56, 2  ;;  %v2083_v9 = vrot.slane %v2031_v44, 2  ;;  %v14725_v49 = vadd.f32 %v2487_v24, %v2440_v58 }
 0x22b   : > { %v1885_v37 = vsel %vm1855_vm4, %v19557_v15, %v1884_v63  ;;  %2989 = vmatprep.subr.bf16.mxu1 %v12496_v7  ;;  %v14730_v25 = vsel %vm1855_vm4, %v2582_v38, %v19118_v6  ;;  %v2134_v16 = vmul.f32 %v14557_v17, %v14680_v31  ;;  %v2224_v27 = vmul.f32 %v19558_v55, %v14557_v17  ;;  %v12497_v15 = vld [vmem:[#allocation10 + $0xc0] ss:$8 sps:$4 sm:$0xff]  }
 0x22c   : > { %v1833_v39 = vmul.f32 %v14604_v46, %v13947_v43  ;;  %v1835_v44 = vmul.f32 %v13947_v43, %v1804_v23  ;;  %v1997_v7 = vmul.f32 %v14604_v46, %v14646_v21  ;;  %v1999_v56 = vmul.f32 %v14444_v33, %v1924_v19  ;;  %v19560_v6 = vld [vmem:[#allocation67_spill] sm:$0xff]  ;;  %v19562_v19 = vld [vmem:[#allocation37_spill] sm:$0xff] }
 0x22d   : > { %v1919_v24 = vadd.f32 %v1885_v37, %v1769_v45  ;;  %v1921_v63 = vadd.f32 %v1889_v18, %v1771_v5  ;;  %v2161_v38 = vmul.f32 %v13868_v34, %v2132_v42  ;;  %v2226_v58 = vmul.f32 %v19558_v55, %v19559_v10  ;;  %v12502_v5 = vld [vmem:[#allocation10 + $0xd4] ss:$8 sps:$4 sm:$0xff]  }
 0x22e   : > { %2990 = vmatpush1.bf16.msra.mxu1 %v12494_v61  ;;  %v19561_v35 = vrot.slane %v19560_v6, 2  ;;  %v2084_v43 = vsel %vm2050_vm6, %v2079_v22, %v2083_v9  ;;  %v2330_v23 = vmul.f32 %v14557_v17, %v14646_v21  ;;  %v2332_v45 = vmul.f32 %v19562_v19, %v14444_v33 }
 0x22f   : > { %2991 = vmatprep.subr.bf16.mxu1 %v12499_v47  ;;  %v2163_v42 = vmul.f32 %v13868_v34, %v2134_v16  ;;  %v2273_v37 = vrot.slane %v2224_v27, 1  ;;  %v1740_v61 = vmul.f32 %v14437_v54, %v14678_v50  ;;  %v1742_v6 = vmul.f32 %v14604_v46, %v14680_v31  ;;  %v12500_v34 = vld [vmem:[#allocation10 + $0xd0] ss:$8 sps:$4 sm:$0xff]  }
 0x230   : > { %v2080_v3 = vsel %vm2050_vm6, %v19561_v35, %v2079_v22  ;;  %v1882_v35 = vrot.slane %v1833_v39, 1  ;;  %v1886_v18 = vrot.slane %v1835_v44, 1  ;;  %v2028_v22 = vmul.f32 %v13989_v0, %v1997_v7  ;;  %v12505_v44 = vld [vmem:[#allocation10 + $0xe4] ss:$8 sps:$4 sm:$0xff]   ;;  %v19564_v7 = vld [vmem:[#allocation38_spill] sm:$0xff] }
 0x231   : > { %v2030_v9 = vmul.f32 %v13989_v0, %v1999_v56  ;;  %v2114_v55 = vadd.f32 %v2080_v3, %v1919_v24  ;;  %v2116_v10 = vadd.f32 %v2084_v43, %v1921_v63  ;;  %v2277_v19 = vrot.slane %v2226_v58, 1 }
 0x232   : > { %v2463_v47 = vmul.f32 %v14557_v17, %v14678_v50  ;;  %2992 = vmatpush1.bf16.msra.mxu1 %v12497_v15  ;;  %v14763_v16 = vmul.f32 %v14147_v48, %v2646_v1  ;;  %v2361_v27 = vmul.f32 %v13919_v2, %v2330_v23  ;;  %v2363_v39 = vmul.f32 %v13919_v2, %v2332_v45 }
 0x233   : > { %2993 = vmatprep.subr.bf16.mxu1 %v12502_v5  ;;  %v19563_v0 = vrot.slane %v14495_v29, 1  ;;  %v2465_v17 = vmul.f32 %v19564_v7, %v14680_v31  ;;  %v1768_v56 = vmul.f32 %v13985_v32, %v1740_v61  ;;  %v1770_v1 = vmul.f32 %v13985_v32, %v1742_v6  ;;  %v12503_v5 = vld [vmem:[#allocation10 + $0xe0] ss:$8 sps:$4 sm:$0xff]   ;;  %v12508_v6 = vld [vmem:[#allocation10 + $0xf4] ss:$8 sps:$4 sm:$0xff]  }
 0x234   : > { %v19565_v24 = vrot.slane %v14534_v12, 1  ;;  %v1887_v58 = vsel %vm1855_vm4, %v1882_v35, %v1886_v18  ;;  %v2077_v2 = vrot.slane %v2028_v22, 2  ;;  %v2081_v15 = vrot.slane %v2030_v9, 2  ;;  %v19567_v18 = vld [vmem:[#allocation45_spill] sm:$0xff]  ;;  %v19568_v9 = vld [vmem:[#allocation71_spill] sm:$0xff] }
 0x235   : > { %v2274_v3 = vsel %vm1855_vm4, %v19563_v0, %v2273_v37  ;;  %v2177_v43 = vadd.f32 %v2161_v38, %v2114_v55  ;;  %v2179_v23 = vadd.f32 %v2163_v42, %v2116_v10  ;;  %v2278_v29 = vsel %vm1855_vm4, %v2273_v37, %v2277_v19  ;;  %v19566_v42 = vld [vmem:[#allocation43_spill] sm:$0xff] }
 0x236   : > { %v1883_v63 = vsel %vm1855_vm4, %v19565_v24, %v1882_v35  ;;  %v14781_v45 = vmul.f32 %v13981_v14, %v2463_v47  ;;  %2994 = vmatpush1.bf16.msra.mxu1 %v12500_v34  ;;  %v2410_v61 = vrot.slane %v2361_v27, 2  ;;  %v2414_v0 = vrot.slane %v2363_v39, 2  ;;  %v19570_v47 = vld [vmem:[#allocation46_spill] sm:$0xff]  ;;  %v19571_v27 = vld [vmem:[#allocation41_spill] sm:$0xff]  ;;  %v19573_v24 = vld [vmem:[#allocation40_spill] sm:$0xff] }
 0x237   : > { %v2131_v32 = vmul.f32 %v14604_v46, %v14678_v50  ;;  %v2133_v12 = vmul.f32 %v14662_v51, %v14680_v31  ;;  %2995 = vmatprep.subr.bf16.mxu1 %v12505_v44  ;;  %v1918_v35 = vadd.f32 %v1883_v63, %v1768_v56  ;;  %v1920_v38 = vadd.f32 %v1887_v58, %v1770_v1  ;;  %v19572_v44 = vld [vmem:[#allocation39_spill] sm:$0xff]  ;;  %v12506_v58 = vld [vmem:[#allocation10 + $0xf0] ss:$8 sps:$4 sm:$0xff]  }
 0x238   : > { %v2223_v37 = vmul.f32 %v19566_v42, %v14662_v51  ;;  %v2225_v22 = vmul.f32 %v19566_v42, %v19567_v18  ;;  %v19569_v55 = vrot.slane %v19568_v9, 2  ;;  %v2082_v19 = vsel %vm2050_vm6, %v2077_v2, %v2081_v15  ;;  %v19574_v42 = vld [vmem:[#allocation70_spill] sm:$0xff] }
 0x239   : > { %v2329_v46 = vmul.f32 %v14662_v51, %v14646_v21  ;;  %v2331_v34 = vmul.f32 %v19570_v47, %v14444_v33  ;;  %v2543_v39 = vmul.f32 %v19571_v27, %v19564_v7  ;;  %v2545_v56 = vmul.f32 %v19571_v27, %v19572_v44 }
 0x23a   : > { %v2078_v10 = vsel %vm2050_vm6, %v19569_v55, %v2077_v2  ;;  %v2649_v1 = vmul.f32 %v19564_v7, %v14646_v21  ;;  %v2651_v63 = vmul.f32 %v19573_v24, %v14444_v33  ;;  %2996 = vmatpush1.bf16.msra.mxu1 %v12503_v5  ;;  %v2308_v2 = vadd.f32 %v2274_v3, %v2177_v43  ;;  %v14815_v43 = vpop.permute.xlu1 %5116  ;;  %v19577_v24 = vld [vmem:[#allocation44_spill] sm:$0xff] }
 0x23b   : > { %v2310_v15 = vadd.f32 %v2278_v29, %v2179_v23  ;;  %v19575_v18 = vrot.slane %v19574_v42, 2  ;;  %v2415_v55 = vsel %vm2050_vm6, %v2410_v61, %v2414_v0  ;;  %2997 = vmatprep.subr.bf16.mxu1 %v12508_v6  ;;  %v2113_v47 = vadd.f32 %v2078_v10, %v1918_v35  ;;  %19576 = vst [vmem:[#allocation57_spill] sm:$0xff] %v14815_v43  ;;  %v19643_v43 = vld [vmem:[#allocation33_spill] sm:$0xff] }
 0x23c   : > { %v2115_v54 = vadd.f32 %v2082_v19, %v1920_v38  ;;  %v2160_v27 = vmul.f32 %v19541_v4, %v2131_v32  ;;  %v2162_v7 = vmul.f32 %v19541_v4, %v2133_v12  ;;  %v2271_v44 = vrot.slane %v2223_v37, 1  ;;  %v19579_v37 = vld [vmem:[#allocation54_spill] sm:$0xff] }
 0x23d   : > { %v2411_v9 = vsel %vm2050_vm6, %v19575_v18, %v2410_v61  ;;  %v2275_v13 = vrot.slane %v2225_v22, 1  ;;  %v2360_v5 = vmul.f32 %v19542_v52, %v2329_v46  ;;  %v2362_v3 = vmul.f32 %v19542_v52, %v2331_v34  ;;  %v19580_v22 = vld [vmem:[#allocation53_spill] sm:$0xff] }
 0x23e   : > { %v2592_v23 = vrot.slane %v2543_v39, 1  ;;  %v2596_v29 = vrot.slane %v2545_v56, 1  ;;  %v2680_v42 = vmul.f32 %v19577_v24, %v2649_v1  ;;  %v2682_v61 = vmul.f32 %v19577_v24, %v2651_v63  ;;  %2998 = vmatpush1.bf16.msra.mxu1 %v12506_v58  ;;  %v19584_v58 = vld [vmem:[#allocation49_spill] sm:$0xff] }
 0x23f   : > { %v2445_v0 = vadd.f32 %v2411_v9, %v2308_v2  ;;  %v2447_v6 = vadd.f32 %v2415_v55, %v2310_v15  ;;  %v2494_v32 = vmul.f32 %v13981_v14, %v2465_v17  ;;  %v2505_v4 = vadd.f32 %v14705_v30, %v14702_v8  ;;  %v19586_v55 = vld [vmem:[#allocation47_spill] sm:$0xff] }
 0x240   : > { %v2723_v12 = vrot.slane %v14763_v16, 2  ;;  %v2176_v35 = vadd.f32 %v2160_v27, %v2113_v47  ;;  %v2178_v52 = vadd.f32 %v2162_v7, %v2115_v54  ;;  %v13134_v38 = vmov -1e+30   ;;  %v19588_v27 = vld [vmem:[#allocation48_spill] sm:$0xff] }
 0x241   : > { %4868 = vst [vmem:[#allocation3 + $0x20] sm:$0xff] %v13134_v38  ;;  %4864 = vst [vmem:[#allocation3] sm:$0xff] %v13134_v38  ;;  %v19578_v14 = vrot.slane %v14615_v20, 1  ;;  %v2276_v30 = vsel %vm1855_vm4, %v2271_v44, %v2275_v13  ;;  %v2408_v54 = vrot.slane %v2360_v5, 2  ;;  %v2412_v17 = vrot.slane %v2362_v3, 2 }
 0x242   : > { %4865 = vst [vmem:[#allocation3 + $0x8] sm:$0xff] %v13134_v38  ;;  %4866 = vst [vmem:[#allocation3 + $0x10] sm:$0xff] %v13134_v38  ;;  %v19581_v10 = vpack.c.bf16 %v19579_v37, %v19580_v22  ;;  %v19582_v19 = vrot.slane %v14570_v60, 1  ;;  %v2597_v34 = vsel %vm1855_vm4, %v2592_v23, %v2596_v29  ;;  %v2729_v39 = vrot.slane %v2680_v42, 2  ;;  %v14842_v60 = vpop.permute.xlu1 %5400 }
 0x243   : > { %4867 = vst [vmem:[#allocation3 + $0x18] sm:$0xff] %v13134_v38  ;;  %4869 = vst [vmem:[#allocation3 + $0x28] sm:$0xff] %v13134_v38  ;;  %v2272_v8 = vsel %vm1855_vm4, %v19578_v14, %v2271_v44  ;;  %v2733_v56 = vrot.slane %v2682_v61, 2  ;;  %v19583_v20 = vpack.c.bf16 %v14517_v57, %v19543_v11  ;;  %v2508_v13 = vadd.f32 %v14781_v45, %v2445_v0 }
 0x244   : > { %4870 = vst [vmem:[#allocation3 + $0x30] sm:$0xff] %v13134_v38  ;;  %4871 = vst [vmem:[#allocation3 + $0x38] sm:$0xff] %v13134_v38  ;;  %3000 = vmatmul.mubr.bf16.vlgmr.msra.gmra.mrb[4].mxu1 %v19581_v10  ;;  %v2593_v46 = vsel %vm1855_vm4, %v19582_v19, %v2592_v23  ;;  %v2510_v1 = vadd.f32 %v2494_v32, %v2447_v6  ;;  %v2462_v63 = vmul.f32 %v14662_v51, %v14678_v50 }
 0x245   : > { %4900 = vst [vmem:[#allocation3 + $0x120] sm:$0xff] %v13134_v38  ;;  %4901 = vst [vmem:[#allocation3 + $0x128] sm:$0xff] %v13134_v38  ;;  %3009 = vmatprep.mubr.bf16.mxu1 %v19583_v20  ;;  %v2464_v2 = vmul.f32 %v19584_v58, %v14680_v31  ;;  %v2307_v15 = vadd.f32 %v2272_v8, %v2176_v35  ;;  %v2309_v18 = vadd.f32 %v2276_v30, %v2178_v52  ;;  %v19597_v30 = vld [vmem:[#allocation60_spill] sm:$0xff] }
 0x246   : > { %4902 = vst [vmem:[#allocation3 + $0x130] sm:$0xff] %v13134_v38  ;;  %4903 = vst [vmem:[#allocation3 + $0x138] sm:$0xff] %v13134_v38  ;;  %v2542_v9 = vmul.f32 %v14125_v59, %v19584_v58  ;;  %v2544_v57 = vmul.f32 %v14125_v59, %v19586_v55  ;;  %v19587_v11 = vrot.slane %v14633_v62, 2  ;;  %v2413_v47 = vsel %vm2050_vm6, %v2408_v54, %v2412_v17  ;;  %v19590_v59 = vld [vmem:[#allocation69_spill] sm:$0xff]  ;;  %v14877_v14 = vpop.permute.xlu1 %5122 }
 0x247   : > { %4904 = vst [vmem:[#allocation3 + $0x140] sm:$0x3] %v13134_v38  ;;  %4905 = vst [vmem:[#allocation3 + $0x148] sm:$0x3] %v13134_v38  ;;  %v2648_v51 = vmul.f32 %v19584_v58, %v14646_v21  ;;  %v2650_v7 = vmul.f32 %v19588_v27, %v14444_v33  ;;  %v2622_v44 = vadd.f32 %v14715_v41, %v14725_v49  ;;  %v19589_v3 = vrot.slane %v14710_v26, 2 }
 0x248   : > { %4906 = vst [vmem:[#allocation3 + $0x150] sm:$0x3] %v13134_v38  ;;  %4907 = vst [vmem:[#allocation3 + $0x158] sm:$0x3] %v13134_v38  ;;  %v2409_v45 = vsel %vm2050_vm6, %v19587_v11, %v2408_v54  ;;  %v2624_v5 = vadd.f32 %v14730_v25, %v2505_v4  ;;  %v19591_v23 = vrot.slane %v19590_v59, 2  ;;  %v2627_v42 = vadd.f32 %v2593_v46, %v2508_v13  ;;  %v19599_v46 = vld [vmem:[#allocation59_spill] sm:$0xff] }
 0x249   : > { %19585 = vst [vmem:[#allocation61_spill] sm:$0xff] %v14842_v60  ;;  %v19592_v29 = vmov %v19589_v3  ;;  %v2629_v61 = vadd.f32 %v2597_v34, %v2510_v1  ;;  %v19593_v0 = vrot.slane %v14595_v36, 2  ;;  %v2734_v49 = vsel %vm2050_vm6, %v2729_v39, %v2733_v56  ;;  %19594 = vst [vmem:[#allocation62_spill] sm:$0xff] %v14877_v14  ;;  %v19595_v36 = vld [vmem:[#allocation72_spill] sm:$0xff]  ;;  %v12511_v11 = vld [vmem:[#allocation11 + $0x4] ss:$16 sps:$4 sm:$0xff]  }
 0x24a   : > { %v2720_v62 = vsel %vm2050_vm6, %v19591_v23, %v19589_v3  ;;  %v2724_v24 = vsel %vm2050_vm6, %v19592_v29, %v2723_v12  ;;  %v2444_v25 = vadd.f32 %v2409_v45, %v2307_v15  ;;  %v2446_v6 = vadd.f32 %v2413_v47, %v2309_v18  ;;  %v12512_v45 = vld [vmem:[#allocation11 + $0x8] ss:$16 sps:$4 sm:$0xff]   ;;  %v12514_v47 = vld [vmem:[#allocation11 + $0xc] ss:$16 sps:$4 sm:$0xff]   ;;  %4594 = vmatprep.subr.bf16.mxu0 %v12511_v11  ;;  %v12521_v3 = vld [vmem:[#allocation11 + $0x40] ss:$16 sps:$4 sm:$0xff]  }
 0x24b   : > { %v2730_v41 = vsel %vm2050_vm6, %v19593_v0, %v2729_v39  ;;  %v2491_v32 = vmul.f32 %v14118_v40, %v2462_v63  ;;  %v2493_v4 = vmul.f32 %v14118_v40, %v2464_v2  ;;  %v2590_v35 = vrot.slane %v2542_v9, 1  ;;  %v12520_v27 = vld [vmem:[#allocation11 + $0x2c] ss:$16 sps:$4 sm:$0xff]   ;;  %4667 = vmatprep.subr.bf16.mxu1 %v12514_v47  ;;  %v12524_v59 = vld [vmem:[#allocation11 + $0x48] ss:$16 sps:$4 sm:$0xff]  }
 0x24c   : > { %v2594_v52 = vrot.slane %v2544_v57, 1  ;;  %v2679_v26 = vmul.f32 %v14147_v48, %v2648_v51  ;;  %v2681_v38 = vmul.f32 %v14147_v48, %v2650_v7  ;;  %v19596_v8 = vpack.c.bf16 %v14619_v53, %v19595_v36  ;;  %v14889_v53 = vpop.permute.xlu1 %5406  ;;  %v12509_v57 = vld [vmem:[#allocation11] ss:$16 sps:$4 sm:$0xff]   ;;  %v12517_v51 = vld [vmem:[#allocation11 + $0x24] ss:$16 sps:$4 sm:$0xff]   ;;  %4668 = vmatpush1.bf16.msra.mxu1 %v12512_v45 }
 0x24d   : > { %v19598_v54 = vpack.c.bf16 %v14670_v28, %v19597_v30  ;;  %v2759_v17 = vadd.f32 %v2720_v62, %v2622_v44  ;;  %v2761_v37 = vadd.f32 %v2724_v24, %v2624_v5  ;;  %v2764_v22 = vadd.f32 %v2730_v41, %v2627_v42  ;;  %19601 = vst [vmem:[#allocation28_spill] sm:$0xff] %v14889_v53  ;;  %v12518_v7 = vld [vmem:[#allocation11 + $0x28] ss:$16 sps:$4 sm:$0xff]   ;;  %v12523_v44 = vld [vmem:[#allocation11 + $0x44] ss:$16 sps:$4 sm:$0xff]  }
 0x24e   : > { %3010 = vmatmul.mubr.bf16.gmra.mrb[8].mxu1 %v19596_v8  ;;  %v2766_v40 = vadd.f32 %v2734_v49, %v2629_v61  ;;  %v2507_v10 = vadd.f32 %v2491_v32, %v2444_v25  ;;  %v2509_v19 = vadd.f32 %v2493_v4, %v2446_v6  ;;  %v19600_v34 = vrot.slane %v19599_v46, 1  ;;  %4595 = vmatpush1.bf16.msra.mxu0 %v12509_v57  ;;  %v12526_v5 = vld [vmem:[#allocation11 + $0x4c] ss:$16 sps:$4 sm:$0xff]   ;;  %v14899_v23 = vld [vmem:[#allocation4 + $0x68] sm:$0x1]  ;;  %v14907_v61 = vld [vmem:[#allocation4] sm:$0xff] }
 0x24f   : > { %3019 = vmatprep.mubr.bf16.mxu1 %v19598_v54  ;;  %v2595_v39 = vsel %vm1855_vm4, %v2590_v35, %v2594_v52  ;;  %v2727_v56 = vrot.slane %v2679_v26, 2  ;;  %v2731_v20 = vrot.slane %v2681_v38, 2  ;;  %v2771_v13 = vpack.c.bf16 %v2761_v37, %v2759_v17  ;;  %4596 = vmatprep.subr.bf16.mxu0 %v12517_v51  ;;  %19604 = vst [vmem:[#allocation67_spill] sm:$0xff] %v14899_v23  ;;  %v14901_v62 = vld [vmem:[#allocation4 + $0x68] sm:$0x3]  ;;  %v19613_v30 = vld [vmem:[#allocation26_spill] sm:$0xff] }
 0x250   : > { %v2591_v48 = vsel %vm1855_vm4, %v19600_v34, %v2590_v35  ;;  %v2628_v28 = vadd.f32 %v2595_v39, %v2509_v19  ;;  %v2774_v63 = vpack.c.bf16 %v2766_v40, %v2764_v22  ;;  %v14895_v9 = vpop.permute.xlu1 %5128  ;;  %4669 = vmatprep.subr.bf16.mxu1 %v12520_v27  ;;  %19605 = vst [vmem:[#allocation37_spill] sm:$0xff] %v14901_v62  ;;  %v14903_v29 = vld [vmem:[#allocation4 + $0x60] sm:$0x1]  ;;  %v12529_v42 = vld [vmem:[#allocation11 + $0x64] ss:$16 sps:$4 sm:$0xff]   ;;  %v14924_v54 = vsub.s32 2, %v19613_v30 }
 0x251   : > { %v2626_v1 = vadd.f32 %v2591_v48, %v2507_v10  ;;  %v2728_v58 = vsel %vm2050_vm6, %v2723_v12, %v2727_v56  ;;  %v2732_v2 = vsel %vm2050_vm6, %v2727_v56, %v2731_v20  ;;  %19602 = vst [vmem:[#allocation31_spill] sm:$0xff] %v14895_v9  ;;  %v12515_v12 = vld [vmem:[#allocation11 + $0x20] ss:$16 sps:$4 sm:$0xff]   ;;  %19606 = vst [vmem:[#allocation38_spill] sm:$0xff] %v14903_v29  ;;  %4670 = vmatpush1.bf16.msra.mxu1 %v12518_v7  ;;  %v14911_v0 = vld [vmem:[#allocation4 + $0x78] sm:$0x1] }
 0x252   : > { %v2765_v18 = vadd.f32 %v2732_v2, %v2628_v28  ;;  %4597 = vmatpush1.bf16.msra.mxu0 %v12515_v12  ;;  %v14905_v24 = vld [vmem:[#allocation4 + $0x60] sm:$0x3]  ;;  %8408 = vst [vmem:[#allocation4 + $0x68] sm:$0x3] %v14907_v61  ;;  %19608 = vst [vmem:[#allocation45_spill] sm:$0xff] %v14911_v0  ;;  %4671 = vmatprep.subr.bf16.mxu1 %v12526_v5 }
 0x253   : > { %v2763_v15 = vadd.f32 %v2728_v58, %v2626_v1  ;;  %19607 = vst [vmem:[#allocation43_spill] sm:$0xff] %v14905_v24  ;;  %4598 = vmatprep.subr.bf16.mxu0 %v12523_v44  ;;  %8407 = vst [vmem:[#allocation4 + $0x60] sm:$0x3] %v14907_v61  ;;  %v14913_v41 = vld [vmem:[#allocation4 + $0x78] sm:$0x3]  ;;  %v19641_v9 = vld [vmem:[#allocation35_spill] sm:$0xff] }
 0x254   : > { %v14897_v16 = vpop.permute.xlu1 %5412  ;;  %19609 = vst [vmem:[#allocation71_spill] sm:$0xff] %v14913_v41  ;;  %v12532_v25 = vld [vmem:[#allocation11 + $0x6c] ss:$16 sps:$4 sm:$0xff]   ;;  %8410 = vst [vmem:[#allocation4 + $0x78] sm:$0x3] %v14907_v61 }
 0x255   : > { %v2773_v55 = vpack.c.bf16 %v2765_v18, %v2763_v15  ;;  %19603 = vst [vmem:[#allocation36_spill] sm:$0xff] %v14897_v16  ;;  %v12527_v6 = vld [vmem:[#allocation11 + $0x60] ss:$16 sps:$4 sm:$0xff]   ;;  %4672 = vmatpush1.bf16.msra.mxu1 %v12524_v59  ;;  %v12530_v32 = vld [vmem:[#allocation11 + $0x68] ss:$16 sps:$4 sm:$0xff]   ;;  %19614 = vst [vmem:[#allocation40_spill] sm:$0xff] %v14924_v54 }
 0x256   : > { %3020 = vmatmul.mubr.bf16.gmra.mrb[12].mxu1 %v2771_v13  ;;  %4599 = vmatpush1.bf16.msra.mxu0 %v12521_v3  ;;  %v12535_v4 = vld [vmem:[#allocation11 + $0x84] ss:$16 sps:$4 sm:$0xff]   ;;  %v12538_v35 = vld [vmem:[#allocation11 + $0x8c] ss:$16 sps:$4 sm:$0xff]   ;;  %v14918_v52 = vld [vmem:[#allocation4 + $0x70] sm:$0x1] }
 0x257   : > { %3029 = vmatprep.mubr.bf16.mxu1 %v2774_v63  ;;  %4600 = vmatprep.subr.bf16.mxu0 %v12529_v42  ;;  %19611 = vst [vmem:[#allocation41_spill] sm:$0xff] %v14918_v52  ;;  %v7278_v26 = vld [vmem:[#allocation4 + $0x70] sm:$0x3]  ;;  %v12536_v8 = vld [vmem:[#allocation11 + $0x88] ss:$16 sps:$4 sm:$0xff]  }
 0x258   : > { %v14915_v49 = vpop.permute.xlu1 %5134  ;;  %4673 = vmatprep.subr.bf16.mxu1 %v12532_v25  ;;  %v12533_v36 = vld [vmem:[#allocation11 + $0x80] ss:$16 sps:$4 sm:$0xff]   ;;  %8409 = vst [vmem:[#allocation4 + $0x70] sm:$0x3] %v14907_v61  ;;  %v12541_v34 = vld [vmem:[#allocation11 + $0xa4] ss:$16 sps:$4 sm:$0xff]  }
 0x259   : > { %19610 = vst [vmem:[#allocation46_spill] sm:$0xff] %v14915_v49  ;;  %4674 = vmatpush1.bf16.msra.mxu1 %v12530_v32  ;;  %v11764_v37 = vld [vmem:[%s18997_s17 + $0x20] ss:$8 sm:$0xf]  ;;  %v12544_v39 = vld [vmem:[#allocation11 + $0xac] ss:$16 sps:$4 sm:$0xff]  }
 0x25a   : > { %4601 = vmatpush1.bf16.msra.mxu0 %v12527_v6  ;;  %4675 = vmatprep.subr.bf16.mxu1 %v12538_v35  ;;  %v14936_v10 = vrot.slane %v11764_v37, %v14924_v54  ;;  %v12539_v46 = vld [vmem:[#allocation11 + $0xa0] ss:$16 sps:$4 sm:$0xff]   ;;  %v12542_v48 = vld [vmem:[#allocation11 + $0xa8] ss:$16 sps:$4 sm:$0xff]   ;;  %v12547_v56 = vld [vmem:[#allocation11 + $0xc4] ss:$16 sps:$4 sm:$0xff]  }
 0x25b   : > { %4602 = vmatprep.subr.bf16.mxu0 %v12535_v4  ;;  %v12550_v20 = vld [vmem:[#allocation11 + $0xcc] ss:$16 sps:$4 sm:$0xff]   ;;  %v12545_v13 = vld [vmem:[#allocation11 + $0xc0] ss:$16 sps:$4 sm:$0xff]   ;;  %v12548_v1 = vld [vmem:[#allocation11 + $0xc8] ss:$16 sps:$4 sm:$0xff]  }
 0x25c   : > { %v14920_v38 = vpop.permute.xlu1 %5418  ;;  %19617 = vst [vmem:[#allocation54_spill] sm:$0xff] %v14936_v10  ;;  %v12551_v28 = vld [vmem:[#allocation11 + $0xe0] ss:$16 sps:$4 sm:$0xff]   ;;  %v12553_v63 = vld [vmem:[#allocation11 + $0xe4] ss:$16 sps:$4 sm:$0xff]  }
 0x25d   : > { %19612 = vst [vmem:[#allocation39_spill] sm:$0xff] %v14920_v38  ;;  %4676 = vmatpush1.bf16.msra.mxu1 %v12536_v8  ;;  %v12554_v58 = vld [vmem:[#allocation11 + $0xe8] ss:$16 sps:$4 sm:$0xff]   ;;  %v12556_v2 = vld [vmem:[#allocation11 + $0xec] ss:$16 sps:$4 sm:$0xff]  }
 0x25e   : > { %3030 = vmatmul.mubr.bf16.gmra.mrb[16].mxu1 %v2773_v55  ;;  %4603 = vmatpush1.bf16.msra.mxu0 %v12533_v36  ;;  %v12559_v15 = vld [vmem:[#allocation11 + $0x104] ss:$16 sps:$4 sm:$0xff]   ;;  %v12562_v18 = vld [vmem:[#allocation11 + $0x10c] ss:$16 sps:$4 sm:$0xff]   ;;  %v12557_v55 = vld [vmem:[#allocation11 + $0x100] ss:$16 sps:$4 sm:$0xff]  }
 0x25f   : > { %4604 = vmatprep.subr.bf16.mxu0 %v12541_v34  ;;  %4677 = vmatprep.subr.bf16.mxu1 %v12544_v39  ;;  %v12560_v57 = vld [vmem:[#allocation11 + $0x108] ss:$16 sps:$4 sm:$0xff]   ;;  %v12563_v11 = vld [vmem:[#allocation11 + $0x120] ss:$16 sps:$4 sm:$0xff]   ;;  %v12565_v45 = vld [vmem:[#allocation11 + $0x124] ss:$16 sps:$4 sm:$0xff]  }
 0x260   : > { %v14926_v17 = vpop.permute.xlu1 %6716  ;;  %v12566_v47 = vld [vmem:[#allocation11 + $0x128] ss:$16 sps:$4 sm:$0xff]   ;;  %v12568_v51 = vld [vmem:[#allocation11 + $0x12c] ss:$16 sps:$4 sm:$0xff]   ;;  %v12571_v27 = vld [vmem:[#allocation11 + $0x144] ss:$16 sps:$4 sm:$0xff]  }
 0x261   : > { %19615 = vst [vmem:[#allocation70_spill] sm:$0xff] %v14926_v17  ;;  %v14932_v22 = vrot.slane %v14926_v17, 6  ;;  %4678 = vmatpush1.bf16.msra.mxu1 %v12542_v48  ;;  %v12574_v12 = vld [vmem:[#allocation11 + $0x14c] ss:$16 sps:$4 sm:$0xff]   ;;  %v12569_v7 = vld [vmem:[#allocation11 + $0x140] ss:$16 sps:$4 sm:$0xff]  }
 0x262   : > { %4605 = vmatpush1.bf16.msra.mxu0 %v12539_v46  ;;  %4679 = vmatprep.subr.bf16.mxu1 %v12550_v20  ;;  %v12572_v44 = vld [vmem:[#allocation11 + $0x148] ss:$16 sps:$4 sm:$0xff]   ;;  %v12575_v5 = vld [vmem:[#allocation11 + $0x160] ss:$16 sps:$4 sm:$0xff]   ;;  %v12577_v3 = vld [vmem:[#allocation11 + $0x164] ss:$16 sps:$4 sm:$0xff]  }
 0x263   : > { %19616 = vst [vmem:[#allocation44_spill] sm:$0xff] %v14932_v22  ;;  %v7290_v40 = vmul.f32 %v7278_v26, %v14932_v22  ;;  %4606 = vmatprep.subr.bf16.mxu0 %v12547_v56  ;;  %v12578_v59 = vld [vmem:[#allocation11 + $0x168] ss:$16 sps:$4 sm:$0xff]   ;;  %v12580_v42 = vld [vmem:[#allocation11 + $0x16c] ss:$16 sps:$4 sm:$0xff]  }
 0x264   : > { %v12583_v25 = vld [vmem:[#allocation11 + $0x184] ss:$16 sps:$4 sm:$0xff]   ;;  %v12586_v6 = vld [vmem:[#allocation11 + $0x18c] ss:$16 sps:$4 sm:$0xff]   ;;  %v12581_v32 = vld [vmem:[#allocation11 + $0x180] ss:$16 sps:$4 sm:$0xff]  }
 0x265   : > { %v14939_v19 = vmul.f32 %v14936_v10, %v7290_v40  ;;  %4680 = vmatpush1.bf16.msra.mxu1 %v12548_v1  ;;  %v12584_v4 = vld [vmem:[#allocation11 + $0x188] ss:$16 sps:$4 sm:$0xff]   ;;  %v12589_v35 = vld [vmem:[#allocation11 + $0x1a4] ss:$16 sps:$4 sm:$0xff]   ;;  %v12592_v26 = vld [vmem:[#allocation11 + $0x1ac] ss:$16 sps:$4 sm:$0xff]  }
 0x266   : > { %4607 = vmatpush1.bf16.msra.mxu0 %v12545_v13  ;;  %4681 = vmatprep.subr.bf16.mxu1 %v12556_v2  ;;  %v12587_v36 = vld [vmem:[#allocation11 + $0x1a0] ss:$16 sps:$4 sm:$0xff]   ;;  %v12590_v8 = vld [vmem:[#allocation11 + $0x1a8] ss:$16 sps:$4 sm:$0xff]   ;;  %v12595_v37 = vld [vmem:[#allocation11 + $0x1c4] ss:$16 sps:$4 sm:$0xff]  }
 0x267   : > { %19618 = vst [vmem:[#allocation53_spill] sm:$0xff] %v14939_v19  ;;  %4608 = vmatprep.subr.bf16.mxu0 %v12553_v63  ;;  %v12598_v40 = vld [vmem:[#allocation11 + $0x1cc] ss:$16 sps:$4 sm:$0xff]   ;;  %v12593_v46 = vld [vmem:[#allocation11 + $0x1c0] ss:$16 sps:$4 sm:$0xff]  }
 0x268   : > { %v12596_v34 = vld [vmem:[#allocation11 + $0x1c8] ss:$16 sps:$4 sm:$0xff]   ;;  %v12601_v48 = vld [vmem:[#allocation11 + $0x1e4] ss:$16 sps:$4 sm:$0xff]   ;;  %v12604_v39 = vld [vmem:[#allocation11 + $0x1ec] ss:$16 sps:$4 sm:$0xff]  }
 0x269   : > { %4682 = vmatpush1.bf16.msra.mxu1 %v12554_v58  ;;  %v12599_v56 = vld [vmem:[#allocation11 + $0x1e0] ss:$16 sps:$4 sm:$0xff]   ;;  %v12602_v20 = vld [vmem:[#allocation11 + $0x1e8] ss:$16 sps:$4 sm:$0xff]  }
 0x26a   : > { %4609 = vmatpush1.bf16.msra.mxu0 %v12551_v28  ;;  %4683 = vmatprep.subr.bf16.mxu1 %v12562_v18  ;;  %v3309_v41 = vld [vmem:[#allocation2 + $0x8] sm:$0xfe] }
 0x26b   : > { %4610 = vmatprep.subr.bf16.mxu0 %v12559_v15 }
 0x26d   : > { %4684 = vmatpush1.bf16.msra.mxu1 %v12560_v57  ;;  %v11682_v57 = vld [vmem:[%s18993_s13 + $0x2] ss:$8 sm:$0x3] }
 0x26e   : > { %4611 = vmatpush1.bf16.msra.mxu0 %v12557_v55  ;;  %4685 = vmatprep.subr.bf16.mxu1 %v12568_v51  ;;  %v3428_v55 = vld [vmem:[#allocation2 + $0x8] sm:$0xfc]  ;;  %v19628_v51 = vld [vmem:[#allocation29_spill] sm:$0xff] }
 0x26f   : > { %4612 = vmatprep.subr.bf16.mxu0 %v12565_v45  ;;  %v3040_v45 = vld [vmem:[%s19627_s1] sm:$0x3]  ;;  %s19844_s1 = sld [smem:[#allocation106_spill]] }
 0x271   : > { %4686 = vmatpush1.bf16.msra.mxu1 %v12566_v47  ;;  %v3264_v47 = vld [vmem:[%s18993_s13] ss:$8 sm:$0x3] }
 0x272   : > { %4613 = vmatpush1.bf16.msra.mxu0 %v12563_v11  ;;  %4687 = vmatprep.subr.bf16.mxu1 %v12574_v12  ;;  %v3427_v11 = vld [vmem:[#allocation2] sm:$0xfc]  ;;  %v19629_v12 = vld [vmem:[#allocation27_spill] sm:$0xff] }
 0x273   : > { %4614 = vmatprep.subr.bf16.mxu0 %v12571_v27  ;;  %v3432_v27 = vmul.f32 %v3428_v55, %v19628_v51 }
 0x275   : > { %4688 = vmatpush1.bf16.msra.mxu1 %v12572_v44  ;;  %v19630_v44 = vld [vmem:[#allocation32_spill] sm:$0xff] }
 0x276   : > { %4615 = vmatpush1.bf16.msra.mxu0 %v12569_v7  ;;  %4689 = vmatprep.subr.bf16.mxu1 %v12580_v42  ;;  %v14968_v7 = vrot.slane %v11682_v57, %v19629_v12  ;;  %v4068_v42 = vld [vmem:[#allocation2 + $0xa8] sm:$0x3] }
 0x277   : > { %4616 = vmatprep.subr.bf16.mxu0 %v12577_v3  ;;  %v11688_v3 = vld [vmem:[%s18993_s13 + $0x10] ss:$8 sm:$0x3] }
 0x279   : > { %4690 = vmatpush1.bf16.msra.mxu1 %v12578_v59  ;;  %v3431_v59 = vmul.f32 %v3427_v11, %v19628_v51  ;;  %v15021_v11 = vrot.slane %v11688_v3, %v19630_v44 }
 0x27a   : > { %4617 = vmatpush1.bf16.msra.mxu0 %v12575_v5  ;;  %4691 = vmatprep.subr.bf16.mxu1 %v12586_v6  ;;  %v14971_v5 = vrot.slane %v11682_v57, %v19630_v44  ;;  %v14981_v6 = vrot.slane %v3040_v45, %v19630_v44  ;;  %v11684_v57 = vld [vmem:[%s18993_s13 + $0x4] ss:$8 sm:$0x3] }
 0x27b   : > { %4618 = vmatprep.subr.bf16.mxu0 %v12583_v25  ;;  %v3068_v25 = vld [vmem:[%s19631_s10] sm:$0x3] }
 0x27d   : > { %4692 = vmatpush1.bf16.msra.mxu1 %v12584_v4 }
 0x27e   : > { %4619 = vmatpush1.bf16.msra.mxu0 %v12581_v32  ;;  %4693 = vmatprep.subr.bf16.mxu1 %v12592_v26  ;;  %v19632_v32 = vld [vmem:[#allocation30_spill] sm:$0xff]  ;;  %v14989_v26 = vrot.slane %v3264_v47, %v19629_v12 }
 0x27f   : > { %4620 = vmatprep.subr.bf16.mxu0 %v12589_v35  ;;  %v3249_v4 = vmul.f32 %v14907_v61, %v19632_v32  ;;  %v14986_v35 = vrot.slane %v3264_v47, %v19630_v44  ;;  %v15005_v61 = vmul.f32 %v14971_v5, %v3431_v59  ;;  %19634 = vst [vmem:[#allocation30_spill] sm:$0xff] %v15021_v11  ;;  %v11683_v59 = vld [vmem:[%s18993_s13 + $0x3] ss:$8 sm:$0x3] }
 0x280   : > { %19633 = vst [vmem:[#allocation29_spill] sm:$0xff] %v14989_v26  ;;  %v15056_v19 = vrot.slane %v11683_v59, %v19630_v44 }
 0x281   : > { %4694 = vmatpush1.bf16.msra.mxu1 %v12590_v8  ;;  %v14995_v8 = vmul.f32 %v14968_v7, %v3432_v27  ;;  %v15015_v55 = vmul.f32 %v14989_v26, %v3249_v4  ;;  %v11685_v27 = vld [vmem:[%s18993_s13 + $0x5] ss:$8 sm:$0x3] }
 0x282   : > { %4621 = vmatpush1.bf16.msra.mxu0 %v12587_v36  ;;  %4695 = vmatprep.subr.bf16.mxu1 %v12598_v40  ;;  %v14992_v36 = vrot.slane %v3040_v45, %v19629_v12  ;;  %v4086_v40 = vmul.f32 %v4068_v42, %v14444_v33  ;;  %v15029_v42 = vmul.f32 %v14986_v35, %v3249_v4 }
 0x283   : > { %4622 = vmatprep.subr.bf16.mxu0 %v12595_v37  ;;  %v14998_v37 = vrot.slane %v11688_v3, %v19629_v12 }
 0x285   : > { %4696 = vmatpush1.bf16.msra.mxu1 %v12596_v34 }
 0x286   : > { %4623 = vmatpush1.bf16.msra.mxu0 %v12593_v46  ;;  %4697 = vmatprep.subr.bf16.mxu1 %v12604_v39  ;;  %v15002_v46 = vrot.slane %v3068_v25, %v19630_v44  ;;  %v11681_v39 = vld [vmem:[%s18993_s13 + $0x1] ss:$8 sm:$0x3] }
 0x287   : > { %4624 = vmatprep.subr.bf16.mxu0 %v12601_v48  ;;  %v15008_v48 = vrot.slane %v3068_v25, %v19629_v12  ;;  %v15032_v25 = vmul.f32 %v14998_v37, %v4086_v40  ;;  %v15046_v40 = vrot.slane %v11681_v39, %v19629_v12 }
 0x289   : > { %4698 = vmatpush1.bf16.msra.mxu1 %v12602_v20  ;;  %19635 = vst [vmem:[#allocation74_spill] sm:$0xff] %v15032_v25  ;;  %19636 = vst [vmem:[#allocation75_spill] sm:$0xff] %v15046_v40  ;;  %v15078_v24 = vmul.f32 %v15046_v40, %v3309_v41 }
 0x28a   : > { %4625 = vmatpush1.bf16.msra.mxu0 %v12599_v56 }
 0x2d4   : > { %v14941_v13 = vpop.f32.mrb[0].mxu1  ;;  %v14943_v1 = vpop.f32.mrb[4].mxu0 }
 0x2d5   : > { %19619 = vst [vmem:[#allocation49_spill] sm:$0xff] %v14941_v13  ;;  %19620 = vst [vmem:[#allocation47_spill] sm:$0xff] %v14943_v1  ;;  %v14945_v28 = vpop.f32.mrb[1].mxu1  ;;  %v14947_v63 = vpop.f32.mrb[5].mxu0  ;;  %v3308_v1 = vld [vmem:[#allocation2] sm:$0xfe] }
 0x2d6   : > { %19621 = vst [vmem:[#allocation48_spill] sm:$0xff] %v14945_v28  ;;  %19622 = vst [vmem:[#allocation69_spill] sm:$0xff] %v14947_v63  ;;  %v14949_v58 = vpop.f32.mrb[2].mxu1  ;;  %v14951_v2 = vpop.f32.mrb[6].mxu0  ;;  %v15066_v63 = vrot.slane %v11685_v27, %v19630_v44 }
 0x2d7   : > { %19623 = vst [vmem:[#allocation72_spill] sm:$0xff] %v14949_v58  ;;  %19624 = vst [vmem:[#allocation60_spill] sm:$0xff] %v14951_v2  ;;  %v14953_v15 = vpop.f32.mrb[3].mxu1  ;;  %v14955_v18 = vpop.f32.mrb[7].mxu0  ;;  %v15063_v2 = vrot.slane %v11683_v59, %v19629_v12 }
 0x2d8   : > { %19625 = vst [vmem:[#allocation59_spill] sm:$0xff] %v14953_v15  ;;  %19626 = vst [vmem:[#allocation73_spill] sm:$0xff] %v14955_v18 }
 0x2d9   : > { %19637 = vst [vmem:[#allocation76_spill] sm:$0xff] %v15066_v63  ;;  %v19644_v63 = vrot.slane %v15078_v24, 1 }
 0x317   : > { %v3001_v34 = vpop.f32.mrb[4].mxu1 }
 0x318   : > { %v3052_v56 = vmul.f32 %v14981_v6, %v3001_v34  ;;  %v3003_v20 = vpop.f32.mrb[5].mxu1 }
 0x319   : > { %v3053_v45 = vmul.f32 %v14992_v36, %v3003_v20  ;;  %v3005_v47 = vpop.f32.mrb[6].mxu1  ;;  %v15037_v20 = vrot.slane %v11681_v39, %v19630_v44 }
 0x31a   : > { %v3080_v34 = vadd.f32 %v15002_v46, %v3052_v56  ;;  %v3054_v3 = vmul.f32 %v14981_v6, %v3005_v47  ;;  %v3007_v10 = vpop.f32.mrb[7].mxu1  ;;  %v15049_v56 = vrot.slane %v11684_v57, %v19630_v44  ;;  %v11686_v47 = vld [vmem:[%s18993_s13 + $0x6] ss:$8 sm:$0x3] }
 0x31b   : > { %v3081_v4 = vadd.f32 %v15008_v48, %v3053_v45  ;;  %v3055_v52 = vmul.f32 %v14992_v36, %v3007_v10  ;;  %v15059_v45 = vrot.slane %v11684_v57, %v19629_v12  ;;  %v15072_v15 = vrot.slane %v11686_v47, %v19630_v44  ;;  %v11687_v57 = vld [vmem:[%s18993_s13 + $0x7] ss:$8 sm:$0x3] }
 0x31c   : > { %v3096_v0 = vmul.f32 0.2, %v3080_v34  ;;  %v3082_v18 = vadd.f32 %v15002_v46, %v3054_v3  ;;  %v15069_v3 = vrot.slane %v11685_v27, %v19629_v12  ;;  %v15081_v17 = vrot.slane %v11686_v47, %v19629_v12 }
 0x31d   : > { %v3097_v10 = vmul.f32 0.2, %v3081_v4  ;;  %v3083_v39 = vadd.f32 %v15008_v48, %v3055_v52  ;;  %19638 = vst [vmem:[#allocation77_spill] sm:$0xff] %v15072_v15  ;;  %v15085_v13 = vmul.f32 %v15037_v20, %v3308_v1  ;;  %v15089_v38 = vrot.slane %v11687_v57, %v19630_v44 }
 0x31e   : > { %v3112_v29 = vmax.f32 %v3080_v34, %v3096_v0  ;;  %v3098_v23 = vmul.f32 0.2, %v3082_v18 }
 0x31f   : > { %v3113_v52 = vmax.f32 %v3081_v4, %v3097_v10  ;;  %v3099_v58 = vmul.f32 0.2, %v3083_v39  ;;  %19639 = vst [vmem:[#allocation78_spill] sm:$0xff] %v15089_v38 }
 0x320   : > { %v3166_v0 = vrot.slane %v3112_v29, 7  ;;  %v3114_v34 = vmax.f32 %v3082_v18, %v3098_v23  ;;  %v15094_v18 = vrot.slane %v11687_v57, %v19629_v12 }
 0x321   : > { %v3011_v59 = vpop.f32.mrb[8].mxu1  ;;  %v3167_v62 = vrot.slane %v3113_v52, 7  ;;  %v3115_v22 = vmax.f32 %v3083_v39, %v3099_v58 }
 0x322   : > { %v3056_v27 = vmul.f32 %v14981_v6, %v3011_v59  ;;  %v3013_v28 = vpop.f32.mrb[9].mxu1  ;;  %3214 = vst [vmem:[#allocation2 + $0x10] sm:$0xfe] %v3166_v0  ;;  %v3168_v41 = vrot.slane %v3114_v34, 7 }
 0x323   : > { %v3057_v4 = vmul.f32 %v14992_v36, %v3013_v28  ;;  %v3015_v10 = vpop.f32.mrb[10].mxu1  ;;  %3215 = vst [vmem:[#allocation2 + $0x18] sm:$0xfe] %v3167_v62  ;;  %v3170_v1 = vrot.slane %v3115_v22, 7 }
 0x324   : > { %v3084_v47 = vadd.f32 %v15002_v46, %v3056_v27  ;;  %v3058_v23 = vmul.f32 %v14981_v6, %v3015_v10  ;;  %v3017_v29 = vpop.f32.mrb[11].mxu1  ;;  %v15100_v52 = vsel %vm1605_vm0, %v3166_v0, %v3168_v41  ;;  %v19640_v27 = vld [vmem:[#allocation34_spill] sm:$0xff] }
 0x325   : > { %v3085_v58 = vadd.f32 %v15008_v48, %v3057_v4  ;;  %v3059_v28 = vmul.f32 %v14992_v36, %v3017_v29  ;;  %3216 = vst [vmem:[#allocation2 + $0x20] sm:$0xff] %v15100_v52  ;;  %v15106_v57 = vsel %vm1605_vm0, %v3167_v62, %v3170_v1  ;;  %v15111_v10 = vmul.f32 %v15037_v20, %v15100_v52 }
 0x326   : > { %v3100_v59 = vmul.f32 0.2, %v3084_v47  ;;  %v3086_v34 = vadd.f32 %v15002_v46, %v3058_v23  ;;  %3217 = vst [vmem:[#allocation2 + $0x28] sm:$0xff] %v15106_v57  ;;  %v15116_v23 = vmul.f32 %v15046_v40, %v15106_v57  ;;  %v3436_v39 = vmul.f32 %v15106_v57, %v19640_v27 }
 0x327   : > { %v3101_v22 = vmul.f32 0.2, %v3085_v58  ;;  %v3087_v4 = vadd.f32 %v15008_v48, %v3059_v28  ;;  %v15122_v28 = vmul.f32 %v15106_v57, %v19641_v9  ;;  %v15126_v53 = vmul.f32 %v15059_v45, %v15106_v57 }
 0x328   : > { %v3116_v0 = vmax.f32 %v3084_v47, %v3100_v59  ;;  %v3102_v29 = vmul.f32 0.2, %v3086_v34  ;;  %v15132_v44 = vmul.f32 %v14968_v7, %v3436_v39 }
 0x329   : > { %v3117_v62 = vmax.f32 %v3085_v58, %v3101_v22  ;;  %v3103_v49 = vmul.f32 0.2, %v3087_v4  ;;  %v3021_v16 = vpop.f32.mrb[12].mxu1 }
 0x32a   : > { %v3172_v47 = vrot.slane %v3116_v0, 7  ;;  %v3118_v59 = vmax.f32 %v3086_v34, %v3102_v29  ;;  %v3060_v14 = vmul.f32 %v14981_v6, %v3021_v16  ;;  %v3023_v60 = vpop.f32.mrb[13].mxu1  ;;  %v15139_v29 = vld [vmem:[#allocation2 + $0x18] sm:$0xff]  ;;  %v19167_v11 = vrot.slane %v15132_v44, 2 }
 0x32b   : > { %v3174_v12 = vrot.slane %v3117_v62, 7  ;;  %v3119_v54 = vmax.f32 %v3087_v4, %v3103_v49  ;;  %v3061_v58 = vmul.f32 %v14992_v36, %v3023_v60  ;;  %v3025_v22 = vpop.f32.mrb[14].mxu1  ;;  %v3434_v33 = vmul.f32 %v15139_v29, %v19643_v43 }
 0x32c   : > { %v15135_v30 = vsel %vm1605_vm0, %v3168_v41, %v3172_v47  ;;  %v3176_v25 = vrot.slane %v3118_v59, 7  ;;  %v3088_v0 = vadd.f32 %v15002_v46, %v3060_v14  ;;  %v3062_v34 = vmul.f32 %v14981_v6, %v3025_v22  ;;  %v3027_v16 = vpop.f32.mrb[15].mxu1 }
 0x32d   : > { %3218 = vst [vmem:[#allocation2 + $0x30] sm:$0xff] %v15135_v30  ;;  %v15143_v49 = vsel %vm1605_vm0, %v3170_v1, %v3174_v12  ;;  %v3178_v60 = vrot.slane %v3119_v54, 7  ;;  %v3089_v39 = vadd.f32 %v15008_v48, %v3061_v58  ;;  %v3063_v4 = vmul.f32 %v14992_v36, %v3027_v16 }
 0x32e   : > { %3219 = vst [vmem:[#allocation2 + $0x38] sm:$0xff] %v15143_v49  ;;  %v15149_v41 = vsel %vm1605_vm0, %v3172_v47, %v3176_v25  ;;  %v3104_v14 = vmul.f32 0.2, %v3088_v0  ;;  %v3090_v62 = vadd.f32 %v15002_v46, %v3062_v34  ;;  %v3251_v59 = vmul.f32 %v15139_v29, %v19641_v9 }
 0x32f   : > { %19642 = vst [vmem:[#allocation34_spill] sm:$0xff] %v15149_v41  ;;  %3220 = vst [vmem:[#allocation2 + $0x40] sm:$0xff] %v15149_v41  ;;  %v15156_v1 = vsel %vm1605_vm0, %v3174_v12, %v3178_v60  ;;  %v3105_v54 = vmul.f32 0.2, %v3089_v39  ;;  %v3091_v58 = vadd.f32 %v15008_v48, %v3063_v4  ;;  %v3328_v22 = vmul.f32 %v15046_v40, %v15139_v29 }
 0x330   : > { %3221 = vst [vmem:[#allocation2 + $0x48] sm:$0xff] %v15156_v1  ;;  %v3120_v47 = vmax.f32 %v3088_v0, %v3104_v14  ;;  %v3106_v16 = vmul.f32 0.2, %v3090_v62  ;;  %v3279_v34 = vmul.f32 %v14989_v26, %v3251_v59  ;;  %v3465_v15 = vmul.f32 %v14968_v7, %v3434_v33 }
 0x331   : > { %v3121_v21 = vmax.f32 %v3089_v39, %v3105_v54  ;;  %v3107_v31 = vmul.f32 0.2, %v3091_v58  ;;  %v3031_v50 = vpop.f32.mrb[16].mxu1  ;;  %v3365_v12 = vrot.slane %v3328_v22, 1 }
 0x332   : > { %v3180_v41 = vrot.slane %v3120_v47, 7  ;;  %v3122_v4 = vmax.f32 %v3090_v62, %v3106_v16  ;;  %v3064_v38 = vmul.f32 %v14981_v6, %v3031_v50  ;;  %v3033_v40 = vpop.f32.mrb[17].mxu1 }
 0x333   : > { %v3182_v0 = vrot.slane %v3121_v21, 7  ;;  %v3123_v14 = vmax.f32 %v3091_v58, %v3107_v31  ;;  %v3065_v59 = vmul.f32 %v14992_v36, %v3033_v40  ;;  %v3035_v26 = vpop.f32.mrb[18].mxu1  ;;  %v3366_v39 = vsel %vm1855_vm4, %v19644_v63, %v3365_v12 }
 0x334   : > { %v15173_v54 = vsel %vm1605_vm0, %v3176_v25, %v3180_v41  ;;  %v3184_v22 = vrot.slane %v3122_v4, 7  ;;  %v3092_v62 = vadd.f32 %v15002_v46, %v3064_v38  ;;  %v3066_v50 = vmul.f32 %v14981_v6, %v3035_v26  ;;  %v3037_v47 = vpop.f32.mrb[19].mxu1 }
 0x335   : > { %3222 = vst [vmem:[#allocation2 + $0x50] sm:$0xff] %v15173_v54  ;;  %v15179_v33 = vsel %vm1605_vm0, %v3178_v60, %v3182_v0  ;;  %v3186_v21 = vrot.slane %v3123_v14, 7  ;;  %v3093_v31 = vadd.f32 %v15008_v48, %v3065_v59  ;;  %v3067_v24 = vmul.f32 %v14992_v36, %v3037_v47 }
 0x336   : > { %3223 = vst [vmem:[#allocation2 + $0x58] sm:$0xff] %v15179_v33  ;;  %v15185_v63 = vsel %vm1605_vm0, %v3180_v41, %v3184_v22  ;;  %v3108_v25 = vmul.f32 0.2, %v3092_v62  ;;  %v3094_v38 = vadd.f32 %v15002_v46, %v3066_v50  ;;  %v19645_v6 = vrot.slane %v15116_v23, 1  ;;  %v3628_v50 = vld [vmem:[#allocation2 + $0x18] sm:$0xfe] }
 0x337   : > { %3224 = vst [vmem:[#allocation2 + $0x60] sm:$0xff] %v15185_v63  ;;  %v15193_v40 = vsel %vm1605_vm0, %v3182_v0, %v3186_v21  ;;  %v3109_v60 = vmul.f32 0.2, %v3093_v31  ;;  %v3095_v36 = vadd.f32 %v15008_v48, %v3067_v24  ;;  %v3412_v58 = vadd.f32 %v3366_v39, %v15015_v55 }
 0x338   : > { %v3370_v26 = vsel %vm1855_vm4, %v3365_v12, %v19645_v6  ;;  %3225 = vst [vmem:[#allocation2 + $0x68] sm:$0xff] %v15193_v40  ;;  %v3124_v41 = vmax.f32 %v3092_v62, %v3108_v25  ;;  %v3110_v16 = vmul.f32 0.2, %v3094_v38  ;;  %v3502_v46 = vrot.slane %v3465_v15, 2 }
 0x339   : > { %v3414_v4 = vadd.f32 %v3370_v26, %v3279_v34  ;;  %v3125_v14 = vmax.f32 %v3093_v31, %v3109_v60  ;;  %v3111_v59 = vmul.f32 0.2, %v3095_v36  ;;  %v3567_v12 = vmul.f32 %v15139_v29, %v19632_v32 }
 0x33a   : > { %v3598_v0 = vmul.f32 %v15063_v2, %v15122_v28  ;;  %v3188_v47 = vrot.slane %v3124_v41, 7  ;;  %v3126_v6 = vmax.f32 %v3094_v38, %v3110_v16  ;;  %v19646_v48 = vrot.slane %v14995_v8, 2  ;;  %v3747_v38 = vld [vmem:[#allocation2 + $0x18] sm:$0xfc] }
 0x33b   : > { %v3507_v34 = vsel %vm2050_vm6, %v3502_v46, %v19167_v11  ;;  %v3190_v15 = vrot.slane %v3125_v14, 7  ;;  %v3127_v39 = vmax.f32 %v3095_v36, %v3111_v59  ;;  %v3596_v28 = vmul.f32 %v15063_v2, %v3567_v12 }
 0x33c   : > { %v3503_v55 = vsel %vm2050_vm6, %v19646_v48, %v3502_v46  ;;  %v3551_v31 = vadd.f32 %v3507_v34, %v3414_v4  ;;  %v3189_v29 = vsel %vm1605_vm0, %v3184_v22, %v3188_v47  ;;  %v3192_v24 = vrot.slane %v3126_v6, 7  ;;  %v4066_v34 = vld [vmem:[#allocation2 + $0x28] sm:$0xfc] }
 0x33d   : > { %v3549_v62 = vadd.f32 %v3503_v55, %v3412_v58  ;;  %v3645_v25 = vmul.f32 %v15059_v45, %v3628_v50  ;;  %3226 = vst [vmem:[#allocation2 + $0x70] sm:$0xff] %v3189_v29  ;;  %v15212_v8 = vsel %vm1605_vm0, %v3186_v21, %v3190_v15  ;;  %v3194_v26 = vrot.slane %v3127_v39, 7  ;;  %v3947_v50 = vld [vmem:[#allocation2 + $0x28] sm:$0xfe] }
 0x33e   : > { %19647 = vst [vmem:[#allocation35_spill] sm:$0xff] %v15212_v8  ;;  %v3614_v60 = vadd.f32 %v3598_v0, %v3551_v31  ;;  %v15216_v41 = vmul.f32 %v15059_v45, %v15143_v49  ;;  %3227 = vst [vmem:[#allocation2 + $0x78] sm:$0xff] %v15212_v8  ;;  %v3193_v22 = vsel %vm1605_vm0, %v3188_v47, %v3192_v24  ;;  %v3684_v16 = vrot.slane %v15126_v53, 1 }
 0x33f   : > { %3230 = vst [vmem:[#allocation2 + $0x90] sm:$0x1] %v3192_v24  ;;  %v3612_v36 = vadd.f32 %v3596_v28, %v3549_v62  ;;  %v3683_v58 = vrot.slane %v3645_v25, 1  ;;  %3228 = vst [vmem:[#allocation2 + $0x80] sm:$0xff] %v3193_v22  ;;  %v15222_v4 = vsel %vm1605_vm0, %v3190_v15, %v3194_v26  ;;  %v3751_v46 = vmul.f32 %v3747_v38, %v19628_v51 }
 0x340   : > { %19648 = vst [vmem:[#allocation33_spill] sm:$0xff] %v15222_v4  ;;  %3231 = vst [vmem:[#allocation2 + $0x98] sm:$0x1] %v3194_v26  ;;  %v19164_v21 = vrot.slane %v15216_v41, 1  ;;  %v3753_v14 = vmul.f32 %v15106_v57, %v19643_v43  ;;  %v3755_v12 = vmul.f32 %v15143_v49, %v19640_v27  ;;  %v3886_v53 = vmul.f32 %v15106_v57, %v19632_v32 }
 0x341   : > { %3229 = vst [vmem:[#allocation2 + $0x88] sm:$0xff] %v15222_v4  ;;  %v3685_v59 = vsel %vm1855_vm4, %v3683_v58, %v3684_v16  ;;  %v3888_v0 = vmul.f32 %v15143_v49, %v19641_v9  ;;  %v3782_v48 = vmul.f32 %v15069_v3, %v3751_v46  ;;  %v3964_v28 = vmul.f32 %v15094_v18, %v3947_v50 }
 0x342   : > { %v3689_v47 = vsel %vm1855_vm4, %v3684_v16, %v19164_v21  ;;  %v3731_v6 = vadd.f32 %v3685_v59, %v3612_v36  ;;  %v3784_v55 = vmul.f32 %v15069_v3, %v3753_v14  ;;  %v15242_v39 = vmul.f32 %v15069_v3, %v3755_v12  ;;  %v3234_v14 = vld [vmem:[#allocation2 + $0x10] sm:$0xff] }
 0x343   : > { %v3733_v15 = vadd.f32 %v3689_v47, %v3614_v60  ;;  %v3915_v62 = vmul.f32 %v15081_v17, %v3886_v53  ;;  %v3917_v31 = vmul.f32 %v15081_v17, %v3888_v0  ;;  %v3820_v29 = vrot.slane %v3782_v48, 2  ;;  %v19655_v21 = vld [vmem:[#allocation51_spill] sm:$0xff] }
 0x344   : > { %v3821_v24 = vrot.slane %v3784_v55, 2  ;;  %v3966_v25 = vmul.f32 %v15094_v18, %v15143_v49  ;;  %v19163_v38 = vrot.slane %v15242_v39, 2  ;;  %v15252_v26 = vmul.f32 %v15094_v18, %v15156_v1 }
 0x345   : > { %v4070_v60 = vmul.f32 %v4066_v34, %v19628_v51  ;;  %v4072_v22 = vmul.f32 %v15143_v49, %v19643_v43  ;;  %v4002_v58 = vrot.slane %v3964_v28, 1  ;;  %v4074_v46 = vmul.f32 %v15156_v1, %v19640_v27 }
 0x346   : > { %v3822_v36 = vsel %vm2050_vm6, %v3820_v29, %v3821_v24  ;;  %v4003_v16 = vrot.slane %v3966_v25, 1  ;;  %v3826_v59 = vsel %vm2050_vm6, %v3821_v24, %v19163_v38  ;;  %v19161_v53 = vrot.slane %v15252_v26, 1 }
 0x347   : > { %v3868_v12 = vadd.f32 %v3822_v36, %v3731_v6  ;;  %v4101_v0 = vmul.f32 %v14998_v37, %v4070_v60  ;;  %v3870_v50 = vadd.f32 %v3826_v59, %v3733_v15  ;;  %v4103_v48 = vmul.f32 %v14998_v37, %v4072_v22 }
 0x348   : > { %v4004_v47 = vsel %vm1855_vm4, %v4002_v58, %v4003_v16  ;;  %v15268_v55 = vmul.f32 %v14998_v37, %v4074_v46  ;;  %v4008_v29 = vsel %vm1855_vm4, %v4003_v16, %v19161_v53  ;;  %v3250_v6 = vmul.f32 %v3234_v14, %v19641_v9 }
 0x349   : > { %v3931_v34 = vadd.f32 %v3915_v62, %v3868_v12  ;;  %v4139_v28 = vrot.slane %v4101_v0, 2  ;;  %v3933_v24 = vadd.f32 %v3917_v31, %v3870_v50  ;;  %v4140_v25 = vrot.slane %v4103_v48, 2  ;;  %v3627_v48 = vld [vmem:[#allocation2 + $0x10] sm:$0xfe] }
 0x34a   : > { %v19160_v60 = vrot.slane %v15268_v55, 2  ;;  %v3327_v15 = vmul.f32 %v15037_v20, %v3234_v14  ;;  %v3278_v22 = vmul.f32 %v14986_v35, %v3250_v6  ;;  %v19158_v58 = vrot.slane %v15111_v10, 1 }
 0x34b   : > { %v4050_v36 = vadd.f32 %v4004_v47, %v3931_v34  ;;  %v3433_v62 = vmul.f32 %v3234_v14, %v19643_v43  ;;  %v4052_v46 = vadd.f32 %v4008_v29, %v3933_v24  ;;  %v4141_v59 = vsel %vm2050_vm6, %v4139_v28, %v4140_v25 }
 0x34c   : > { %v4145_v16 = vsel %vm2050_vm6, %v4140_v25, %v19160_v60  ;;  %v3362_v31 = vrot.slane %v3327_v15, 1  ;;  %v3435_v0 = vmul.f32 %v15100_v52, %v19640_v27  ;;  %v3566_v47 = vmul.f32 %v3234_v14, %v19632_v32  ;;  %v19653_v60 = vld [vmem:[#allocation78_spill] sm:$0xff] }
 0x34d   : > { %v4187_v12 = vadd.f32 %v4141_v59, %v4050_v36  ;;  %v3464_v50 = vmul.f32 %v14971_v5, %v3433_v62  ;;  %v4189_v34 = vadd.f32 %v4145_v16, %v4052_v46  ;;  %v19649_v6 = vrot.slane %v15085_v13, 1  ;;  %v3746_v62 = vld [vmem:[#allocation2 + $0x10] sm:$0xfc] }
 0x34e   : > { %v3368_v28 = vsel %vm1855_vm4, %v3362_v31, %v19158_v58  ;;  %v3568_v24 = vmul.f32 %v15100_v52, %v19641_v9  ;;  %v15297_v36 = vmul.f32 %v14971_v5, %v3435_v0  ;;  %v3595_v13 = vmul.f32 %v15056_v19, %v3566_v47 }
 0x34f   : > { %v3363_v29 = vsel %vm1855_vm4, %v19649_v6, %v3362_v31  ;;  %v3413_v15 = vadd.f32 %v3368_v28, %v3278_v22  ;;  %v3499_v14 = vrot.slane %v3464_v50, 2  ;;  %v4203_v46 = vpack.c.bf16 %v4189_v34, %v4187_v12 }
 0x350   : > { %v3411_v25 = vadd.f32 %v3363_v29, %v15029_v42  ;;  %v3597_v59 = vmul.f32 %v15056_v19, %v3568_v24  ;;  %v3644_v16 = vmul.f32 %v15049_v56, %v3627_v48  ;;  %v19650_v31 = vrot.slane %v15005_v61, 2 }
 0x351   : > { %v19159_v58 = vrot.slane %v15297_v36, 2  ;;  %v3646_v42 = vmul.f32 %v15049_v56, %v15100_v52  ;;  %v15310_v22 = vmul.f32 %v15049_v56, %v15135_v30  ;;  %4626 = vmatprep.mubr.bf16.mxu0 %v4203_v46  ;;  %4699 = vmatprep.mubr.bf16.mxu1 %v4203_v46  ;;  %v3750_v50 = vmul.f32 %v3746_v62, %v19628_v51  ;;  %v19651_v46 = vld [vmem:[#allocation76_spill] sm:$0xff]  ;;  %v3946_v62 = vld [vmem:[#allocation2 + $0x20] sm:$0xfe] }
 0x352   : > { %v3500_v6 = vsel %vm2050_vm6, %v19650_v31, %v3499_v14  ;;  %v3680_v0 = vrot.slane %v3644_v16, 1  ;;  %v3752_v61 = vmul.f32 %v15100_v52, %v19643_v43  ;;  %v3754_v29 = vmul.f32 %v15135_v30, %v19640_v27 }
 0x353   : > { %v3548_v12 = vadd.f32 %v3500_v6, %v3411_v25  ;;  %v3505_v47 = vsel %vm2050_vm6, %v3499_v14, %v19159_v58  ;;  %v3681_v48 = vrot.slane %v3646_v42, 1  ;;  %v19162_v34 = vrot.slane %v15310_v22, 1 }
 0x354   : > { %v3550_v28 = vadd.f32 %v3505_v47, %v3413_v15  ;;  %v3781_v25 = vmul.f32 %v19651_v46, %v3750_v50  ;;  %v3783_v16 = vmul.f32 %v19651_v46, %v3752_v61  ;;  %v15328_v14 = vmul.f32 %v19651_v46, %v3754_v29 }
 0x355   : > { %v3611_v24 = vadd.f32 %v3595_v13, %v3548_v12  ;;  %v3682_v31 = vsel %vm1855_vm4, %v3680_v0, %v3681_v48  ;;  %v3687_v6 = vsel %vm1855_vm4, %v3681_v48, %v19162_v34  ;;  %v3885_v42 = vmul.f32 %v15100_v52, %v19632_v32  ;;  %v19652_v0 = vld [vmem:[#allocation77_spill] sm:$0xff] }
 0x356   : > { %v3613_v58 = vadd.f32 %v3597_v59, %v3550_v28  ;;  %v3817_v13 = vrot.slane %v3781_v25, 2  ;;  %v3818_v12 = vrot.slane %v3783_v16, 2  ;;  %v19166_v50 = vrot.slane %v15328_v14, 2  ;;  %v4065_v48 = vld [vmem:[#allocation2 + $0x20] sm:$0xfc]  ;;  %v19654_v59 = vld [vmem:[#allocation34_spill] sm:$0xff] }
 0x357   : > { %v3730_v15 = vadd.f32 %v3682_v31, %v3611_v24  ;;  %v3887_v61 = vmul.f32 %v15135_v30, %v19641_v9  ;;  %v3914_v47 = vmul.f32 %v19652_v0, %v3885_v42  ;;  %v3963_v53 = vmul.f32 %v19653_v60, %v3946_v62 }
 0x358   : > { %v3732_v34 = vadd.f32 %v3687_v6, %v3613_v58  ;;  %v3819_v29 = vsel %vm2050_vm6, %v3817_v13, %v3818_v12  ;;  %v3965_v32 = vmul.f32 %v19653_v60, %v15135_v30  ;;  %v15342_v28 = vmul.f32 %v19653_v60, %v19654_v59 }
 0x359   : > { %v3824_v24 = vsel %vm2050_vm6, %v3818_v12, %v19166_v50  ;;  %v3867_v9 = vadd.f32 %v3819_v29, %v3730_v15  ;;  %v3916_v25 = vmul.f32 %v19652_v0, %v3887_v61  ;;  %v3999_v16 = vrot.slane %v3963_v53, 1 }
 0x35a   : > { %v3869_v62 = vadd.f32 %v3824_v24, %v3732_v34  ;;  %v4000_v31 = vrot.slane %v3965_v32, 1  ;;  %v19165_v58 = vrot.slane %v15342_v28, 1  ;;  %v4069_v6 = vmul.f32 %v4065_v48, %v19628_v51  ;;  %v19656_v34 = vld [vmem:[#allocation30_spill] sm:$0xff]  ;;  %v19658_v48 = vld [vmem:[#allocation56_spill] sm:$0xff]  ;;  %v19659_v24 = vld [vmem:[#allocation29_spill] sm:$0xff] }
 0x35b   : > { %v3930_v42 = vadd.f32 %v3914_v47, %v3867_v9  ;;  %v4071_v13 = vmul.f32 %v15135_v30, %v19643_v43  ;;  %v4073_v38 = vmul.f32 %v19654_v59, %v19640_v27  ;;  %v3253_v12 = vmul.f32 %v15106_v57, %v19655_v21 }
 0x35c   : > { %v3932_v15 = vadd.f32 %v3916_v25, %v3869_v62  ;;  %v4001_v61 = vsel %vm1855_vm4, %v3999_v16, %v4000_v31  ;;  %v4006_v53 = vsel %vm1855_vm4, %v4000_v31, %v19165_v58  ;;  %v4100_v29 = vmul.f32 %v19656_v34, %v4069_v6  ;;  %v19660_v25 = vld [vmem:[#allocation75_spill] sm:$0xff] }
 0x35d   : > { %v4049_v51 = vadd.f32 %v4001_v61, %v3930_v42  ;;  %v4102_v47 = vmul.f32 %v19656_v34, %v4071_v13  ;;  %v15363_v43 = vmul.f32 %v19656_v34, %v4073_v38  ;;  %v3255_v27 = vmul.f32 %v15143_v49, %v19658_v48  ;;  %v19661_v13 = vld [vmem:[#allocation52_spill] sm:$0xff] }
 0x35e   : > { %v4051_v32 = vadd.f32 %v4006_v53, %v3932_v15  ;;  %v4136_v57 = vrot.slane %v4100_v29, 2  ;;  %v3281_v9 = vmul.f32 %v19659_v24, %v3253_v12  ;;  %v3332_v16 = vmul.f32 %v19660_v25, %v15143_v49  ;;  %v19662_v15 = vld [vmem:[#allocation55_spill] sm:$0xff] }
 0x35f   : > { %19657 = vst [vmem:[#allocation76_spill] sm:$0xff] %v15363_v43  ;;  %v4137_v62 = vrot.slane %v4102_v47, 2  ;;  %v19172_v31 = vrot.slane %v15363_v43, 2  ;;  %v3283_v6 = vmul.f32 %v19659_v24, %v3255_v27  ;;  %v15374_v42 = vmul.f32 %v19660_v25, %v15156_v1 }
 0x360   : > { %v3373_v38 = vrot.slane %v3332_v16, 1  ;;  %v3438_v61 = vmul.f32 %v15143_v49, %v19661_v13  ;;  %v3440_v53 = vmul.f32 %v15156_v1, %v19662_v15  ;;  %v3571_v12 = vmul.f32 %v15143_v49, %v19655_v21 }
 0x361   : > { %v4138_v29 = vsel %vm2050_vm6, %v4136_v57, %v4137_v62  ;;  %v4143_v47 = vsel %vm2050_vm6, %v4137_v62, %v19172_v31  ;;  %v3377_v27 = vrot.slane %v15374_v42, 1  ;;  %v3573_v16 = vmul.f32 %v15156_v1, %v19658_v48 }
 0x362   : > { %v4186_v58 = vadd.f32 %v4138_v29, %v4049_v51  ;;  %v4188_v50 = vadd.f32 %v4143_v47, %v4051_v32  ;;  %v19663_v11 = vrot.slane %v15116_v23, 1  ;;  %v3469_v8 = vmul.f32 %v14968_v7, %v3438_v61 }
 0x363   : > { %v3378_v49 = vsel %vm1855_vm4, %v3373_v38, %v3377_v27  ;;  %v15397_v62 = vmul.f32 %v14968_v7, %v3440_v53  ;;  %v3600_v31 = vmul.f32 %v15063_v2, %v3571_v12  ;;  %v3602_v32 = vmul.f32 %v15063_v2, %v3573_v16 }
 0x364   : > { %v3374_v4 = vsel %vm1855_vm4, %v19663_v11, %v3373_v38  ;;  %v4202_v43 = vpack.c.bf16 %v4188_v50, %v4186_v58  ;;  %v3418_v24 = vadd.f32 %v3378_v49, %v3283_v6  ;;  %v3510_v51 = vrot.slane %v3469_v8, 2 }
 0x365   : > { %v3416_v57 = vadd.f32 %v3374_v4, %v3281_v9  ;;  %v3514_v23 = vrot.slane %v15397_v62, 2  ;;  %v3651_v11 = vmul.f32 %v15059_v45, %v15156_v1  ;;  %v15406_v61 = vmul.f32 %v15059_v45, %v15179_v33 }
 0x366   : > { %v3757_v4 = vmul.f32 %v15156_v1, %v19661_v13  ;;  %4627 = vmatmul.mubr.bf16.vlgmr.msra.gmra.mrb[8].mxu0 %v4202_v43  ;;  %4700 = vmatmul.mubr.bf16.vlgmr.msra.gmra.mrb[20].mxu1 %v4202_v43  ;;  %v19664_v50 = vrot.slane %v15132_v44, 2  ;;  %v3759_v58 = vmul.f32 %v15179_v33, %v19662_v15  ;;  %v3890_v9 = vmul.f32 %v15156_v1, %v19655_v21 }
 0x367   : > { %v3515_v6 = vsel %vm2050_vm6, %v3510_v51, %v3514_v23  ;;  %v3692_v53 = vrot.slane %v3651_v11, 1  ;;  %v3696_v12 = vrot.slane %v15406_v61, 1  ;;  %v3892_v47 = vmul.f32 %v15179_v33, %v19658_v48 }
 0x368   : > { %v3511_v8 = vsel %vm2050_vm6, %v19664_v50, %v3510_v51  ;;  %v3555_v29 = vadd.f32 %v3515_v6, %v3418_v24  ;;  %v3788_v43 = vmul.f32 %v15069_v3, %v3757_v4  ;;  %v15423_v44 = vmul.f32 %v15069_v3, %v3759_v58 }
 0x369   : > { %v3553_v38 = vadd.f32 %v3511_v8, %v3416_v57  ;;  %v19665_v49 = vrot.slane %v15216_v41, 1  ;;  %v3697_v57 = vsel %vm1855_vm4, %v3692_v53, %v3696_v12  ;;  %v3919_v51 = vmul.f32 %v15081_v17, %v3890_v9 }
 0x36a   : > { %v3618_v24 = vadd.f32 %v3602_v32, %v3555_v29  ;;  %v3829_v11 = vrot.slane %v3788_v43, 2  ;;  %v19175_v4 = vrot.slane %v15423_v44, 2  ;;  %v3921_v8 = vmul.f32 %v15081_v17, %v3892_v47 }
 0x36b   : > { %v3616_v16 = vadd.f32 %v3600_v31, %v3553_v38  ;;  %v3693_v50 = vsel %vm1855_vm4, %v19665_v49, %v3692_v53  ;;  %v3970_v31 = vmul.f32 %v15094_v18, %v15179_v33  ;;  %v15440_v41 = vmul.f32 %v15094_v18, %v15193_v40 }
 0x36c   : > { %v4076_v6 = vmul.f32 %v15179_v33, %v19661_v13  ;;  %v3737_v38 = vadd.f32 %v3697_v57, %v3618_v24  ;;  %v19666_v9 = vrot.slane %v15242_v39, 2  ;;  %v3834_v53 = vsel %vm2050_vm6, %v3829_v11, %v19175_v4 }
 0x36d   : > { %v3735_v58 = vadd.f32 %v3693_v50, %v3616_v16  ;;  %v4078_v29 = vmul.f32 %v15193_v40, %v19662_v15  ;;  %v4011_v47 = vrot.slane %v3970_v31, 1  ;;  %v4015_v16 = vrot.slane %v15440_v41, 1 }
 0x36e   : > { %v3830_v32 = vsel %vm2050_vm6, %v19666_v9, %v3829_v11  ;;  %v4107_v49 = vmul.f32 %v14998_v37, %v4076_v6  ;;  %v3874_v50 = vadd.f32 %v3834_v53, %v3737_v38  ;;  %v3252_v39 = vmul.f32 %v15100_v52, %v19655_v21 }
 0x36f   : > { %v3872_v43 = vadd.f32 %v3830_v32, %v3735_v58  ;;  %v15455_v57 = vmul.f32 %v14998_v37, %v4078_v29  ;;  %v3254_v24 = vmul.f32 %v15135_v30, %v19658_v48  ;;  %v19667_v9 = vrot.slane %v15252_v26, 1 }
 0x370   : > { %v4016_v31 = vsel %vm1855_vm4, %v4011_v47, %v4015_v16  ;;  %v4148_v6 = vrot.slane %v4107_v49, 2  ;;  %v3937_v38 = vadd.f32 %v3921_v8, %v3874_v50  ;;  %v3280_v53 = vmul.f32 %v14986_v35, %v3252_v39 }
 0x371   : > { %v3935_v11 = vadd.f32 %v3919_v51, %v3872_v43  ;;  %v4012_v58 = vsel %vm1855_vm4, %v19667_v9, %v4011_v47  ;;  %v19176_v32 = vrot.slane %v15455_v57, 2  ;;  %v3282_v52 = vmul.f32 %v14986_v35, %v3254_v24 }
 0x372   : > { %v19668_v4 = vrot.slane %v15268_v55, 2  ;;  %v3331_v26 = vmul.f32 %v15037_v20, %v15135_v30  ;;  %v15477_v43 = vmul.f32 %v15037_v20, %v19654_v59  ;;  %v4056_v47 = vadd.f32 %v4016_v31, %v3937_v38 }
 0x373   : > { %v4054_v29 = vadd.f32 %v4012_v58, %v3935_v11  ;;  %v4153_v8 = vsel %vm2050_vm6, %v4148_v6, %v19176_v32  ;;  %v3437_v49 = vmul.f32 %v15135_v30, %v19661_v13  ;;  %v3439_v55 = vmul.f32 %v19654_v59, %v19662_v15 }
 0x374   : > { %v4149_v51 = vsel %vm2050_vm6, %v19668_v4, %v4148_v6  ;;  %v3371_v4 = vrot.slane %v3331_v26, 1  ;;  %v3375_v39 = vrot.slane %v15477_v43, 1  ;;  %v3570_v24 = vmul.f32 %v15135_v30, %v19655_v21 }
 0x375   : > { %v4191_v50 = vadd.f32 %v4149_v51, %v4054_v29  ;;  %v4193_v11 = vadd.f32 %v4153_v8, %v4056_v47  ;;  %v3468_v9 = vmul.f32 %v14971_v5, %v3437_v49  ;;  %v15491_v58 = vmul.f32 %v14971_v5, %v3439_v55 }
 0x376   : > { %v3572_v31 = vmul.f32 %v19654_v59, %v19658_v48  ;;  %v19669_v6 = vrot.slane %v15111_v10, 1  ;;  %v3376_v29 = vsel %vm1855_vm4, %v3371_v4, %v3375_v39  ;;  %v3599_v51 = vmul.f32 %v15056_v19, %v3570_v24 }
 0x377   : > { %v3650_v30 = vmul.f32 %v15049_v56, %v19654_v59  ;;  %v4205_v26 = vpack.c.bf16 %v4193_v11, %v4191_v50  ;;  %v3417_v8 = vadd.f32 %v3376_v29, %v3282_v52  ;;  %v3508_v49 = vrot.slane %v3468_v9, 2 }
 0x378   : > { %v3372_v38 = vsel %vm1855_vm4, %v19669_v6, %v3371_v4  ;;  %v19180_v55 = vrot.slane %v15491_v58, 2  ;;  %v3601_v32 = vmul.f32 %v15056_v19, %v3572_v31  ;;  %v15508_v10 = vmul.f32 %v15049_v56, %v15173_v54 }
 0x379   : > { %v3415_v47 = vadd.f32 %v3372_v38, %v3280_v53  ;;  %v3690_v6 = vrot.slane %v3650_v30, 1  ;;  %4636 = vmatprep.mubr.bf16.mxu0 %v4205_v26  ;;  %4709 = vmatprep.mubr.bf16.mxu1 %v4205_v26  ;;  %v19670_v4 = vrot.slane %v15297_v36, 2  ;;  %v3756_v53 = vmul.f32 %v19654_v59, %v19661_v13 }
 0x37a   : > { %v3758_v52 = vmul.f32 %v15173_v54, %v19662_v15  ;;  %v3513_v50 = vsel %vm2050_vm6, %v3508_v49, %v19180_v55  ;;  %v19671_v9 = vrot.slane %v15310_v22, 1  ;;  %v19179_v38 = vrot.slane %v15508_v10, 1  ;;  %v19679_v55 = vld [vmem:[#allocation63_spill] sm:$0xff] }
 0x37b   : > { %v3509_v24 = vsel %vm2050_vm6, %v19670_v4, %v3508_v49  ;;  %v3554_v36 = vadd.f32 %v3513_v50, %v3417_v8  ;;  %v3787_v29 = vmul.f32 %v19651_v46, %v3756_v53  ;;  %v3889_v26 = vmul.f32 %v19654_v59, %v19655_v21 }
 0x37c   : > { %v3552_v11 = vadd.f32 %v3509_v24, %v3415_v47  ;;  %v3691_v31 = vsel %vm1855_vm4, %v19671_v9, %v3690_v6  ;;  %v15526_v30 = vmul.f32 %v19651_v46, %v3758_v52  ;;  %v3695_v47 = vsel %vm1855_vm4, %v3690_v6, %v19179_v38 }
 0x37d   : > { %v3891_v22 = vmul.f32 %v15173_v54, %v19658_v48  ;;  %v3969_v49 = vmul.f32 %v19653_v60, %v15173_v54  ;;  %v3617_v8 = vadd.f32 %v3601_v32, %v3554_v36  ;;  %v3827_v24 = vrot.slane %v3787_v29, 2 }
 0x37e   : > { %v3615_v4 = vadd.f32 %v3599_v51, %v3552_v11  ;;  %v19177_v53 = vrot.slane %v15526_v30, 2  ;;  %v3918_v52 = vmul.f32 %v19652_v0, %v3889_v26  ;;  %v15542_v51 = vmul.f32 %v19653_v60, %v15185_v63 }
 0x37f   : > { %v3920_v21 = vmul.f32 %v19652_v0, %v3891_v22  ;;  %v4009_v6 = vrot.slane %v3969_v49, 1  ;;  %v3736_v11 = vadd.f32 %v3695_v47, %v3617_v8  ;;  %v19672_v48 = vrot.slane %v15328_v14, 2  ;;  %v19674_v49 = vld [vmem:[#allocation65_spill] sm:$0xff] }
 0x380   : > { %v3734_v50 = vadd.f32 %v3691_v31, %v3615_v4  ;;  %v3832_v32 = vsel %vm2050_vm6, %v3827_v24, %v19177_v53  ;;  %v4075_v36 = vmul.f32 %v15173_v54, %v19661_v13  ;;  %v19673_v29 = vrot.slane %v15342_v28, 1 }
 0x381   : > { %v3828_v9 = vsel %vm2050_vm6, %v19672_v48, %v3827_v24  ;;  %v19178_v4 = vrot.slane %v15542_v51, 1  ;;  %v4077_v47 = vmul.f32 %v15185_v63, %v19662_v15  ;;  %v3873_v14 = vadd.f32 %v3832_v32, %v3736_v11  ;;  %v19675_v24 = vld [vmem:[#allocation66_spill] sm:$0xff]  ;;  %v19676_v32 = vld [vmem:[#allocation29_spill] sm:$0xff] }
 0x382   : > { %v3871_v31 = vadd.f32 %v3828_v9, %v3734_v50  ;;  %v4010_v26 = vsel %vm1855_vm4, %v19673_v29, %v4009_v6  ;;  %v4106_v22 = vmul.f32 %v19656_v34, %v4075_v36  ;;  %v3257_v8 = vmul.f32 %v15156_v1, %v19674_v49 }
 0x383   : > { %v3259_v48 = vmul.f32 %v15179_v33, %v19675_v24  ;;  %v4014_v28 = vsel %vm1855_vm4, %v4009_v6, %v19178_v4  ;;  %v15567_v50 = vmul.f32 %v19656_v34, %v4077_v47  ;;  %v3336_v15 = vmul.f32 %v19660_v25, %v15179_v33  ;;  %v19677_v47 = vld [vmem:[#allocation76_spill] sm:$0xff] }
 0x384   : > { %v3934_v13 = vadd.f32 %v3918_v52, %v3871_v31  ;;  %v3936_v11 = vadd.f32 %v3920_v21, %v3873_v14  ;;  %v4146_v9 = vrot.slane %v4106_v22, 2  ;;  %v3285_v36 = vmul.f32 %v19676_v32, %v3257_v8  ;;  %v19680_v14 = vld [vmem:[#allocation64_spill] sm:$0xff] }
 0x385   : > { %v3287_v1 = vmul.f32 %v19676_v32, %v3259_v48  ;;  %v4150_v53 = vrot.slane %v15567_v50, 2  ;;  %v15576_v52 = vmul.f32 %v19660_v25, %v15193_v40  ;;  %v3381_v6 = vrot.slane %v3336_v15, 1 }
 0x386   : > { %v4053_v29 = vadd.f32 %v4010_v26, %v3934_v13  ;;  %v4055_v31 = vadd.f32 %v4014_v28, %v3936_v11  ;;  %v19678_v4 = vrot.slane %v19677_v47, 2  ;;  %v3442_v21 = vmul.f32 %v15179_v33, %v19679_v55 }
 0x387   : > { %v3444_v22 = vmul.f32 %v15193_v40, %v19680_v14  ;;  %v4151_v26 = vsel %vm2050_vm6, %v4146_v9, %v4150_v53  ;;  %v3382_v48 = vsel %vm1855_vm4, %v3377_v27, %v3381_v6  ;;  %v19182_v13 = vrot.slane %v15576_v52, 1 }
 0x388   : > { %v4147_v38 = vsel %vm2050_vm6, %v19678_v4, %v4146_v9  ;;  %v4192_v28 = vadd.f32 %v4151_v26, %v4055_v31  ;;  %v3420_v15 = vadd.f32 %v3382_v48, %v3285_v36  ;;  %v3473_v4 = vmul.f32 %v14968_v7, %v3442_v21  ;;  %v19681_v26 = vld [vmem:[#allocation35_spill] sm:$0xff] }
 0x389   : > { %v4190_v8 = vadd.f32 %v4147_v38, %v4053_v29  ;;  %v15594_v11 = vmul.f32 %v14968_v7, %v3444_v22  ;;  %v3386_v47 = vsel %vm1855_vm4, %v3381_v6, %v19182_v13  ;;  %v3575_v38 = vmul.f32 %v15179_v33, %v19674_v49  ;;  %v19682_v13 = vld [vmem:[#allocation33_spill] sm:$0xff] }
 0x38a   : > { %v3577_v42 = vmul.f32 %v15193_v40, %v19675_v24  ;;  %v3655_v27 = vmul.f32 %v15059_v45, %v15193_v40  ;;  %v3422_v36 = vadd.f32 %v3386_v47, %v3287_v1  ;;  %v3518_v29 = vrot.slane %v3473_v4, 2 }
 0x38b   : > { %v4204_v9 = vpack.c.bf16 %v4192_v28, %v4190_v8  ;;  %v19181_v31 = vrot.slane %v15594_v11, 2  ;;  %v3604_v21 = vmul.f32 %v15063_v2, %v3575_v38  ;;  %v15610_v6 = vmul.f32 %v15059_v45, %v19681_v26 }
 0x38c   : > { %v3606_v22 = vmul.f32 %v15063_v2, %v3577_v42  ;;  %v3700_v33 = vrot.slane %v3655_v27, 1  ;;  %v3519_v48 = vsel %vm2050_vm6, %v3514_v23, %v3518_v29  ;;  %v3761_v8 = vmul.f32 %v15193_v40, %v19679_v55 }
 0x38d   : > { %4637 = vmatmul.mubr.bf16.gmra.mrb[12].mxu0 %v4204_v9  ;;  %4710 = vmatmul.mubr.bf16.gmra.mrb[24].mxu1 %v4204_v9  ;;  %v3523_v1 = vsel %vm2050_vm6, %v3518_v29, %v19181_v31  ;;  %v3557_v28 = vadd.f32 %v3519_v48, %v3420_v15  ;;  %v3704_v38 = vrot.slane %v15610_v6, 1  ;;  %v3763_v62 = vmul.f32 %v19681_v26, %v19680_v14 }
 0x38e   : > { %v3559_v4 = vadd.f32 %v3523_v1, %v3422_v36  ;;  %v3701_v47 = vsel %vm1855_vm4, %v3696_v12, %v3700_v33  ;;  %v3792_v23 = vmul.f32 %v15069_v3, %v3761_v8  ;;  %v3894_v42 = vmul.f32 %v15193_v40, %v19674_v49 }
 0x38f   : > { %v3896_v27 = vmul.f32 %v19681_v26, %v19675_v24  ;;  %v3620_v9 = vadd.f32 %v3604_v21, %v3557_v28  ;;  %v3705_v61 = vsel %vm1855_vm4, %v3700_v33, %v3704_v38  ;;  %v3974_v12 = vmul.f32 %v15094_v18, %v19681_v26 }
 0x390   : > { %v3622_v15 = vadd.f32 %v3606_v22, %v3559_v4  ;;  %v15637_v36 = vmul.f32 %v15069_v3, %v3763_v62  ;;  %v3837_v29 = vrot.slane %v3792_v23, 2  ;;  %v3923_v48 = vmul.f32 %v15081_v17, %v3894_v42 }
 0x391   : > { %v3925_v1 = vmul.f32 %v15081_v17, %v3896_v27  ;;  %v3739_v8 = vadd.f32 %v3701_v47, %v3620_v9  ;;  %v15643_v21 = vmul.f32 %v15094_v18, %v19682_v13  ;;  %v4019_v22 = vrot.slane %v3974_v12, 1 }
 0x392   : > { %v3741_v31 = vadd.f32 %v3705_v61, %v3622_v15  ;;  %v19683_v33 = vrot.slane %v15423_v44, 2  ;;  %v19183_v4 = vrot.slane %v15637_v36, 2  ;;  %v4080_v62 = vmul.f32 %v19681_v26, %v19679_v55 }
 0x393   : > { %v4082_v23 = vmul.f32 %v19682_v13, %v19680_v14  ;;  %v4020_v47 = vsel %vm1855_vm4, %v4015_v16, %v4019_v22  ;;  %v19185_v27 = vrot.slane %v15643_v21, 1  ;;  %v3256_v44 = vmul.f32 %v19654_v59, %v19674_v49 }
 0x394   : > { %v3838_v28 = vsel %vm2050_vm6, %v19683_v33, %v3837_v29  ;;  %v3842_v9 = vsel %vm2050_vm6, %v3837_v29, %v19183_v4  ;;  %v4111_v15 = vmul.f32 %v14998_v37, %v4080_v62  ;;  %v3258_v12 = vmul.f32 %v15173_v54, %v19675_v24 }
 0x395   : > { %v3876_v42 = vadd.f32 %v3838_v28, %v3739_v8  ;;  %v15664_v61 = vmul.f32 %v14998_v37, %v4082_v23  ;;  %v3878_v41 = vadd.f32 %v3842_v9, %v3741_v31  ;;  %v4024_v16 = vsel %vm1855_vm4, %v4019_v22, %v19185_v27 }
 0x396   : > { %v3284_v59 = vmul.f32 %v14986_v35, %v3256_v44  ;;  %v4156_v33 = vrot.slane %v4111_v15, 2  ;;  %v3286_v29 = vmul.f32 %v14986_v35, %v3258_v12  ;;  %v3335_v62 = vmul.f32 %v15037_v20, %v15173_v54 }
 0x397   : > { %v3939_v8 = vadd.f32 %v3923_v48, %v3876_v42  ;;  %v19184_v28 = vrot.slane %v15664_v61, 2  ;;  %v3941_v23 = vadd.f32 %v3925_v1, %v3878_v41  ;;  %v15678_v31 = vmul.f32 %v15037_v20, %v15185_v63 }
 0x398   : > { %v3441_v48 = vmul.f32 %v15173_v54, %v19679_v55  ;;  %v19684_v22 = vrot.slane %v15455_v57, 2  ;;  %v3379_v9 = vrot.slane %v3335_v62, 1  ;;  %v3443_v1 = vmul.f32 %v15185_v63, %v19680_v14 }
 0x399   : > { %v4058_v4 = vadd.f32 %v4020_v47, %v3939_v8  ;;  %v4161_v44 = vsel %vm2050_vm6, %v4156_v33, %v19184_v28  ;;  %v4060_v47 = vadd.f32 %v4024_v16, %v3941_v23  ;;  %v3383_v12 = vrot.slane %v15678_v31, 1  ;;  %v15692_v8 = vld [vmem:[#allocation2 + $0x70] sm:$0xff] }
 0x39a   : > { %v4157_v42 = vsel %vm2050_vm6, %v19684_v22, %v4156_v33  ;;  %v3472_v41 = vmul.f32 %v14971_v5, %v3441_v48  ;;  %v3380_v57 = vsel %vm1855_vm4, %v3375_v39, %v3379_v9  ;;  %v15698_v22 = vmul.f32 %v14971_v5, %v3443_v1 }
 0x39b   : > { %v4195_v15 = vadd.f32 %v4157_v42, %v4058_v4  ;;  %v3574_v33 = vmul.f32 %v15173_v54, %v19674_v49  ;;  %v3576_v16 = vmul.f32 %v15185_v63, %v19675_v24  ;;  %v4197_v4 = vadd.f32 %v4161_v44, %v4060_v47 }
 0x39c   : > { %v3384_v62 = vsel %vm1855_vm4, %v3379_v9, %v3383_v12  ;;  %v3419_v23 = vadd.f32 %v3380_v57, %v3284_v59  ;;  %v3516_v48 = vrot.slane %v3472_v41, 2  ;;  %v3520_v43 = vrot.slane %v15698_v22, 2 }
 0x39d   : > { %v3421_v42 = vadd.f32 %v3384_v62, %v3286_v29  ;;  %v3603_v39 = vmul.f32 %v15056_v19, %v3574_v33  ;;  %v3605_v1 = vmul.f32 %v15056_v19, %v3576_v16  ;;  %v4207_v28 = vpack.c.bf16 %v4197_v4, %v4195_v15  ;;  %v15729_v16 = vld [vmem:[#allocation2 + $0x80] sm:$0xff] }
 0x39e   : > { %v19685_v54 = vrot.slane %v15491_v58, 2  ;;  %v3654_v44 = vmul.f32 %v15049_v56, %v15185_v63  ;;  %v15717_v9 = vmul.f32 %v15049_v56, %v15692_v8  ;;  %v3521_v59 = vsel %vm2050_vm6, %v3516_v48, %v3520_v43 }
 0x39f   : > { %v3760_v47 = vmul.f32 %v15185_v63, %v19679_v55  ;;  %v3762_v58 = vmul.f32 %v15692_v8, %v19680_v14  ;;  %4646 = vmatprep.mubr.bf16.mxu0 %v4207_v28  ;;  %4719 = vmatprep.mubr.bf16.mxu1 %v4207_v28  ;;  %v3558_v15 = vadd.f32 %v3521_v59, %v3421_v42  ;;  %v19686_v28 = vrot.slane %v15508_v10, 1 }
 0x3a0   : > { %v3517_v27 = vsel %vm2050_vm6, %v19685_v54, %v3516_v48  ;;  %v3698_v41 = vrot.slane %v3654_v44, 1  ;;  %v3702_v57 = vrot.slane %v15717_v9, 1  ;;  %v3893_v33 = vmul.f32 %v15185_v63, %v19674_v49 }
 0x3a1   : > { %v3556_v29 = vadd.f32 %v3517_v27, %v3419_v23  ;;  %v3791_v27 = vmul.f32 %v19651_v46, %v3760_v47  ;;  %v15733_v62 = vmul.f32 %v19651_v46, %v3762_v58  ;;  %v3895_v23 = vmul.f32 %v15692_v8, %v19675_v24 }
 0x3a2   : > { %v3621_v48 = vadd.f32 %v3605_v1, %v3558_v15  ;;  %v3699_v42 = vsel %vm1855_vm4, %v19686_v28, %v3698_v41  ;;  %v3703_v63 = vsel %vm1855_vm4, %v3698_v41, %v3702_v57  ;;  %v3922_v49 = vmul.f32 %v19652_v0, %v3893_v33  ;;  %v19688_v33 = vld [vmem:[#allocation42_spill] sm:$0xff] }
 0x3a3   : > { %v3619_v4 = vadd.f32 %v3603_v39, %v3556_v29  ;;  %v3835_v54 = vrot.slane %v3791_v27, 2  ;;  %v19186_v44 = vrot.slane %v15733_v62, 2  ;;  %v3924_v59 = vmul.f32 %v19652_v0, %v3895_v23 }
 0x3a4   : > { %v3740_v29 = vadd.f32 %v3703_v63, %v3621_v48  ;;  %v3973_v24 = vmul.f32 %v19653_v60, %v15692_v8  ;;  %v15750_v10 = vmul.f32 %v19653_v60, %v15729_v16  ;;  %v4079_v1 = vmul.f32 %v15692_v8, %v19679_v55 }
 0x3a5   : > { %v3738_v39 = vadd.f32 %v3699_v42, %v3619_v4  ;;  %v19687_v47 = vrot.slane %v15526_v30, 2  ;;  %v3840_v15 = vsel %vm2050_vm6, %v3835_v54, %v19186_v44  ;;  %v4081_v41 = vmul.f32 %v15729_v16, %v19680_v14  ;;  %v19689_v42 = vld [vmem:[#allocation50_spill] sm:$0xff] }
 0x3a6   : > { %v3261_v4 = vmul.f32 %v15193_v40, %v19688_v33  ;;  %v3877_v23 = vadd.f32 %v3840_v15, %v3740_v29  ;;  %v4017_v48 = vrot.slane %v3973_v24, 1  ;;  %v19187_v28 = vrot.slane %v15750_v10, 1  ;;  %v3430_v24 = vld [vmem:[#allocation2 + $0x88] sm:$0x3] }
 0x3a7   : > { %v3836_v58 = vsel %vm2050_vm6, %v19687_v47, %v3835_v54  ;;  %v4110_v55 = vmul.f32 %v19656_v34, %v4079_v1  ;;  %v15767_v30 = vmul.f32 %v19656_v34, %v4081_v41  ;;  %v3263_v63 = vmul.f32 %v19681_v26, %v19689_v42  ;;  %v3311_v47 = vld [vmem:[#allocation2 + $0x88] sm:$0x1] }
 0x3a8   : > { %v3875_v27 = vadd.f32 %v3836_v58, %v3738_v39  ;;  %v3289_v54 = vmul.f32 %v19676_v32, %v3261_v4  ;;  %v3940_v44 = vadd.f32 %v3924_v59, %v3877_v23  ;;  %v19690_v40 = vrot.slane %v15542_v51, 1  ;;  %v19691_v51 = vld [vmem:[#allocation58_spill] sm:$0xff] }
 0x3a9   : > { %v4022_v29 = vsel %vm1855_vm4, %v4017_v48, %v19187_v28  ;;  %v4154_v1 = vrot.slane %v4110_v55, 2  ;;  %v4158_v58 = vrot.slane %v15767_v30, 2  ;;  %v3291_v15 = vmul.f32 %v19676_v32, %v3263_v63  ;;  %v19692_v32 = vld [vmem:[#allocation68_spill] sm:$0xff]  ;;  %v19703_v30 = vld [vmem:[#allocation26_spill] sm:$0xff] }
 0x3aa   : > { %v3938_v14 = vadd.f32 %v3922_v49, %v3875_v27  ;;  %v4018_v39 = vsel %vm1855_vm4, %v19690_v40, %v4017_v48  ;;  %v3340_v41 = vmul.f32 %v19660_v25, %v19681_v26  ;;  %v4059_v49 = vadd.f32 %v4022_v29, %v3940_v44  ;;  %v3630_v29 = vld [vmem:[#allocation2 + $0x98] sm:$0x1] }
 0x3ab   : > { %v3342_v59 = vmul.f32 %v19660_v25, %v3311_v47  ;;  %v3446_v27 = vmul.f32 %v19681_v26, %v19691_v51  ;;  %v4155_v23 = vsel %vm2050_vm6, %v4150_v53, %v4154_v1  ;;  %v4159_v48 = vsel %vm2050_vm6, %v4154_v1, %v4158_v58 }
 0x3ac   : > { %v4057_v4 = vadd.f32 %v4018_v39, %v3938_v14  ;;  %v3389_v55 = vrot.slane %v3340_v41, 1  ;;  %v3448_v63 = vmul.f32 %v3430_v24, %v19692_v32  ;;  %v4196_v28 = vadd.f32 %v4159_v48, %v4059_v49  ;;  %v3749_v49 = vld [vmem:[#allocation2 + $0x98] sm:$0x3] }
 0x3ad   : > { %v3393_v14 = vrot.slane %v3342_v59, 1  ;;  %v3477_v44 = vmul.f32 %v14968_v7, %v3446_v27  ;;  %v19693_v25 = vrot.slane %v15576_v52, 1  ;;  %v3579_v53 = vmul.f32 %v19681_v26, %v19688_v33 }
 0x3ae   : > { %v4194_v40 = vadd.f32 %v4155_v23, %v4057_v4  ;;  %v3479_v50 = vmul.f32 %v14968_v7, %v3448_v63  ;;  %v3581_v39 = vmul.f32 %v19682_v13, %v19689_v42  ;;  %v19694_v7 = vrot.slane %v15594_v11, 2 }
 0x3af   : > { %v3390_v47 = vsel %vm1855_vm4, %v19693_v25, %v3389_v55  ;;  %v3394_v24 = vsel %vm1855_vm4, %v3389_v55, %v3393_v14  ;;  %v3526_v4 = vrot.slane %v3477_v44, 2  ;;  %v3608_v52 = vmul.f32 %v15063_v2, %v3579_v53  ;;  %v3949_v53 = vld [vmem:[#allocation2 + $0xa8] sm:$0x1] }
 0x3b0   : > { %v4206_v1 = vpack.c.bf16 %v4196_v28, %v4194_v40  ;;  %v3424_v41 = vadd.f32 %v3390_v47, %v3289_v54  ;;  %v3426_v59 = vadd.f32 %v3394_v24, %v3291_v15  ;;  %v3530_v27 = vrot.slane %v3479_v50, 2  ;;  %v3884_v54 = vld [vmem:[#allocation2 + $0x98] sm:$0xff] }
 0x3b1   : > { %v3610_v23 = vmul.f32 %v15063_v2, %v3581_v39  ;;  %v3527_v26 = vsel %vm2050_vm6, %v19694_v7, %v3526_v4  ;;  %v3659_v28 = vmul.f32 %v15059_v45, %v19682_v13  ;;  %v3661_v48 = vmul.f32 %v15059_v45, %v3630_v29  ;;  %v12799_v7 = vld [vmem:[#allocation2 + $0x60] sm:$0xff] }
 0x3b2   : > { %4647 = vmatmul.mubr.bf16.gmra.mrb[16].mxu0 %v4206_v1  ;;  %4720 = vmatmul.mubr.bf16.gmra.mrb[28].mxu1 %v4206_v1  ;;  %v3531_v55 = vsel %vm2050_vm6, %v3526_v4, %v3530_v27  ;;  %v3561_v15 = vadd.f32 %v3527_v26, %v3424_v41  ;;  %v3765_v63 = vmul.f32 %v19682_v13, %v19691_v51  ;;  %v19695_v6 = vrot.slane %v15637_v36, 2 }
 0x3b3   : > { %v3767_v2 = vmul.f32 %v3749_v49, %v19692_v32  ;;  %v3563_v40 = vadd.f32 %v3531_v55, %v3426_v59  ;;  %v3708_v14 = vrot.slane %v3659_v28, 1  ;;  %v3712_v44 = vrot.slane %v3661_v48, 1 }
 0x3b4   : > { %v3898_v11 = vmul.f32 %v19682_v13, %v19688_v33  ;;  %v3624_v25 = vadd.f32 %v3608_v52, %v3561_v15  ;;  %v3796_v47 = vmul.f32 %v15069_v3, %v3765_v63  ;;  %v3900_v50 = vmul.f32 %v3884_v54, %v19689_v42  ;;  %v3310_v63 = vld [vmem:[#allocation2 + $0x80] sm:$0x1] }
 0x3b5   : > { %v3798_v45 = vmul.f32 %v15069_v3, %v3767_v2  ;;  %v3626_v39 = vadd.f32 %v3610_v23, %v3563_v40  ;;  %v3709_v29 = vsel %vm1855_vm4, %v3704_v38, %v3708_v14  ;;  %v3713_v1 = vsel %vm1855_vm4, %v3708_v14, %v3712_v44  ;;  %v3429_v14 = vld [vmem:[#allocation2 + $0x80] sm:$0x3] }
 0x3b6   : > { %v3927_v24 = vmul.f32 %v15081_v17, %v3898_v11  ;;  %v3743_v41 = vadd.f32 %v3709_v29, %v3624_v25  ;;  %v3845_v4 = vrot.slane %v3796_v47, 2  ;;  %v3929_v49 = vmul.f32 %v15081_v17, %v3900_v50 }
 0x3b7   : > { %v3849_v13 = vrot.slane %v3798_v45, 2  ;;  %v3745_v59 = vadd.f32 %v3713_v1, %v3626_v39  ;;  %v3978_v3 = vmul.f32 %v15094_v18, %v3884_v54  ;;  %v3980_v27 = vmul.f32 %v15094_v18, %v3949_v53 }
 0x3b8   : > { %v4084_v52 = vmul.f32 %v3884_v54, %v19691_v51  ;;  %v3846_v38 = vsel %vm2050_vm6, %v19695_v6, %v3845_v4  ;;  %v3260_v26 = vmul.f32 %v12799_v7, %v19688_v33  ;;  %v3262_v28 = vmul.f32 %v15692_v8, %v19689_v42  ;;  %v19696_v54 = vld [vmem:[#allocation74_spill] sm:$0xff]  ;;  %v4067_v6 = vld [vmem:[#allocation2 + $0xa0] sm:$0x3]  ;;  %v3748_v7 = vld [vmem:[#allocation2 + $0x90] sm:$0x3] }
 0x3b9   : > { %v3850_v23 = vsel %vm2050_vm6, %v3845_v4, %v3849_v13  ;;  %v3880_v17 = vadd.f32 %v3846_v38, %v3743_v41  ;;  %v4027_v55 = vrot.slane %v3978_v3, 1  ;;  %v4031_v15 = vrot.slane %v3980_v27, 1 }
 0x3ba   : > { %v3882_v48 = vadd.f32 %v3850_v23, %v3745_v59  ;;  %v4115_v18 = vmul.f32 %v14998_v37, %v4084_v52  ;;  %v4168_v2 = vrot.slane %v19696_v54, 2  ;;  %v3288_v36 = vmul.f32 %v14986_v35, %v3260_v26  ;;  %v3629_v52 = vld [vmem:[#allocation2 + $0x90] sm:$0x1] }
 0x3bb   : > { %v3339_v40 = vmul.f32 %v15037_v20, %v15692_v8  ;;  %v3943_v44 = vadd.f32 %v3927_v24, %v3880_v17  ;;  %v19697_v25 = vrot.slane %v15643_v21, 1  ;;  %v4032_v45 = vsel %vm1855_vm4, %v4027_v55, %v4031_v15 }
 0x3bc   : > { %v3945_v11 = vadd.f32 %v3929_v49, %v3882_v48  ;;  %v4164_v50 = vrot.slane %v4115_v18, 2  ;;  %v3341_v53 = vmul.f32 %v15037_v20, %v3310_v63  ;;  %v3445_v39 = vmul.f32 %v15692_v8, %v19691_v51 }
 0x3bd   : > { %v4028_v47 = vsel %vm1855_vm4, %v19697_v25, %v4027_v55  ;;  %v3387_v37 = vrot.slane %v3339_v40, 1  ;;  %v3290_v41 = vmul.f32 %v14986_v35, %v3262_v28  ;;  %v3447_v24 = vmul.f32 %v3429_v14, %v19692_v32  ;;  %v3883_v14 = vld [vmem:[#allocation2 + $0x90] sm:$0xff] }
 0x3be   : > { %v4062_v29 = vadd.f32 %v4028_v47, %v3943_v44  ;;  %v4064_v1 = vadd.f32 %v4032_v45, %v3945_v11  ;;  %v19698_v4 = vrot.slane %v15664_v61, 2  ;;  %v4169_v13 = vsel %vm2050_vm6, %v4164_v50, %v4168_v2 }
 0x3bf   : > { %v3388_v20 = vsel %vm1855_vm4, %v3383_v12, %v3387_v37  ;;  %v3391_v49 = vrot.slane %v3341_v53, 1  ;;  %v3476_v27 = vmul.f32 %v14971_v5, %v3445_v39  ;;  %v3578_v35 = vmul.f32 %v15692_v8, %v19688_v33 }
 0x3c0   : > { %v4165_v21 = vsel %vm2050_vm6, %v19698_v4, %v4164_v50  ;;  %v4201_v3 = vadd.f32 %v4169_v13, %v4064_v1  ;;  %v3423_v38 = vadd.f32 %v3388_v20, %v3288_v36  ;;  %v3478_v23 = vmul.f32 %v14971_v5, %v3447_v24 }
 0x3c1   : > { %v4199_v59 = vadd.f32 %v4165_v21, %v4062_v29  ;;  %v3392_v61 = vsel %vm1855_vm4, %v3387_v37, %v3391_v49  ;;  %v3580_v31 = vmul.f32 %v15729_v16, %v19689_v42  ;;  %v3524_v28 = vrot.slane %v3476_v27, 2 }
 0x3c2   : > { %v3425_v26 = vadd.f32 %v3392_v61, %v3290_v41  ;;  %v3658_v17 = vmul.f32 %v15049_v56, %v15729_v16  ;;  %v3528_v48 = vrot.slane %v3478_v23, 2  ;;  %v3660_v8 = vmul.f32 %v15049_v56, %v3629_v52 }
 0x3c3   : > { %v4209_v12 = vpack.c.bf16 %v4201_v3, %v4199_v59  ;;  %v3764_v55 = vmul.f32 %v15729_v16, %v19691_v51  ;;  %v4085_v15 = vmul.f32 %v4067_v6, %v19692_v32  ;;  %v3525_v5 = vsel %vm2050_vm6, %v3520_v43, %v3524_v28  ;;  %v3948_v43 = vld [vmem:[#allocation2 + $0xa0] sm:$0x1] }
 0x3c4   : > { %v3607_v63 = vmul.f32 %v15056_v19, %v3578_v35  ;;  %v3706_v18 = vrot.slane %v3658_v17, 1  ;;  %v3766_v54 = vmul.f32 %v3748_v7, %v19692_v32  ;;  %v3529_v2 = vsel %vm2050_vm6, %v3524_v28, %v3528_v48  ;;  %v19706_v28 = vld [vmem:[#allocation32_spill] sm:$0xff] }
 0x3c5   : > { %4656 = vmatprep.mubr.bf16.mxu0 %v4209_v12  ;;  %4729 = vmatprep.mubr.bf16.mxu1 %v4209_v12  ;;  %v3560_v36 = vadd.f32 %v3525_v5, %v3423_v38  ;;  %v3710_v56 = vrot.slane %v3660_v8, 1  ;;  %v3795_v40 = vmul.f32 %v19651_v46, %v3764_v55  ;;  %v3562_v44 = vadd.f32 %v3529_v2, %v3425_v26  ;;  %v4740_v12 = vld [vmem:[%s19702_s15] sm:$0xf]  ;;  %v19707_v48 = vld [vmem:[#allocation40_spill] sm:$0xff]  ;;  %v19709_v55 = vld [vmem:[#allocation27_spill] sm:$0xff] }
 0x3c6   : > { %v3609_v11 = vmul.f32 %v15056_v19, %v3580_v31  ;;  %v3797_v25 = vmul.f32 %v19651_v46, %v3766_v54  ;;  %v3897_v22 = vmul.f32 %v15729_v16, %v19688_v33  ;;  %v3707_v32 = vsel %vm1855_vm4, %v3702_v57, %v3706_v18  ;;  %v12800_v31 = vld [vmem:[#allocation4] sm:$0xff] }
 0x3c7   : > { %v3623_v47 = vadd.f32 %v3607_v63, %v3560_v36  ;;  %v3843_v45 = vrot.slane %v3795_v40, 2  ;;  %v4116_v50 = vmul.f32 %v19656_v34, %v4085_v15  ;;  %v3899_v39 = vmul.f32 %v3883_v14, %v19689_v42 }
 0x3c8   : > { %v3625_v53 = vadd.f32 %v3609_v11, %v3562_v44  ;;  %v3847_v37 = vrot.slane %v3797_v25, 2  ;;  %v3977_v19 = vmul.f32 %v19653_v60, %v3883_v14  ;;  %v3711_v46 = vsel %vm1855_vm4, %v3706_v18, %v3710_v56 }
 0x3c9   : > { %v3742_v29 = vadd.f32 %v3707_v32, %v3623_v47  ;;  %v3979_v16 = vmul.f32 %v19653_v60, %v3948_v43  ;;  %v4083_v33 = vmul.f32 %v3883_v14, %v19691_v51  ;;  %v19699_v9 = vrot.slane %v15733_v62, 2 }
 0x3ca   : > { %v3744_v1 = vadd.f32 %v3711_v46, %v3625_v53  ;;  %v3926_v41 = vmul.f32 %v19652_v0, %v3897_v22  ;;  %v4025_v24 = vrot.slane %v3977_v19, 1  ;;  %v3848_v4 = vsel %vm2050_vm6, %v3843_v45, %v3847_v37 }
 0x3cb   : > { %v3844_v57 = vsel %vm2050_vm6, %v19699_v9, %v3843_v45  ;;  %v4029_v21 = vrot.slane %v3979_v16, 1  ;;  %v4114_v13 = vmul.f32 %v19656_v34, %v4083_v33  ;;  %v3928_v49 = vmul.f32 %v19652_v0, %v3899_v39 }
 0x3cc   : > { %v3879_v42 = vadd.f32 %v3844_v57, %v3742_v29  ;;  %v3881_v20 = vadd.f32 %v3848_v4, %v3744_v1  ;;  %v19700_v3 = vrot.slane %v15750_v10, 1  ;;  %v4166_v52 = vrot.slane %v4116_v50, 2  ;;  %v15904_v10 = vpop.permute.xlu0 %5113  ;;  %v19713_v1 = vld [vmem:[#allocation57_spill] sm:$0xff] }
 0x3cd   : > { %v4162_v59 = vrot.slane %v4114_v13, 2  ;;  %v4030_v27 = vsel %vm1855_vm4, %v4025_v24, %v4029_v21  ;;  %19701 = vst [vmem:[#allocation77_spill] sm:$0xff] %v15904_v10  ;;  %v15912_v26 = vsub.s32 3, %v19703_v30  ;;  %v15918_v17 = vrot.slane %v4740_v12, %v19706_v28 }
 0x3ce   : > { %v3942_v60 = vadd.f32 %v3926_v41, %v3879_v42  ;;  %v3944_v51 = vadd.f32 %v3928_v49, %v3881_v20  ;;  %v4026_v62 = vsel %vm1855_vm4, %v19700_v3, %v4025_v24  ;;  %v15921_v8 = vrot.slane %v4740_v12, %v19707_v48  ;;  %v5176_v20 = vld [vmem:[#allocation3] sm:$0xfe] }
 0x3cf   : > { %v4163_v61 = vsel %vm2050_vm6, %v4158_v58, %v4162_v59  ;;  %v4167_v34 = vsel %vm2050_vm6, %v4162_v59, %v4166_v52  ;;  %19704 = vst [vmem:[#allocation78_spill] sm:$0xff] %v15912_v26  ;;  %v4794_v58 = vld [vmem:[%s19705_s21] sm:$0xf]  ;;  %v15924_v15 = vrot.slane %v4740_v12, %v19709_v55  ;;  %v15927_v5 = vrot.slane %v4740_v12, %v15912_v26  ;;  %v5177_v59 = vld [vmem:[#allocation3 + $0x8] sm:$0xfe]  ;;  %v12801_v12 = vld [vmem:[#allocation3] sm:$0xff] }
 0x3d0   : > { %v4061_v35 = vadd.f32 %v4026_v62, %v3942_v60  ;;  %v4063_v6 = vadd.f32 %v4030_v27, %v3944_v51  ;;  %v15906_v7 = vpop.permute.xlu0 %5397  ;;  %19708 = vst [vmem:[#allocation34_spill] sm:$0xff] %v15921_v8  ;;  %v15932_v18 = vrot.slane %v4794_v58, %v19706_v28  ;;  %v15935_v54 = vrot.slane %v4794_v58, %v19707_v48  ;;  %v15972_v51 = vld [vmem:[#allocation3] sm:$0xfc]  ;;  %v5381_v27 = vld [vmem:[#allocation3 + $0x8] sm:$0xfc]  ;;  %s20138_s21 = sld [smem:[#allocation117_spill]] }
 0x3d1   : > { %v15938_v56 = vrot.slane %v4794_v58, %v19709_v55  ;;  %v15941_v40 = vrot.slane %v4794_v58, %v15912_v26  ;;  %vm5136_vm7 = vcmp.eq.s32.totalorder %v15904_v10, 1  ;;  %vm5137_vm9 = vcmp.eq.s32.totalorder %v19713_v1, 1 }
 0x3d2   : > { %v4198_v38 = vadd.f32 %v4163_v61, %v4061_v35  ;;  %v4200_v0 = vadd.f32 %v4167_v34, %v4063_v6  ;;  %v15976_v35 = vld [vmem:[#allocation3 + $0x10] sm:$0xfe]  ;;  %v15984_v61 = vld [vmem:[#allocation3 + $0x18] sm:$0xfe]  ;;  %vm5420_vm11 = vcmp.eq.s32.totalorder %v15906_v7, 1 }
 0x3d3   : > { %19711 = vst [vmem:[#allocation30_spill] sm:$0xff] %v15938_v56  ;;  %19712 = vst [vmem:[#allocation56_spill] sm:$0xff] %v15941_v40  ;;  %v15986_v34 = vld [vmem:[#allocation3 + $0x18] sm:$0xfc]  ;;  %v16000_v58 = vsel %vm5136_vm7, %v12801_v12, -1e+30 }
 0x3d4   : > { %v4208_v23 = vpack.c.bf16 %v4200_v0, %v4198_v38  ;;  %v15929_v63 = vpop.permute.xlu0 %5119  ;;  %19714 = vst [vmem:[#allocation75_spill] sm:$0xff] %v15976_v35  ;;  %v15988_v38 = vld [vmem:[#allocation3 + $0x10] sm:$0xfc]  ;;  %19717 = vst [vmem:[#allocation55_spill] sm:$0xff] %v16000_v58 }
 0x3d5   : > { %19710 = vst [vmem:[#allocation51_spill] sm:$0xff] %v15929_v63  ;;  %vm19242_vm8 = vcmp.eq.s32.totalorder %v15929_v63, 1  ;;  %19715 = vst [vmem:[#allocation52_spill] sm:$0xff] %v15988_v38  ;;  %v19716_v0 = vld [vmem:[#allocation61_spill] sm:$0xff] }
 0x3d6   : > { %4657 = vmatmul.mubr.bf16.gmra.mrb[20].mxu0 %v4208_v23  ;;  %4730 = vmatmul.mubr.bf16.gmra.mrb[32].mxu1 %v4208_v23  ;;  %vm5421_vm10 = vcmp.eq.s32.totalorder %v19716_v0, 1 }
 0x3d7   : > { %6384 = vmatprep.mubr.f32.mxu0 %v12800_v31 }
 0x439   : > { %v4628_v2 = vpop.f32.mrb[8].mxu0  ;;  %v4701_v36 = vpop.f32.mrb[20].mxu1 }
 0x43a   : > { %v4762_v14 = vmul.f32 %v15918_v17, %v4628_v2  ;;  %v4764_v44 = vmul.f32 %v15921_v8, %v4701_v36  ;;  %v4630_v11 = vpop.f32.mrb[9].mxu0  ;;  %v4703_v25 = vpop.f32.mrb[21].mxu1  ;;  %v5251_v2 = vrot.slane %v5177_v59, 1  ;;  %v5439_v36 = vrot.slane %v5381_v27, 2 }
 0x43b   : > { %v4763_v22 = vmul.f32 %v15924_v15, %v4630_v11  ;;  %v4765_v43 = vmul.f32 %v15927_v5, %v4703_v25  ;;  %v4632_v47 = vpop.f32.mrb[10].mxu0  ;;  %v4705_v32 = vpop.f32.mrb[22].mxu1  ;;  %v16074_v25 = vld [vmem:[#allocation3 + $0x148] sm:$0x3]  ;;  %v16100_v11 = vld [vmem:[#allocation3 + $0x140] sm:$0x1] }
 0x43c   : > { %v4816_v45 = vadd.f32 %v15932_v18, %v4762_v14  ;;  %v4818_v50 = vadd.f32 %v15935_v54, %v4764_v44  ;;  %v4766_v53 = vmul.f32 %v15918_v17, %v4632_v47  ;;  %v4768_v37 = vmul.f32 %v15921_v8, %v4705_v32  ;;  %v4634_v39 = vpop.f32.mrb[11].mxu0  ;;  %v4707_v19 = vpop.f32.mrb[23].mxu1  ;;  %19719 = vst [vmem:[#allocation66_spill] sm:$0xff] %v16074_v25 }
 0x43d   : > { %v4817_v46 = vadd.f32 %v15938_v56, %v4763_v22  ;;  %v4819_v29 = vadd.f32 %v15941_v40, %v4765_v43  ;;  %v4767_v16 = vmul.f32 %v15924_v15, %v4634_v39  ;;  %v4769_v33 = vmul.f32 %v15927_v5, %v4707_v19  ;;  %19720 = vst [vmem:[#allocation29_spill] sm:$0xff] %v16100_v11 }
 0x43e   : > { %v4940_v9 = vrot.slane %v4816_v45, 7  ;;  %v4942_v57 = vrot.slane %v4818_v50, 7  ;;  %v15959_v41 = vadd.f32 %v15932_v18, %v4766_v53  ;;  %v15962_v24 = vadd.f32 %v15935_v54, %v4768_v37 }
 0x43f   : > { %v4941_v4 = vrot.slane %v4817_v46, 7  ;;  %v4943_v42 = vrot.slane %v4819_v29, 7  ;;  %v15965_v21 = vadd.f32 %v15938_v56, %v4767_v16  ;;  %v15968_v13 = vadd.f32 %v15941_v40, %v4769_v33 }
 0x440   : > { %5036 = vst [vmem:[#allocation3 + $0x20] sm:$0xfe] %v4940_v9  ;;  %5038 = vst [vmem:[#allocation3 + $0x30] sm:$0xfe] %v4942_v57  ;;  %v19191_v49 = vrot.slane %v15959_v41, 7  ;;  %v19190_v60 = vrot.slane %v15962_v24, 7 }
 0x441   : > { %5037 = vst [vmem:[#allocation3 + $0x28] sm:$0xfe] %v4941_v4  ;;  %5039 = vst [vmem:[#allocation3 + $0x38] sm:$0xfe] %v4943_v42  ;;  %v19189_v3 = vrot.slane %v15965_v21, 7  ;;  %v19188_v62 = vrot.slane %v15968_v13, 7 }
 0x442   : > { %v4945_v52 = vsel %vm1605_vm0, %v4940_v9, %v19191_v49  ;;  %v4949_v6 = vsel %vm1605_vm0, %v4942_v57, %v19190_v60  ;;  %v5248_v14 = vrot.slane %v5176_v20, 1  ;;  %v5436_v44 = vrot.slane %v15972_v51, 2 }
 0x443   : > { %5040 = vst [vmem:[#allocation3 + $0x40] sm:$0xff] %v4945_v52  ;;  %5042 = vst [vmem:[#allocation3 + $0x50] sm:$0xff] %v4949_v6  ;;  %v4947_v23 = vsel %vm1605_vm0, %v4941_v4, %v19189_v3  ;;  %v4951_v31 = vsel %vm1605_vm0, %v4943_v42, %v19188_v62  ;;  %v16015_v45 = vsel %vm19242_vm8, %v4945_v52, -1e+30  ;;  %v16017_v50 = vrot.slane %v4945_v52, 1 }
 0x444   : > { %5041 = vst [vmem:[#allocation3 + $0x48] sm:$0xff] %v4947_v23  ;;  %5043 = vst [vmem:[#allocation3 + $0x58] sm:$0xff] %v4951_v31  ;;  %v16009_v47 = vsel %vm19242_vm8, %v4947_v23, -1e+30  ;;  %v16011_v32 = vrot.slane %v4947_v23, 1  ;;  %v16019_v53 = vrot.slane %v4947_v23, 2 }
 0x445   : > { %v16023_v37 = vsel %vm5137_vm9, %v4947_v23, -1e+30  ;;  %v16027_v39 = vsel %vm5136_vm7, %v4947_v23, -1e+30  ;;  %v16031_v4 = vsel %vm5137_vm9, %v4945_v52, -1e+30 }
 0x446   : > { %v16035_v42 = vsel %vm5136_vm7, %v4945_v52, -1e+30  ;;  %v16040_v6 = vld [vmem:[#allocation3 + $0x148] sm:$0x1] }
 0x447   : > { %v5076_v19 = vld [vmem:[#allocation3 + $0x20] sm:$0xff]  ;;  %19718 = vst [vmem:[#allocation65_spill] sm:$0xff] %v16040_v6 }
 0x448   : > { %v5077_v46 = vld [vmem:[#allocation3 + $0x28] sm:$0xff]  ;;  %v5249_v33 = vrot.slane %v5076_v19, 1  ;;  %v5668_v22 = vld [vmem:[#allocation3 + $0x20] sm:$0xfe] }
 0x449   : > { %v5669_v29 = vld [vmem:[#allocation3 + $0x28] sm:$0xfe]  ;;  %v5252_v9 = vrot.slane %v5077_v46, 1  ;;  %v5440_v57 = vrot.slane %v5077_v46, 2  ;;  %v5149_v20 = vsel %vm5137_vm9, %v5077_v46, -1e+30 }
 0x44a   : > { %v5869_v16 = vld [vmem:[#allocation3 + $0x28] sm:$0xfc]  ;;  %v5739_v59 = vrot.slane %v5669_v29, 1  ;;  %v5250_v27 = vsel %vm1855_vm4, %v5248_v14, %v5249_v33 }
 0x44b   : > { %v5887_v51 = vrot.slane %v5869_v16, 2  ;;  %v5253_v23 = vsel %vm1855_vm4, %v5251_v2, %v5252_v9  ;;  %v5263_v31 = vsel %vm1855_vm4, %v5252_v9, %v16011_v32  ;;  %v5441_v12 = vsel %vm2050_vm6, %v5439_v36, %v5440_v57  ;;  %v5868_v16 = vld [vmem:[#allocation3 + $0x20] sm:$0xfc]  ;;  %v16055_v9 = vld [vmem:[#allocation3 + $0x48] sm:$0xfe] }
 0x44c   : > { %v5451_v43 = vsel %vm2050_vm6, %v5440_v57, %v16019_v53  ;;  %v5349_v62 = vmax.f32 %v16000_v58, %v5253_v23  ;;  %v5353_v3 = vmax.f32 %v5149_v20, %v5263_v31  ;;  %v5537_v29 = vsel %vm5420_vm11, %v5441_v12, -1e+30  ;;  %v16062_v23 = vld [vmem:[#allocation3 + $0x48] sm:$0xfc]  ;;  %v16131_v55 = vld [vmem:[#allocation3 + $0x58] sm:$0xfe] }
 0x44d   : > { %v5541_v14 = vsel %vm5421_vm10, %v5451_v43, -1e+30  ;;  %v5605_v2 = vsel %vm5136_vm7, %v5077_v46, -1e+30  ;;  %v16057_v36 = vrot.slane %v4945_v52, 2  ;;  %v5741_v20 = vsel %vm1855_vm4, %v5739_v59, %v16011_v32 }
 0x44e   : > { %v5569_v60 = vmax.f32 %v5349_v62, %v5537_v29  ;;  %v5148_v31 = vsel %vm5137_vm9, %v5076_v19, -1e+30  ;;  %v5261_v43 = vsel %vm1855_vm4, %v5249_v33, %v16017_v50  ;;  %v16068_v12 = vmax.f32 %v5353_v3, %v5541_v14  ;;  %v16080_v14 = vld [vmem:[#allocation3 + $0x40] sm:$0xfe] }
 0x44f   : > { %v5889_v52 = vsel %vm2050_vm6, %v5887_v51, %v16019_v53  ;;  %v5348_v46 = vmax.f32 %v16000_v58, %v5250_v27  ;;  %v5437_v57 = vrot.slane %v5076_v19, 2  ;;  %v5736_v59 = vrot.slane %v5668_v22, 1  ;;  %v16082_v51 = vld [vmem:[#allocation3 + $0x40] sm:$0xfc]  ;;  %v16102_v29 = vld [vmem:[#allocation3 + $0x140] sm:$0x3] }
 0x450   : > { %v5637_v62 = vmax.f32 %v5569_v60, %v5605_v2  ;;  %v5884_v49 = vrot.slane %v5868_v16, 2  ;;  %v5352_v30 = vmax.f32 %v5148_v31, %v5261_v43  ;;  %v5985_v60 = vsel %vm5420_vm11, %v5889_v52, -1e+30  ;;  %v5083_v43 = vld [vmem:[#allocation3 + $0x58] sm:$0xff]  ;;  %19721 = vst [vmem:[#allocation76_spill] sm:$0xff] %v16102_v29 }
 0x451   : > { %v5438_v33 = vsel %vm2050_vm6, %v5436_v44, %v5437_v57  ;;  %v5449_v3 = vsel %vm2050_vm6, %v5437_v57, %v16057_v36  ;;  %v5604_v57 = vsel %vm5136_vm7, %v5076_v19, -1e+30  ;;  %v5738_v52 = vsel %vm1855_vm4, %v5736_v59, %v16017_v50 }
 0x452   : > { %v5837_v27 = vmax.f32 %v5637_v62, %v5741_v20  ;;  %v5536_v22 = vsel %vm5420_vm11, %v5438_v33, -1e+30  ;;  %v5540_v16 = vsel %vm5421_vm10, %v5449_v3, -1e+30  ;;  %v5886_v31 = vsel %vm2050_vm6, %v5884_v49, %v16057_v36  ;;  %v5079_v20 = vld [vmem:[#allocation3 + $0x38] sm:$0xff] }
 0x453   : > { %v5568_v2 = vmax.f32 %v5348_v46, %v5536_v22  ;;  %v16104_v46 = vmax.f32 %v5352_v30, %v5540_v16  ;;  %v5984_v49 = vsel %vm5420_vm11, %v5886_v31, -1e+30  ;;  %v5258_v59 = vrot.slane %v5079_v20, 1  ;;  %v5871_v16 = vld [vmem:[#allocation3 + $0x38] sm:$0xfc] }
 0x454   : > { %v6017_v62 = vmax.f32 %v5837_v27, %v5985_v60  ;;  %v16112_v60 = vrot.slane %v5083_v43, 1  ;;  %v5446_v33 = vrot.slane %v5079_v20, 2  ;;  %v16116_v30 = vrot.slane %v5083_v43, 2 }
 0x455   : > { %v5636_v19 = vmax.f32 %v5568_v2, %v5604_v57  ;;  %v5151_v2 = vsel %vm5137_vm9, %v5079_v20, -1e+30  ;;  %v19722_v57 = vrot.slane %v15984_v61, 1  ;;  %v16133_v61 = vld [vmem:[#allocation3 + $0x58] sm:$0xfc] }
 0x456   : > { %v16110_v27 = vmax.f32 %v6017_v62, %v16027_v39  ;;  %v5267_v31 = vsel %vm1855_vm4, %v5258_v59, %v16112_v60  ;;  %v19723_v62 = vrot.slane %v15986_v34, 2  ;;  %v5455_v48 = vsel %vm2050_vm6, %v5446_v33, %v16116_v30 }
 0x457   : > { %v5836_v3 = vmax.f32 %v5636_v19, %v5738_v52  ;;  %v5259_v39 = vsel %vm1855_vm4, %v19722_v57, %v5258_v59  ;;  %v5671_v19 = vld [vmem:[#allocation3 + $0x38] sm:$0xfe]  ;;  %v5355_v22 = vmax.f32 %v5151_v2, %v5267_v31  ;;  %v5543_v59 = vsel %vm5421_vm10, %v5455_v48, -1e+30  ;;  %v16148_v31 = vld [vmem:[#allocation3 + $0x30] sm:$0xff] }
 0x458   : > { %v5447_v52 = vsel %vm2050_vm6, %v19723_v62, %v5446_v33  ;;  %v5351_v26 = vmax.f32 %v16000_v58, %v5259_v39  ;;  %v5745_v39 = vrot.slane %v5671_v19, 1  ;;  %v16150_v62 = vpop.permute.xlu0 %5403  ;;  %v16154_v57 = vsel %vm19242_vm8, %v5083_v43, -1e+30 }
 0x459   : > { %v6016_v44 = vmax.f32 %v5836_v3, %v5984_v49  ;;  %v5539_v34 = vsel %vm5420_vm11, %v5447_v52, -1e+30  ;;  %v5893_v3 = vrot.slane %v5871_v16, 2  ;;  %v16146_v33 = vmax.f32 %v5355_v22, %v5543_v59  ;;  %19724 = vst [vmem:[#allocation63_spill] sm:$0xff] %v16150_v62 }
 0x45a   : > { %v16144_v2 = vmax.f32 %v5351_v26, %v5539_v34  ;;  %v16158_v48 = vsel %vm5136_vm7, %v5079_v20, -1e+30  ;;  %v16168_v16 = vsel %vm1855_vm4, %v5745_v39, %v16112_v60  ;;  %v16172_v52 = vsel %vm5136_vm7, %v5083_v43, -1e+30 }
 0x45b   : > { %v16142_v49 = vmax.f32 %v6016_v44, %v16035_v42  ;;  %v16162_v42 = vsel %vm5137_vm9, %v5083_v43, -1e+30  ;;  %v5895_v26 = vsel %vm2050_vm6, %v5893_v3, %v16116_v30  ;;  %v16183_v39 = vsel %vm5137_vm9, %v16148_v31, -1e+30 }
 0x45c   : > { %19725 = vst [vmem:[#allocation64_spill] sm:$0xff] %v16183_v39  ;;  %vm19252_vm12 = vcmp.eq.s32.totalorder %v16150_v62, 1  ;;  %v19789_v62 = vld [vmem:[#allocation56_spill] sm:$0xff] }
 0x460   : > { %v4638_v44 = vpop.f32.mrb[12].mxu0  ;;  %v4711_v22 = vpop.f32.mrb[24].mxu1 }
 0x461   : > { %v4770_v34 = vmul.f32 %v15918_v17, %v4638_v44  ;;  %v4772_v59 = vmul.f32 %v15921_v8, %v4711_v22  ;;  %v4640_v28 = vpop.f32.mrb[13].mxu0  ;;  %v4713_v3 = vpop.f32.mrb[25].mxu1  ;;  %v16191_v22 = vsel %vm5420_vm11, %v5895_v26, -1e+30 }
 0x462   : > { %v4771_v43 = vmul.f32 %v15924_v15, %v4640_v28  ;;  %v4773_v20 = vmul.f32 %v15927_v5, %v4713_v3  ;;  %v4642_v29 = vpop.f32.mrb[14].mxu0  ;;  %v4715_v19 = vpop.f32.mrb[26].mxu1 }
 0x463   : > { %v4824_v11 = vadd.f32 %v15932_v18, %v4770_v34  ;;  %v4826_v6 = vadd.f32 %v15935_v54, %v4772_v59  ;;  %v4774_v25 = vmul.f32 %v15918_v17, %v4642_v29  ;;  %v4776_v28 = vmul.f32 %v15921_v8, %v4715_v19  ;;  %v4644_v3 = vpop.f32.mrb[15].mxu0  ;;  %v4717_v10 = vpop.f32.mrb[27].mxu1 }
 0x464   : > { %v4825_v38 = vadd.f32 %v15938_v56, %v4771_v43  ;;  %v4827_v44 = vadd.f32 %v15941_v40, %v4773_v20  ;;  %v4775_v39 = vmul.f32 %v15924_v15, %v4644_v3  ;;  %v4777_v26 = vmul.f32 %v15927_v5, %v4717_v10 }
 0x465   : > { %v4952_v58 = vrot.slane %v4824_v11, 7  ;;  %v4956_v35 = vrot.slane %v4826_v6, 7  ;;  %v16203_v34 = vadd.f32 %v15932_v18, %v4774_v25  ;;  %v16206_v59 = vadd.f32 %v15935_v54, %v4776_v28 }
 0x466   : > { %v4954_v29 = vrot.slane %v4825_v38, 7  ;;  %v4958_v19 = vrot.slane %v4827_v44, 7  ;;  %v16209_v8 = vadd.f32 %v15938_v56, %v4775_v39  ;;  %v16212_v43 = vadd.f32 %v15941_v40, %v4777_v26  ;;  %v16224_v44 = vld [vmem:[#allocation3 + $0x50] sm:$0xff] }
 0x467   : > { %v19728_v20 = vrot.slane %v15959_v41, 7  ;;  %v19729_v11 = vrot.slane %v15962_v24, 7  ;;  %v19211_v6 = vrot.slane %v16203_v34, 7  ;;  %v19210_v38 = vrot.slane %v16206_v59, 7 }
 0x468   : > { %19726 = vst [vmem:[#allocation35_spill] sm:$0xff] %v16209_v8  ;;  %19727 = vst [vmem:[#allocation33_spill] sm:$0xff] %v16212_v43  ;;  %v19730_v39 = vrot.slane %v15965_v21, 7  ;;  %v19731_v41 = vrot.slane %v15968_v13, 7  ;;  %v19209_v24 = vrot.slane %v16209_v8, 7  ;;  %v19208_v26 = vrot.slane %v16212_v43, 7 }
 0x469   : > { %v16217_v10 = vsel %vm1605_vm0, %v19728_v20, %v4952_v58  ;;  %v4957_v25 = vsel %vm1605_vm0, %v19729_v11, %v4956_v35  ;;  %v16239_v20 = vsel %vm1605_vm0, %v4952_v58, %v19211_v6  ;;  %v4965_v21 = vsel %vm1605_vm0, %v4956_v35, %v19210_v38 }
 0x46a   : > { %5046 = vst [vmem:[#allocation3 + $0x70] sm:$0xff] %v4957_v25  ;;  %v16229_v28 = vsel %vm1605_vm0, %v19730_v39, %v4954_v29  ;;  %v4959_v3 = vsel %vm1605_vm0, %v19731_v41, %v4958_v19  ;;  %5050 = vst [vmem:[#allocation3 + $0x90] sm:$0xff] %v4965_v21  ;;  %v16249_v25 = vsel %vm1605_vm0, %v4954_v29, %v19209_v24  ;;  %v16257_v58 = vsel %vm19242_vm8, %v16224_v44, -1e+30 }
 0x46b   : > { %5047 = vst [vmem:[#allocation3 + $0x78] sm:$0xff] %v4959_v3  ;;  %v5270_v11 = vrot.slane %v16229_v28, 1  ;;  %v5458_v13 = vrot.slane %v16229_v28, 2  ;;  %v4967_v39 = vsel %vm1605_vm0, %v4958_v19, %v19208_v26  ;;  %19732 = vst [vmem:[#allocation42_spill] sm:$0xff] %v16257_v58  ;;  %v19212_v29 = vrot.slane %v16249_v25, 1  ;;  %v19737_v58 = vld [vmem:[#allocation28_spill] sm:$0xff] }
 0x46c   : > { %5051 = vst [vmem:[#allocation3 + $0x98] sm:$0xff] %v4967_v39  ;;  %v19213_v21 = vrot.slane %v16249_v25, 2  ;;  %v19733_v24 = vmax.f32 %v16068_v12, %v16023_v37  ;;  %v19735_v6 = vrot.slane %v16062_v23, 2  ;;  %v19736_v12 = vld [vmem:[#allocation62_spill] sm:$0xff]  ;;  %vm5423_vm14 = vcmp.eq.s32.totalorder %v19737_v58, 1 }
 0x46d   : > { %v5271_v41 = vsel %vm1855_vm4, %v16011_v32, %v5270_v11  ;;  %v5459_v3 = vsel %vm2050_vm6, %v16019_v53, %v5458_v13  ;;  %v5759_v32 = vsel %vm1855_vm4, %v5270_v11, %v19212_v29  ;;  %vm5139_vm13 = vcmp.eq.s32.totalorder %v19736_v12, 1 }
 0x46e   : > { %v5357_v19 = vmax.f32 %v16009_v47, %v5271_v41  ;;  %v5545_v26 = vsel %vm19252_vm12, %v5459_v3, -1e+30  ;;  %v5841_v35 = vmax.f32 %v19733_v24, %v5271_v41  ;;  %v5989_v39 = vsel %vm5421_vm10, %v5459_v3, -1e+30 }
 0x46f   : > { %v5907_v53 = vsel %vm2050_vm6, %v5458_v13, %v19213_v21  ;;  %v19734_v47 = vrot.slane %v16055_v9, 1  ;;  %v6223_v37 = vsel %vm2050_vm6, %v19735_v6, %v5458_v13  ;;  %v5613_v41 = vsel %vm19242_vm8, %v16229_v28, -1e+30 }
 0x470   : > { %v5577_v24 = vmax.f32 %v5357_v19, %v5545_v26  ;;  %v6021_v3 = vmax.f32 %v5841_v35, %v5989_v39  ;;  %v6057_v9 = vsel %vm5137_vm9, %v16229_v28, -1e+30  ;;  %v6257_v23 = vsel %vm5420_vm11, %v6223_v37, -1e+30 }
 0x471   : > { %v6139_v38 = vsel %vm1855_vm4, %v19734_v47, %v5270_v11  ;;  %v5268_v6 = vrot.slane %v16217_v10, 1  ;;  %v5456_v26 = vrot.slane %v16217_v10, 2  ;;  %v5993_v13 = vsel %vm19252_vm12, %v5907_v53, -1e+30 }
 0x472   : > { %v6173_v29 = vmax.f32 %v16110_v27, %v6139_v38  ;;  %v5645_v11 = vmax.f32 %v5577_v24, %v5613_v41  ;;  %v6089_v35 = vmax.f32 %v6021_v3, %v6057_v9  ;;  %v19216_v39 = vrot.slane %v16239_v20, 1 }
 0x473   : > { %v5269_v27 = vsel %vm1855_vm4, %v16017_v50, %v5268_v6  ;;  %v5457_v38 = vsel %vm2050_vm6, %v16057_v36, %v5456_v26  ;;  %v19219_v47 = vrot.slane %v16239_v20, 2  ;;  %v19738_v36 = vmax.f32 %v16104_v46, %v16031_v4 }
 0x474   : > { %v6289_v19 = vmax.f32 %v6173_v29, %v6257_v23  ;;  %v5845_v37 = vmax.f32 %v5645_v11, %v5759_v32  ;;  %v6177_v21 = vmax.f32 %v6089_v35, %v5759_v32  ;;  %v5356_v43 = vmax.f32 %v16015_v45, %v5269_v27 }
 0x475   : > { %v5544_v24 = vsel %vm19252_vm12, %v5457_v38, -1e+30  ;;  %v6261_v29 = vsel %vm5421_vm10, %v5907_v53, -1e+30  ;;  %v5757_v50 = vsel %vm1855_vm4, %v5268_v6, %v19216_v39  ;;  %v5840_v41 = vmax.f32 %v19738_v36, %v5269_v27 }
 0x476   : > { %v5905_v3 = vsel %vm2050_vm6, %v5456_v26, %v19219_v47  ;;  %v6025_v9 = vmax.f32 %v5845_v37, %v5993_v13  ;;  %v6293_v45 = vmax.f32 %v6177_v21, %v6261_v29  ;;  %v5576_v23 = vmax.f32 %v5356_v43, %v5544_v24  ;;  %v16350_v24 = vld [vmem:[#allocation3 + $0x78] sm:$0xff] }
 0x477   : > { %v5988_v11 = vsel %vm5421_vm10, %v5457_v38, -1e+30  ;;  %v5612_v35 = vsel %vm19242_vm8, %v16217_v10, -1e+30  ;;  %v19739_v39 = vrot.slane %v16080_v14, 1  ;;  %v19740_v46 = vrot.slane %v16082_v51, 2  ;;  %v16336_v38 = vpop.permute.xlu0 %5125 }
 0x478   : > { %v6020_v8 = vmax.f32 %v5840_v41, %v5988_v11  ;;  %v12180_v36 = vpack.c.bf16 %v6293_v45, %v6289_v19  ;;  %v5644_v13 = vmax.f32 %v5576_v23, %v5612_v35  ;;  %v6056_v43 = vsel %vm5137_vm9, %v16217_v10, -1e+30  ;;  %19742 = vst [vmem:[#allocation50_spill] sm:$0xff] %v16350_v24 }
 0x479   : > { %v6137_v4 = vsel %vm1855_vm4, %v19739_v39, %v5268_v6  ;;  %v6221_v27 = vsel %vm2050_vm6, %v19740_v46, %v5456_v26  ;;  %v5157_v51 = vsel %vm5139_vm13, %v16229_v28, -1e+30  ;;  %v19741_v6 = vmax.f32 %v16144_v2, %v16158_v48 }
 0x47a   : > { %v6172_v21 = vmax.f32 %v16142_v49, %v6137_v4  ;;  %v6088_v37 = vmax.f32 %v6020_v8, %v6056_v43  ;;  %v6256_v14 = vsel %vm5420_vm11, %v6221_v27, -1e+30  ;;  %vm5140_vm15 = vcmp.eq.s32.totalorder %v16336_v38, 1  ;;  %12181 = vmatprep.subr.bf16.mxu0 %v12180_v36  ;;  %v16373_v4 = vld [vmem:[#allocation3 + $0x98] sm:$0xff] }
 0x47b   : > { %v5839_v26 = vmax.f32 %v19741_v6, %v16168_v16  ;;  %v5844_v19 = vmax.f32 %v5644_v13, %v5757_v50  ;;  %v5361_v39 = vmax.f32 %v5157_v51, %v5759_v32  ;;  %v5549_v8 = vsel %vm5423_vm14, %v5907_v53, -1e+30  ;;  %19743 = vst [vmem:[#allocation58_spill] sm:$0xff] %v16373_v4 }
 0x47c   : > { %v6288_v49 = vmax.f32 %v6172_v21, %v6256_v14  ;;  %v5992_v29 = vsel %vm19252_vm12, %v5905_v3, -1e+30  ;;  %v6176_v28 = vmax.f32 %v6088_v37, %v5757_v50  ;;  %v6260_v41 = vsel %vm5421_vm10, %v5905_v3, -1e+30 }
 0x47d   : > { %v6061_v2 = vsel %vm19242_vm8, %v16249_v25, -1e+30  ;;  %v6024_v48 = vmax.f32 %v5844_v19, %v5992_v29  ;;  %v16359_v16 = vmax.f32 %v5361_v39, %v5549_v8  ;;  %v5156_v53 = vsel %vm5139_vm13, %v16217_v10, -1e+30 }
 0x47e   : > { %v16361_v32 = vmax.f32 %v6025_v9, %v6061_v2  ;;  %v6292_v45 = vmax.f32 %v6176_v28, %v6260_v41  ;;  %v16369_v23 = vsel %vm5139_vm13, %v16249_v25, -1e+30  ;;  %v5360_v11 = vmax.f32 %v5156_v53, %v5757_v50  ;;  %v16424_v41 = vpop.permute.xlu0 %5409 }
 0x47f   : > { %v5548_v35 = vsel %vm5423_vm14, %v5905_v3, -1e+30  ;;  %v6060_v46 = vsel %vm19242_vm8, %v16239_v20, -1e+30  ;;  %v5274_v10 = vrot.slane %v16350_v24, 1  ;;  %v5462_v27 = vrot.slane %v16350_v24, 2 }
 0x480   : > { %v12182_v36 = vpack.c.bf16 %v6292_v45, %v6288_v49  ;;  %v16382_v13 = vmax.f32 %v5360_v11, %v5548_v35  ;;  %v16387_v50 = vsel %vm5139_vm13, %v16239_v20, -1e+30  ;;  %v16389_v3 = vmax.f32 %v6024_v48, %v6060_v46 }
 0x481   : > { %v5275_v43 = vsel %vm1855_vm4, %v16112_v60, %v5274_v10  ;;  %v5463_v21 = vsel %vm2050_vm6, %v16116_v30, %v5462_v27  ;;  %v19218_v37 = vrot.slane %v16373_v4, 1  ;;  %v19217_v14 = vrot.slane %v16373_v4, 2 }
 0x482   : > { %12183 = vmatpush1.bf16.msra.mxu0 %v12182_v36  ;;  %v5359_v6 = vmax.f32 %v16154_v57, %v5275_v43  ;;  %v5547_v19 = vsel %vm19252_vm12, %v5463_v21, -1e+30  ;;  %v19744_v49 = vmax.f32 %v16146_v33, %v16162_v42  ;;  %v5991_v39 = vsel %vm5421_vm10, %v5463_v21, -1e+30  ;;  %v19749_v21 = vld [vmem:[#allocation34_spill] sm:$0xff] }
 0x483   : > { %v16408_v30 = vsel %vm2050_vm6, %v5462_v27, %v19217_v14  ;;  %v6019_v8 = vmax.f32 %v5839_v26, %v16191_v22  ;;  %v16414_v29 = vrot.slane %v16224_v44, 1  ;;  %v16419_v57 = vsel %vm5140_vm15, %v16249_v25, -1e+30 }
 0x484   : > { %v5843_v60 = vmax.f32 %v19744_v49, %v5275_v43  ;;  %19745 = vst [vmem:[#allocation68_spill] sm:$0xff] %v16408_v30  ;;  %v16421_v33 = vmax.f32 %v5359_v6, %v5547_v19  ;;  %v16429_v2 = vsel %vm5140_vm15, %v16239_v20, -1e+30  ;;  %v16434_v22 = vsel %vm19242_vm8, %v16350_v24, -1e+30 }
 0x485   : > { %v16439_v26 = vsel %vm1855_vm4, %v5274_v10, %v19218_v37  ;;  %v19746_v48 = vrot.slane %v16133_v61, 2  ;;  %v4648_v45 = vpop.f32.mrb[16].mxu0  ;;  %v4721_v11 = vpop.f32.mrb[28].mxu1  ;;  %v16447_v35 = vsel %vm19252_vm12, %v16408_v30, -1e+30  ;;  %v16453_v36 = vmax.f32 %v6019_v8, %v16172_v52 }
 0x486   : > { %v6023_v42 = vmax.f32 %v5843_v60, %v5991_v39  ;;  %19747 = vst [vmem:[#allocation74_spill] sm:$0xff] %v16447_v35  ;;  %v6059_v46 = vsel %vm5137_vm9, %v16350_v24, -1e+30  ;;  %v19748_v43 = vrot.slane %v16131_v55, 1  ;;  %v4780_v6 = vmul.f32 %v19749_v21, %v4721_v11  ;;  %v4650_v19 = vpop.f32.mrb[17].mxu0  ;;  %v4723_v49 = vpop.f32.mrb[29].mxu1 }
 0x487   : > { %v6227_v53 = vsel %vm2050_vm6, %v19746_v48, %v5462_v27  ;;  %v4778_v27 = vmul.f32 %v15918_v17, %v4648_v45  ;;  %v16467_v39 = vsel %vm5421_vm10, %v16408_v30, -1e+30  ;;  %v4779_v52 = vmul.f32 %v15924_v15, %v4650_v19  ;;  %v4725_v8 = vpop.f32.mrb[30].mxu1  ;;  %v19768_v24 = vld [vmem:[#allocation36_spill] sm:$0xff] }
 0x488   : > { %v16458_v61 = vsel %vm1855_vm4, %v19748_v43, %v5274_v10  ;;  %v4781_v55 = vmul.f32 %v15927_v5, %v4723_v49  ;;  %v4652_v10 = vpop.f32.mrb[18].mxu0  ;;  %v16471_v48 = vmax.f32 %v6023_v42, %v6059_v46  ;;  %v16475_v45 = vsel %vm5420_vm11, %v6227_v53, -1e+30  ;;  %v4727_v49 = vpop.f32.mrb[31].mxu1 }
 0x489   : > { %vm5424_vm2 = vcmp.eq.s32.totalorder %v16424_v41, 1  ;;  %v4832_v11 = vadd.f32 %v15932_v18, %v4778_v27  ;;  %v4834_v43 = vadd.f32 %v15935_v54, %v4780_v6  ;;  %v4782_v14 = vmul.f32 %v15918_v17, %v4652_v10  ;;  %v4654_v37 = vpop.f32.mrb[19].mxu0 }
 0x48a   : > { %v4784_v19 = vmul.f32 %v19749_v21, %v4725_v8  ;;  %v4833_v60 = vadd.f32 %v15938_v56, %v4779_v52  ;;  %v4835_v42 = vadd.f32 %v15941_v40, %v4781_v55  ;;  %v4783_v46 = vmul.f32 %v15924_v15, %v4654_v37 }
 0x48b   : > { %v4785_v53 = vmul.f32 %v15927_v5, %v4727_v49  ;;  %v4968_v28 = vrot.slane %v4832_v11, 7  ;;  %v4972_v51 = vrot.slane %v4834_v43, 7  ;;  %v16487_v27 = vadd.f32 %v15932_v18, %v4782_v14 }
 0x48c   : > { %v16490_v6 = vadd.f32 %v15935_v54, %v4784_v19  ;;  %v4970_v10 = vrot.slane %v4833_v60, 7  ;;  %v4974_v8 = vrot.slane %v4835_v42, 7  ;;  %v16493_v47 = vadd.f32 %v15938_v56, %v4783_v46  ;;  %v19756_v19 = vld [vmem:[#allocation35_spill] sm:$0xff]  ;;  %v19758_v46 = vld [vmem:[#allocation33_spill] sm:$0xff] }
 0x48d   : > { %19750 = vst [vmem:[#allocation57_spill] sm:$0xff] %v16487_v27  ;;  %v16496_v52 = vadd.f32 %v15941_v40, %v4785_v53  ;;  %v19754_v37 = vrot.slane %v16203_v34, 7  ;;  %v19755_v11 = vrot.slane %v16206_v59, 7  ;;  %v19220_v43 = vrot.slane %v16487_v27, 7 }
 0x48e   : > { %19751 = vst [vmem:[#allocation62_spill] sm:$0xff] %v16490_v6  ;;  %19752 = vst [vmem:[#allocation34_spill] sm:$0xff] %v16493_v47  ;;  %v19223_v60 = vrot.slane %v16490_v6, 7  ;;  %v19757_v49 = vrot.slane %v19756_v19, 7  ;;  %v19759_v53 = vrot.slane %v19758_v46, 7  ;;  %vm5425_vm5 = vcmp.eq.s32.totalorder %v19768_v24, 1 }
 0x48f   : > { %19753 = vst [vmem:[#allocation79_spill] sm:$0xff] %v16496_v52  ;;  %v16501_v55 = vsel %vm1605_vm0, %v19754_v37, %v4968_v28  ;;  %v4973_v14 = vsel %vm1605_vm0, %v19755_v11, %v4972_v51  ;;  %v19221_v37 = vrot.slane %v16493_v47, 7  ;;  %v19222_v9 = vrot.slane %v16496_v52, 7 }
 0x490   : > { %5054 = vst [vmem:[#allocation3 + $0xb0] sm:$0xff] %v4973_v14  ;;  %v4971_v42 = vsel %vm1605_vm0, %v19757_v49, %v4970_v10  ;;  %v4975_v34 = vsel %vm1605_vm0, %v19759_v53, %v4974_v8  ;;  %v16519_v59 = vsel %vm1605_vm0, %v4968_v28, %v19220_v43  ;;  %v4981_v11 = vsel %vm1605_vm0, %v4972_v51, %v19223_v60  ;;  %v19761_v28 = vld [vmem:[#allocation75_spill] sm:$0xff] }
 0x491   : > { %5055 = vst [vmem:[#allocation3 + $0xb8] sm:$0xff] %v4975_v34  ;;  %v5286_v14 = vrot.slane %v4971_v42, 1  ;;  %v5474_v19 = vrot.slane %v4971_v42, 2  ;;  %5058 = vst [vmem:[#allocation3 + $0xd0] sm:$0xff] %v4981_v11  ;;  %v16527_v49 = vsel %vm1605_vm0, %v4970_v10, %v19221_v37  ;;  %v4983_v46 = vsel %vm1605_vm0, %v4974_v8, %v19222_v9 }
 0x492   : > { %v19760_v53 = vrot.slane %v16148_v31, 1  ;;  %v19762_v34 = vrot.slane %v19761_v28, 1  ;;  %5059 = vst [vmem:[#allocation3 + $0xd8] sm:$0xff] %v4983_v46  ;;  %v19764_v10 = vrot.slane %v16249_v25, 1  ;;  %v19765_v8 = vrot.slane %v16249_v25, 2 }
 0x493   : > { %v19230_v28 = vrot.slane %v16527_v49, 1  ;;  %v19767_v46 = vmax.f32 %v16359_v16, %v16369_v23  ;;  %v5621_v23 = vsel %vm5140_vm15, %v4971_v42, -1e+30  ;;  %v19240_v4 = vrot.slane %v16519_v59, 1 }
 0x494   : > { %v16537_v43 = vsel %vm1855_vm4, %v19762_v34, %v19760_v53  ;;  %v19763_v51 = vmov %v19760_v53  ;;  %v5287_v37 = vsel %vm1855_vm4, %v19764_v10, %v5286_v14  ;;  %v5475_v9 = vsel %vm2050_vm6, %v19765_v8, %v5474_v19  ;;  %v19766_v34 = vld [vmem:[#allocation31_spill] sm:$0xff] }
 0x495   : > { %v16543_v11 = vsel %vm1855_vm4, %v19763_v51, %v16414_v29  ;;  %v19231_v53 = vrot.slane %v16527_v49, 2  ;;  %vm5141_vm3 = vcmp.eq.s32.totalorder %v19766_v34, 1  ;;  %v5365_v60 = vmax.f32 %v16419_v57, %v5287_v37 }
 0x496   : > { %v5553_v51 = vsel %vm5424_vm2, %v5475_v9, -1e+30  ;;  %v5849_v30 = vmax.f32 %v19767_v46, %v5287_v37  ;;  %v5997_v25 = vsel %vm5423_vm14, %v5475_v9, -1e+30  ;;  %v5775_v10 = vsel %vm1855_vm4, %v5286_v14, %v19230_v28 }
 0x497   : > { %v5923_v8 = vsel %vm2050_vm6, %v5474_v19, %v19231_v53  ;;  %v6181_v57 = vmax.f32 %v16361_v32, %v5287_v37  ;;  %v5585_v16 = vmax.f32 %v5365_v60, %v5553_v51  ;;  %v6265_v52 = vsel %vm19252_vm12, %v5475_v9, -1e+30  ;;  %v16582_v51 = vpop.permute.xlu0 %5131 }
 0x498   : > { %v6029_v46 = vmax.f32 %v5849_v30, %v5997_v25  ;;  %v6065_v14 = vsel %vm5139_vm13, %v4971_v42, -1e+30  ;;  %v5284_v19 = vrot.slane %v16501_v55, 1  ;;  %v5472_v32 = vrot.slane %v16501_v55, 2 }
 0x499   : > { %v6297_v28 = vmax.f32 %v6181_v57, %v6265_v52  ;;  %v5653_v37 = vmax.f32 %v5585_v16, %v5621_v23  ;;  %v6001_v30 = vsel %vm5424_vm2, %v5923_v8, -1e+30  ;;  %v6269_v9 = vsel %vm5423_vm14, %v5923_v8, -1e+30 }
 0x49a   : > { %v6097_v53 = vmax.f32 %v6029_v46, %v6065_v14  ;;  %v19769_v52 = vrot.slane %v16239_v20, 1  ;;  %v19770_v57 = vrot.slane %v16239_v20, 2  ;;  %vm5142_vm1 = vcmp.eq.s32.totalorder %v16582_v51, 1 }
 0x49b   : > { %v5853_v23 = vmax.f32 %v5653_v37, %v5775_v10  ;;  %v5773_v47 = vsel %vm1855_vm4, %v5284_v19, %v19240_v4  ;;  %v19772_v20 = vrot.slane %v16519_v59, 2  ;;  %v5620_v40 = vsel %vm5140_vm15, %v16501_v55, -1e+30 }
 0x49c   : > { %v5285_v25 = vsel %vm1855_vm4, %v19769_v52, %v5284_v19  ;;  %v5473_v16 = vsel %vm2050_vm6, %v19770_v57, %v5472_v32  ;;  %v6185_v46 = vmax.f32 %v6097_v53, %v5775_v10  ;;  %v19771_v52 = vmax.f32 %v16382_v13, %v16387_v50 }
 0x49d   : > { %v5364_v14 = vmax.f32 %v16429_v2, %v5285_v25  ;;  %v5552_v60 = vsel %vm5424_vm2, %v5473_v16, -1e+30  ;;  %v5921_v57 = vsel %vm2050_vm6, %v5472_v32, %v19772_v20  ;;  %v5996_v53 = vsel %vm5423_vm14, %v5473_v16, -1e+30 }
 0x49e   : > { %v5848_v6 = vmax.f32 %v19771_v52, %v5285_v25  ;;  %v6033_v37 = vmax.f32 %v5853_v23, %v6001_v30  ;;  %v6301_v2 = vmax.f32 %v6185_v46, %v6269_v9  ;;  %v6064_v13 = vsel %vm5139_vm13, %v16501_v55, -1e+30 }
 0x49f   : > { %v5584_v27 = vmax.f32 %v5364_v14, %v5552_v60  ;;  %v6180_v50 = vmax.f32 %v16389_v3, %v5285_v25  ;;  %v5165_v19 = vsel %vm5141_vm3, %v4971_v42, -1e+30  ;;  %v6264_v30 = vsel %vm19252_vm12, %v5473_v16, -1e+30 }
 0x4a0   : > { %v6028_v56 = vmax.f32 %v5848_v6, %v5996_v53  ;;  %v12184_v32 = vpack.c.bf16 %v6301_v2, %v6297_v28  ;;  %v5369_v60 = vmax.f32 %v5165_v19, %v5775_v10  ;;  %v6000_v9 = vsel %vm5424_vm2, %v5921_v57, -1e+30 }
 0x4a1   : > { %v5652_v52 = vmax.f32 %v5584_v27, %v5620_v40  ;;  %v6296_v6 = vmax.f32 %v6180_v50, %v6264_v30  ;;  %v5557_v46 = vsel %vm5425_vm5, %v5923_v8, -1e+30  ;;  %v6069_v40 = vsel %vm5140_vm15, %v16527_v49, -1e+30  ;;  %v16639_v8 = vld [vmem:[#allocation3 + $0x70] sm:$0xff] }
 0x4a2   : > { %v6096_v23 = vmax.f32 %v6028_v56, %v6064_v13  ;;  %12185 = vmatprep.subr.bf16.mxu0 %v12184_v32  ;;  %v16624_v3 = vmax.f32 %v5369_v60, %v5557_v46  ;;  %v5164_v27 = vsel %vm5141_vm3, %v16501_v55, -1e+30  ;;  %v16635_v56 = vsel %vm5141_vm3, %v16527_v49, -1e+30  ;;  %v12608_v13 = vld [vmem:[#allocation13 + $0x8] ss:$16 sps:$4 sm:$0xff]  }
 0x4a3   : > { %v5852_v14 = vmax.f32 %v5652_v52, %v5773_v47  ;;  %v16637_v28 = vmax.f32 %v6033_v37, %v6069_v40  ;;  %v5368_v10 = vmax.f32 %v5164_v27, %v5773_v47  ;;  %v6268_v16 = vsel %vm5423_vm14, %v5921_v57, -1e+30  ;;  %v12610_v52 = vld [vmem:[#allocation13 + $0xc] ss:$16 sps:$4 sm:$0xff]  }
 0x4a4   : > { %v6184_v42 = vmax.f32 %v6096_v23, %v5773_v47  ;;  %v5556_v55 = vsel %vm5425_vm5, %v5921_v57, -1e+30  ;;  %v16650_v2 = vsel %vm5142_vm1, %v16527_v49, -1e+30  ;;  %v6068_v47 = vsel %vm5140_vm15, %v16519_v59, -1e+30  ;;  %8233 = vmatprep.subr.bf16.mxu1 %v12610_v52 }
 0x4a5   : > { %v6032_v25 = vmax.f32 %v5852_v14, %v6000_v9  ;;  %v16652_v37 = vmax.f32 %v5368_v10, %v5556_v55  ;;  %v16660_v50 = vsel %vm5141_vm3, %v16519_v59, -1e+30  ;;  %v6175_v57 = vmax.f32 %v16453_v36, %v16458_v61  ;;  %v19774_v23 = vld [vmem:[#allocation55_spill] sm:$0xff]  ;;  %v12616_v14 = vld [vmem:[#allocation13 + $0x2c] ss:$16 sps:$4 sm:$0xff]   ;;  %8234 = vmatpush1.bf16.msra.mxu1 %v12608_v13 }
 0x4a6   : > { %v6300_v53 = vmax.f32 %v6184_v42, %v6268_v16  ;;  %v16667_v32 = vrot.slane %v16639_v8, 1  ;;  %v16672_v60 = vsel %vm5142_vm1, %v16519_v59, -1e+30  ;;  %v5350_v46 = vmax.f32 %v19774_v23, %v16537_v43  ;;  %v19775_v61 = vld [vmem:[#allocation64_spill] sm:$0xff]  ;;  %v5670_v16 = vld [vmem:[#allocation3 + $0x30] sm:$0xfe]  ;;  %8235 = vmatprep.subr.bf16.mxu1 %v12616_v14 }
 0x4a7   : > { %v16662_v19 = vmax.f32 %v6032_v25, %v6068_v47  ;;  %v19776_v40 = vrot.slane %v16148_v31, 2  ;;  %v19777_v27 = vld [vmem:[#allocation52_spill] sm:$0xff]  ;;  %v16691_v25 = vrot.slane %v16224_v44, 2  ;;  %v16693_v43 = vld [vmem:[#allocation3 + $0x90] sm:$0xff]  ;;  %v19779_v55 = vmax.f32 %v16421_v33, %v16434_v22 }
 0x4a8   : > { %19773 = vst [vmem:[#allocation35_spill] sm:$0xff] %v16667_v32  ;;  %v12186_v30 = vpack.c.bf16 %v6300_v53, %v6296_v6  ;;  %v16681_v36 = vsel %vm1855_vm4, %v16414_v29, %v16667_v32  ;;  %v5354_v6 = vmax.f32 %v19775_v61, %v16543_v11  ;;  %v19778_v42 = vrot.slane %v19777_v27, 2  ;;  %v12614_v52 = vld [vmem:[#allocation13 + $0x28] ss:$16 sps:$4 sm:$0xff]   ;;  %v12628_v9 = vld [vmem:[#allocation13 + $0x6c] ss:$16 sps:$4 sm:$0xff]  }
 0x4a9   : > { %v16699_v53 = vmax.f32 %v19779_v55, %v16439_v26  ;;  %v19781_v11 = vmax.f32 %v16471_v48, %v16439_v26  ;;  %v16708_v23 = vrot.slane %v16639_v8, 2  ;;  %v19784_v33 = vrot.slane %v16148_v31, 2  ;;  %8236 = vmatpush1.bf16.msra.mxu1 %v12614_v52 }
 0x4aa   : > { %v5444_v10 = vsel %vm2050_vm6, %v19778_v42, %v19776_v40  ;;  %12187 = vmatpush1.bf16.msra.mxu0 %v12186_v30  ;;  %v19783_v30 = vld [vmem:[#allocation42_spill] sm:$0xff]  ;;  %v5606_v48 = vsel %vm5136_vm7, %v16148_v31, -1e+30  ;;  %v16721_v42 = vld [vmem:[#allocation3 + $0x30] sm:$0xfc]  ;;  %v19787_v35 = vrot.slane %v16693_v43, 1 }
 0x4ab   : > { %19780 = vst [vmem:[#allocation33_spill] sm:$0xff] %v16699_v53  ;;  %v16705_v47 = vmax.f32 %v19781_v11, %v16467_v39  ;;  %v5538_v61 = vsel %vm5420_vm11, %v5444_v10, -1e+30  ;;  %v5358_v40 = vmax.f32 %v19783_v30, %v16681_v36  ;;  %v5453_v22 = vsel %vm2050_vm6, %v19784_v33, %v16691_v25  ;;  %v12622_v11 = vld [vmem:[#allocation13 + $0x4c] ss:$16 sps:$4 sm:$0xff]  }
 0x4ac   : > { %v5570_v27 = vmax.f32 %v5350_v46, %v5538_v61  ;;  %v16724_v10 = vmax.f32 %v6175_v57, %v16475_v45  ;;  %v16729_v13 = vsel %vm2050_vm6, %v16691_v25, %v16708_v23  ;;  %v5542_v55 = vsel %vm5421_vm10, %v5453_v22, -1e+30  ;;  %v16739_v57 = vpop.permute.xlu0 %5415  ;;  %8237 = vmatprep.subr.bf16.mxu1 %v12622_v11 }
 0x4ad   : > { %19782 = vst [vmem:[#allocation75_spill] sm:$0xff] %v16705_v47  ;;  %v5546_v31 = vsel %vm19252_vm12, %v16729_v13, -1e+30  ;;  %v16737_v61 = vmax.f32 %v5354_v6, %v5542_v55  ;;  %v5742_v45 = vrot.slane %v5670_v16, 1  ;;  %v16746_v33 = vsel %vm5137_vm9, %v16224_v44, -1e+30 }
 0x4ae   : > { %19786 = vst [vmem:[#allocation31_spill] sm:$0xff] %v16724_v10  ;;  %v5638_v14 = vmax.f32 %v5570_v27, %v5606_v48  ;;  %v16751_v22 = vsel %vm19242_vm8, %v16639_v8, -1e+30  ;;  %v12620_v6 = vld [vmem:[#allocation13 + $0x48] ss:$16 sps:$4 sm:$0xff]   ;;  %v4658_v55 = vpop.f32.mrb[20].mxu0  ;;  %v16755_v48 = vmax.f32 %v5358_v40, %v5546_v31  ;;  %v16766_v16 = vsel %vm1855_vm4, %v16667_v32, %v19787_v35 }
 0x4af   : > { %v4731_v27 = vpop.f32.mrb[32].mxu1  ;;  %v5744_v30 = vsel %vm1855_vm4, %v5742_v45, %v16414_v29  ;;  %v4786_v4 = vmul.f32 %v15918_v17, %v4658_v55  ;;  %v4660_v52 = vpop.f32.mrb[21].mxu0  ;;  %vm5426_vm8 = vcmp.eq.s32.totalorder %v16739_v57, 1  ;;  %8238 = vmatpush1.bf16.msra.mxu1 %v12620_v6  ;;  %v19788_v47 = vld [vmem:[#allocation30_spill] sm:$0xff]  ;;  %v19790_v32 = vld [vmem:[#allocation57_spill] sm:$0xff] }
 0x4b0   : > { %v4788_v20 = vmul.f32 %v19749_v21, %v4731_v27  ;;  %v4733_v46 = vpop.f32.mrb[33].mxu1  ;;  %v4787_v29 = vmul.f32 %v15924_v15, %v4660_v52  ;;  %v4662_v11 = vpop.f32.mrb[22].mxu0  ;;  %v16773_v27 = vmax.f32 %v5638_v14, %v5744_v30  ;;  %8239 = vmatprep.subr.bf16.mxu1 %v12628_v9  ;;  %v12619_v57 = vld [vmem:[#allocation13 + $0x44] ss:$16 sps:$4 sm:$0xff]  }
 0x4b1   : > { %v4789_v31 = vmul.f32 %v15927_v5, %v4733_v46  ;;  %v4735_v45 = vpop.f32.mrb[34].mxu1  ;;  %v4840_v44 = vadd.f32 %v15932_v18, %v4786_v4  ;;  %v4790_v53 = vmul.f32 %v15918_v17, %v4662_v11  ;;  %v4664_v52 = vpop.f32.mrb[23].mxu0  ;;  %v12626_v46 = vld [vmem:[#allocation13 + $0x68] ss:$16 sps:$4 sm:$0xff]   ;;  %v12634_v4 = vld [vmem:[#allocation13 + $0x8c] ss:$16 sps:$4 sm:$0xff]  }
 0x4b2   : > { %v4842_v35 = vadd.f32 %v15935_v54, %v4788_v20  ;;  %v4792_v40 = vmul.f32 %v19749_v21, %v4735_v45  ;;  %v4737_v10 = vpop.f32.mrb[35].mxu1  ;;  %v4841_v63 = vadd.f32 %v19788_v47, %v4787_v29  ;;  %v4791_v14 = vmul.f32 %v15924_v15, %v4664_v52  ;;  %v12640_v52 = vld [vmem:[#allocation13 + $0xac] ss:$16 sps:$4 sm:$0xff]  }
 0x4b3   : > { %v4843_v55 = vadd.f32 %v19789_v62, %v4789_v31  ;;  %v4793_v30 = vmul.f32 %v15927_v5, %v4737_v10  ;;  %v4984_v58 = vrot.slane %v4840_v44, 7  ;;  %v4844_v17 = vadd.f32 %v15932_v18, %v4790_v53  ;;  %v19792_v5 = vld [vmem:[#allocation62_spill] sm:$0xff]  ;;  %8240 = vmatpush1.bf16.msra.mxu1 %v12626_v46 }
 0x4b4   : > { %v4988_v20 = vrot.slane %v4842_v35, 7  ;;  %v4846_v21 = vadd.f32 %v15935_v54, %v4792_v40  ;;  %v4986_v11 = vrot.slane %v4841_v63, 7  ;;  %v4845_v6 = vadd.f32 %v19788_v47, %v4791_v14  ;;  %v12632_v18 = vld [vmem:[#allocation13 + $0x88] ss:$16 sps:$4 sm:$0xff]   ;;  %8241 = vmatprep.subr.bf16.mxu1 %v12634_v4 }
 0x4b5   : > { %v4990_v45 = vrot.slane %v4843_v55, 7  ;;  %v4847_v29 = vadd.f32 %v19789_v62, %v4793_v30  ;;  %v19791_v31 = vrot.slane %v19790_v32, 7  ;;  %v19793_v9 = vrot.slane %v19792_v5, 7  ;;  %v19794_v63 = vld [vmem:[#allocation34_spill] sm:$0xff]  ;;  %v19796_v62 = vld [vmem:[#allocation79_spill] sm:$0xff] }
 0x4b6   : > { %v4992_v44 = vrot.slane %v4844_v17, 7  ;;  %v4996_v35 = vrot.slane %v4846_v21, 7  ;;  %v19795_v54 = vrot.slane %v19794_v63, 7  ;;  %v19797_v47 = vrot.slane %v19796_v62, 7 }
 0x4b7   : > { %v16791_v15 = vsel %vm1605_vm0, %v19791_v31, %v4984_v58  ;;  %v4989_v10 = vsel %vm1605_vm0, %v19793_v9, %v4988_v20  ;;  %v4994_v40 = vrot.slane %v4845_v6, 7  ;;  %v4998_v55 = vrot.slane %v4847_v29, 7  ;;  %8242 = vmatpush1.bf16.msra.mxu1 %v12632_v18 }
 0x4b8   : > { %5062 = vst [vmem:[#allocation3 + $0xf0] sm:$0xff] %v4989_v10  ;;  %v16799_v53 = vsel %vm1605_vm0, %v19795_v54, %v4986_v11  ;;  %v4991_v32 = vsel %vm1605_vm0, %v19797_v47, %v4990_v45  ;;  %v16805_v14 = vsel %vm1605_vm0, %v4984_v58, %v4992_v44  ;;  %5068 = vst [vmem:[#allocation3 + $0x120] sm:$0x1] %v4992_v44  ;;  %v16828_v6 = vsel %vm5421_vm10, %v16729_v13, -1e+30  ;;  %v19802_v54 = vld [vmem:[#allocation46_spill] sm:$0xff] }
 0x4b9   : > { %5063 = vst [vmem:[#allocation3 + $0xf8] sm:$0xff] %v4991_v32  ;;  %v4997_v46 = vsel %vm1605_vm0, %v4988_v20, %v4996_v35  ;;  %5070 = vst [vmem:[#allocation3 + $0x130] sm:$0x1] %v4996_v35  ;;  %v16809_v30 = vrot.slane %v16799_v53, 1  ;;  %v16812_v17 = vrot.slane %v16799_v53, 2  ;;  %v16816_v4 = vsel %vm1605_vm0, %v4986_v11, %v4994_v40  ;;  %8243 = vmatprep.subr.bf16.mxu1 %v12640_v52  ;;  %v19803_v52 = vld [vmem:[#allocation39_spill] sm:$0xff] }
 0x4ba   : > { %5064 = vst [vmem:[#allocation3 + $0x100] sm:$0xff] %v16805_v14  ;;  %5066 = vst [vmem:[#allocation3 + $0x110] sm:$0xff] %v4997_v46  ;;  %v4999_v58 = vsel %vm1605_vm0, %v4990_v45, %v4998_v55  ;;  %v19798_v20 = vrot.slane %v16721_v42, 2  ;;  %v19799_v11 = vrot.slane %v16527_v49, 1  ;;  %v19800_v29 = vrot.slane %v16527_v49, 2 }
 0x4bb   : > { %5069 = vst [vmem:[#allocation3 + $0x128] sm:$0x1] %v4994_v40  ;;  %5071 = vst [vmem:[#allocation3 + $0x138] sm:$0x1] %v4998_v55  ;;  %v16843_v31 = vrot.slane %v16816_v4, 2  ;;  %v19801_v10 = vmax.f32 %v16624_v3, %v16635_v56  ;;  %vm5143_vm0 = vcmp.eq.s32.totalorder %v19802_v54, 1 }
 0x4bc   : > { %v16823_v21 = vsel %vm2050_vm6, %v19798_v20, %v16691_v25  ;;  %5065 = vst [vmem:[#allocation3 + $0x108] sm:$0xff] %v16816_v4  ;;  %5067 = vst [vmem:[#allocation3 + $0x118] sm:$0xff] %v4999_v58  ;;  %v5303_v45 = vsel %vm1855_vm4, %v19799_v11, %v16809_v30  ;;  %v5491_v42 = vsel %vm2050_vm6, %v19800_v29, %v16812_v17  ;;  %v16840_v25 = vrot.slane %v16816_v4, 1  ;;  %v12638_v13 = vld [vmem:[#allocation13 + $0xa8] ss:$16 sps:$4 sm:$0xff]  }
 0x4bd   : > { %v5373_v5 = vmax.f32 %v16650_v2, %v5303_v45  ;;  %v5561_v9 = vsel %vm5426_vm8, %v5491_v42, -1e+30  ;;  %v5857_v44 = vmax.f32 %v19801_v10, %v5303_v45  ;;  %v6005_v49 = vsel %vm5425_vm5, %v5491_v42, -1e+30  ;;  %8244 = vmatpush1.bf16.msra.mxu1 %v12638_v13 }
 0x4be   : > { %v5791_v35 = vsel %vm1855_vm4, %v16809_v30, %v16840_v25  ;;  %v5939_v18 = vsel %vm2050_vm6, %v16812_v17, %v16843_v31  ;;  %v6189_v2 = vmax.f32 %v16637_v28, %v5303_v45  ;;  %v5629_v56 = vsel %vm5142_vm1, %v16799_v53, -1e+30 }
 0x4bf   : > { %v5593_v3 = vmax.f32 %v5373_v5, %v5561_v9  ;;  %v6037_v62 = vmax.f32 %v5857_v44, %v6005_v49  ;;  %v6273_v47 = vsel %vm5424_vm2, %v5491_v42, -1e+30  ;;  %v6073_v32 = vsel %vm5141_vm3, %v16799_v53, -1e+30 }
 0x4c0   : > { %v6305_v40 = vmax.f32 %v6189_v2, %v6273_v47  ;;  %v16872_v28 = vrot.slane %v16791_v15, 1  ;;  %v16875_v55 = vrot.slane %v16791_v15, 2  ;;  %vm5427_vm12 = vcmp.eq.s32.totalorder %v19803_v52, 1  ;;  %v12617_v52 = vld [vmem:[#allocation13 + $0x40] ss:$16 sps:$4 sm:$0xff]  }
 0x4c1   : > { %v5661_v46 = vmax.f32 %v5593_v3, %v5629_v56  ;;  %v6105_v58 = vmax.f32 %v6037_v62, %v6073_v32  ;;  %v16879_v20 = vrot.slane %v16805_v14, 1  ;;  %v16882_v11 = vrot.slane %v16805_v14, 2 }
 0x4c2   : > { %v6009_v45 = vsel %vm5426_vm8, %v5939_v18, -1e+30  ;;  %v6277_v29 = vsel %vm5425_vm5, %v5939_v18, -1e+30  ;;  %v19804_v42 = vrot.slane %v16519_v59, 1  ;;  %v19805_v5 = vrot.slane %v16519_v59, 2 }
 0x4c3   : > { %v5861_v10 = vmax.f32 %v5661_v46, %v5791_v35  ;;  %v6193_v44 = vmax.f32 %v6105_v58, %v5791_v35  ;;  %v5789_v18 = vsel %vm1855_vm4, %v16872_v28, %v16879_v20  ;;  %v19806_v3 = vmax.f32 %v16652_v37, %v16660_v50  ;;  %v5209_v62 = vld [vmem:[#allocation3 + $0x108] sm:$0x1] }
 0x4c4   : > { %v5301_v13 = vsel %vm1855_vm4, %v19804_v42, %v16872_v28  ;;  %v5489_v9 = vsel %vm2050_vm6, %v19805_v5, %v16875_v55  ;;  %v5937_v59 = vsel %vm2050_vm6, %v16875_v55, %v16882_v11  ;;  %v5628_v58 = vsel %vm5142_vm1, %v16791_v15, -1e+30 }
 0x4c5   : > { %v5372_v49 = vmax.f32 %v16672_v60, %v5301_v13  ;;  %v5560_v2 = vsel %vm5426_vm8, %v5489_v9, -1e+30  ;;  %v5856_v56 = vmax.f32 %v19806_v3, %v5301_v13  ;;  %v6004_v35 = vsel %vm5425_vm5, %v5489_v9, -1e+30  ;;  %v5385_v60 = vld [vmem:[#allocation3 + $0x108] sm:$0x3] }
 0x4c6   : > { %v6041_v47 = vmax.f32 %v5861_v10, %v6009_v45  ;;  %v6309_v32 = vmax.f32 %v6193_v44, %v6277_v29  ;;  %v6072_v37 = vsel %vm5141_vm3, %v16791_v15, -1e+30  ;;  %v6188_v50 = vmax.f32 %v16662_v19, %v5301_v13  ;;  %v5873_v3 = vld [vmem:[#allocation3 + $0x128] sm:$0x3] }
 0x4c7   : > { %v5592_v46 = vmax.f32 %v5372_v49, %v5560_v2  ;;  %v6036_v42 = vmax.f32 %v5856_v56, %v6004_v35  ;;  %v6272_v5 = vsel %vm5424_vm2, %v5489_v9, -1e+30  ;;  %v5310_v45 = vrot.slane %v5209_v62, 1  ;;  %v5697_v10 = vld [vmem:[#allocation3 + $0x128] sm:$0x1] }
 0x4c8   : > { %v12188_v63 = vpack.c.bf16 %v6309_v32, %v6305_v40  ;;  %v5498_v29 = vrot.slane %v5385_v60, 2  ;;  %v6008_v44 = vsel %vm5426_vm8, %v5937_v59, -1e+30  ;;  %v6304_v2 = vmax.f32 %v6188_v50, %v6272_v5 }
 0x4c9   : > { %v5660_v0 = vmax.f32 %v5592_v46, %v5628_v58  ;;  %v6104_v49 = vmax.f32 %v6036_v42, %v6072_v37  ;;  %v5173_v56 = vsel %vm5143_vm0, %v16799_v53, -1e+30  ;;  %v5311_v13 = vsel %vm1855_vm4, %v16809_v30, %v5310_v45  ;;  %v6049_v46 = vld [vmem:[#allocation3 + $0x128] sm:$0xff]  ;;  %v5208_v58 = vld [vmem:[#allocation3 + $0x100] sm:$0x1] }
 0x4ca   : > { %12189 = vmatprep.subr.bf16.mxu0 %v12188_v63  ;;  %v5499_v40 = vsel %vm2050_vm6, %v16812_v17, %v5498_v29  ;;  %v5946_v9 = vrot.slane %v5873_v3, 2  ;;  %v5377_v62 = vmax.f32 %v5173_v56, %v5311_v13  ;;  %v5798_v32 = vrot.slane %v5697_v10, 1  ;;  %v5384_v30 = vld [vmem:[#allocation3 + $0x100] sm:$0x3] }
 0x4cb   : > { %v5860_v19 = vmax.f32 %v5660_v0, %v5789_v18  ;;  %v6192_v35 = vmax.f32 %v6104_v49, %v5789_v18  ;;  %v5565_v60 = vsel %vm5427_vm12, %v5499_v40, -1e+30  ;;  %v6276_v53 = vsel %vm5425_vm5, %v5937_v59, -1e+30  ;;  %v5872_v13 = vld [vmem:[#allocation3 + $0x120] sm:$0x3] }
 0x4cc   : > { %v6077_v0 = vsel %vm5142_vm1, %v16816_v4, -1e+30  ;;  %v19807_v17 = vrot.slane %v16693_v43, 2  ;;  %v5597_v37 = vmax.f32 %v5377_v62, %v5565_v60  ;;  %v5947_v50 = vsel %vm2050_vm6, %v16843_v31, %v5946_v9  ;;  %v19808_v62 = vld [vmem:[#allocation66_spill] sm:$0xff] }
 0x4cd   : > { %v6040_v42 = vmax.f32 %v5860_v19, %v6008_v44  ;;  %v6308_v18 = vmax.f32 %v6192_v35, %v6276_v53  ;;  %v6109_v5 = vmax.f32 %v6041_v47, %v6077_v0  ;;  %v5633_v59 = vsel %vm5143_vm0, %v16816_v4, -1e+30  ;;  %v5696_v19 = vld [vmem:[#allocation3 + $0x120] sm:$0x1] }
 0x4ce   : > { %v16939_v63 = vsel %vm2050_vm6, %v16708_v23, %v19807_v17  ;;  %v6146_v3 = vrot.slane %v6049_v46, 1  ;;  %v6230_v45 = vrot.slane %v6049_v46, 2  ;;  %v5308_v29 = vrot.slane %v5208_v58, 1 }
 0x4cf   : > { %v12190_v10 = vpack.c.bf16 %v6308_v18, %v6304_v2  ;;  %v5665_v44 = vmax.f32 %v5597_v37, %v5633_v59  ;;  %v5799_v49 = vsel %vm1855_vm4, %v16840_v25, %v5798_v32  ;;  %v5496_v56 = vrot.slane %v5384_v30, 2  ;;  %v6048_v37 = vld [vmem:[#allocation3 + $0x120] sm:$0xff] }
 0x4d0   : > { %v6013_v40 = vsel %vm5427_vm12, %v5947_v50, -1e+30  ;;  %v6147_v47 = vsel %vm1855_vm4, %v16840_v25, %v6146_v3  ;;  %v6231_v4 = vsel %vm2050_vm6, %v16843_v31, %v6230_v45  ;;  %v5172_v2 = vsel %vm5143_vm0, %v16791_v15, -1e+30 }
 0x4d1   : > { %12191 = vmatpush1.bf16.msra.mxu0 %v12190_v10  ;;  %v5865_v9 = vmax.f32 %v5665_v44, %v5799_v49  ;;  %v6197_v35 = vmax.f32 %v6109_v5, %v6147_v47  ;;  %v19809_v60 = vrot.slane %v19808_v62, 2  ;;  %v6281_v58 = vsel %vm5426_vm8, %v6231_v4, -1e+30  ;;  %v19811_v44 = vld [vmem:[#allocation65_spill] sm:$0xff] }
 0x4d2   : > { %v5309_v25 = vsel %vm1855_vm4, %v16872_v28, %v5308_v29  ;;  %v5497_v31 = vsel %vm2050_vm6, %v16875_v55, %v5496_v56  ;;  %v5796_v53 = vrot.slane %v5696_v19, 1  ;;  %v5944_v0 = vrot.slane %v5872_v13, 2  ;;  %v6118_v4 = vld [vmem:[#allocation3 + $0x50] sm:$0xfe] }
 0x4d3   : > { %v6239_v32 = vsel %vm2050_vm6, %v6230_v45, %v19809_v60  ;;  %v6045_v30 = vmax.f32 %v5865_v9, %v6013_v40  ;;  %v6313_v15 = vmax.f32 %v6197_v35, %v6281_v58  ;;  %v5376_v17 = vmax.f32 %v5172_v2, %v5309_v25  ;;  %v6206_v60 = vld [vmem:[#allocation3 + $0x50] sm:$0xfc]  ;;  %v19813_v58 = vld [vmem:[#allocation76_spill] sm:$0xff] }
 0x4d4   : > { %v5564_v18 = vsel %vm5427_vm12, %v5497_v31, -1e+30  ;;  %v6081_v50 = vsel %vm5143_vm0, %v6049_v46, -1e+30  ;;  %v6076_v5 = vsel %vm5142_vm1, %v16805_v14, -1e+30  ;;  %v19810_v28 = vmax.f32 %v16737_v61, %v16746_v33 }
 0x4d5   : > { %v5986_v59 = vsel %vm5420_vm11, %v16823_v21, -1e+30  ;;  %v6113_v45 = vmax.f32 %v6045_v30, %v6081_v50  ;;  %v5596_v29 = vmax.f32 %v5376_v17, %v5564_v18  ;;  %v5632_v10 = vsel %vm5143_vm0, %v16805_v14, -1e+30  ;;  %v19815_v18 = vld [vmem:[#allocation29_spill] sm:$0xff] }
 0x4d6   : > { %v5842_v55 = vmax.f32 %v19810_v28, %v16681_v36  ;;  %v6108_v46 = vmax.f32 %v6040_v42, %v6076_v5  ;;  %v19812_v49 = vrot.slane %v19811_v44, 1  ;;  %v6285_v19 = vsel %vm5427_vm12, %v6239_v32, -1e+30  ;;  %v17000_v32 = vld [vmem:[#allocation3 + $0xb8] sm:$0xff] }
 0x4d7   : > { %v6144_v61 = vrot.slane %v6048_v37, 1  ;;  %v6228_v36 = vrot.slane %v6048_v37, 2  ;;  %v5664_v13 = vmax.f32 %v5596_v29, %v5632_v10  ;;  %v5797_v21 = vsel %vm1855_vm4, %v16879_v20, %v5796_v53  ;;  %v19817_v29 = vld [vmem:[#allocation50_spill] sm:$0xff] }
 0x4d8   : > { %v6155_v56 = vsel %vm1855_vm4, %v6146_v3, %v19812_v49  ;;  %v5945_v40 = vsel %vm2050_vm6, %v16882_v11, %v5944_v0  ;;  %v6018_v3 = vmax.f32 %v16773_v27, %v5986_v59  ;;  %v6022_v47 = vmax.f32 %v5842_v55, %v16828_v6  ;;  %v12802_v6 = vld [vmem:[#allocation3 + $0x50] sm:$0xff] }
 0x4d9   : > { %v6201_v33 = vmax.f32 %v6113_v45, %v6155_v56  ;;  %v6145_v14 = vsel %vm1855_vm4, %v16879_v20, %v6144_v61  ;;  %v6229_v42 = vsel %vm2050_vm6, %v16882_v11, %v6228_v36  ;;  %v5864_v9 = vmax.f32 %v5664_v13, %v5797_v21  ;;  %v17037_v21 = vld [vmem:[#allocation3 + $0xd8] sm:$0xff] }
 0x4da   : > { %v6080_v35 = vsel %vm5143_vm0, %v6048_v37, -1e+30  ;;  %v6196_v62 = vmax.f32 %v6108_v46, %v6145_v14  ;;  %v6012_v20 = vsel %vm5427_vm12, %v5945_v40, -1e+30  ;;  %v19814_v25 = vrot.slane %v19813_v58, 2  ;;  %v19818_v46 = vld [vmem:[#allocation58_spill] sm:$0xff] }
 0x4db   : > { %v6317_v2 = vmax.f32 %v6201_v33, %v6285_v19  ;;  %v6280_v27 = vsel %vm5426_vm8, %v6229_v42, -1e+30  ;;  %v6054_v31 = vsel %vm5136_vm7, %v12802_v6, -1e+30  ;;  %v6044_v0 = vmax.f32 %v5864_v9, %v6012_v20  ;;  %v19819_v19 = vld [vmem:[#allocation35_spill] sm:$0xff] }
 0x4dc   : > { %v6237_v11 = vsel %vm2050_vm6, %v6228_v36, %v19814_v25  ;;  %v6312_v30 = vmax.f32 %v6196_v62, %v6280_v27  ;;  %v6058_v17 = vsel %vm5137_vm9, %v16639_v8, -1e+30  ;;  %v19816_v37 = vrot.slane %v19815_v18, 1 }
 0x4dd   : > { %v12192_v53 = vpack.c.bf16 %v6317_v2, %v6313_v15  ;;  %v6086_v5 = vmax.f32 %v6018_v3, %v6054_v31  ;;  %v6090_v28 = vmax.f32 %v6022_v47, %v6058_v17  ;;  %v6140_v55 = vrot.slane %v6118_v4, 1  ;;  %v19826_v31 = vld [vmem:[#allocation63_spill] sm:$0xff] }
 0x4de   : > { %v6153_v50 = vsel %vm1855_vm4, %v6144_v61, %v19816_v37  ;;  %v6112_v59 = vmax.f32 %v6044_v0, %v6080_v35  ;;  %v6224_v45 = vrot.slane %v6206_v60, 2  ;;  %v5159_v39 = vsel %vm5139_vm13, %v19817_v29, -1e+30  ;;  %v17069_v37 = vld [vmem:[#allocation3 + $0xb0] sm:$0xff] }
 0x4df   : > { %12193 = vmatprep.subr.bf16.mxu0 %v12192_v53  ;;  %v5290_v15 = vrot.slane %v17000_v32, 1  ;;  %v6284_v1 = vsel %vm5427_vm12, %v6237_v11, -1e+30  ;;  %v6178_v10 = vmax.f32 %v6090_v28, %v16766_v16  ;;  %v5163_v44 = vsel %vm5140_vm15, %v19818_v46, -1e+30 }
 0x4e0   : > { %v5363_v49 = vmax.f32 %v5159_v39, %v16439_v26  ;;  %v6200_v56 = vmax.f32 %v6112_v59, %v6153_v50  ;;  %v6141_v61 = vsel %vm1855_vm4, %v6140_v55, %v19819_v19  ;;  %v6225_v36 = vsel %vm2050_vm6, %v6224_v45, %v16708_v23  ;;  %v19821_v26 = vld [vmem:[#allocation68_spill] sm:$0xff]  ;;  %v19830_v55 = vld [vmem:[#allocation75_spill] sm:$0xff] }
 0x4e1   : > { %v19820_v33 = vrot.slane %v19818_v46, 1  ;;  %v6174_v40 = vmax.f32 %v6086_v5, %v6141_v61  ;;  %v5478_v42 = vrot.slane %v17000_v32, 2  ;;  %v5551_v47 = vsel %vm5423_vm14, %v19821_v26, -1e+30  ;;  %v19828_v5 = vld [vmem:[#allocation51_spill] sm:$0xff] }
 0x4e2   : > { %v6316_v4 = vmax.f32 %v6200_v56, %v6284_v1  ;;  %v19823_v23 = vmax.f32 %v16755_v48, %v16751_v22  ;;  %v6262_v35 = vsel %vm5421_vm10, %v16939_v63, -1e+30  ;;  %v5583_v62 = vmax.f32 %v5363_v49, %v5551_v47  ;;  %v19831_v59 = vld [vmem:[#allocation31_spill] sm:$0xff] }
 0x4e3   : > { %v17035_v13 = vsel %vm1855_vm4, %v19820_v33, %v5290_v15  ;;  %v6294_v60 = vmax.f32 %v6178_v10, %v6262_v35  ;;  %v19825_v20 = vrot.slane %v19818_v46, 2  ;;  %v5619_v25 = vsel %vm5139_vm13, %v19818_v46, -1e+30  ;;  %v19833_v10 = vld [vmem:[#allocation33_spill] sm:$0xff] }
 0x4e4   : > { %v5367_v14 = vmax.f32 %v5163_v44, %v17035_v13  ;;  %v17048_v2 = vmax.f32 %v19823_v23, %v16766_v16  ;;  %v5926_v11 = vrot.slane %v17037_v21, 2  ;;  %v12194_v27 = vpack.c.bf16 %v6316_v4, %v6312_v30  ;;  %v19834_v44 = vld [vmem:[#allocation74_spill] sm:$0xff]  ;;  %v17099_v33 = vld [vmem:[%s19453_s24] sm:$0xff]  ;;  %v17109_v4 = vld [vmem:[#allocation4] sm:$0xff] }
 0x4e5   : > { %v5479_v58 = vsel %vm2050_vm6, %v19825_v20, %v5478_v42  ;;  %v6258_v22 = vsel %vm5420_vm11, %v6225_v36, -1e+30  ;;  %v5651_v6 = vmax.f32 %v5583_v62, %v5619_v25  ;;  %vm19827_vm7 = vcmp.eq.s32.totalorder %v19826_v31, 1  ;;  %v17118_v35 = vld [vmem:[#allocation3 + $0xd0] sm:$0xff] }
 0x4e6   : > { %v5555_v48 = vsel %vm5424_vm2, %v5479_v58, -1e+30  ;;  %v5994_v53 = vsel %vm19827_vm7, %v16939_v63, -1e+30  ;;  %v6290_v0 = vmax.f32 %v6174_v40, %v6258_v22  ;;  %v5999_v18 = vsel %vm5423_vm14, %v5479_v58, -1e+30  ;;  %12195 = vmatpush1.bf16.msra.mxu0 %v12194_v27  ;;  %vm19838_vm11 = vmmov %vm19827_vm7 }
 0x4e7   : > { %v5587_v17 = vmax.f32 %v5367_v14, %v5555_v48  ;;  %v6026_v30 = vmax.f32 %v17048_v2, %v5994_v53  ;;  %v5623_v7 = vsel %vm5140_vm15, %v17000_v32, -1e+30  ;;  %v5851_v50 = vmax.f32 %v5651_v6, %v17035_v13 }
 0x4e8   : > { %vm19829_vm9 = vcmp.eq.s32.totalorder %v19828_v5, 1  ;;  %v19832_v45 = vpack.c.bf16 %v19830_v55, %v19831_v59  ;;  %v12198_v29 = vpack.c.bf16 %v6294_v60, %v6290_v0  ;;  %v5778_v39 = vrot.slane %v17037_v21, 1 }
 0x4e9   : > { %v6063_v28 = vsel %vm19829_vm9, %v19818_v46, -1e+30  ;;  %v5927_v1 = vsel %vm2050_vm6, %v5478_v42, %v5926_v11  ;;  %v19835_v49 = vmax.f32 %v19833_v10, %v19834_v44  ;;  %v6031_v19 = vmax.f32 %v5851_v50, %v5999_v18 }
 0x4ea   : > { %12197 = vmatprep.subr.bf16.mxu0 %v19832_v45  ;;  %v6067_v46 = vsel %vm5139_vm13, %v17000_v32, -1e+30  ;;  %v5158_v61 = vsel %vm5139_vm13, %v16639_v8, -1e+30  ;;  %v5288_v36 = vrot.slane %v17069_v37, 1  ;;  %vm19836_vm10 = vcmask 523264  }
 0x4eb   : > { %v6095_v56 = vmax.f32 %v19835_v49, %v6063_v28  ;;  %11753 = vmatmul.mubr.msk.f32.vlgmr.msra.gmra.mrb[24].mxu0 %vm19836_vm10, %v17099_v33  ;;  %v5655_v40 = vmax.f32 %v5587_v17, %v5623_v7  ;;  %v5162_v14 = vsel %vm5140_vm15, %v16693_v43, -1e+30  ;;  %v5362_v42 = vmax.f32 %v5158_v61, %v16766_v16  ;;  %vm19840_vm7 = vmmov %vm19836_vm10  ;;  %v17155_v45 = vld [vmem:[#allocation3 + $0xf8] sm:$0xff] }
 0x4ec   : > { %v5476_v26 = vrot.slane %v17069_v37, 2  ;;  %12199 = vmatpush1.bf16.msra.mxu0 %v12198_v29  ;;  %v6099_v8 = vmax.f32 %v6031_v19, %v6067_v46  ;;  %6390 = vmatprep.mubr.f32.mxu0 %v17109_v4  ;;  %v19837_v23 = vrot.slane %v16693_v43, 1  ;;  %v5550_v9 = vsel %vm5423_vm14, %v16939_v63, -1e+30 }
 0x4ed   : > { %v6183_v47 = vmax.f32 %v6095_v56, %v17035_v13  ;;  %v5779_v16 = vsel %vm1855_vm4, %v5290_v15, %v5778_v39  ;;  %v6267_v13 = vsel %vm19838_vm11, %v5479_v58, -1e+30  ;;  %v19839_v60 = vrot.slane %v16693_v43, 2  ;;  %v17135_v15 = vld [vmem:[%s19453_s24 + $0x8] sm:$0xff] }
 0x4ee   : > { %v5289_v2 = vsel %vm1855_vm4, %v19837_v23, %v5288_v36  ;;  %v6187_v25 = vmax.f32 %v6099_v8, %v5779_v16  ;;  %v6271_v27 = vsel %vm5423_vm14, %v5927_v1, -1e+30  ;;  %v5582_v22 = vmax.f32 %v5362_v42, %v5550_v9 }
 0x4ef   : > { %v5366_v62 = vmax.f32 %v5162_v14, %v5289_v2  ;;  %v5477_v20 = vsel %vm2050_vm6, %v19839_v60, %v5476_v26  ;;  %v5855_v48 = vmax.f32 %v5655_v40, %v5779_v16  ;;  %11754 = vmatmul.mubr.msk.f32.gmra.mrb[26].mxu0 %vm19840_vm7, %v17135_v15  ;;  %v5618_v6 = vsel %vm5139_vm13, %v16693_v43, -1e+30 }
 0x4f0   : > { %v5554_v63 = vsel %vm5424_vm2, %v5477_v20, -1e+30  ;;  %v5924_v53 = vrot.slane %v17118_v35, 2  ;;  %v6003_v0 = vsel %vm5424_vm2, %v5927_v1, -1e+30  ;;  %v6299_v17 = vmax.f32 %v6183_v47, %v6267_v13  ;;  %6461 = vmatprep.mubr.f32.mxu0 %v17109_v4 }
 0x4f1   : > { %v5586_v58 = vmax.f32 %v5366_v62, %v5554_v63  ;;  %v6303_v18 = vmax.f32 %v6187_v25, %v6271_v27  ;;  %v5650_v7 = vmax.f32 %v5582_v22, %v5618_v6  ;;  %v5776_v50 = vrot.slane %v17118_v35, 1 }
 0x4f2   : > { %v5925_v28 = vsel %vm2050_vm6, %v5476_v26, %v5924_v53  ;;  %v5998_v55 = vsel %vm5423_vm14, %v5477_v20, -1e+30  ;;  %v6062_v59 = vsel %vm19829_vm9, %v16693_v43, -1e+30  ;;  %v5622_v10 = vsel %vm5140_vm15, %v17069_v37, -1e+30 }
 0x4f3   : > { %v12200_v29 = vpack.c.bf16 %v6303_v18, %v6299_v17  ;;  %v5850_v44 = vmax.f32 %v5650_v7, %v5289_v2  ;;  %v6094_v49 = vmax.f32 %v6026_v30, %v6062_v59  ;;  %v6035_v56 = vmax.f32 %v5855_v48, %v6003_v0  ;;  %v17183_v26 = vld [vmem:[#allocation3 + $0x118] sm:$0xff]  ;;  %v17211_v48 = vld [vmem:[#allocation3 + $0xf0] sm:$0xff] }
 0x4f4   : > { %v5654_v19 = vmax.f32 %v5586_v58, %v5622_v10  ;;  %v6066_v46 = vsel %vm5139_vm13, %v17069_v37, -1e+30  ;;  %v5167_v5 = vsel %vm5141_vm3, %v17000_v32, -1e+30  ;;  %v17168_v43 = vsel %vm5424_vm2, %v5925_v28, -1e+30  ;;  %vm19841_vm13 = vmmov %vm19838_vm11 }
 0x4f5   : > { %12201 = vmatprep.subr.bf16.mxu0 %v12200_v29  ;;  %v6030_v61 = vmax.f32 %v5850_v44, %v5998_v55  ;;  %v17171_v40 = vrot.slane %v17155_v45, 1  ;;  %v5371_v30 = vmax.f32 %v5167_v5, %v5779_v16  ;;  %v5777_v14 = vsel %vm1855_vm4, %v5288_v36, %v5776_v50 }
 0x4f6   : > { %v6266_v12 = vsel %vm19841_vm13, %v5477_v20, -1e+30  ;;  %v17179_v42 = vrot.slane %v17155_v45, 2  ;;  %v5559_v32 = vsel %vm5425_vm5, %v5927_v1, -1e+30  ;;  %v6182_v47 = vmax.f32 %v6094_v49, %v5289_v2 }
 0x4f7   : > { %v6098_v8 = vmax.f32 %v6030_v61, %v6066_v46  ;;  %v5307_v23 = vsel %vm1855_vm4, %v5778_v39, %v17171_v40  ;;  %v5591_v9 = vmax.f32 %v5371_v30, %v5559_v32  ;;  %v5854_v36 = vmax.f32 %v5654_v19, %v5777_v14  ;;  %v17249_v61 = vld [vmem:[#allocation3 + $0x110] sm:$0xff] }
 0x4f8   : > { %v5171_v31 = vsel %vm5142_vm1, %v17037_v21, -1e+30  ;;  %v5495_v1 = vsel %vm2050_vm6, %v5926_v11, %v17179_v42  ;;  %v5627_v2 = vsel %vm5141_vm3, %v17037_v21, -1e+30  ;;  %v17200_v39 = vrot.slane %v17183_v26, 2 }
 0x4f9   : > { %v6186_v16 = vmax.f32 %v6098_v8, %v5777_v14  ;;  %v5375_v13 = vmax.f32 %v5171_v31, %v5307_v23  ;;  %v5659_v62 = vmax.f32 %v5591_v9, %v5627_v2  ;;  %v6270_v60 = vsel %vm5423_vm14, %v5925_v28, -1e+30  ;;  %v5211_v2 = vld [vmem:[#allocation3 + $0x118] sm:$0x1] }
 0x4fa   : > { %v5563_v20 = vsel %vm5426_vm8, %v5495_v1, -1e+30  ;;  %v6007_v25 = vsel %vm5425_vm5, %v5495_v1, -1e+30  ;;  %v6298_v11 = vmax.f32 %v6182_v47, %v6266_v12  ;;  %v6071_v22 = vsel %vm5140_vm15, %v17037_v21, -1e+30 }
 0x4fb   : > { %v6302_v27 = vmax.f32 %v6186_v16, %v6270_v60  ;;  %v5859_v63 = vmax.f32 %v5659_v62, %v5307_v23  ;;  %v6034_v58 = vmax.f32 %v5854_v36, %v17168_v43  ;;  %v5631_v3 = vsel %vm5142_vm1, %v17155_v45, -1e+30  ;;  %v5387_v16 = vld [vmem:[#allocation3 + $0x118] sm:$0x3] }
 0x4fc   : > { %v17218_v6 = vrot.slane %v17183_v26, 1  ;;  %v6103_v0 = vmax.f32 %v6035_v56, %v6071_v22  ;;  %v5595_v18 = vmax.f32 %v5375_v13, %v5563_v20  ;;  %v5943_v7 = vsel %vm2050_vm6, %v17179_v42, %v17200_v39 }
 0x4fd   : > { %v12202_v17 = vpack.c.bf16 %v6302_v27, %v6298_v11  ;;  %v6039_v55 = vmax.f32 %v5859_v63, %v6007_v25  ;;  %v6075_v21 = vsel %vm5141_vm3, %v17155_v45, -1e+30  ;;  %v5166_v29 = vsel %vm5141_vm3, %v17069_v37, -1e+30  ;;  %v5875_v63 = vld [vmem:[#allocation3 + $0x138] sm:$0x3] }
 0x4fe   : > { %v6191_v59 = vmax.f32 %v6103_v0, %v5307_v23  ;;  %v17230_v10 = vrot.slane %v17211_v48, 1  ;;  %v5370_v49 = vmax.f32 %v5166_v29, %v5777_v14  ;;  %v17233_v56 = vrot.slane %v17211_v48, 2 }
 0x4ff   : > { %12203 = vmatpush1.bf16.msra.mxu0 %v12202_v17  ;;  %v6107_v44 = vmax.f32 %v6039_v55, %v6075_v21  ;;  %v5558_v19 = vsel %vm5425_vm5, %v5925_v28, -1e+30  ;;  %v5795_v46 = vsel %vm1855_vm4, %v17171_v40, %v17218_v6  ;;  %v6275_v5 = vsel %vm5424_vm2, %v5495_v1, -1e+30 }
 0x500   : > { %v5170_v37 = vsel %vm5142_vm1, %v17118_v35, -1e+30  ;;  %v5305_v43 = vsel %vm1855_vm4, %v5776_v50, %v17230_v10  ;;  %v5493_v14 = vsel %vm2050_vm6, %v5924_v53, %v17233_v56  ;;  %v5590_v12 = vmax.f32 %v5370_v49, %v5558_v19 }
 0x501   : > { %v6195_v30 = vmax.f32 %v6107_v44, %v5795_v46  ;;  %v5374_v28 = vmax.f32 %v5170_v37, %v5305_v43  ;;  %v5663_v32 = vmax.f32 %v5595_v18, %v5631_v3  ;;  %v6279_v8 = vsel %vm5425_vm5, %v5943_v7, -1e+30 }
 0x502   : > { %v5562_v47 = vsel %vm5426_vm8, %v5493_v14, -1e+30  ;;  %v5626_v50 = vsel %vm5141_vm3, %v17118_v35, -1e+30  ;;  %v6307_v23 = vmax.f32 %v6191_v59, %v6275_v5  ;;  %v17263_v31 = vrot.slane %v17249_v61, 2 }
 0x503   : > { %v6311_v9 = vmax.f32 %v6195_v30, %v6279_v8  ;;  %v5658_v36 = vmax.f32 %v5590_v12, %v5626_v50  ;;  %v5594_v1 = vmax.f32 %v5374_v28, %v5562_v47  ;;  %v6006_v53 = vsel %vm5425_vm5, %v5493_v14, -1e+30  ;;  %v6123_v50 = vld [vmem:[#allocation3 + $0x158] sm:$0x1] }
 0x504   : > { %v6070_v60 = vsel %vm5140_vm15, %v17118_v35, -1e+30  ;;  %v5863_v20 = vmax.f32 %v5663_v32, %v5795_v46  ;;  %v5630_v25 = vsel %vm5142_vm1, %v17211_v48, -1e+30  ;;  %v17274_v11 = vrot.slane %v17249_v61, 1 }
 0x505   : > { %v12204_v13 = vpack.c.bf16 %v6311_v9, %v6307_v23  ;;  %v5858_v62 = vmax.f32 %v5658_v36, %v5305_v43  ;;  %v6102_v27 = vmax.f32 %v6034_v58, %v6070_v60  ;;  %v5941_v22 = vsel %vm2050_vm6, %v17233_v56, %v17263_v31  ;;  %v5699_v58 = vld [vmem:[#allocation3 + $0x138] sm:$0x1]  ;;  %v5386_v36 = vld [vmem:[#allocation3 + $0x110] sm:$0x3] }
 0x506   : > { %v5314_v0 = vrot.slane %v5211_v2, 1  ;;  %v5502_v17 = vrot.slane %v5387_v16, 2  ;;  %v5662_v38 = vmax.f32 %v5594_v1, %v5630_v25  ;;  %v6074_v35 = vsel %vm5141_vm3, %v17211_v48, -1e+30  ;;  %v6211_v23 = vld [vmem:[#allocation3 + $0x158] sm:$0x3] }
 0x507   : > { %12205 = vmatprep.subr.bf16.mxu0 %v12204_v13  ;;  %v6038_v3 = vmax.f32 %v5858_v62, %v6006_v53  ;;  %v6190_v18 = vmax.f32 %v6102_v27, %v5305_v43  ;;  %v5175_v55 = vsel %vm5143_vm0, %v17155_v45, -1e+30  ;;  %v5950_v44 = vrot.slane %v5875_v63, 2  ;;  %v6051_v43 = vld [vmem:[#allocation3 + $0x138] sm:$0xff]  ;;  %v5874_v25 = vld [vmem:[#allocation3 + $0x130] sm:$0x3] }
 0x508   : > { %v5315_v59 = vsel %vm1855_vm4, %v17171_v40, %v5314_v0  ;;  %v5503_v29 = vsel %vm2050_vm6, %v17179_v42, %v5502_v17  ;;  %v6011_v49 = vsel %vm5426_vm8, %v5943_v7, -1e+30  ;;  %v5793_v34 = vsel %vm1855_vm4, %v17230_v10, %v17274_v11  ;;  %v5210_v40 = vld [vmem:[#allocation3 + $0x110] sm:$0x1] }
 0x509   : > { %v6106_v21 = vmax.f32 %v6038_v3, %v6074_v35  ;;  %v5379_v19 = vmax.f32 %v5175_v55, %v5315_v59  ;;  %v5567_v45 = vsel %vm5427_vm12, %v5503_v29, -1e+30  ;;  %v6043_v46 = vmax.f32 %v5863_v20, %v6011_v49  ;;  %v5698_v0 = vld [vmem:[#allocation3 + $0x130] sm:$0x1] }
 0x50a   : > { %v5802_v37 = vrot.slane %v5699_v58, 1  ;;  %v5862_v30 = vmax.f32 %v5662_v38, %v5793_v34  ;;  %v6274_v42 = vsel %vm5424_vm2, %v5493_v14, -1e+30  ;;  %v6278_v7 = vsel %vm5425_vm5, %v5941_v22, -1e+30 }
 0x50b   : > { %v6194_v5 = vmax.f32 %v6106_v21, %v5793_v34  ;;  %v5599_v28 = vmax.f32 %v5379_v19, %v5567_v45  ;;  %v6306_v12 = vmax.f32 %v6190_v18, %v6274_v42  ;;  %v5635_v8 = vsel %vm5143_vm0, %v17183_v26, -1e+30  ;;  %v6210_v45 = vld [vmem:[#allocation3 + $0x150] sm:$0x3] }
 0x50c   : > { %v5951_v47 = vsel %vm2050_vm6, %v17200_v39, %v5950_v44  ;;  %v6079_v41 = vsel %vm5142_vm1, %v17183_v26, -1e+30  ;;  %v6150_v14 = vrot.slane %v6051_v43, 1  ;;  %v5312_v24 = vrot.slane %v5210_v40, 1  ;;  %v6122_v40 = vld [vmem:[#allocation3 + $0x150] sm:$0x1] }
 0x50d   : > { %v6310_v32 = vmax.f32 %v6194_v5, %v6278_v7  ;;  %v5667_v9 = vmax.f32 %v5599_v28, %v5635_v8  ;;  %v5803_v53 = vsel %vm1855_vm4, %v17218_v6, %v5802_v37  ;;  %v6111_v2 = vmax.f32 %v6043_v46, %v6079_v41 }
 0x50e   : > { %v6234_v16 = vrot.slane %v6051_v43, 2  ;;  %v6242_v62 = vrot.slane %v6211_v23, 2  ;;  %v5174_v60 = vsel %vm5143_vm0, %v17211_v48, -1e+30  ;;  %v5313_v20 = vsel %vm1855_vm4, %v17230_v10, %v5312_v24 }
 0x50f   : > { %v12206_v1 = vpack.c.bf16 %v6310_v32, %v6306_v12  ;;  %v5867_v13 = vmax.f32 %v5667_v9, %v5803_v53  ;;  %v6015_v26 = vsel %vm5427_vm12, %v5951_v47, -1e+30  ;;  %v6158_v27 = vrot.slane %v6123_v50, 1 }
 0x510   : > { %v5378_v63 = vmax.f32 %v5174_v60, %v5313_v20  ;;  %v5500_v3 = vrot.slane %v5386_v36, 2  ;;  %v6010_v17 = vsel %vm5426_vm8, %v5941_v22, -1e+30  ;;  %v6083_v35 = vsel %vm5143_vm0, %v6051_v43, -1e+30 }
 0x511   : > { %12207 = vmatpush1.bf16.msra.mxu0 %v12206_v1  ;;  %v6047_v38 = vmax.f32 %v5867_v13, %v6015_v26  ;;  %v6151_v48 = vsel %vm1855_vm4, %v17218_v6, %v6150_v14  ;;  %v6235_v18 = vsel %vm2050_vm6, %v17200_v39, %v6234_v16  ;;  %v5948_v58 = vrot.slane %v5874_v25, 2  ;;  %v6050_v6 = vld [vmem:[#allocation3 + $0x130] sm:$0xff] }
 0x512   : > { %v6199_v10 = vmax.f32 %v6111_v2, %v6151_v48  ;;  %v5501_v55 = vsel %vm2050_vm6, %v17233_v56, %v5500_v3  ;;  %v6243_v59 = vsel %vm2050_vm6, %v6234_v16, %v6242_v62  ;;  %v5800_v29 = vrot.slane %v5698_v0, 1  ;;  %v12607_v60 = vld [vmem:[#allocation13 + $0x4] ss:$16 sps:$4 sm:$0xff]   ;;  %v12605_v20 = vld [vmem:[#allocation13] ss:$16 sps:$4 sm:$0xff]  }
 0x513   : > { %v6115_v21 = vmax.f32 %v6047_v38, %v6083_v35  ;;  %v5566_v22 = vsel %vm5427_vm12, %v5501_v55, -1e+30  ;;  %v6042_v44 = vmax.f32 %v5862_v30, %v6010_v17  ;;  %v6159_v49 = vsel %vm1855_vm4, %v6150_v14, %v6158_v27  ;;  %v12613_v25 = vld [vmem:[#allocation13 + $0x24] ss:$16 sps:$4 sm:$0xff]   ;;  %v12623_v27 = vld [vmem:[#allocation13 + $0x60] ss:$16 sps:$4 sm:$0xff]  }
 0x514   : > { %v5598_v34 = vmax.f32 %v5378_v63, %v5566_v22  ;;  %v6283_v39 = vsel %vm5426_vm8, %v6235_v18, -1e+30  ;;  %v5634_v56 = vsel %vm5143_vm0, %v17249_v61, -1e+30  ;;  %v6287_v46 = vsel %vm5427_vm12, %v6243_v59, -1e+30 }
 0x515   : > { %v6203_v19 = vmax.f32 %v6115_v21, %v6159_v49  ;;  %v6315_v5 = vmax.f32 %v6199_v10, %v6283_v39  ;;  %v5949_v43 = vsel %vm2050_vm6, %v17263_v31, %v5948_v58  ;;  %v5801_v42 = vsel %vm1855_vm4, %v17274_v11, %v5800_v29  ;;  %v12625_v26 = vld [vmem:[#allocation13 + $0x64] ss:$16 sps:$4 sm:$0xff]   ;;  %v12629_v3 = vld [vmem:[#allocation13 + $0x80] ss:$16 sps:$4 sm:$0xff]   ;;  %v12644_v35 = vld [vmem:[#allocation13 + $0xc8] ss:$16 sps:$4 sm:$0xff]  }
 0x516   : > { %v5666_v37 = vmax.f32 %v5598_v34, %v5634_v56  ;;  %v6078_v7 = vsel %vm5142_vm1, %v17249_v61, -1e+30  ;;  %v6148_v28 = vrot.slane %v6050_v6, 1  ;;  %v6232_v8 = vrot.slane %v6050_v6, 2  ;;  %vm19842_vm1 = vmmov %vm19840_vm7  ;;  %v12631_v63 = vld [vmem:[#allocation13 + $0x84] ss:$16 sps:$4 sm:$0xff]  }
 0x517   : > { %v6319_v30 = vmax.f32 %v6203_v19, %v6287_v46  ;;  %v6110_v32 = vmax.f32 %v6042_v44, %v6078_v7  ;;  %v6240_v47 = vrot.slane %v6210_v45, 2  ;;  %v6014_v23 = vsel %vm5427_vm12, %v5949_v43, -1e+30  ;;  %vm19843_vm5 = vmmov %vm19842_vm1  ;;  %v12635_v0 = vld [vmem:[#allocation13 + $0xa0] ss:$16 sps:$4 sm:$0xff]  }
 0x518   : > { %v5866_v12 = vmax.f32 %v5666_v37, %v5801_v42  ;;  %v6156_v9 = vrot.slane %v6122_v40, 1  ;;  %v6082_v14 = vsel %vm5143_vm0, %v6050_v6, -1e+30  ;;  %v6149_v24 = vsel %vm1855_vm4, %v17274_v11, %v6148_v28  ;;  %v12641_v17 = vld [vmem:[#allocation13 + $0xc0] ss:$16 sps:$4 sm:$0xff]  }
 0x519   : > { %v12208_v50 = vpack.c.bf16 %v6319_v30, %v6315_v5  ;;  %v6198_v61 = vmax.f32 %v6110_v32, %v6149_v24  ;;  %v6233_v36 = vsel %vm2050_vm6, %v17263_v31, %v6232_v8  ;;  %v6241_v1 = vsel %vm2050_vm6, %v6232_v8, %v6240_v47  ;;  %v12611_v31 = vld [vmem:[#allocation13 + $0x20] ss:$16 sps:$4 sm:$0xff]   ;;  %v12643_v38 = vld [vmem:[#allocation13 + $0xc4] ss:$16 sps:$4 sm:$0xff]   ;;  %v12650_v18 = vld [vmem:[#allocation13 + $0xe8] ss:$16 sps:$4 sm:$0xff]  }
 0x51a   : > { %v6046_v41 = vmax.f32 %v5866_v12, %v6014_v23  ;;  %v6157_v53 = vsel %vm1855_vm4, %v6148_v28, %v6156_v9  ;;  %v6282_v16 = vsel %vm5426_vm8, %v6233_v36, -1e+30  ;;  %v6286_v54 = vsel %vm5427_vm12, %v6241_v1, -1e+30  ;;  %v12647_v48 = vld [vmem:[#allocation13 + $0xe0] ss:$16 sps:$4 sm:$0xff]   ;;  %v6713_v1 = vpop.permute.xlu0 %6712 }
 0x51b   : > { %12209 = vmatprep.subr.bf16.mxu0 %v12208_v50  ;;  %v6314_v13 = vmax.f32 %v6198_v61, %v6282_v16  ;;  %v12649_v10 = vld [vmem:[#allocation13 + $0xe4] ss:$16 sps:$4 sm:$0xff]   ;;  %v12652_v55 = vld [vmem:[#allocation13 + $0xec] ss:$16 sps:$4 sm:$0xff]   ;;  %v12653_v59 = vld [vmem:[#allocation13 + $0x100] ss:$16 sps:$4 sm:$0xff]  }
 0x51c   : > { %v6114_v51 = vmax.f32 %v6046_v41, %v6082_v14  ;;  %v12655_v58 = vld [vmem:[#allocation13 + $0x104] ss:$16 sps:$4 sm:$0xff]   ;;  %v12658_v21 = vld [vmem:[#allocation13 + $0x10c] ss:$16 sps:$4 sm:$0xff]   ;;  %v12656_v22 = vld [vmem:[#allocation13 + $0x108] ss:$16 sps:$4 sm:$0xff]  }
 0x51d   : > { %v12661_v29 = vld [vmem:[#allocation13 + $0x124] ss:$16 sps:$4 sm:$0xff]   ;;  %v12664_v44 = vld [vmem:[#allocation13 + $0x12c] ss:$16 sps:$4 sm:$0xff]   ;;  %v12659_v49 = vld [vmem:[#allocation13 + $0x120] ss:$16 sps:$4 sm:$0xff]  }
 0x51e   : > { %v6202_v2 = vmax.f32 %v6114_v51, %v6157_v53  ;;  %v12662_v34 = vld [vmem:[#allocation13 + $0x128] ss:$16 sps:$4 sm:$0xff]   ;;  %v12665_v6 = vld [vmem:[#allocation13 + $0x140] ss:$16 sps:$4 sm:$0xff]   ;;  %v12667_v19 = vld [vmem:[#allocation13 + $0x144] ss:$16 sps:$4 sm:$0xff]  }
 0x51f   : > { %v12668_v39 = vld [vmem:[#allocation13 + $0x148] ss:$16 sps:$4 sm:$0xff]   ;;  %v12670_v56 = vld [vmem:[#allocation13 + $0x14c] ss:$16 sps:$4 sm:$0xff]   ;;  %v12671_v45 = vld [vmem:[#allocation13 + $0x160] ss:$16 sps:$4 sm:$0xff]  }
 0x520   : > { %v6318_v62 = vmax.f32 %v6202_v2, %v6286_v54  ;;  %v12673_v46 = vld [vmem:[#allocation13 + $0x164] ss:$16 sps:$4 sm:$0xff]   ;;  %v12674_v5 = vld [vmem:[#allocation13 + $0x168] ss:$16 sps:$4 sm:$0xff]   ;;  %v12676_v37 = vld [vmem:[#allocation13 + $0x16c] ss:$16 sps:$4 sm:$0xff]  }
 0x521   : > { %v12679_v43 = vld [vmem:[#allocation13 + $0x184] ss:$16 sps:$4 sm:$0xff]   ;;  %v12682_v40 = vld [vmem:[#allocation13 + $0x18c] ss:$16 sps:$4 sm:$0xff]   ;;  %v12677_v30 = vld [vmem:[#allocation13 + $0x180] ss:$16 sps:$4 sm:$0xff]  }
 0x522   : > { %v12210_v11 = vpack.c.bf16 %v6318_v62, %v6314_v13  ;;  %v12680_v42 = vld [vmem:[#allocation13 + $0x188] ss:$16 sps:$4 sm:$0xff]   ;;  %v12685_v7 = vld [vmem:[#allocation13 + $0x1a4] ss:$16 sps:$4 sm:$0xff]   ;;  %v12688_v28 = vld [vmem:[#allocation13 + $0x1ac] ss:$16 sps:$4 sm:$0xff]  }
 0x523   : > { %v12683_v12 = vld [vmem:[#allocation13 + $0x1a0] ss:$16 sps:$4 sm:$0xff]   ;;  %v12686_v32 = vld [vmem:[#allocation13 + $0x1a8] ss:$16 sps:$4 sm:$0xff]   ;;  %v12691_v8 = vld [vmem:[#allocation13 + $0x1c4] ss:$16 sps:$4 sm:$0xff]  }
 0x524   : > { %12211 = vmatpush1.bf16.msra.mxu0 %v12210_v11  ;;  %v12694_v47 = vld [vmem:[#allocation13 + $0x1cc] ss:$16 sps:$4 sm:$0xff]   ;;  %v12689_v50 = vld [vmem:[#allocation13 + $0x1c0] ss:$16 sps:$4 sm:$0xff]   ;;  %v12692_v23 = vld [vmem:[#allocation13 + $0x1c8] ss:$16 sps:$4 sm:$0xff]  }
 0x525   : > { %8147 = vmatprep.subr.bf16.mxu0 %v12607_v60  ;;  %v12697_v9 = vld [vmem:[#allocation13 + $0x1e4] ss:$16 sps:$4 sm:$0xff]   ;;  %v12700_v41 = vld [vmem:[#allocation13 + $0x1ec] ss:$16 sps:$4 sm:$0xff]   ;;  %v12695_v14 = vld [vmem:[#allocation13 + $0x1e0] ss:$16 sps:$4 sm:$0xff]  }
 0x526   : > { %v12698_v24 = vld [vmem:[#allocation13 + $0x1e8] ss:$16 sps:$4 sm:$0xff]   ;;  %v12703_v51 = vld [vmem:[#allocation13 + $0x204] ss:$16 sps:$4 sm:$0xff]   ;;  %v12706_v61 = vld [vmem:[#allocation13 + $0x20c] ss:$16 sps:$4 sm:$0xff]  }
 0x527   : > { %11755 = vmatmul.mubr.msk.f32.vlgmr.msra.gmra.mrb[28].mxu0 %vm19842_vm1, %v17099_v33  ;;  %v12637_v33 = vld [vmem:[#allocation13 + $0xa4] ss:$16 sps:$4 sm:$0xff]   ;;  %v17367_v36 = vld [vmem:[%s19844_s1] sm:$0xf]  ;;  %v19846_v53 = vld [vmem:[#allocation32_spill] sm:$0xff]  ;;  %vm6827_vm8 = vcmask 1043456  }
 0x528   : > { %6467 = vmatprep.mubr.f32.mxu0 %v17109_v4  ;;  %8148 = vmatpush1.bf16.msra.mxu0 %v12605_v20  ;;  %19845 = vst [vmem:[#allocation36_spill] sm:$0xff] %v17367_v36  ;;  %v1480_v2 = vrot.slane %v17367_v36, %v19846_v53  ;;  %v19847_v16 = vld [vmem:[#allocation27_spill] sm:$0xff]  ;;  %v17376_v13 = vld [vmem:[%s19848_s3] sm:$0xf]  ;;  %v19850_v62 = vld [vmem:[#allocation44_spill] sm:$0xff]  ;;  %vm19864_vm12 = vcmask 1041408  }
 0x529   : > { %8149 = vmatprep.subr.bf16.mxu0 %v12613_v25  ;;  %v1484_v54 = vrot.slane %v17367_v36, %v19847_v16  ;;  %19849 = vst [vmem:[#allocation55_spill] sm:$0xff] %v17376_v13  ;;  %v19851_v60 = vld [vmem:[#allocation37_spill] sm:$0xff]  ;;  %vm6506_vm14 = vcmask 1044480   ;;  %vm6984_vm15 = vcmask 1042432   ;;  %vm19883_vm2 = vmmov %vm19864_vm12  ;;  %s19945_s1 = sld [smem:[#allocation115_spill]]  ;;  %s12163_s3 = sshll.u32 %s13288_s26, 7 }
 0x52a   : > { %v7289_v11 = vmul.f32 %v19851_v60, %v19850_v62  ;;  %v17383_v20 = vld [vmem:[%s18997_s17 + $0x20] ss:$8 sm:$0xf]  ;;  %vm19884_vm3 = vmmov %vm19883_vm2  ;;  %s11401_s26 = scalar_lea.sflag [#allocation7], %s13553_s14 }
 0x52b   : > { %11756 = vmatmul.mubr.msk.f32.gmra.mrb[30].mxu0 %vm19843_vm5, %v17135_v15  ;;  %v12646_v15 = vld [vmem:[#allocation13 + $0xcc] ss:$16 sps:$4 sm:$0xff]   ;;  %19852 = vst [vmem:[#allocation64_spill] sm:$0xff] %v17383_v20  ;;  %v17387_v25 = vrot.slane %v17383_v20, %v19847_v16  ;;  %vm19893_vm0 = vmmov %vm19883_vm2 }
 0x52c   : > { %8150 = vmatpush1.bf16.msra.mxu0 %v12611_v31  ;;  %8245 = vmatprep.subr.bf16.mxu1 %v12646_v15  ;;  %v17389_v31 = vpop.permute.xlu1 %6558  ;;  %vm19894_vm10 = vmmov %vm19893_vm0 }
 0x52d   : > { %8151 = vmatprep.subr.bf16.mxu0 %v12619_v57  ;;  %8246 = vmatpush1.bf16.msra.mxu1 %v12644_v35  ;;  %v17391_v57 = vpop.permute.xlu0 %6553  ;;  %v17404_v35 = vrot.slane %v6713_v1, 2  ;;  %v17407_v15 = vmul.f32 %v17387_v25, %v7289_v11  ;;  %vm19929_vm11 = vmmov %vm19893_vm0 }
 0x52e   : > { %8247 = vmatprep.subr.bf16.mxu1 %v12652_v55  ;;  %19853 = vst [vmem:[#allocation52_spill] sm:$0xff] %v17391_v57  ;;  %v19858_v55 = vld [vmem:[#allocation43_spill] sm:$0xff]  ;;  %vm19930_vm7 = vmmov %vm19893_vm0 }
 0x52f   : > { %vm19938_vm9 = vmmov %vm19893_vm0 }
 0x530   : > { %8152 = vmatpush1.bf16.msra.mxu0 %v12617_v52  ;;  %v19854_v52 = vld [vmem:[#allocation49_spill] sm:$0xff]  ;;  %vm19939_vm13 = vmmov %vm19893_vm0 }
 0x531   : > { %8153 = vmatprep.subr.bf16.mxu0 %v12625_v26  ;;  %8248 = vmatpush1.bf16.msra.mxu1 %v12650_v18  ;;  %v1497_v26 = vmul.f32 %v1480_v2, %v19854_v52  ;;  %v17418_v18 = vld [vmem:[%s18997_s17 + $0x7] ss:$8 sm:$0xf]  ;;  %vm20014_vm1 = vmmov %vm19893_vm0 }
 0x532   : > { %8249 = vmatprep.subr.bf16.mxu1 %v12658_v21  ;;  %19857 = vst [vmem:[#allocation42_spill] sm:$0xff] %v17418_v18  ;;  %v17424_v21 = vrot.slane %v17383_v20, %v19846_v53  ;;  %v17508_v11 = vrot.slane %v17418_v18, %v19846_v53  ;;  %vm20015_vm5 = vmmov %vm19893_vm0 }
 0x534   : > { %8154 = vmatpush1.bf16.msra.mxu0 %v12623_v27  ;;  %v1510_v27 = vrot.slane %v17376_v13, %v19846_v53  ;;  %19859 = vst [vmem:[#allocation77_spill] sm:$0xff] %v17424_v21  ;;  %19873 = vst [vmem:[#allocation65_spill] sm:$0xff] %v17508_v11 }
 0x535   : > { %8155 = vmatprep.subr.bf16.mxu0 %v12631_v63  ;;  %8250 = vmatpush1.bf16.msra.mxu1 %v12656_v22  ;;  %v19855_v63 = vld [vmem:[#allocation48_spill] sm:$0xff] }
 0x536   : > { %8251 = vmatprep.subr.bf16.mxu1 %v12664_v44 }
 0x538   : > { %8156 = vmatpush1.bf16.msra.mxu0 %v12629_v3  ;;  %v1498_v3 = vmul.f32 %v1484_v54, %v19855_v63 }
 0x539   : > { %8157 = vmatprep.subr.bf16.mxu0 %v12637_v33  ;;  %8252 = vmatpush1.bf16.msra.mxu1 %v12662_v34  ;;  %v1514_v33 = vrot.slane %v17376_v13, %v19847_v16 }
 0x53a   : > { %8253 = vmatprep.subr.bf16.mxu1 %v12670_v56 }
 0x53c   : > { %8158 = vmatpush1.bf16.msra.mxu0 %v12635_v0  ;;  %v19856_v0 = vld [vmem:[#allocation70_spill] sm:$0xff] }
 0x53d   : > { %8159 = vmatprep.subr.bf16.mxu0 %v12643_v38  ;;  %8254 = vmatpush1.bf16.msra.mxu1 %v12668_v39  ;;  %v17402_v38 = vrot.slane %v6713_v1, 6 }
 0x53e   : > { %8255 = vmatprep.subr.bf16.mxu1 %v12676_v37 }
 0x540   : > { %8160 = vmatpush1.bf16.msra.mxu0 %v12641_v17  ;;  %v17400_v17 = vrot.slane %v19856_v0, 2 }
 0x541   : > { %8161 = vmatprep.subr.bf16.mxu0 %v12649_v10  ;;  %8256 = vmatpush1.bf16.msra.mxu1 %v12674_v5  ;;  %v17413_v10 = vrot.slane %v17389_v31, 4  ;;  %v17445_v5 = vrot.slane %v17418_v18, %v19847_v16 }
 0x542   : > { %8257 = vmatprep.subr.bf16.mxu1 %v12682_v40  ;;  %v17451_v40 = vld [vmem:[%s18997_s17 + $0x2] ss:$8 sm:$0xf] }
 0x543   : > { %19865 = vst [vmem:[#allocation57_spill] sm:$0xff] %v17451_v40  ;;  %v17495_v1 = vrot.slane %v17451_v40, %v19847_v16  ;;  %v17520_v63 = vrot.slane %v17451_v40, %v19846_v53 }
 0x544   : > { %8162 = vmatpush1.bf16.msra.mxu0 %v12647_v48  ;;  %v17410_v48 = vrot.slane %v17391_v57, 4 }
 0x545   : > { %8163 = vmatprep.subr.bf16.mxu0 %v12655_v58  ;;  %8258 = vmatpush1.bf16.msra.mxu1 %v12680_v42  ;;  %v7288_v58 = vmul.f32 %v19858_v55, %v19850_v62  ;;  %v17461_v42 = vld [vmem:[%s18997_s17 + $0x3] ss:$8 sm:$0xf] }
 0x546   : > { %8259 = vmatprep.subr.bf16.mxu1 %v12688_v28  ;;  %19866 = vst [vmem:[#allocation62_spill] sm:$0xff] %v17461_v42  ;;  %v17532_v55 = vrot.slane %v17461_v42, %v19846_v53 }
 0x547   : > { %v17469_v28 = vmul.f32 %v17424_v21, %v7288_v58 }
 0x548   : > { %8164 = vmatpush1.bf16.msra.mxu0 %v12653_v59  ;;  %v19860_v59 = vld [vmem:[#allocation72_spill] sm:$0xff] }
 0x549   : > { %8165 = vmatprep.subr.bf16.mxu0 %v12661_v29  ;;  %8260 = vmatpush1.bf16.msra.mxu1 %v12686_v32  ;;  %v1501_v22 = vmul.f32 %v1480_v2, %v19860_v59  ;;  %v19861_v29 = vld [vmem:[#allocation59_spill] sm:$0xff]  ;;  %19868 = vst [vmem:[#allocation79_spill] sm:$0xff] %v17469_v28 }
 0x54a   : > { %8261 = vmatprep.subr.bf16.mxu1 %v12694_v47  ;;  %v1502_v44 = vmul.f32 %v1484_v54, %v19861_v29  ;;  %v17474_v47 = vld [vmem:[%s18997_s17 + $0x4] ss:$8 sm:$0xf]  ;;  %v17500_v2 = vld [vmem:[%s18997_s17 + $0x6] ss:$8 sm:$0xf] }
 0x54b   : > { %v1531_v32 = vadd.f32 %v1510_v27, %v1501_v22  ;;  %19869 = vst [vmem:[#allocation46_spill] sm:$0xff] %v17474_v47  ;;  %19871 = vst [vmem:[#allocation66_spill] sm:$0xff] %v17500_v2  ;;  %v19872_v54 = vld [vmem:[#allocation67_spill] sm:$0xff]  ;;  %v17536_v59 = vrot.slane %v17500_v2, %v19847_v16  ;;  %v17540_v22 = vrot.slane %v17474_v47, %v19846_v53 }
 0x54c   : > { %8166 = vmatpush1.bf16.msra.mxu0 %v12659_v49  ;;  %v1527_v49 = vadd.f32 %v1510_v27, %v1497_v26  ;;  %v17504_v60 = vmul.f32 %v17445_v5, %v19872_v54  ;;  %v17512_v26 = vrot.slane %v17461_v42, %v19847_v16 }
 0x54d   : > { %8167 = vmatprep.subr.bf16.mxu0 %v12667_v19  ;;  %8262 = vmatpush1.bf16.msra.mxu1 %v12692_v23  ;;  %v17431_v19 = vld [vmem:[%s18997_s17] ss:$8 sm:$0xf] }
 0x54e   : > { %8263 = vmatprep.subr.bf16.mxu1 %v12700_v41  ;;  %19862 = vst [vmem:[#allocation30_spill] sm:$0xff] %v17431_v19 }
 0x550   : > { %8168 = vmatpush1.bf16.msra.mxu0 %v12665_v6  ;;  %v1528_v6 = vadd.f32 %v1514_v33, %v1498_v3 }
 0x551   : > { %8169 = vmatprep.subr.bf16.mxu0 %v12673_v46  ;;  %8264 = vmatpush1.bf16.msra.mxu1 %v12698_v24  ;;  %v17441_v46 = vsel %vm19864_vm12, %v17402_v38, %v19850_v62  ;;  %v17491_v24 = vrot.slane %v17431_v19, %v19846_v53  ;;  %vm20024_vm12 = vmmov %vm19893_vm0 }
 0x552   : > { %8276 = vmatprep.subr.bf16.mxu1 %v12706_v61 }
 0x554   : > { %8170 = vmatpush1.bf16.msra.mxu0 %v12671_v45  ;;  %v17436_v45 = vld [vmem:[%s18997_s17 + $0x1] ss:$8 sm:$0xf] }
 0x555   : > { %8171 = vmatprep.subr.bf16.mxu0 %v12679_v43  ;;  %19863 = vst [vmem:[#allocation56_spill] sm:$0xff] %v17436_v45  ;;  %v17482_v41 = vrot.slane %v17436_v45, %v19847_v16  ;;  %v17516_v27 = vrot.slane %v17436_v45, %v19846_v53 }
 0x558   : > { %8172 = vmatpush1.bf16.msra.mxu0 %v12677_v30  ;;  %v17456_v30 = vsel %vm6827_vm8, %v17410_v48, %v17413_v10 }
 0x559   : > { %8173 = vmatprep.subr.bf16.mxu0 %v12685_v7  ;;  %v17466_v7 = vsel %vm2050_vm6, %v17404_v35, %v17400_v17 }
 0x55a   : > { %19867 = vst [vmem:[#allocation34_spill] sm:$0xff] %v17466_v7 }
 0x55c   : > { %8174 = vmatpush1.bf16.msra.mxu0 %v12683_v12 }
 0x55d   : > { %8175 = vmatprep.subr.bf16.mxu0 %v12691_v8  ;;  %v1532_v8 = vadd.f32 %v1514_v33, %v1502_v44  ;;  %v17524_v33 = vrot.slane %v17474_v47, %v19847_v16 }
 0x560   : > { %8176 = vmatpush1.bf16.msra.mxu0 %v12689_v50 }
 0x561   : > { %8177 = vmatprep.subr.bf16.mxu0 %v12697_v9  ;;  %v17478_v9 = vrot.slane %v17431_v19, %v19847_v16 }
 0x564   : > { %8178 = vmatpush1.bf16.msra.mxu0 %v12695_v14  ;;  %v17487_v14 = vld [vmem:[%s18997_s17 + $0x5] ss:$8 sm:$0xf] }
 0x565   : > { %8190 = vmatprep.subr.bf16.mxu0 %v12703_v51  ;;  %19870 = vst [vmem:[#allocation39_spill] sm:$0xff] %v17487_v14  ;;  %v17528_v0 = vrot.slane %v17487_v14, %v19847_v16  ;;  %v17544_v29 = vrot.slane %v17487_v14, %v19846_v53 }
 0x567   : > { %19874 = vst [vmem:[#allocation76_spill] sm:$0xff] %v17544_v29 }
 0x5be   : > { %v6386_v34 = vpop.f32.mrb[24].mxu0 }
 0x5bf   : > { %v6474_v39 = vadd.f32 %v6386_v34, %v1527_v49  ;;  %v6388_v56 = vpop.f32.mrb[25].mxu0  ;;  %v17552_v34 = vrot.slane %v17500_v2, %v19846_v53 }
 0x5c0   : > { %v6475_v43 = vadd.f32 %v6388_v56, %v1528_v6  ;;  %v19876_v6 = vld [vmem:[#allocation38_spill] sm:$0xff] }
 0x5c1   : > { %v6507_v12 = vrot.slane %v6474_v39, 3  ;;  %19875 = vst [vmem:[#allocation29_spill] sm:$0xff] %v17552_v34  ;;  %v17556_v39 = vmul.f32 %v17508_v11, %v19876_v6 }
 0x5c2   : > { %v6508_v50 = vrot.slane %v6475_v43, 3  ;;  %v6392_v23 = vpop.f32.mrb[26].mxu0 }
 0x5c3   : > { %6531 = vst [vmem:[#allocation4] sm:$0xe0] %v6507_v12  ;;  %v6478_v51 = vadd.f32 %v6392_v23, %v1531_v32  ;;  %v6394_v61 = vpop.f32.mrb[27].mxu0  ;;  %19877 = vst [vmem:[#allocation50_spill] sm:$0xff] %v17556_v39 }
 0x5c4   : > { %6532 = vst [vmem:[#allocation4 + $0x8] sm:$0xe0] %v6508_v50  ;;  %v6479_v52 = vadd.f32 %v6394_v61, %v1532_v8 }
 0x5c5   : > { %v6511_v3 = vrot.slane %v6478_v51, 3 }
 0x5c6   : > { %v6513_v58 = vrot.slane %v6479_v52, 3 }
 0x5c7   : > { %v17547_v44 = vsel %vm6506_vm14, %v6507_v12, %v6511_v3  ;;  %6539 = vst [vmem:[#allocation4 + $0x40] sm:$0x1f] %v6511_v3 }
 0x5c8   : > { %6535 = vst [vmem:[#allocation4 + $0x20] sm:$0xff] %v17547_v44  ;;  %v6514_v56 = vsel %vm6506_vm14, %v6508_v50, %v6513_v58  ;;  %6540 = vst [vmem:[#allocation4 + $0x48] sm:$0x1f] %v6513_v58  ;;  %v6565_v43 = vmul.f32 %v17389_v31, %v17547_v44  ;;  %v17564_v12 = vmul.f32 %v17516_v27, %v17547_v44 }
 0x5c9   : > { %v17568_v32 = vmul.f32 %v17441_v46, %v17547_v44  ;;  %6536 = vst [vmem:[#allocation4 + $0x28] sm:$0xff] %v6514_v56  ;;  %v6566_v8 = vmul.f32 %v17389_v31, %v6514_v56  ;;  %v17572_v23 = vmul.f32 %v17482_v41, %v6514_v56  ;;  %v6729_v50 = vmul.f32 %v17441_v46, %v6514_v56 }
 0x5ca   : > { %v6839_v51 = vmul.f32 %v17456_v30, %v6514_v56  ;;  %v17577_v61 = vmul.f32 %v17524_v33, %v6514_v56  ;;  %v7040_v54 = vmul.f32 %v17466_v7, %v6514_v56  ;;  %v7135_v52 = vmul.f32 %v17391_v57, %v6514_v56  ;;  %v6543_v40 = vld [vmem:[#allocation4] sm:$0xff] }
 0x5cb   : > { %v17582_v3 = vmul.f32 %v17491_v24, %v6565_v43  ;;  %v6544_v58 = vld [vmem:[#allocation4 + $0x8] sm:$0xff]  ;;  %v17585_v6 = vmul.f32 %v17478_v9, %v6566_v8  ;;  %v6670_v49 = vrot.slane %v17572_v23, 1  ;;  %v17589_v16 = vmul.f32 %v17495_v1, %v6729_v50 }
 0x5cc   : > { %v6608_v37 = vld [vmem:[#allocation4 + $0x8] sm:$0xfe]  ;;  %v17592_v2 = vmul.f32 %v17512_v26, %v6839_v51  ;;  %v6562_v14 = vmul.f32 %v17391_v57, %v6544_v58  ;;  %v6989_v8 = vrot.slane %v17577_v61, 5  ;;  %v17608_v23 = vmul.f32 %v17528_v0, %v7040_v54 }
 0x5cd   : > { %v6703_v53 = vld [vmem:[#allocation4 + $0x8] sm:$0xfc]  ;;  %v6643_v56 = vmul.f32 %v17482_v41, %v6608_v37 }
 0x5ce   : > { %v6725_v43 = vmul.f32 %v17402_v38, %v6703_v53  ;;  %v6820_v47 = vld [vmem:[#allocation4 + $0x8] sm:$0xf0]  ;;  %v6592_v58 = vmul.f32 %v17478_v9, %v6562_v14  ;;  %v19879_v39 = vrot.slane %v17592_v2, 4 }
 0x5cf   : > { %v6930_v42 = vld [vmem:[#allocation4 + $0x8] sm:$0xe0]  ;;  %v6835_v45 = vmul.f32 %v17410_v48, %v6820_v47  ;;  %v6669_v18 = vrot.slane %v6643_v56, 1  ;;  %v6616_v61 = vld [vmem:[#allocation4 + $0x48] sm:$0x1]  ;;  %v17611_v47 = vmul.f32 %v17536_v59, %v7135_v52 }
 0x5d0   : > { %v6961_v51 = vmul.f32 %v17524_v33, %v6930_v42  ;;  %v7022_v19 = vld [vmem:[#allocation4 + $0x8] sm:$0xc0]  ;;  %v6760_v37 = vmul.f32 %v17495_v1, %v6725_v43  ;;  %v17614_v42 = vmul.f32 %v17391_v57, %v6543_v40  ;;  %v6651_v9 = vmul.f32 %v17482_v41, %v6616_v61  ;;  %v6707_v56 = vld [vmem:[#allocation4 + $0x48] sm:$0x3]  ;;  %v6702_v61 = vld [vmem:[#allocation4] sm:$0xfc] }
 0x5d1   : > { %v7036_v53 = vmul.f32 %v17404_v35, %v7022_v19  ;;  %8396 = vst [vmem:[#allocation4 + $0x8] sm:$0xff] %v17109_v4  ;;  %v6870_v20 = vmul.f32 %v17512_v26, %v6835_v45  ;;  %v6671_v14 = vsel %vm1855_vm4, %v6669_v18, %v6670_v49  ;;  %v6824_v43 = vld [vmem:[#allocation4 + $0x48] sm:$0xf]  ;;  %v6733_v45 = vmul.f32 %v19850_v62, %v6707_v56  ;;  %v17626_v56 = vld [vmem:[#allocation4] sm:$0xf0] }
 0x5d2   : > { %v6786_v19 = vrot.slane %v6760_v37, 2  ;;  %v6988_v50 = vrot.slane %v6961_v51, 5  ;;  %v6695_v13 = vadd.f32 %v6671_v14, %v6592_v58  ;;  %v6843_v54 = vmul.f32 %v17413_v10, %v6824_v43  ;;  %v6934_v36 = vld [vmem:[#allocation4 + $0x48] sm:$0x1f]  ;;  %v6607_v51 = vld [vmem:[#allocation4] sm:$0xfe] }
 0x5d3   : > { %v6896_v28 = vrot.slane %v6870_v20, 4  ;;  %v7026_v52 = vld [vmem:[#allocation4 + $0x48] sm:$0x3f]  ;;  %v6680_v34 = vrot.slane %v6651_v9, 1  ;;  %v19878_v40 = vrot.slane %v17589_v16, 2  ;;  %v6969_v18 = vmul.f32 %v17524_v33, %v6934_v36 }
 0x5d4   : > { %v7131_v21 = vld [vmem:[#allocation4 + $0x48] sm:$0xff]  ;;  %v6990_v37 = vsel %vm6984_vm15, %v6988_v50, %v6989_v8  ;;  %v6615_v58 = vld [vmem:[#allocation4 + $0x40] sm:$0x1]  ;;  %v6768_v20 = vmul.f32 %v17495_v1, %v6733_v45  ;;  %v6878_v9 = vmul.f32 %v17512_v26, %v6843_v54  ;;  %v17635_v33 = vld [vmem:[#allocation4] sm:$0xe0]  ;;  %v7044_v57 = vmul.f32 %v17400_v17, %v7026_v52 }
 0x5d5   : > { %v6788_v41 = vsel %vm2050_vm6, %v6786_v19, %v19878_v40  ;;  %8404 = vst [vmem:[#allocation4 + $0x48] sm:$0xff] %v17109_v4  ;;  %v6706_v14 = vld [vmem:[#allocation4 + $0x40] sm:$0x3]  ;;  %v6898_v19 = vsel %vm6827_vm8, %v6896_v28, %v19879_v39  ;;  %v6681_v40 = vsel %vm1855_vm4, %v6670_v49, %v6680_v34  ;;  %v6999_v11 = vrot.slane %v6969_v18, 5  ;;  %v7182_v29 = vld [vmem:[#allocation4 + $0x28] sm:$0xfe] }
 0x5d6   : > { %v6812_v43 = vadd.f32 %v6788_v41, %v6695_v13  ;;  %v17633_v36 = vld [vmem:[#allocation4 + $0x40] sm:$0xf]  ;;  %v7071_v1 = vmul.f32 %v17528_v0, %v7036_v53  ;;  %v17642_v13 = vld [vmem:[#allocation4] sm:$0xc0]  ;;  %v6699_v28 = vadd.f32 %v6681_v40, %v17585_v6  ;;  %v6797_v39 = vrot.slane %v6768_v20, 2 }
 0x5d7   : > { %v17637_v50 = vld [vmem:[#allocation4 + $0x40] sm:$0x1f]  ;;  %v6907_v54 = vrot.slane %v6878_v9, 4  ;;  %8395 = vst [vmem:[#allocation4] sm:$0xff] %v17109_v4  ;;  %v7000_v49 = vsel %vm6984_vm15, %v6989_v8, %v6999_v11  ;;  %v7079_v34 = vmul.f32 %v17528_v0, %v7044_v57  ;;  %v7098_v52 = vrot.slane %v17608_v23, 6 }
 0x5d8   : > { %v17644_v26 = vld [vmem:[#allocation4 + $0x40] sm:$0x3f]  ;;  %v6922_v41 = vadd.f32 %v6898_v19, %v6812_v43  ;;  %v7097_v53 = vrot.slane %v7071_v1, 6  ;;  %v7273_v18 = vld [vmem:[#allocation4 + $0x28] sm:$0xfc]  ;;  %v19882_v20 = vrot.slane %v17592_v2, 4  ;;  %v7139_v19 = vmul.f32 %v7131_v21, %v17389_v31 }
 0x5d9   : > { %v17646_v45 = vld [vmem:[#allocation4 + $0x40] sm:$0xff]  ;;  %v7108_v8 = vrot.slane %v7079_v34, 6  ;;  %v7213_v57 = vmul.f32 %v17445_v5, %v7182_v29  ;;  %v7281_v1 = vmul.f32 %v7273_v18, %v17402_v38  ;;  %v6591_v29 = vmul.f32 %v17491_v24, %v17614_v42 }
 0x5da   : > { %19880 = vst [vmem:[#allocation58_spill] sm:$0xff] %v17646_v45  ;;  %8403 = vst [vmem:[#allocation4 + $0x40] sm:$0xff] %v17109_v4  ;;  %v19881_v45 = vrot.slane %v17589_v16, 2  ;;  %v6908_v43 = vsel %vm6827_vm8, %v19882_v20, %v6907_v54  ;;  %v7014_v9 = vadd.f32 %v6990_v37, %v6922_v41  ;;  %v7099_v11 = vsel %vm19883_vm2, %v7097_v53, %v7098_v52 }
 0x5db   : > { %v7170_v23 = vmul.f32 %v17536_v59, %v7139_v19  ;;  %v7217_v16 = vmul.f32 %v17445_v5, %v7131_v21  ;;  %v7109_v2 = vsel %vm19884_vm3, %v7098_v52, %v7108_v8  ;;  %v7285_v37 = vmul.f32 %v7131_v21, %v17441_v46  ;;  %vm20064_vm2 = vmmov %vm19893_vm0 }
 0x5dc   : > { %v6798_v6 = vsel %vm2050_vm6, %v19881_v45, %v6797_v39  ;;  %v7123_v0 = vadd.f32 %v7099_v11, %v7014_v9  ;;  %v7239_v39 = vrot.slane %v7213_v57, 1  ;;  %v7316_v41 = vmul.f32 %v17387_v25, %v7281_v1  ;;  %vm20065_vm3 = vmmov %vm19893_vm0 }
 0x5dd   : > { %v6816_v40 = vadd.f32 %v6798_v6, %v6699_v28  ;;  %v7240_v54 = vrot.slane %v7217_v16, 1  ;;  %v7320_v59 = vmul.f32 %v17387_v25, %v7285_v37  ;;  %v6642_v5 = vmul.f32 %v17516_v27, %v6607_v51 }
 0x5de   : > { %v7174_v28 = vadd.f32 %v17611_v47, %v7123_v0  ;;  %v6650_v53 = vmul.f32 %v17516_v27, %v6615_v58  ;;  %v19885_v18 = vrot.slane %v17504_v60, 1  ;;  %v7342_v47 = vrot.slane %v7316_v41, 2 }
 0x5df   : > { %v6926_v45 = vadd.f32 %v6908_v43, %v6816_v40  ;;  %v7241_v52 = vsel %vm1855_vm4, %v7239_v39, %v7240_v54  ;;  %v6667_v6 = vrot.slane %v17564_v12, 1  ;;  %v7343_v9 = vrot.slane %v7320_v59, 2 }
 0x5e0   : > { %v7251_v21 = vsel %vm1855_vm4, %v7240_v54, %v19885_v18  ;;  %v7265_v43 = vadd.f32 %v7241_v52, %v7174_v28  ;;  %v6666_v24 = vrot.slane %v6642_v5, 1  ;;  %v6678_v42 = vrot.slane %v6650_v53, 1 }
 0x5e1   : > { %v7018_v34 = vadd.f32 %v7000_v49, %v6926_v45  ;;  %v6724_v25 = vmul.f32 %v17402_v38, %v6702_v61  ;;  %v6732_v51 = vmul.f32 %v19850_v62, %v6706_v14  ;;  %v6763_v27 = vmul.f32 %v17520_v63, %v17568_v32 }
 0x5e2   : > { %v7344_v60 = vsel %vm2050_vm6, %v7342_v47, %v7343_v9  ;;  %v19886_v49 = vrot.slane %v17407_v15, 2  ;;  %v6668_v12 = vsel %vm1855_vm4, %v6666_v24, %v6667_v6  ;;  %v6679_v11 = vsel %vm1855_vm4, %v6667_v6, %v6678_v42  ;;  %v7272_v42 = vld [vmem:[#allocation4 + $0x20] sm:$0xfc] }
 0x5e3   : > { %v7127_v20 = vadd.f32 %v7109_v2, %v7018_v34  ;;  %v7368_v40 = vadd.f32 %v7344_v60, %v7265_v43  ;;  %v6694_v8 = vadd.f32 %v6668_v12, %v6591_v29  ;;  %v6759_v61 = vmul.f32 %v17520_v63, %v6724_v25  ;;  %v19887_v25 = vld [vmem:[#allocation76_spill] sm:$0xff] }
 0x5e4   : > { %v7354_v19 = vsel %vm2050_vm6, %v7343_v9, %v19886_v49  ;;  %v6698_v14 = vadd.f32 %v6679_v11, %v17582_v3  ;;  %v6767_v32 = vmul.f32 %v17520_v63, %v6732_v51  ;;  %v6784_v0 = vrot.slane %v6763_v27, 2 }
 0x5e5   : > { %v7178_v58 = vadd.f32 %v7170_v23, %v7127_v20  ;;  %v6783_v23 = vrot.slane %v6759_v61, 2  ;;  %v6834_v15 = vmul.f32 %v17410_v48, %v17626_v56  ;;  %v6838_v16 = vmul.f32 %v17456_v30, %v17547_v44 }
 0x5e6   : > { %v6842_v1 = vmul.f32 %v17413_v10, %v17633_v36  ;;  %v6795_v2 = vrot.slane %v6767_v32, 2  ;;  %v6960_v39 = vmul.f32 %v17540_v22, %v17635_v33  ;;  %v6964_v3 = vmul.f32 %v17540_v22, %v17547_v44 }
 0x5e7   : > { %v7269_v57 = vadd.f32 %v7251_v21, %v7178_v58  ;;  %v6785_v63 = vsel %vm2050_vm6, %v6783_v23, %v6784_v0  ;;  %v6869_v37 = vmul.f32 %v17532_v55, %v6834_v15  ;;  %v6873_v56 = vmul.f32 %v17532_v55, %v6838_v16  ;;  %v19888_v58 = vld [vmem:[#allocation52_spill] sm:$0xff] }
 0x5e8   : > { %v6877_v28 = vmul.f32 %v17532_v55, %v6842_v1  ;;  %v6796_v41 = vsel %vm2050_vm6, %v6784_v0, %v6795_v2  ;;  %v6811_v36 = vadd.f32 %v6785_v63, %v6694_v8  ;;  %v6968_v29 = vmul.f32 %v17540_v22, %v17637_v50  ;;  %v7181_v55 = vld [vmem:[#allocation4 + $0x20] sm:$0xfe]  ;;  %v19892_v0 = vld [vmem:[#allocation29_spill] sm:$0xff] }
 0x5e9   : > { %v7372_v45 = vadd.f32 %v7354_v19, %v7269_v57  ;;  %v6815_v34 = vadd.f32 %v6796_v41, %v6698_v14  ;;  %v6893_v33 = vrot.slane %v6869_v37, 4  ;;  %v6894_v59 = vrot.slane %v6873_v56, 4  ;;  %v19891_v14 = vld [vmem:[#allocation50_spill] sm:$0xff]  ;;  %v19895_v56 = vld [vmem:[#allocation77_spill] sm:$0xff]  ;;  %v19897_v41 = vld [vmem:[#allocation36_spill] sm:$0xff] }
 0x5ea   : > { %v6905_v5 = vrot.slane %v6877_v28, 4  ;;  %v6985_v53 = vrot.slane %v6960_v39, 5  ;;  %v6986_v52 = vrot.slane %v6964_v3, 5  ;;  %v6997_v18 = vrot.slane %v6968_v29, 5 }
 0x5eb   : > { %v7376_v54 = vpack.c.bf16 %v7372_v45, %v7368_v40  ;;  %v7035_v21 = vmul.f32 %v17404_v35, %v17642_v13  ;;  %v6895_v47 = vsel %vm6827_vm8, %v6893_v33, %v6894_v59  ;;  %v7039_v22 = vmul.f32 %v17466_v7, %v17547_v44  ;;  %v19890_v40 = vld [vmem:[#allocation65_spill] sm:$0xff] }
 0x5ec   : > { %v6906_v6 = vsel %vm6827_vm8, %v6894_v59, %v6905_v5  ;;  %v7043_v50 = vmul.f32 %v17400_v17, %v17644_v26  ;;  %v6921_v20 = vadd.f32 %v6895_v47, %v6811_v36  ;;  %v6987_v9 = vsel %vm6984_vm15, %v6985_v53, %v6986_v52  ;;  %v19889_v26 = vld [vmem:[#allocation58_spill] sm:$0xff]  ;;  %v19899_v53 = vld [vmem:[#allocation79_spill] sm:$0xff] }
 0x5ed   : > { %8179 = vmatprep.mubr.bf16.mxu0 %v7376_v54  ;;  %8265 = vmatprep.mubr.bf16.mxu1 %v7376_v54  ;;  %v6925_v43 = vadd.f32 %v6906_v6, %v6815_v34  ;;  %v6998_v24 = vsel %vm6984_vm15, %v6986_v52, %v6997_v18  ;;  %v7070_v13 = vmul.f32 %v19887_v25, %v7035_v21  ;;  %v7248_v32 = vrot.slane %v19891_v14, 1  ;;  %v19896_v54 = vld [vmem:[#allocation40_spill] sm:$0xff]  ;;  %v19898_v34 = vld [vmem:[#allocation78_spill] sm:$0xff] }
 0x5ee   : > { %v7074_v51 = vmul.f32 %v19887_v25, %v7039_v22  ;;  %v7078_v27 = vmul.f32 %v19887_v25, %v7043_v50  ;;  %v7134_v60 = vmul.f32 %v19888_v58, %v17547_v44  ;;  %v7013_v49 = vadd.f32 %v6987_v9, %v6921_v20  ;;  %v19900_v50 = vld [vmem:[#allocation47_spill] sm:$0xff]  ;;  %v19902_v25 = vld [vmem:[#allocation69_spill] sm:$0xff] }
 0x5ef   : > { %v7017_v19 = vadd.f32 %v6998_v24, %v6925_v43  ;;  %v7138_v12 = vmul.f32 %v19889_v26, %v17389_v31  ;;  %v7212_v11 = vmul.f32 %v19890_v40, %v7181_v55  ;;  %v7094_v8 = vrot.slane %v7070_v13, 6  ;;  %v19901_v43 = vld [vmem:[#allocation55_spill] sm:$0xff] }
 0x5f0   : > { %v7095_v61 = vrot.slane %v7074_v51, 6  ;;  %v7106_v57 = vrot.slane %v7078_v27, 6  ;;  %v7165_v23 = vmul.f32 %v19892_v0, %v7134_v60  ;;  %v7216_v16 = vmul.f32 %v19890_v40, %v19889_v26  ;;  %v12712_v40 = vld [vmem:[#allocation13 + $0x22c] ss:$16 sps:$4 sm:$0xff]  }
 0x5f1   : > { %v7169_v15 = vmul.f32 %v19892_v0, %v7138_v12  ;;  %v7280_v44 = vmul.f32 %v7272_v42, %v17402_v38  ;;  %v7236_v2 = vrot.slane %v7212_v11, 1  ;;  %v7284_v39 = vmul.f32 %v19889_v26, %v17441_v46  ;;  %v12709_v12 = vld [vmem:[#allocation13 + $0x224] ss:$16 sps:$4 sm:$0xff]   ;;  %v19903_v11 = vld [vmem:[#allocation60_spill] sm:$0xff] }
 0x5f2   : > { %v7096_v1 = vsel %vm19893_vm0, %v7094_v8, %v7095_v61  ;;  %v7107_v45 = vsel %vm19894_vm10, %v7095_v61, %v7106_v57  ;;  %v7237_v37 = vrot.slane %v7216_v16, 1  ;;  %v1488_v36 = vrot.slane %v19897_v41, %v19896_v54  ;;  %v19904_v57 = vld [vmem:[#allocation71_spill] sm:$0xff] }
 0x5f3   : > { %v7122_v3 = vadd.f32 %v7096_v1, %v7013_v49  ;;  %v7126_v63 = vadd.f32 %v7107_v45, %v7017_v19  ;;  %v7315_v28 = vmul.f32 %v19895_v56, %v7280_v44  ;;  %v7319_v29 = vmul.f32 %v19895_v56, %v7284_v39  ;;  %v12701_v49 = vld [vmem:[#allocation13 + $0x200] ss:$16 sps:$4 sm:$0xff]   ;;  %v12704_v19 = vld [vmem:[#allocation13 + $0x208] ss:$16 sps:$4 sm:$0xff]  }
 0x5f4   : > { %v1492_v33 = vrot.slane %v19897_v41, %v19898_v34  ;;  %v7351_v52 = vrot.slane %v19899_v53, 2  ;;  %v7238_v18 = vsel %vm1855_vm4, %v7236_v2, %v7237_v37  ;;  %v7249_v21 = vsel %vm1855_vm4, %v7237_v37, %v7248_v32  ;;  %v19905_v32 = vld [vmem:[#allocation64_spill] sm:$0xff]  ;;  %v12707_v2 = vld [vmem:[#allocation13 + $0x220] ss:$16 sps:$4 sm:$0xff]   ;;  %v19907_v56 = vld [vmem:[#allocation42_spill] sm:$0xff] }
 0x5f5   : > { %v7173_v59 = vadd.f32 %v7165_v23, %v7122_v3  ;;  %v7177_v5 = vadd.f32 %v7169_v15, %v7126_v63  ;;  %v7339_v55 = vrot.slane %v7315_v28, 2  ;;  %v7340_v47 = vrot.slane %v7319_v29, 2  ;;  %v19906_v23 = vld [vmem:[#allocation73_spill] sm:$0xff]  ;;  %v12710_v39 = vld [vmem:[#allocation13 + $0x228] ss:$16 sps:$4 sm:$0xff]  }
 0x5f6   : > { %v1499_v20 = vmul.f32 %v1488_v36, %v19900_v50  ;;  %v1518_v9 = vrot.slane %v19901_v43, %v19896_v54  ;;  %v1500_v13 = vmul.f32 %v1492_v33, %v19902_v25  ;;  %v1522_v51 = vrot.slane %v19901_v43, %v19898_v34  ;;  %v12715_v63 = vld [vmem:[#allocation13 + $0x244] ss:$16 sps:$4 sm:$0xff]   ;;  %v12718_v37 = vld [vmem:[#allocation13 + $0x24c] ss:$16 sps:$4 sm:$0xff]  }
 0x5f7   : > { %v7264_v6 = vadd.f32 %v7238_v18, %v7173_v59  ;;  %v7268_v22 = vadd.f32 %v7249_v21, %v7177_v5  ;;  %v7341_v24 = vsel %vm2050_vm6, %v7339_v55, %v7340_v47  ;;  %v7352_v42 = vsel %vm2050_vm6, %v7340_v47, %v7351_v52  ;;  %v19908_v53 = vld [vmem:[#allocation30_spill] sm:$0xff]  ;;  %v19909_v18 = vld [vmem:[#allocation56_spill] sm:$0xff]  ;;  %v19910_v50 = vld [vmem:[#allocation57_spill] sm:$0xff] }
 0x5f8   : > { %v1503_v8 = vmul.f32 %v1488_v36, %v19903_v11  ;;  %v1529_v61 = vadd.f32 %v1518_v9, %v1499_v20  ;;  %v7291_v14 = vmul.f32 %v19904_v57, %v19850_v62  ;;  %v17760_v0 = vrot.slane %v19905_v32, %v19898_v34  ;;  %v19911_v43 = vld [vmem:[#allocation62_spill] sm:$0xff] }
 0x5f9   : > { %v7367_v27 = vadd.f32 %v7341_v24, %v7264_v6  ;;  %v7371_v60 = vadd.f32 %v7352_v42, %v7268_v22  ;;  %v1504_v15 = vmul.f32 %v1492_v33, %v19906_v23  ;;  %v1530_v44 = vadd.f32 %v1522_v51, %v1500_v13  ;;  %v12713_v6 = vld [vmem:[#allocation13 + $0x240] ss:$16 sps:$4 sm:$0xff]   ;;  %v12716_v22 = vld [vmem:[#allocation13 + $0x248] ss:$16 sps:$4 sm:$0xff]   ;;  %v12721_v42 = vld [vmem:[#allocation13 + $0x264] ss:$16 sps:$4 sm:$0xff]  }
 0x5fa   : > { %v6463_v16 = vpop.f32.mrb[28].mxu0  ;;  %v17765_v28 = vrot.slane %v19907_v56, %v19898_v34  ;;  %v1533_v36 = vadd.f32 %v1518_v9, %v1503_v8  ;;  %v17768_v29 = vmul.f32 %v17760_v0, %v7291_v14  ;;  %v17772_v52 = vrot.slane %v19908_v53, %v19898_v34  ;;  %v12724_v25 = vld [vmem:[#allocation13 + $0x26c] ss:$16 sps:$4 sm:$0xff]   ;;  %v12719_v23 = vld [vmem:[#allocation13 + $0x260] ss:$16 sps:$4 sm:$0xff]  }
 0x5fb   : > { %v7375_v26 = vpack.c.bf16 %v7371_v60, %v7367_v27  ;;  %v6476_v1 = vadd.f32 %v6463_v16, %v1529_v61  ;;  %v6465_v45 = vpop.f32.mrb[29].mxu0  ;;  %v1534_v5 = vadd.f32 %v1522_v51, %v1504_v15  ;;  %v17776_v21 = vrot.slane %v19909_v18, %v19898_v34  ;;  %v19912_v13 = vld [vmem:[#allocation46_spill] sm:$0xff]  ;;  %v19913_v27 = vld [vmem:[#allocation45_spill] sm:$0xff] }
 0x5fc   : > { %v6477_v3 = vadd.f32 %v6465_v45, %v1530_v44  ;;  %v17780_v20 = vrot.slane %v19910_v50, %v19898_v34  ;;  %v17784_v9 = vrot.slane %v19911_v43, %v19898_v34  ;;  %v17788_v51 = vrot.slane %v19912_v13, %v19898_v34  ;;  %v12722_v15 = vld [vmem:[#allocation13 + $0x268] ss:$16 sps:$4 sm:$0xff]   ;;  %v12727_v45 = vld [vmem:[#allocation13 + $0x284] ss:$16 sps:$4 sm:$0xff]  }
 0x5fd   : > { %8180 = vmatmul.mubr.bf16.vlgmr.msra.gmra.mrb[32].mxu0 %v7375_v26  ;;  %8266 = vmatmul.mubr.bf16.vlgmr.msra.gmra.mrb[36].mxu1 %v7375_v26  ;;  %v6509_v41 = vrot.slane %v6476_v1, 3  ;;  %v17792_v60 = vmul.f32 %v17765_v28, %v19913_v27  ;;  %v17804_v11 = vrot.slane %v19909_v18, %v19896_v54  ;;  %v17808_v61 = vrot.slane %v19908_v53, %v19896_v54  ;;  %v12728_v18 = vld [vmem:[#allocation13 + $0x288] ss:$16 sps:$4 sm:$0xff]  }
 0x5fe   : > { %8191 = vmatpush1.bf16.msra.mxu0 %v12701_v49  ;;  %8277 = vmatpush1.bf16.msra.mxu1 %v12704_v19  ;;  %v6510_v33 = vrot.slane %v6477_v3, 3  ;;  %v6469_v59 = vpop.f32.mrb[30].mxu0  ;;  %v19914_v19 = vld [vmem:[#allocation39_spill] sm:$0xff]  ;;  %v17812_v57 = vrot.slane %v19912_v13, %v19896_v54  ;;  %v17816_v14 = vrot.slane %v19907_v56, %v19896_v54  ;;  %v17821_v16 = vrot.slane %v19910_v50, %v19896_v54 }
 0x5ff   : > { %8192 = vmatprep.subr.bf16.mxu0 %v12709_v12  ;;  %8278 = vmatprep.subr.bf16.mxu1 %v12712_v40  ;;  %6533 = vst [vmem:[#allocation4 + $0x10] sm:$0xe0] %v6509_v41  ;;  %v6480_v55 = vadd.f32 %v6469_v59, %v1533_v36  ;;  %v6471_v47 = vpop.f32.mrb[31].mxu0  ;;  %v17796_v26 = vrot.slane %v19914_v19, %v19898_v34  ;;  %v19915_v12 = vld [vmem:[#allocation66_spill] sm:$0xff] }
 0x600   : > { %6534 = vst [vmem:[#allocation4 + $0x18] sm:$0xe0] %v6510_v33  ;;  %v6481_v24 = vadd.f32 %v6471_v47, %v1534_v5  ;;  %v17800_v40 = vrot.slane %v19915_v12, %v19898_v34  ;;  %19916 = vst [vmem:[#allocation35_spill] sm:$0xff] %v17816_v14  ;;  %v17825_v44 = vrot.slane %v19911_v43, %v19896_v54  ;;  %v12736_v47 = vld [vmem:[#allocation13 + $0x2ac] ss:$16 sps:$4 sm:$0xff]  }
 0x601   : > { %v6515_v49 = vrot.slane %v6480_v55, 3  ;;  %v17831_v3 = vrot.slane %v19914_v19, %v19896_v54  ;;  %v12733_v55 = vld [vmem:[#allocation13 + $0x2a4] ss:$16 sps:$4 sm:$0xff]  }
 0x602   : > { %8193 = vmatpush1.bf16.msra.mxu0 %v12707_v2  ;;  %8279 = vmatpush1.bf16.msra.mxu1 %v12710_v39  ;;  %v6517_v8 = vrot.slane %v6481_v24, 3  ;;  %v12730_v39 = vld [vmem:[#allocation13 + $0x28c] ss:$16 sps:$4 sm:$0xff]  }
 0x603   : > { %8194 = vmatprep.subr.bf16.mxu0 %v12715_v63  ;;  %8280 = vmatprep.subr.bf16.mxu1 %v12718_v37  ;;  %v6516_v32 = vsel %vm6506_vm14, %v6509_v41, %v6515_v49  ;;  %6541 = vst [vmem:[#allocation4 + $0x50] sm:$0x1f] %v6515_v49  ;;  %19917 = vst [vmem:[#allocation68_spill] sm:$0xff] %v17831_v3  ;;  %v17835_v63 = vrot.slane %v19915_v12, %v19896_v54  ;;  %v12725_v37 = vld [vmem:[#allocation13 + $0x280] ss:$16 sps:$4 sm:$0xff]  }
 0x604   : > { %6537 = vst [vmem:[#allocation4 + $0x30] sm:$0xff] %v6516_v32  ;;  %v6518_v1 = vsel %vm6506_vm14, %v6510_v33, %v6517_v8  ;;  %6542 = vst [vmem:[#allocation4 + $0x58] sm:$0x1f] %v6517_v8 }
 0x605   : > { %19918 = vst [vmem:[#allocation28_spill] sm:$0xff] %v17835_v63  ;;  %6538 = vst [vmem:[#allocation4 + $0x38] sm:$0xff] %v6518_v1  ;;  %v6568_v56 = vmul.f32 %v17389_v31, %v6518_v1  ;;  %v17839_v41 = vmul.f32 %v17776_v21, %v6518_v1  ;;  %v6731_v36 = vmul.f32 %v17441_v46, %v6518_v1 }
 0x606   : > { %8195 = vmatpush1.bf16.msra.mxu0 %v12713_v6  ;;  %8281 = vmatpush1.bf16.msra.mxu1 %v12716_v22  ;;  %v6841_v33 = vmul.f32 %v17456_v30, %v6518_v1  ;;  %v17844_v59 = vmul.f32 %v17788_v51, %v6518_v1  ;;  %v7042_v5 = vmul.f32 %v17466_v7, %v6518_v1  ;;  %v19919_v6 = vld [vmem:[#allocation41_spill] sm:$0xff] }
 0x607   : > { %8196 = vmatprep.subr.bf16.mxu0 %v12721_v42  ;;  %8282 = vmatprep.subr.bf16.mxu1 %v12724_v25  ;;  %v7137_v53 = vmul.f32 %v19888_v58, %v6518_v1  ;;  %v17850_v22 = vmul.f32 %v17816_v14, %v19919_v6  ;;  %v6546_v50 = vld [vmem:[#allocation4 + $0x18] sm:$0xff]  ;;  %v17853_v43 = vmul.f32 %v17772_v52, %v6568_v56  ;;  %v19924_v3 = vrot.slane %v17839_v41, 1 }
 0x608   : > { %v6610_v24 = vld [vmem:[#allocation4 + $0x18] sm:$0xfe]  ;;  %v17857_v13 = vmul.f32 %v17780_v20, %v6731_v36  ;;  %v17860_v27 = vmul.f32 %v17784_v9, %v6841_v33  ;;  %v6564_v49 = vmul.f32 %v19888_v58, %v6546_v50  ;;  %v12731_v33 = vld [vmem:[#allocation13 + $0x2a0] ss:$16 sps:$4 sm:$0xff]   ;;  %v17878_v42 = vmul.f32 %v17796_v26, %v7042_v5 }
 0x609   : > { %19920 = vst [vmem:[#allocation61_spill] sm:$0xff] %v17850_v22  ;;  %v6705_v25 = vld [vmem:[#allocation4 + $0x18] sm:$0xfc]  ;;  %v6645_v19 = vmul.f32 %v17776_v21, %v6610_v24 }
 0x60a   : > { %8197 = vmatpush1.bf16.msra.mxu0 %v12719_v23  ;;  %8283 = vmatpush1.bf16.msra.mxu1 %v12722_v15  ;;  %v6727_v12 = vmul.f32 %v17402_v38, %v6705_v25  ;;  %v6822_v8 = vld [vmem:[#allocation4 + $0x18] sm:$0xf0]  ;;  %v12734_v6 = vld [vmem:[#allocation13 + $0x2a8] ss:$16 sps:$4 sm:$0xff]   ;;  %v6594_v50 = vmul.f32 %v17772_v52, %v6564_v49  ;;  %v17881_v52 = vmul.f32 %v17800_v40, %v7137_v53 }
 0x60b   : > { %8198 = vmatprep.subr.bf16.mxu0 %v12727_v45  ;;  %v6932_v32 = vld [vmem:[#allocation4 + $0x18] sm:$0xe0]  ;;  %8284 = vmatprep.subr.bf16.mxu1 %v12730_v39  ;;  %v6837_v1 = vmul.f32 %v17410_v48, %v6822_v8  ;;  %v6675_v24 = vrot.slane %v6645_v19, 1  ;;  %v12739_v39 = vld [vmem:[#allocation13 + $0x2c4] ss:$16 sps:$4 sm:$0xff]   ;;  %v19921_v19 = vrot.slane %v17839_v41, 1 }
 0x60c   : > { %v6963_v36 = vmul.f32 %v17788_v51, %v6932_v32  ;;  %v7024_v45 = vld [vmem:[#allocation4 + $0x18] sm:$0xc0]  ;;  %v6762_v25 = vmul.f32 %v17780_v20, %v6727_v12  ;;  %v6618_v8 = vld [vmem:[#allocation4 + $0x58] sm:$0x1] }
 0x60d   : > { %v17873_v2 = vmul.f32 %v17404_v35, %v7024_v45  ;;  %8398 = vst [vmem:[#allocation4 + $0x18] sm:$0xff] %v17109_v4  ;;  %v12742_v23 = vld [vmem:[#allocation13 + $0x2cc] ss:$16 sps:$4 sm:$0xff]   ;;  %v6709_v15 = vld [vmem:[#allocation4 + $0x58] sm:$0x3]  ;;  %v6872_v32 = vmul.f32 %v17784_v9, %v6837_v1  ;;  %v6653_v49 = vmul.f32 %v17776_v21, %v6618_v8  ;;  %v6677_v12 = vsel %vm1855_vm4, %v6675_v24, %v19921_v19 }
 0x60e   : > { %v6826_v56 = vld [vmem:[#allocation4 + $0x58] sm:$0xf]  ;;  %8199 = vmatpush1.bf16.msra.mxu0 %v12725_v37  ;;  %8285 = vmatpush1.bf16.msra.mxu1 %v12728_v18  ;;  %v6735_v45 = vmul.f32 %v19850_v62, %v6709_v15  ;;  %v6792_v54 = vrot.slane %v6762_v25, 2  ;;  %v6697_v5 = vadd.f32 %v6677_v12, %v6594_v50  ;;  %v12737_v21 = vld [vmem:[#allocation13 + $0x2c0] ss:$16 sps:$4 sm:$0xff]  }
 0x60f   : > { %v6936_v34 = vld [vmem:[#allocation4 + $0x58] sm:$0x1f]  ;;  %8200 = vmatprep.subr.bf16.mxu0 %v12733_v55  ;;  %8286 = vmatprep.subr.bf16.mxu1 %v12736_v47  ;;  %v6845_v53 = vmul.f32 %v17413_v10, %v6826_v56  ;;  %v6902_v37 = vrot.slane %v6872_v32, 4  ;;  %v17893_v8 = vld [vmem:[#allocation4 + $0x10] sm:$0xfe]  ;;  %v6684_v25 = vrot.slane %v6653_v49, 1 }
 0x610   : > { %v7028_v22 = vld [vmem:[#allocation4 + $0x58] sm:$0x3f]  ;;  %v6971_v18 = vmul.f32 %v17788_v51, %v6936_v34  ;;  %v17895_v24 = vld [vmem:[#allocation4 + $0x10] sm:$0xfc]  ;;  %v6770_v19 = vmul.f32 %v17780_v20, %v6735_v45  ;;  %v19922_v55 = vrot.slane %v17857_v13, 2  ;;  %v6994_v56 = vrot.slane %v6963_v36, 5 }
 0x611   : > { %v17888_v1 = vld [vmem:[#allocation4 + $0x58] sm:$0xff]  ;;  %v17897_v15 = vld [vmem:[#allocation4 + $0x10] sm:$0xf0]  ;;  %v17903_v34 = vld [vmem:[#allocation4 + $0x50] sm:$0x1]  ;;  %v6880_v14 = vmul.f32 %v17784_v9, %v6845_v53  ;;  %v19923_v49 = vrot.slane %v17860_v27, 4  ;;  %v6685_v7 = vsel %vm1855_vm4, %v19924_v3, %v6684_v25 }
 0x612   : > { %8406 = vst [vmem:[#allocation4 + $0x58] sm:$0xff] %v17109_v4  ;;  %v6794_v47 = vsel %vm2050_vm6, %v6792_v54, %v19922_v55  ;;  %v12740_v50 = vld [vmem:[#allocation13 + $0x2c8] ss:$16 sps:$4 sm:$0xff]   ;;  %v12745_v32 = vld [vmem:[#allocation13 + $0x2e4] ss:$16 sps:$4 sm:$0xff]   ;;  %v7003_v45 = vrot.slane %v6971_v18, 5  ;;  %8201 = vmatpush1.bf16.msra.mxu0 %v12731_v33  ;;  %8287 = vmatpush1.bf16.msra.mxu1 %v12734_v6  ;;  %v6701_v41 = vadd.f32 %v6685_v7, %v17853_v43 }
 0x613   : > { %v17905_v51 = vld [vmem:[#allocation4 + $0x50] sm:$0x3]  ;;  %v6814_v63 = vadd.f32 %v6794_v47, %v6697_v5  ;;  %v6904_v20 = vsel %vm6827_vm8, %v6902_v37, %v19923_v49  ;;  %v17915_v36 = vld [vmem:[#allocation4 + $0x10] sm:$0xe0]  ;;  %v6801_v5 = vrot.slane %v6770_v19, 2  ;;  %v19925_v9 = vrot.slane %v17844_v59, 5  ;;  %8202 = vmatprep.subr.bf16.mxu0 %v12739_v39  ;;  %8288 = vmatprep.subr.bf16.mxu1 %v12742_v23 }
 0x614   : > { %v17907_v12 = vld [vmem:[#allocation4 + $0x50] sm:$0xf]  ;;  %v17917_v55 = vld [vmem:[#allocation4 + $0x10] sm:$0xc0]  ;;  %v7046_v37 = vmul.f32 %v17400_v17, %v7028_v22  ;;  %v6911_v3 = vrot.slane %v6880_v14, 4  ;;  %v19927_v23 = vrot.slane %v17857_v13, 2  ;;  %v7073_v49 = vmul.f32 %v17796_v26, %v17873_v2 }
 0x615   : > { %v17913_v54 = vld [vmem:[#allocation4 + $0x10] sm:$0xff]  ;;  %v6996_v53 = vsel %vm6984_vm15, %v6994_v56, %v19925_v9  ;;  %v6924_v25 = vadd.f32 %v6904_v20, %v6814_v63  ;;  %v19926_v19 = vmov %v19925_v9  ;;  %v7184_v56 = vld [vmem:[#allocation4 + $0x38] sm:$0xfe]  ;;  %v7104_v7 = vrot.slane %v17878_v42, 6 }
 0x616   : > { %v17926_v33 = vld [vmem:[#allocation4 + $0x50] sm:$0x1f]  ;;  %8397 = vst [vmem:[#allocation4 + $0x10] sm:$0xff] %v17109_v4  ;;  %v7004_v47 = vsel %vm6984_vm15, %v19926_v19, %v7003_v45  ;;  %v12748_v22 = vld [vmem:[#allocation13 + $0x2ec] ss:$16 sps:$4 sm:$0xff]   ;;  %v6802_v39 = vsel %vm2050_vm6, %v19927_v23, %v6801_v5  ;;  %v7081_v9 = vmul.f32 %v17796_v26, %v7046_v37  ;;  %v19928_v59 = vrot.slane %v17860_v27, 4  ;;  %8203 = vmatpush1.bf16.msra.mxu0 %v12737_v21 }
 0x617   : > { %v17928_v6 = vld [vmem:[#allocation4 + $0x50] sm:$0x3f]  ;;  %v7275_v14 = vld [vmem:[#allocation4 + $0x38] sm:$0xfc]  ;;  %v6818_v63 = vadd.f32 %v6802_v39, %v6701_v41  ;;  %v7016_v20 = vadd.f32 %v6996_v53, %v6924_v25  ;;  %v7103_v45 = vrot.slane %v7073_v49, 6  ;;  %v7215_v2 = vmul.f32 %v17765_v28, %v7184_v56  ;;  %8289 = vmatpush1.bf16.msra.mxu1 %v12740_v50  ;;  %8204 = vmatprep.subr.bf16.mxu0 %v12745_v32 }
 0x618   : > { %v17930_v18 = vld [vmem:[#allocation4 + $0x50] sm:$0xff]  ;;  %v6912_v43 = vsel %vm6827_vm8, %v19928_v59, %v6911_v3  ;;  %v7112_v5 = vrot.slane %v7081_v9, 6  ;;  %v7219_v26 = vmul.f32 %v17765_v28, %v17888_v1  ;;  %v12746_v42 = vld [vmem:[#allocation13 + $0x2e8] ss:$16 sps:$4 sm:$0xff]   ;;  %v7283_v53 = vmul.f32 %v7275_v14, %v17402_v38  ;;  %8290 = vmatprep.subr.bf16.mxu1 %v12748_v22  ;;  %v12754_v3 = vld [vmem:[#allocation13 + $0x30c] ss:$16 sps:$4 sm:$0xff]  }
 0x619   : > { %8405 = vst [vmem:[#allocation4 + $0x50] sm:$0xff] %v17109_v4  ;;  %v7141_v4 = vmul.f32 %v17888_v1, %v17389_v31  ;;  %v12743_v13 = vld [vmem:[#allocation13 + $0x2e0] ss:$16 sps:$4 sm:$0xff]   ;;  %v12751_v37 = vld [vmem:[#allocation13 + $0x304] ss:$16 sps:$4 sm:$0xff]   ;;  %v6928_v27 = vadd.f32 %v6912_v43, %v6818_v63  ;;  %v7287_v21 = vmul.f32 %v17888_v1, %v17441_v46  ;;  %v7105_v25 = vsel %vm19929_vm11, %v7103_v45, %v7104_v7 }
 0x61a   : > { %v7113_v19 = vsel %vm19930_vm7, %v7104_v7, %v7112_v5  ;;  %v7245_v56 = vrot.slane %v7215_v2, 1  ;;  %v7246_v28 = vrot.slane %v7219_v26, 1  ;;  %v7125_v32 = vadd.f32 %v7105_v25, %v7016_v20  ;;  %8205 = vmatpush1.bf16.msra.mxu0 %v12743_v13  ;;  %v17961_v49 = vld [vmem:[#allocation4 + $0x30] sm:$0xff]  ;;  %v12766_v25 = vld [vmem:[#allocation13 + $0x34c] ss:$16 sps:$4 sm:$0xff]  }
 0x61b   : > { %v7172_v41 = vmul.f32 %v17800_v40, %v7141_v4  ;;  %v7020_v50 = vadd.f32 %v7004_v47, %v6928_v27  ;;  %v7318_v23 = vmul.f32 %v17760_v0, %v7283_v53  ;;  %v7322_v39 = vmul.f32 %v17760_v0, %v7287_v21  ;;  %v12749_v40 = vld [vmem:[#allocation13 + $0x300] ss:$16 sps:$4 sm:$0xff]   ;;  %8291 = vmatpush1.bf16.msra.mxu1 %v12746_v42  ;;  %v12752_v47 = vld [vmem:[#allocation13 + $0x308] ss:$16 sps:$4 sm:$0xff]   ;;  %v12757_v14 = vld [vmem:[#allocation13 + $0x324] ss:$16 sps:$4 sm:$0xff]  }
 0x61c   : > { %v7247_v1 = vsel %vm1855_vm4, %v7245_v56, %v7246_v28  ;;  %v19931_v22 = vrot.slane %v17792_v60, 1  ;;  %v7357_v7 = vrot.slane %v17768_v29, 2  ;;  %8206 = vmatprep.subr.bf16.mxu0 %v12751_v37  ;;  %v6563_v63 = vmul.f32 %v19888_v58, %v17913_v54  ;;  %8292 = vmatprep.subr.bf16.mxu1 %v12754_v3  ;;  %v12760_v4 = vld [vmem:[#allocation13 + $0x32c] ss:$16 sps:$4 sm:$0xff]   ;;  %v12755_v26 = vld [vmem:[#allocation13 + $0x320] ss:$16 sps:$4 sm:$0xff]  }
 0x61d   : > { %v7129_v0 = vadd.f32 %v7113_v19, %v7020_v50  ;;  %v7176_v59 = vadd.f32 %v17881_v52, %v7125_v32  ;;  %v7348_v43 = vrot.slane %v7318_v23, 2  ;;  %v7349_v20 = vrot.slane %v7322_v39, 2  ;;  %v12758_v42 = vld [vmem:[#allocation13 + $0x328] ss:$16 sps:$4 sm:$0xff]   ;;  %v12763_v37 = vld [vmem:[#allocation13 + $0x344] ss:$16 sps:$4 sm:$0xff]  }
 0x61e   : > { %v7255_v9 = vsel %vm1855_vm4, %v7246_v28, %v19931_v22  ;;  %v6567_v60 = vmul.f32 %v17389_v31, %v17961_v49  ;;  %v6593_v13 = vmul.f32 %v17808_v61, %v6563_v63  ;;  %v6644_v29 = vmul.f32 %v17804_v11, %v17893_v8  ;;  %8207 = vmatpush1.bf16.msra.mxu0 %v12749_v40  ;;  %v12764_v40 = vld [vmem:[#allocation13 + $0x348] ss:$16 sps:$4 sm:$0xff]  }
 0x61f   : > { %v6648_v45 = vmul.f32 %v17804_v11, %v17961_v49  ;;  %v7180_v5 = vadd.f32 %v7172_v41, %v7129_v0  ;;  %v7267_v54 = vadd.f32 %v7247_v1, %v7176_v59  ;;  %v7350_v2 = vsel %vm2050_vm6, %v7348_v43, %v7349_v20  ;;  %8293 = vmatpush1.bf16.msra.mxu1 %v12752_v47 }
 0x620   : > { %v7358_v52 = vsel %vm2050_vm6, %v7349_v20, %v7357_v7  ;;  %8208 = vmatprep.subr.bf16.mxu0 %v12757_v14  ;;  %v6597_v27 = vmul.f32 %v17808_v61, %v6567_v60  ;;  %v6652_v8 = vmul.f32 %v17804_v11, %v17903_v34  ;;  %v6672_v53 = vrot.slane %v6644_v29, 1  ;;  %8294 = vmatprep.subr.bf16.mxu1 %v12760_v4  ;;  %v12772_v7 = vld [vmem:[#allocation13 + $0x36c] ss:$16 sps:$4 sm:$0xff]   ;;  %v12770_v29 = vld [vmem:[#allocation13 + $0x368] ss:$16 sps:$4 sm:$0xff]  }
 0x621   : > { %v6673_v21 = vrot.slane %v6648_v45, 1  ;;  %v7271_v3 = vadd.f32 %v7255_v9, %v7180_v5  ;;  %v7370_v41 = vadd.f32 %v7350_v2, %v7267_v54  ;;  %v6726_v19 = vmul.f32 %v17402_v38, %v17895_v24  ;;  %v12761_v24 = vld [vmem:[#allocation13 + $0x340] ss:$16 sps:$4 sm:$0xff]   ;;  %v12775_v2 = vld [vmem:[#allocation13 + $0x384] ss:$16 sps:$4 sm:$0xff]  }
 0x622   : > { %v6730_v56 = vmul.f32 %v17441_v46, %v17961_v49  ;;  %v6682_v50 = vrot.slane %v6652_v8, 1  ;;  %v6734_v61 = vmul.f32 %v19850_v62, %v17905_v51  ;;  %v6836_v11 = vmul.f32 %v17410_v48, %v17897_v15  ;;  %8209 = vmatpush1.bf16.msra.mxu0 %v12755_v26  ;;  %v12769_v15 = vld [vmem:[#allocation13 + $0x364] ss:$16 sps:$4 sm:$0xff]  }
 0x623   : > { %v6674_v28 = vsel %vm1855_vm4, %v6672_v53, %v6673_v21  ;;  %v7374_v34 = vadd.f32 %v7358_v52, %v7271_v3  ;;  %v6761_v23 = vmul.f32 %v17821_v16, %v6726_v19  ;;  %8295 = vmatpush1.bf16.msra.mxu1 %v12758_v42  ;;  %8210 = vmatprep.subr.bf16.mxu0 %v12763_v37  ;;  %v12778_v52 = vld [vmem:[#allocation13 + $0x38c] ss:$16 sps:$4 sm:$0xff]  }
 0x624   : > { %v6696_v32 = vadd.f32 %v6674_v28, %v6593_v13  ;;  %v6765_v39 = vmul.f32 %v17821_v16, %v6730_v56  ;;  %v6683_v1 = vsel %vm1855_vm4, %v6673_v21, %v6682_v50  ;;  %v6769_v22 = vmul.f32 %v17821_v16, %v6734_v61  ;;  %8296 = vmatprep.subr.bf16.mxu1 %v12766_v25  ;;  %v12767_v13 = vld [vmem:[#allocation13 + $0x360] ss:$16 sps:$4 sm:$0xff]   ;;  %v19932_v21 = vld [vmem:[#allocation34_spill] sm:$0xff]  ;;  %v12781_v61 = vld [vmem:[#allocation13 + $0x3a4] ss:$16 sps:$4 sm:$0xff]  }
 0x625   : > { %v6840_v51 = vmul.f32 %v17456_v30, %v17961_v49  ;;  %v7378_v9 = vpack.c.bf16 %v7374_v34, %v7370_v41  ;;  %v6700_v47 = vadd.f32 %v6683_v1, %v6597_v27  ;;  %v6789_v14 = vrot.slane %v6761_v23, 2  ;;  %v7183_v50 = vld [vmem:[#allocation4 + $0x30] sm:$0xfe] }
 0x626   : > { %v6790_v63 = vrot.slane %v6765_v39, 2  ;;  %v6799_v0 = vrot.slane %v6769_v22, 2  ;;  %v6844_v59 = vmul.f32 %v17413_v10, %v17907_v12  ;;  %v6871_v43 = vmul.f32 %v17825_v44, %v6836_v11  ;;  %8211 = vmatpush1.bf16.msra.mxu0 %v12761_v24  ;;  %v12784_v11 = vld [vmem:[#allocation13 + $0x3ac] ss:$16 sps:$4 sm:$0xff]   ;;  %v7274_v1 = vld [vmem:[#allocation4 + $0x30] sm:$0xfc] }
 0x627   : > { %v6875_v20 = vmul.f32 %v17825_v44, %v6840_v51  ;;  %8222 = vmatprep.mubr.bf16.mxu0 %v7378_v9  ;;  %8308 = vmatprep.mubr.bf16.mxu1 %v7378_v9  ;;  %v6962_v4 = vmul.f32 %v17812_v57, %v17915_v36  ;;  %v6966_v60 = vmul.f32 %v17812_v57, %v17961_v49  ;;  %v19934_v9 = vld [vmem:[#allocation35_spill] sm:$0xff] }
 0x628   : > { %v6791_v16 = vsel %vm2050_vm6, %v6789_v14, %v6790_v63  ;;  %8297 = vmatpush1.bf16.msra.mxu1 %v12764_v40  ;;  %v6800_v12 = vsel %vm2050_vm6, %v6790_v63, %v6799_v0  ;;  %v6879_v5 = vmul.f32 %v17825_v44, %v6844_v59  ;;  %v6899_v54 = vrot.slane %v6871_v43, 4  ;;  %8212 = vmatprep.subr.bf16.mxu0 %v12769_v15  ;;  %v12779_v14 = vld [vmem:[#allocation13 + $0x3a0] ss:$16 sps:$4 sm:$0xff]   ;;  %v12782_v63 = vld [vmem:[#allocation13 + $0x3a8] ss:$16 sps:$4 sm:$0xff]  }
 0x629   : > { %v6813_v45 = vadd.f32 %v6791_v16, %v6696_v32  ;;  %8298 = vmatprep.subr.bf16.mxu1 %v12772_v7  ;;  %v6817_v26 = vadd.f32 %v6800_v12, %v6700_v47  ;;  %v6900_v42 = vrot.slane %v6875_v20, 4  ;;  %v6970_v36 = vmul.f32 %v17812_v57, %v17926_v33  ;;  %v12773_v57 = vld [vmem:[#allocation13 + $0x380] ss:$16 sps:$4 sm:$0xff]   ;;  %v12776_v33 = vld [vmem:[#allocation13 + $0x388] ss:$16 sps:$4 sm:$0xff]  }
 0x62a   : > { %v6991_v37 = vrot.slane %v6962_v4, 5  ;;  %v6909_v27 = vrot.slane %v6879_v5, 4  ;;  %v6992_v8 = vrot.slane %v6966_v60, 5  ;;  %v7037_v53 = vmul.f32 %v17404_v35, %v17917_v55  ;;  %8213 = vmatpush1.bf16.msra.mxu0 %v12767_v13  ;;  %v19933_v32 = vld [vmem:[#allocation68_spill] sm:$0xff]  ;;  %v19935_v7 = vld [vmem:[#allocation53_spill] sm:$0xff] }
 0x62b   : > { %v7041_v3 = vmul.f32 %v19932_v21, %v17961_v49  ;;  %v6901_v44 = vsel %vm6827_vm8, %v6899_v54, %v6900_v42  ;;  %v7001_v41 = vrot.slane %v6970_v36, 5  ;;  %v7045_v25 = vmul.f32 %v17400_v17, %v17928_v6  ;;  %8214 = vmatprep.subr.bf16.mxu0 %v12775_v2  ;;  %v19936_v43 = vld [vmem:[#allocation28_spill] sm:$0xff]  ;;  %v12787_v4 = vld [vmem:[#allocation13 + $0x3c4] ss:$16 sps:$4 sm:$0xff]  }
 0x62c   : > { %v7136_v19 = vmul.f32 %v19888_v58, %v17961_v49  ;;  %8299 = vmatpush1.bf16.msra.mxu1 %v12770_v29  ;;  %v6910_v56 = vsel %vm6827_vm8, %v6900_v42, %v6909_v27  ;;  %v6923_v28 = vadd.f32 %v6901_v44, %v6813_v45  ;;  %v6993_v55 = vsel %vm6984_vm15, %v6991_v37, %v6992_v8  ;;  %v12790_v60 = vld [vmem:[#allocation13 + $0x3cc] ss:$16 sps:$4 sm:$0xff]   ;;  %v19937_v29 = vld [vmem:[#allocation61_spill] sm:$0xff] }
 0x62d   : > { %8300 = vmatprep.subr.bf16.mxu1 %v12778_v52  ;;  %v6927_v34 = vadd.f32 %v6910_v56, %v6817_v26  ;;  %v7002_v6 = vsel %vm6984_vm15, %v6992_v8, %v7001_v41  ;;  %v7072_v23 = vmul.f32 %v19933_v32, %v7037_v53  ;;  %v7076_v39 = vmul.f32 %v19933_v32, %v7041_v3  ;;  %v19940_v37 = vld [vmem:[#allocation54_spill] sm:$0xff]  ;;  %v12785_v53 = vld [vmem:[#allocation13 + $0x3c0] ss:$16 sps:$4 sm:$0xff]   ;;  %v12793_v44 = vld [vmem:[#allocation13 + $0x3e4] ss:$16 sps:$4 sm:$0xff]  }
 0x62e   : > { %v7015_v49 = vadd.f32 %v6993_v55, %v6923_v28  ;;  %v7080_v24 = vmul.f32 %v19933_v32, %v7045_v25  ;;  %v7140_v40 = vmul.f32 %v17930_v18, %v17389_v31  ;;  %v7214_v15 = vmul.f32 %v19934_v9, %v7183_v50  ;;  %8215 = vmatpush1.bf16.msra.mxu0 %v12773_v57  ;;  %v12788_v3 = vld [vmem:[#allocation13 + $0x3c8] ss:$16 sps:$4 sm:$0xff]   ;;  %v9250_v50 = vld [vmem:[#allocation17 + $0x8] sm:$0xff] }
 0x62f   : > { %v7019_v22 = vadd.f32 %v7002_v6, %v6927_v34  ;;  %v7100_v51 = vrot.slane %v7072_v23, 6  ;;  %v7355_v47 = vrot.slane %v19935_v7, 2  ;;  %v7101_v0 = vrot.slane %v7076_v39, 6  ;;  %8216 = vmatprep.subr.bf16.mxu0 %v12781_v61  ;;  %v9253_v56 = vld [vmem:[#allocation17 + $0x20] sm:$0xff]  ;;  %v9254_v61 = vld [vmem:[#allocation17 + $0x28] sm:$0xff] }
 0x630   : > { %8301 = vmatpush1.bf16.msra.mxu1 %v12776_v33  ;;  %v7110_v59 = vrot.slane %v7080_v24, 6  ;;  %v7167_v20 = vmul.f32 %v19936_v43, %v7136_v19  ;;  %v7218_v16 = vmul.f32 %v19934_v9, %v17930_v18  ;;  %v7171_v13 = vmul.f32 %v19936_v43, %v7140_v40  ;;  %v9249_v33 = vld [vmem:[#allocation17] sm:$0xff]  ;;  %v12791_v32 = vld [vmem:[#allocation13 + $0x3e0] ss:$16 sps:$4 sm:$0xff]  }
 0x631   : > { %8302 = vmatprep.subr.bf16.mxu1 %v12784_v11  ;;  %v7252_v12 = vrot.slane %v19937_v29, 1  ;;  %v7282_v45 = vmul.f32 %v7274_v1, %v17402_v38  ;;  %v7286_v5 = vmul.f32 %v17930_v18, %v17441_v46  ;;  %v7102_v54 = vsel %vm19938_vm9, %v7100_v51, %v7101_v0  ;;  %v12796_v18 = vld [vmem:[#allocation13 + $0x3ec] ss:$16 sps:$4 sm:$0xff]   ;;  %v12794_v23 = vld [vmem:[#allocation13 + $0x3e8] ss:$16 sps:$4 sm:$0xff]   ;;  %v9258_v9 = vld [vmem:[#allocation17 + $0x48] sm:$0xff] }
 0x632   : > { %v7111_v2 = vsel %vm19939_vm13, %v7101_v0, %v7110_v59  ;;  %v7242_v52 = vrot.slane %v7214_v15, 1  ;;  %v7243_v26 = vrot.slane %v7218_v16, 1  ;;  %v7124_v42 = vadd.f32 %v7102_v54, %v7015_v49  ;;  %8217 = vmatpush1.bf16.msra.mxu0 %v12779_v14  ;;  %v9261_v51 = vld [vmem:[#allocation17 + $0x60] sm:$0xff]  ;;  %v9262_v15 = vld [vmem:[#allocation17 + $0x68] sm:$0xff] }
 0x633   : > { %v7128_v36 = vadd.f32 %v7111_v2, %v7019_v22  ;;  %v7317_v27 = vmul.f32 %v19940_v37, %v7282_v45  ;;  %v7321_v8 = vmul.f32 %v19940_v37, %v7286_v5  ;;  %8218 = vmatprep.subr.bf16.mxu0 %v12787_v4  ;;  %v11902_v39 = vcombine.high %v9249_v33, %v9253_v56  ;;  %v9257_v22 = vld [vmem:[#allocation17 + $0x40] sm:$0xff]  ;;  %v9270_v16 = vld [vmem:[#allocation17 + $0xa8] sm:$0xff] }
 0x634   : > { %8303 = vmatpush1.bf16.msra.mxu1 %v12782_v63  ;;  %v7175_v41 = vadd.f32 %v7167_v20, %v7124_v42  ;;  %v7244_v28 = vsel %vm1855_vm4, %v7242_v52, %v7243_v26  ;;  %v7253_v55 = vsel %vm1855_vm4, %v7243_v26, %v7252_v12  ;;  %v11904_v1 = vcombine.high %v9250_v50, %v9254_v61  ;;  %v9265_v59 = vld [vmem:[#allocation17 + $0x80] sm:$0xff]  ;;  %v9266_v20 = vld [vmem:[#allocation17 + $0x88] sm:$0xff] }
 0x635   : > { %8304 = vmatprep.subr.bf16.mxu1 %v12790_v60  ;;  %v7179_v25 = vadd.f32 %v7171_v13, %v7128_v36  ;;  %v7345_v19 = vrot.slane %v7317_v27, 2  ;;  %v7346_v57 = vrot.slane %v7321_v8, 2  ;;  %v11903_v14 = vcombine.low %v9250_v50, %v9254_v61  ;;  %v9269_v43 = vld [vmem:[#allocation17 + $0xa0] sm:$0xff]  ;;  %v9274_v5 = vld [vmem:[#allocation17 + $0xc8] sm:$0xff] }
 0x636   : > { %v7266_v11 = vadd.f32 %v7244_v28, %v7175_v41  ;;  %8219 = vmatpush1.bf16.msra.mxu0 %v12785_v53  ;;  %v11910_v63 = vcombine.high %v9257_v22, %v9261_v51  ;;  %v11912_v0 = vcombine.high %v9258_v9, %v9262_v15  ;;  %v11909_v4 = vcombine.low %v9257_v22, %v9261_v51  ;;  %v9273_v12 = vld [vmem:[#allocation17 + $0xc0] sm:$0xff]  ;;  %v9278_v54 = vld [vmem:[#allocation17 + $0xe8] sm:$0xff] }
 0x637   : > { %v7270_v34 = vadd.f32 %v7253_v55, %v7179_v25  ;;  %v7356_v6 = vsel %vm2050_vm6, %v7346_v57, %v7355_v47  ;;  %v7347_v49 = vsel %vm2050_vm6, %v7345_v19, %v7346_v57  ;;  %8220 = vmatprep.subr.bf16.mxu0 %v12793_v44  ;;  %v11901_v47 = vcombine.low %v9249_v33, %v9253_v56  ;;  %v9277_v45 = vld [vmem:[#allocation17 + $0xe0] sm:$0xff]  ;;  %v9282_v27 = vld [vmem:[#allocation17 + $0x108] sm:$0xff] }
 0x638   : > { %8305 = vmatpush1.bf16.msra.mxu1 %v12788_v3  ;;  %v7369_v24 = vadd.f32 %v7347_v49, %v7266_v11  ;;  %v11911_v60 = vcombine.low %v9258_v9, %v9262_v15  ;;  %v11918_v13 = vcombine.high %v9265_v59, %v9269_v43  ;;  %v11920_v29 = vcombine.high %v9266_v20, %v9270_v16  ;;  %v9281_v36 = vld [vmem:[#allocation17 + $0x100] sm:$0xff]  ;;  %v9286_v8 = vld [vmem:[#allocation17 + $0x128] sm:$0xff] }
 0x639   : > { %8306 = vmatprep.subr.bf16.mxu1 %v12796_v18  ;;  %v7373_v40 = vadd.f32 %v7356_v6, %v7270_v34  ;;  %v11917_v2 = vcombine.low %v9265_v59, %v9269_v43  ;;  %v11919_v52 = vcombine.low %v9266_v20, %v9270_v16  ;;  %v11926_v26 = vcombine.high %v9273_v12, %v9277_v45  ;;  %v9285_v37 = vld [vmem:[#allocation17 + $0x120] sm:$0xff]  ;;  %v9290_v33 = vld [vmem:[#allocation17 + $0x148] sm:$0xff] }
 0x63a   : > { %8221 = vmatpush1.bf16.msra.mxu0 %v12791_v32  ;;  %v11928_v42 = vcombine.high %v9274_v5, %v9278_v54  ;;  %v11925_v53 = vcombine.low %v9273_v12, %v9277_v45  ;;  %v11927_v3 = vcombine.low %v9274_v5, %v9278_v54  ;;  %v11934_v44 = vcombine.high %v9281_v36, %v9285_v37  ;;  %v9289_v19 = vld [vmem:[#allocation17 + $0x140] sm:$0xff]  ;;  %v9294_v55 = vld [vmem:[#allocation17 + $0x168] sm:$0xff] }
 0x63b   : > { %v7377_v7 = vpack.c.bf16 %v7373_v40, %v7369_v24  ;;  %10785 = vmatprep.subr.bf16.mxu0 %v11902_v39  ;;  %v11936_v18 = vcombine.high %v9282_v27, %v9286_v8  ;;  %v11933_v41 = vcombine.low %v9281_v36, %v9285_v37  ;;  %v11935_v25 = vcombine.low %v9282_v27, %v9286_v8  ;;  %v9293_v57 = vld [vmem:[#allocation17 + $0x160] sm:$0xff]  ;;  %v9298_v32 = vld [vmem:[#allocation17 + $0x188] sm:$0xff] }
 0x63c   : > { %8307 = vmatpush1.bf16.msra.mxu1 %v12794_v23  ;;  %v11941_v56 = vcombine.low %v9289_v19, %v9293_v57  ;;  %v11942_v28 = vcombine.high %v9289_v19, %v9293_v57  ;;  %v9297_v50 = vld [vmem:[#allocation17 + $0x180] sm:$0xff]  ;;  %v11943_v11 = vcombine.low %v9290_v33, %v9294_v55  ;;  %v11944_v34 = vcombine.high %v9290_v33, %v9294_v55  ;;  %v9302_v23 = vld [vmem:[#allocation17 + $0x1a8] sm:$0xff] }
 0x63d   : > { %10871 = vmatprep.subr.bf16.mxu1 %v11904_v1  ;;  %8223 = vmatmul.mubr.bf16.vlgmr.msra.gmra.mrb[32].mxu0 %v7377_v7  ;;  %v9301_v61 = vld [vmem:[#allocation17 + $0x1a0] sm:$0xff]  ;;  %v11952_v39 = vcombine.high %v9298_v32, %v9302_v23  ;;  %v9306_v40 = vld [vmem:[#allocation17 + $0x1c8] sm:$0xff]  ;;  %v11951_v51 = vcombine.low %v9298_v32, %v9302_v23 }
 0x63e   : > { %10786 = vmatpush1.bf16.msra.mxu0 %v11901_v47  ;;  %v11950_v6 = vcombine.high %v9297_v50, %v9301_v61  ;;  %v9305_v49 = vld [vmem:[#allocation17 + $0x1c0] sm:$0xff]  ;;  %v9310_v1 = vld [vmem:[#allocation17 + $0x1e8] sm:$0xff]  ;;  %v11949_v22 = vcombine.low %v9297_v50, %v9301_v61 }
 0x63f   : > { %8309 = vmatmul.mubr.bf16.vlgmr.msra.gmra.mrb[36].mxu1 %v7377_v7  ;;  %10787 = vmatprep.subr.bf16.mxu0 %v11910_v63  ;;  %v9309_v24 = vld [vmem:[#allocation17 + $0x1e0] sm:$0xff]  ;;  %v11960_v15 = vcombine.high %v9306_v40, %v9310_v1  ;;  %v9318_v63 = vld [vmem:[#allocation17 + $0x228] sm:$0xff]  ;;  %v11959_v59 = vcombine.low %v9306_v40, %v9310_v1 }
 0x640   : > { %10872 = vmatpush1.bf16.msra.mxu1 %v11903_v14  ;;  %v11958_v9 = vcombine.high %v9305_v49, %v9309_v24  ;;  %v9313_v7 = vld [vmem:[#allocation17 + $0x200] sm:$0xff]  ;;  %v9314_v14 = vld [vmem:[#allocation17 + $0x208] sm:$0xff] }
 0x641   : > { %10873 = vmatprep.subr.bf16.mxu1 %v11912_v0  ;;  %v9317_v47 = vld [vmem:[#allocation17 + $0x220] sm:$0xff]  ;;  %v11957_v0 = vcombine.low %v9305_v49, %v9309_v24  ;;  %v11968_v20 = vcombine.high %v9314_v14, %v9318_v63  ;;  %v11967_v12 = vcombine.low %v9314_v14, %v9318_v63  ;;  %v9354_v32 = vld [vmem:[#allocation17 + $0x348] sm:$0xff] }
 0x642   : > { %10788 = vmatpush1.bf16.msra.mxu0 %v11909_v4  ;;  %v11966_v43 = vcombine.high %v9313_v7, %v9317_v47  ;;  %v9321_v16 = vld [vmem:[#allocation17 + $0x240] sm:$0xff]  ;;  %v9358_v23 = vld [vmem:[#allocation17 + $0x368] sm:$0xff] }
 0x643   : > { %10789 = vmatprep.subr.bf16.mxu0 %v11918_v13  ;;  %v9325_v4 = vld [vmem:[#allocation17 + $0x260] sm:$0xff]  ;;  %v9326_v13 = vld [vmem:[#allocation17 + $0x268] sm:$0xff]  ;;  %v12008_v40 = vcombine.high %v9354_v32, %v9358_v23  ;;  %v12007_v63 = vcombine.low %v9354_v32, %v9358_v23  ;;  %v8349_v32 = vld [vmem:[#allocation16] sm:$0xf] }
 0x644   : > { %10874 = vmatpush1.bf16.msra.mxu1 %v11911_v60  ;;  %v9322_v60 = vld [vmem:[#allocation17 + $0x248] sm:$0xff]  ;;  %v11974_v45 = vcombine.high %v9321_v16, %v9325_v4  ;;  %v9329_v54 = vld [vmem:[#allocation17 + $0x280] sm:$0xff] }
 0x645   : > { %10875 = vmatprep.subr.bf16.mxu1 %v11920_v29  ;;  %v11965_v29 = vcombine.low %v9313_v7, %v9317_v47  ;;  %v11976_v5 = vcombine.high %v9322_v60, %v9326_v13  ;;  %v11975_v36 = vcombine.low %v9322_v60, %v9326_v13  ;;  %v9337_v8 = vld [vmem:[#allocation17 + $0x2c0] sm:$0xff]  ;;  %v18050_v14 = vld [vmem:[#allocation17 + $0x408] sm:$0xff] }
 0x646   : > { %10790 = vmatpush1.bf16.msra.mxu0 %v11917_v2  ;;  %v9333_v2 = vld [vmem:[#allocation17 + $0x2a0] sm:$0xff]  ;;  %19943 = vst [vmem:[#allocation75_spill] sm:$0xff] %v18050_v14  ;;  %v9370_v13 = vld [vmem:[#allocation17 + $0x3c8] sm:$0xff] }
 0x647   : > { %10791 = vmatprep.subr.bf16.mxu0 %v11926_v26  ;;  %v9334_v26 = vld [vmem:[#allocation17 + $0x2a8] sm:$0xff]  ;;  %v11982_v37 = vcombine.high %v9329_v54, %v9333_v2  ;;  %v9345_v57 = vld [vmem:[#allocation17 + $0x300] sm:$0xff] }
 0x648   : > { %10876 = vmatpush1.bf16.msra.mxu1 %v11919_v52  ;;  %v9330_v52 = vld [vmem:[#allocation17 + $0x288] sm:$0xff]  ;;  %v9349_v33 = vld [vmem:[#allocation17 + $0x320] sm:$0xff] }
 0x649   : > { %10877 = vmatprep.subr.bf16.mxu1 %v11928_v42  ;;  %v11973_v42 = vcombine.low %v9321_v16, %v9325_v4  ;;  %v11984_v27 = vcombine.high %v9330_v52, %v9334_v26  ;;  %v11998_v61 = vcombine.high %v9345_v57, %v9349_v33  ;;  %v11997_v49 = vcombine.low %v9345_v57, %v9349_v33  ;;  %v9361_v1 = vld [vmem:[#allocation17 + $0x380] sm:$0xff] }
 0x64a   : > { %10792 = vmatpush1.bf16.msra.mxu0 %v11925_v53  ;;  %v9341_v53 = vld [vmem:[#allocation17 + $0x2e0] sm:$0xff] }
 0x64b   : > { %10793 = vmatprep.subr.bf16.mxu0 %v11934_v44  ;;  %v9342_v44 = vld [vmem:[#allocation17 + $0x2e8] sm:$0xff]  ;;  %v11989_v55 = vcombine.low %v9337_v8, %v9341_v53  ;;  %v18046_v7 = vld [vmem:[#allocation17 + $0x400] sm:$0xff] }
 0x64c   : > { %10878 = vmatpush1.bf16.msra.mxu1 %v11927_v3  ;;  %v9338_v3 = vld [vmem:[#allocation17 + $0x2c8] sm:$0xff]  ;;  %19941 = vst [vmem:[#allocation63_spill] sm:$0xff] %v18046_v7  ;;  %v18048_v47 = vld [vmem:[#allocation17 + $0x420] sm:$0xff] }
 0x64d   : > { %10879 = vmatprep.subr.bf16.mxu1 %v11936_v18  ;;  %v11981_v18 = vcombine.low %v9329_v54, %v9333_v2  ;;  %v11992_v19 = vcombine.high %v9338_v3, %v9342_v44  ;;  %v11991_v50 = vcombine.low %v9338_v3, %v9342_v44  ;;  %19942 = vst [vmem:[#allocation51_spill] sm:$0xff] %v18048_v47  ;;  %v9369_v16 = vld [vmem:[#allocation17 + $0x3c0] sm:$0xff] }
 0x64e   : > { %10794 = vmatpush1.bf16.msra.mxu0 %v11933_v41  ;;  %v11983_v41 = vcombine.low %v9330_v52, %v9334_v26  ;;  %v9373_v4 = vld [vmem:[#allocation17 + $0x3e0] sm:$0xff]  ;;  %v12030_v26 = vcombine.high %v18046_v7, %v18048_v47  ;;  %v18250_v7 = vld [vmem:[#allocation17 + $0x488] sm:$0xff] }
 0x64f   : > { %10795 = vmatprep.subr.bf16.mxu0 %v11942_v28  ;;  %v9350_v28 = vld [vmem:[#allocation17 + $0x328] sm:$0xff]  ;;  %v12021_v2 = vcombine.low %v9369_v16, %v9373_v4  ;;  %19971 = vst [vmem:[#allocation47_spill] sm:$0xff] %v18250_v7 }
 0x650   : > { %10880 = vmatpush1.bf16.msra.mxu1 %v11935_v25  ;;  %v11990_v25 = vcombine.high %v9337_v8, %v9341_v53  ;;  %v19946_v53 = vld [vmem:[#allocation27_spill] sm:$0xff] }
 0x651   : > { %10881 = vmatprep.subr.bf16.mxu1 %v11944_v34  ;;  %v9353_v34 = vld [vmem:[#allocation17 + $0x340] sm:$0xff] }
 0x652   : > { %10796 = vmatpush1.bf16.msra.mxu0 %v11941_v56  ;;  %v9346_v56 = vld [vmem:[#allocation17 + $0x308] sm:$0xff] }
 0x653   : > { %10797 = vmatprep.subr.bf16.mxu0 %v11950_v6  ;;  %v9357_v6 = vld [vmem:[#allocation17 + $0x360] sm:$0xff] }
 0x654   : > { %10882 = vmatpush1.bf16.msra.mxu1 %v11943_v11  ;;  %v12000_v11 = vcombine.high %v9346_v56, %v9350_v28  ;;  %v12006_v24 = vcombine.high %v9353_v34, %v9357_v6  ;;  %v18076_v57 = vld [vmem:[%s19945_s1 + $0x7] ss:$8 sm:$0xf] }
 0x655   : > { %10883 = vmatprep.subr.bf16.mxu1 %v11952_v39  ;;  %v11999_v39 = vcombine.low %v9346_v56, %v9350_v28  ;;  %v18094_v23 = vrot.slane %v18076_v57, %v19946_v53 }
 0x656   : > { %10798 = vmatpush1.bf16.msra.mxu0 %v11949_v22  ;;  %v9365_v22 = vld [vmem:[#allocation17 + $0x3a0] sm:$0xff] }
 0x657   : > { %10799 = vmatprep.subr.bf16.mxu0 %v11958_v9  ;;  %v9366_v9 = vld [vmem:[#allocation17 + $0x3a8] sm:$0xff] }
 0x658   : > { %10884 = vmatpush1.bf16.msra.mxu1 %v11951_v51  ;;  %v9362_v51 = vld [vmem:[#allocation17 + $0x388] sm:$0xff] }
 0x659   : > { %10885 = vmatprep.subr.bf16.mxu1 %v11960_v15  ;;  %v12005_v15 = vcombine.low %v9353_v34, %v9357_v6  ;;  %v8319_v6 = vld [vmem:[#allocation14] sm:$0xf] }
 0x65a   : > { %10800 = vmatpush1.bf16.msra.mxu0 %v11957_v0  ;;  %v12014_v0 = vcombine.high %v9361_v1, %v9365_v22 }
 0x65b   : > { %10801 = vmatprep.subr.bf16.mxu0 %v11966_v43  ;;  %v18054_v43 = vld [vmem:[#allocation17 + $0x428] sm:$0xff] }
 0x65c   : > { %10886 = vmatpush1.bf16.msra.mxu1 %v11959_v59  ;;  %19944 = vst [vmem:[#allocation31_spill] sm:$0xff] %v18054_v43 }
 0x65d   : > { %10887 = vmatprep.subr.bf16.mxu1 %v11968_v20  ;;  %v12016_v20 = vcombine.high %v9362_v51, %v9366_v9 }
 0x65e   : > { %10802 = vmatpush1.bf16.msra.mxu0 %v11965_v29  ;;  %v9374_v29 = vld [vmem:[#allocation17 + $0x3e8] sm:$0xff] }
 0x65f   : > { %10803 = vmatprep.subr.bf16.mxu0 %v11974_v45  ;;  %v12015_v45 = vcombine.low %v9362_v51, %v9366_v9  ;;  %v12024_v54 = vcombine.high %v9370_v13, %v9374_v29  ;;  %v12023_v52 = vcombine.low %v9370_v13, %v9374_v29  ;;  %v11895_v9 = vld [vmem:[%s19945_s1 + $0x3] ss:$8 sm:$0xf]  ;;  %v11896_v29 = vld [vmem:[%s19945_s1 + $0x4] ss:$8 sm:$0xf] }
 0x660   : > { %10888 = vmatpush1.bf16.msra.mxu1 %v11967_v12  ;;  %v12013_v12 = vcombine.low %v9361_v1, %v9365_v22  ;;  %v18106_v1 = vld [vmem:[%s19945_s1 + $0x2] ss:$8 sm:$0xf] }
 0x661   : > { %10889 = vmatprep.subr.bf16.mxu1 %v11976_v5  ;;  %v12022_v5 = vcombine.high %v9369_v16, %v9373_v4 }
 0x662   : > { %10804 = vmatpush1.bf16.msra.mxu0 %v11973_v42  ;;  %v12032_v42 = vcombine.high %v18050_v14, %v18054_v43  ;;  %v18235_v43 = vld [vmem:[#allocation17 + $0x4a0] sm:$0xff] }
 0x663   : > { %10805 = vmatprep.subr.bf16.mxu0 %v11982_v37  ;;  %v11900_v37 = vld [vmem:[%s19945_s1 + $0x20] ss:$8 sm:$0xf]  ;;  %19966 = vst [vmem:[#allocation50_spill] sm:$0xff] %v18235_v43 }
 0x664   : > { %10890 = vmatpush1.bf16.msra.mxu1 %v11975_v36  ;;  %v9147_v36 = vld [vmem:[#allocation4 + $0x68] sm:$0x3]  ;;  %v18067_v3 = vrot.slane %v11900_v37, %v19946_v53 }
 0x665   : > { %10891 = vmatprep.subr.bf16.mxu1 %v11984_v27  ;;  %v9146_v27 = vld [vmem:[#allocation4 + $0x60] sm:$0x3]  ;;  %v9159_v8 = vmul.f32 %v9147_v36, %v19850_v62  ;;  %v18329_v43 = vld [vmem:[#allocation17 + $0x5a0] sm:$0xff] }
 0x666   : > { %10806 = vmatpush1.bf16.msra.mxu0 %v11981_v18  ;;  %v9158_v44 = vmul.f32 %v9146_v27, %v19850_v62  ;;  %v19947_v18 = vld [vmem:[#allocation32_spill] sm:$0xff]  ;;  %19993 = vst [vmem:[#allocation61_spill] sm:$0xff] %v18329_v43 }
 0x667   : > { %10807 = vmatprep.subr.bf16.mxu0 %v11990_v25  ;;  %v9149_v25 = vld [vmem:[#allocation4 + $0x78] sm:$0x3]  ;;  %v18079_v33 = vmul.f32 %v18067_v3, %v9159_v8  ;;  %v18110_v22 = vrot.slane %v18076_v57, %v19947_v18  ;;  %v18113_v51 = vrot.slane %v8319_v6, %v19947_v18  ;;  %v18126_v16 = vrot.slane %v8349_v32, %v19947_v18  ;;  %v18387_v43 = vld [vmem:[#allocation17 + $0x640] sm:$0xff] }
 0x668   : > { %10892 = vmatpush1.bf16.msra.mxu1 %v11983_v41  ;;  %v18071_v41 = vrot.slane %v11900_v37, %v19947_v18  ;;  %v9161_v56 = vmul.f32 %v9149_v25, %v19850_v62  ;;  %v9058_v8 = vld [vmem:[#allocation4 + $0x78] sm:$0x1]  ;;  %v18180_v25 = vrot.slane %v11895_v9, %v19946_v53  ;;  %v18205_v60 = vrot.slane %v11895_v9, %v19947_v18 }
 0x669   : > { %10893 = vmatprep.subr.bf16.mxu1 %v11992_v19  ;;  %v9148_v19 = vld [vmem:[#allocation4 + $0x70] sm:$0x3]  ;;  %19954 = vst [vmem:[#allocation49_spill] sm:$0xff] %v18110_v22  ;;  %v18208_v59 = vrot.slane %v11896_v29, %v19947_v18  ;;  %20006 = vst [vmem:[#allocation91_spill] sm:$0xff] %v18387_v43 }
 0x66a   : > { %10808 = vmatpush1.bf16.msra.mxu0 %v11989_v55  ;;  %19948 = vst [vmem:[#allocation33_spill] sm:$0xff] %v18071_v41  ;;  %v18083_v28 = vmul.f32 %v18071_v41, %v9158_v44  ;;  %v19950_v55 = vld [vmem:[#allocation78_spill] sm:$0xff]  ;;  %v18177_v44 = vrot.slane %v18106_v1, %v19946_v53  ;;  %v18268_v41 = vld [vmem:[#allocation17 + $0x4e8] sm:$0xff] }
 0x66b   : > { %10809 = vmatprep.subr.bf16.mxu0 %v11998_v61  ;;  %v9160_v61 = vmul.f32 %v9148_v19, %v19850_v62  ;;  %v18183_v19 = vrot.slane %v11896_v29, %v19946_v53  ;;  %19959 = vst [vmem:[#allocation59_spill] sm:$0xff] %v18208_v59  ;;  %v18242_v47 = vrot.slane %v18106_v1, %v19950_v55  ;;  %19978 = vst [vmem:[#allocation42_spill] sm:$0xff] %v18268_v41 }
 0x66c   : > { %10894 = vmatpush1.bf16.msra.mxu1 %v11991_v50  ;;  %19949 = vst [vmem:[#allocation74_spill] sm:$0xff] %v18083_v28  ;;  %v18086_v50 = vrot.slane %v11900_v37, %v19950_v55  ;;  %v18252_v28 = vld [vmem:[#allocation17 + $0x4a8] sm:$0xff] }
 0x66d   : > { %10895 = vmatprep.subr.bf16.mxu1 %v12000_v11  ;;  %v19952_v11 = vld [vmem:[#allocation40_spill] sm:$0xff]  ;;  %19968 = vst [vmem:[#allocation77_spill] sm:$0xff] %v18242_v47  ;;  %19972 = vst [vmem:[#allocation55_spill] sm:$0xff] %v18252_v28  ;;  %v18333_v28 = vld [vmem:[#allocation17 + $0x5a8] sm:$0xff] }
 0x66e   : > { %10810 = vmatpush1.bf16.msra.mxu0 %v11997_v49  ;;  %19951 = vst [vmem:[#allocation44_spill] sm:$0xff] %v18086_v50  ;;  %v18090_v34 = vrot.slane %v11900_v37, %v19952_v11  ;;  %v8471_v49 = vld [vmem:[%s19945_s1] ss:$8 sm:$0xf]  ;;  %v18129_v4 = vrot.slane %v8319_v6, %v19952_v11  ;;  %v18132_v13 = vrot.slane %v8349_v32, %v19952_v11  ;;  %19995 = vst [vmem:[#allocation80_spill] sm:$0xff] %v18333_v28 }
 0x66f   : > { %10811 = vmatprep.subr.bf16.mxu0 %v12006_v24  ;;  %v18167_v36 = vrot.slane %v8471_v49, %v19946_v53  ;;  %v18213_v24 = vld [vmem:[#allocation17 + $0x440] sm:$0xff]  ;;  %v18288_v59 = vrot.slane %v11895_v9, %v19952_v11 }
 0x670   : > { %10896 = vmatpush1.bf16.msra.mxu1 %v11999_v39  ;;  %19953 = vst [vmem:[#allocation37_spill] sm:$0xff] %v18090_v34  ;;  %v9056_v39 = vld [vmem:[#allocation4 + $0x68] sm:$0x1] }
 0x671   : > { %10897 = vmatprep.subr.bf16.mxu1 %v12008_v40  ;;  %v11893_v40 = vld [vmem:[%s19945_s1 + $0x1] ss:$8 sm:$0xf]  ;;  %19985 = vst [vmem:[#allocation39_spill] sm:$0xff] %v18288_v59 }
 0x672   : > { %10812 = vmatpush1.bf16.msra.mxu0 %v12005_v15  ;;  %v9055_v15 = vld [vmem:[#allocation4 + $0x60] sm:$0x1]  ;;  %v18170_v37 = vrot.slane %v11893_v40, %v19946_v53  ;;  %v18238_v14 = vrot.slane %v11893_v40, %v19950_v55  ;;  %v18264_v47 = vld [vmem:[#allocation17 + $0x4e0] sm:$0xff] }
 0x673   : > { %10813 = vmatprep.subr.bf16.mxu0 %v12014_v0  ;;  %v18120_v0 = vmul.f32 %v18086_v50, %v9161_v56  ;;  %v18173_v27 = vmul.f32 %v18110_v22, %v9055_v15  ;;  %v18202_v15 = vrot.slane %v18106_v1, %v19947_v18  ;;  %v18229_v50 = vrot.slane %v8471_v49, %v19950_v55  ;;  %v18319_v59 = vld [vmem:[#allocation17 + $0x580] sm:$0xff]  ;;  %v18345_v22 = vld [vmem:[#allocation17 + $0x5c8] sm:$0xff] }
 0x674   : > { %10898 = vmatpush1.bf16.msra.mxu1 %v12007_v63  ;;  %19967 = vst [vmem:[#allocation29_spill] sm:$0xff] %v18238_v14  ;;  %19976 = vst [vmem:[#allocation64_spill] sm:$0xff] %v18264_v47  ;;  %v18341_v47 = vld [vmem:[#allocation17 + $0x5c0] sm:$0xff] }
 0x675   : > { %10899 = vmatprep.subr.bf16.mxu1 %v12016_v20  ;;  %19955 = vst [vmem:[#allocation48_spill] sm:$0xff] %v18120_v0  ;;  %v18123_v20 = vmul.f32 %v18090_v34, %v9160_v61  ;;  %19958 = vst [vmem:[#allocation72_spill] sm:$0xff] %v18173_v27  ;;  %v18248_v0 = vrot.slane %v11896_v29, %v19950_v55 }
 0x676   : > { %10814 = vmatpush1.bf16.msra.mxu0 %v12013_v12  ;;  %v18140_v12 = vld [vmem:[%s19945_s1 + $0x5] ss:$8 sm:$0xf]  ;;  %19963 = vst [vmem:[#allocation52_spill] sm:$0xff] %v18229_v50  ;;  %19992 = vst [vmem:[#allocation28_spill] sm:$0xff] %v18319_v59 }
 0x677   : > { %10815 = vmatprep.subr.bf16.mxu0 %v12022_v5  ;;  %19956 = vst [vmem:[#allocation70_spill] sm:$0xff] %v18123_v20  ;;  %v18146_v5 = vrot.slane %v8319_v6, %v19946_v53  ;;  %v18187_v56 = vrot.slane %v18140_v12, %v19946_v53  ;;  %v18221_v20 = vrot.slane %v18140_v12, %v19947_v18  ;;  %19970 = vst [vmem:[#allocation79_spill] sm:$0xff] %v18248_v0  ;;  %v18254_v50 = vld [vmem:[#allocation17 + $0x4c0] sm:$0xff] }
 0x678   : > { %10900 = vmatpush1.bf16.msra.mxu1 %v12015_v45  ;;  %v18143_v45 = vmul.f32 %v18094_v23, %v9056_v39  ;;  %v18198_v39 = vrot.slane %v11893_v40, %v19947_v18  ;;  %19973 = vst [vmem:[#allocation69_spill] sm:$0xff] %v18254_v50  ;;  %v18258_v27 = vrot.slane %v18140_v12, %v19950_v55  ;;  %19996 = vst [vmem:[#allocation81_spill] sm:$0xff] %v18341_v47  ;;  %v18363_v50 = vld [vmem:[#allocation17 + $0x620] sm:$0xff] }
 0x679   : > { %10901 = vmatprep.subr.bf16.mxu1 %v12024_v54  ;;  %v18149_v54 = vrot.slane %v8349_v32, %v19946_v53  ;;  %19961 = vst [vmem:[#allocation38_spill] sm:$0xff] %v18221_v20  ;;  %v18271_v0 = vrot.slane %v8471_v49, %v19952_v11  ;;  %v18277_v20 = vld [vmem:[#allocation17 + $0x500] sm:$0xff]  ;;  %19998 = vst [vmem:[#allocation83_spill] sm:$0xff] %v18345_v22  ;;  %v18349_v41 = vrot.slane %v18140_v12, %v19952_v11 }
 0x67a   : > { %10816 = vmatpush1.bf16.msra.mxu0 %v12021_v2  ;;  %v18152_v2 = vrot.slane %v8319_v6, %v19950_v55  ;;  %v18215_v6 = vld [vmem:[#allocation17 + $0x460] sm:$0xff]  ;;  %19974 = vst [vmem:[#allocation60_spill] sm:$0xff] %v18258_v27  ;;  %19981 = vst [vmem:[#allocation57_spill] sm:$0xff] %v18277_v20 }
 0x67b   : > { %10828 = vmatprep.subr.bf16.mxu0 %v12030_v26  ;;  %v18161_v26 = vrot.slane %v18076_v57, %v19950_v55  ;;  %19979 = vst [vmem:[#allocation30_spill] sm:$0xff] %v18271_v0  ;;  %v18279_v27 = vld [vmem:[#allocation17 + $0x520] sm:$0xff]  ;;  %v18317_v0 = vld [vmem:[#allocation17 + $0x568] sm:$0xff]  ;;  %19999 = vst [vmem:[#allocation84_spill] sm:$0xff] %v18349_v41 }
 0x67c   : > { %10902 = vmatpush1.bf16.msra.mxu1 %v12023_v52  ;;  %v18157_v52 = vld [vmem:[%s19945_s1 + $0x6] ss:$8 sm:$0xf]  ;;  %19982 = vst [vmem:[#allocation62_spill] sm:$0xff] %v18279_v27  ;;  %19991 = vst [vmem:[#allocation53_spill] sm:$0xff] %v18317_v0  ;;  %s13136_s1 = smov [#allocation19]  }
 0x67d   : > { %10914 = vmatprep.subr.bf16.mxu1 %v12032_v42  ;;  %19957 = vst [vmem:[#allocation43_spill] sm:$0xff] %v18161_v26  ;;  %v18164_v42 = vrot.slane %v8349_v32, %v19950_v55  ;;  %v18191_v61 = vrot.slane %v18157_v52, %v19946_v53  ;;  %v18195_v32 = vrot.slane %v8471_v49, %v19947_v18  ;;  %v18217_v53 = vld [vmem:[#allocation17 + $0x448] sm:$0xff]  ;;  %v18361_v20 = vld [vmem:[#allocation17 + $0x600] sm:$0xff]  ;;  %20002 = vst [vmem:[#allocation87_spill] sm:$0xff] %v18363_v50  ;;  %s13038_s4 = sshll.u32 %s13136_s1, 4  ;;  %s13039_s4 = int_to_ptr.vmem [resolvable:$false] %s13038_s4 }
 0x67e   : > { %v18211_v63 = vmul.f32 %v18161_v26, %v9058_v8  ;;  %v18225_v34 = vrot.slane %v18157_v52, %v19947_v18  ;;  %v18231_v8 = vld [vmem:[#allocation17 + $0x468] sm:$0xff]  ;;  %v18233_v26 = vld [vmem:[#allocation17 + $0x480] sm:$0xff]  ;;  %v18245_v18 = vrot.slane %v11895_v9, %v19950_v55  ;;  %v18262_v14 = vrot.slane %v18157_v52, %v19950_v55  ;;  %20001 = vst [vmem:[#allocation86_spill] sm:$0xff] %v18361_v20  ;;  %s13040_s7 = scalar_lea.vmem %s13039_s4, 256 }
 0x67f   : > { %19964 = vst [vmem:[#allocation58_spill] sm:$0xff] %v18231_v8  ;;  %19965 = vst [vmem:[#allocation65_spill] sm:$0xff] %v18233_v26  ;;  %v18281_v55 = vld [vmem:[#allocation17 + $0x508] sm:$0xff]  ;;  %v18291_v49 = vrot.slane %v11896_v29, %v19952_v11  ;;  %v18305_v9 = vld [vmem:[#allocation17 + $0x560] sm:$0xff]  ;;  %v18377_v29 = vrot.slane %v18076_v57, %v19952_v11 }
 0x680   : > { %19960 = vst [vmem:[#allocation67_spill] sm:$0xff] %v18211_v63  ;;  %19962 = vst [vmem:[#allocation76_spill] sm:$0xff] %v18225_v34  ;;  %v18274_v34 = vrot.slane %v11893_v40, %v19952_v11  ;;  %v18343_v40 = vld [vmem:[#allocation17 + $0x5e0] sm:$0xff]  ;;  %v18359_v27 = vld [vmem:[#allocation17 + $0x5e8] sm:$0xff] }
 0x681   : > { %19969 = vst [vmem:[#allocation36_spill] sm:$0xff] %v18245_v18  ;;  %19975 = vst [vmem:[#allocation71_spill] sm:$0xff] %v18262_v14  ;;  %v18266_v18 = vld [vmem:[#allocation17 + $0x4c8] sm:$0xff]  ;;  %v18285_v14 = vrot.slane %v18106_v1, %v19952_v11  ;;  %v18389_v59 = vld [vmem:[#allocation17 + $0x660] sm:$0xff] }
 0x682   : > { %19977 = vst [vmem:[#allocation73_spill] sm:$0xff] %v18266_v18  ;;  %19980 = vst [vmem:[#allocation56_spill] sm:$0xff] %v18274_v34  ;;  %v18301_v1 = vld [vmem:[#allocation17 + $0x528] sm:$0xff]  ;;  %v18399_v18 = vrot.slane %v18157_v52, %v19952_v11 }
 0x683   : > { %19983 = vst [vmem:[#allocation46_spill] sm:$0xff] %v18281_v55  ;;  %19984 = vst [vmem:[#allocation45_spill] sm:$0xff] %v18285_v14  ;;  %v18303_v14 = vld [vmem:[#allocation17 + $0x540] sm:$0xff]  ;;  %v18331_v34 = vld [vmem:[#allocation17 + $0x588] sm:$0xff] }
 0x684   : > { %19986 = vst [vmem:[#allocation66_spill] sm:$0xff] %v18291_v49  ;;  %19987 = vst [vmem:[#allocation41_spill] sm:$0xff] %v18301_v1  ;;  %v18315_v49 = vld [vmem:[#allocation17 + $0x548] sm:$0xff] }
 0x685   : > { %19988 = vst [vmem:[#allocation34_spill] sm:$0xff] %v18303_v14  ;;  %19989 = vst [vmem:[#allocation68_spill] sm:$0xff] %v18305_v9  ;;  %v18371_v41 = vld [vmem:[#allocation17 + $0x608] sm:$0xff] }
 0x686   : > { %19990 = vst [vmem:[#allocation35_spill] sm:$0xff] %v18315_v49  ;;  %19994 = vst [vmem:[#allocation54_spill] sm:$0xff] %v18331_v34  ;;  %v18373_v63 = vld [vmem:[#allocation17 + $0x628] sm:$0xff] }
 0x687   : > { %19997 = vst [vmem:[#allocation82_spill] sm:$0xff] %v18343_v40  ;;  %20000 = vst [vmem:[#allocation85_spill] sm:$0xff] %v18359_v27  ;;  %v18427_v55 = vld [vmem:[#allocation17 + $0x668] sm:$0xff] }
 0x688   : > { %20003 = vst [vmem:[#allocation88_spill] sm:$0xff] %v18371_v41  ;;  %20004 = vst [vmem:[#allocation89_spill] sm:$0xff] %v18373_v63  ;;  %v9057_v26 = vld [vmem:[#allocation4 + $0x70] sm:$0x1] }
 0x689   : > { %20005 = vst [vmem:[#allocation90_spill] sm:$0xff] %v18377_v29  ;;  %20007 = vst [vmem:[#allocation92_spill] sm:$0xff] %v18389_v59 }
 0x68a   : > { %20008 = vst [vmem:[#allocation93_spill] sm:$0xff] %v18399_v18  ;;  %20010 = vst [vmem:[#allocation95_spill] sm:$0xff] %v18427_v55 }
 0x710   : > { %v8224_v0 = vpop.f32.mrb[32].mxu0 }
 0x711   : > { %v8341_v7 = vmul.f32 %v18113_v51, %v8224_v0  ;;  %v8226_v47 = vpop.f32.mrb[33].mxu0 }
 0x712   : > { %v8310_v49 = vpop.f32.mrb[36].mxu1  ;;  %v8342_v9 = vmul.f32 %v18146_v5, %v8226_v47  ;;  %v8228_v27 = vpop.f32.mrb[34].mxu0 }
 0x713   : > { %v8343_v40 = vmul.f32 %v18129_v4, %v8310_v49  ;;  %v8312_v28 = vpop.f32.mrb[37].mxu1  ;;  %v8371_v49 = vadd.f32 %v18126_v16, %v8341_v7  ;;  %v8345_v34 = vmul.f32 %v18113_v51, %v8228_v27  ;;  %v8230_v18 = vpop.f32.mrb[35].mxu0 }
 0x714   : > { %v8344_v12 = vmul.f32 %v18152_v2, %v8312_v28  ;;  %v8314_v22 = vpop.f32.mrb[38].mxu1  ;;  %v8372_v28 = vadd.f32 %v18149_v54, %v8342_v9  ;;  %v8346_v20 = vmul.f32 %v18146_v5, %v8230_v18 }
 0x715   : > { %v8373_v11 = vadd.f32 %v18132_v13, %v8343_v40  ;;  %v8347_v57 = vmul.f32 %v18129_v4, %v8314_v22  ;;  %v8316_v47 = vpop.f32.mrb[39].mxu1  ;;  %v8379_v63 = vmul.f32 0.2, %v8371_v49  ;;  %v8375_v7 = vadd.f32 %v18126_v16, %v8345_v34 }
 0x716   : > { %v8374_v50 = vadd.f32 %v18164_v42, %v8344_v12  ;;  %v8348_v52 = vmul.f32 %v18152_v2, %v8316_v47  ;;  %v8380_v41 = vmul.f32 0.2, %v8372_v28  ;;  %v8376_v22 = vadd.f32 %v18149_v54, %v8346_v20  ;;  %v18425_v47 = vld [vmem:[#allocation17 + $0x648] sm:$0xff] }
 0x717   : > { %v8381_v0 = vmul.f32 0.2, %v8373_v11  ;;  %v8377_v40 = vadd.f32 %v18132_v13, %v8347_v57  ;;  %v8387_v27 = vmax.f32 %v8371_v49, %v8379_v63  ;;  %v8383_v14 = vmul.f32 0.2, %v8375_v7  ;;  %20009 = vst [vmem:[#allocation94_spill] sm:$0xff] %v18425_v47 }
 0x718   : > { %v8382_v51 = vmul.f32 0.2, %v8374_v50  ;;  %v8378_v4 = vadd.f32 %v18164_v42, %v8348_v52  ;;  %v8388_v1 = vmax.f32 %v8372_v28, %v8380_v41  ;;  %v8384_v5 = vmul.f32 0.2, %v8376_v22  ;;  %v18431_v52 = vld [vmem:[#allocation17 + $0x6a0] sm:$0xff] }
 0x719   : > { %v8389_v9 = vmax.f32 %v8373_v11, %v8381_v0  ;;  %v8385_v12 = vmul.f32 0.2, %v8377_v40  ;;  %v8419_v34 = vrot.slane %v8387_v27, 3  ;;  %v8391_v13 = vmax.f32 %v8375_v7, %v8383_v14  ;;  %v18429_v11 = vld [vmem:[#allocation17 + $0x680] sm:$0xff]  ;;  %20012 = vst [vmem:[#allocation97_spill] sm:$0xff] %v18431_v52 }
 0x71a   : > { %v8390_v18 = vmax.f32 %v8374_v50, %v8382_v51  ;;  %v8386_v2 = vmul.f32 0.2, %v8378_v4  ;;  %v8420_v20 = vrot.slane %v8388_v1, 3  ;;  %v8392_v42 = vmax.f32 %v8376_v22, %v8384_v5  ;;  %20011 = vst [vmem:[#allocation96_spill] sm:$0xff] %v18429_v11 }
 0x71b   : > { %v8421_v16 = vrot.slane %v8389_v9, 3  ;;  %v8393_v57 = vmax.f32 %v8377_v40, %v8385_v12  ;;  %8443 = vst [vmem:[#allocation4] sm:$0xe0] %v8419_v34  ;;  %v8423_v41 = vrot.slane %v8391_v13, 3  ;;  %v18440_v7 = vmul.f32 %v18377_v29, %v9057_v26 }
 0x71c   : > { %v8422_v54 = vrot.slane %v8390_v18, 3  ;;  %v8394_v63 = vmax.f32 %v8378_v4, %v8386_v2  ;;  %8444 = vst [vmem:[#allocation4 + $0x8] sm:$0xe0] %v8420_v20  ;;  %v8425_v1 = vrot.slane %v8392_v42, 3 }
 0x71d   : > { %8445 = vst [vmem:[#allocation4 + $0x10] sm:$0xe0] %v8421_v16  ;;  %v8427_v50 = vrot.slane %v8393_v57, 3  ;;  %20013 = vst [vmem:[#allocation98_spill] sm:$0xff] %v18440_v7  ;;  %v18443_v40 = vsel %vm6506_vm14, %v8419_v34, %v8423_v41 }
 0x71e   : > { %8446 = vst [vmem:[#allocation4 + $0x18] sm:$0xe0] %v8422_v54  ;;  %v8429_v49 = vrot.slane %v8394_v63, 3  ;;  %8451 = vst [vmem:[#allocation4 + $0x40] sm:$0x1f] %v8423_v41  ;;  %v8426_v27 = vsel %vm6506_vm14, %v8420_v20, %v8425_v1  ;;  %v8467_v9 = vmul.f32 %v18443_v40, %v17389_v31  ;;  %v18459_v12 = vmul.f32 %v18198_v39, %v18443_v40 }
 0x71f   : > { %v8428_v51 = vsel %vm6506_vm14, %v8421_v16, %v8427_v50  ;;  %8453 = vst [vmem:[#allocation4 + $0x50] sm:$0x1f] %v8427_v50  ;;  %8447 = vst [vmem:[#allocation4 + $0x20] sm:$0xff] %v18443_v40  ;;  %v8468_v18 = vmul.f32 %v8426_v27, %v17389_v31  ;;  %v8545_v5 = vmul.f32 %v18170_v37, %v8426_v27 }
 0x720   : > { %8449 = vst [vmem:[#allocation4 + $0x30] sm:$0xff] %v8428_v51  ;;  %8452 = vst [vmem:[#allocation4 + $0x48] sm:$0x1f] %v8425_v1  ;;  %v18453_v26 = vsel %vm6506_vm14, %v8422_v54, %v8429_v49  ;;  %v8613_v2 = vmul.f32 %v8426_v27, %v17441_v46  ;;  %v8716_v34 = vmul.f32 %v8426_v27, %v17456_v30 }
 0x721   : > { %8454 = vst [vmem:[#allocation4 + $0x58] sm:$0x1f] %v8429_v49  ;;  %8448 = vst [vmem:[#allocation4 + $0x28] sm:$0xff] %v8426_v27  ;;  %v18467_v16 = vmul.f32 %v18183_v19, %v8426_v27  ;;  %v8910_v13 = vmul.f32 %v8426_v27, %v19932_v21  ;;  %v9005_v57 = vmul.f32 %v8426_v27, %v19888_v58  ;;  %v8568_v42 = vrot.slane %v8545_v5, 1 }
 0x722   : > { %8450 = vst [vmem:[#allocation4 + $0x38] sm:$0xff] %v18453_v26  ;;  %v18472_v20 = vmul.f32 %v18195_v32, %v8467_v9  ;;  %v8498_v54 = vmul.f32 %v18167_v36, %v8468_v18  ;;  %v8648_v63 = vmul.f32 %v18177_v44, %v8613_v2  ;;  %v18477_v41 = vmul.f32 %v18180_v25, %v8716_v34  ;;  %v8455_v51 = vld [vmem:[#allocation4] sm:$0xff]  ;;  %vm20025_vm14 = vmmov %vm19893_vm0 }
 0x723   : > { %v8865_v50 = vrot.slane %v18467_v16, 5  ;;  %v18481_v1 = vmul.f32 %v18187_v56, %v8910_v13  ;;  %v18484_v49 = vmul.f32 %v18191_v61, %v9005_v57  ;;  %v8509_v27 = vld [vmem:[#allocation4] sm:$0xfe]  ;;  %v8456_v22 = vld [vmem:[#allocation4 + $0x8] sm:$0xff]  ;;  %v8463_v2 = vmul.f32 %v8455_v51, %v19888_v58 }
 0x724   : > { %v8510_v18 = vld [vmem:[#allocation4 + $0x8] sm:$0xfe]  ;;  %v8671_v4 = vrot.slane %v8648_v63, 2  ;;  %v18489_v34 = vmul.f32 %v18198_v39, %v8509_v27  ;;  %v8612_v16 = vmul.f32 %v18443_v40, %v17441_v46  ;;  %v8464_v13 = vmul.f32 %v8456_v22, %v19888_v58 }
 0x725   : > { %v8601_v5 = vld [vmem:[#allocation4 + $0x8] sm:$0xfc]  ;;  %v8541_v57 = vmul.f32 %v18170_v37, %v8510_v18  ;;  %v8774_v0 = vrot.slane %v18477_v41, 4  ;;  %v18500_v55 = vmul.f32 %v18195_v32, %v8463_v2 }
 0x726   : > { %v8609_v14 = vmul.f32 %v8601_v5, %v17402_v38  ;;  %v8704_v28 = vld [vmem:[#allocation4 + $0x8] sm:$0xf0]  ;;  %v18503_v22 = vmul.f32 %v18202_v15, %v8612_v16  ;;  %v8494_v18 = vmul.f32 %v18167_v36, %v8464_v13 }
 0x727   : > { %v8807_v9 = vld [vmem:[#allocation4 + $0x8] sm:$0xe0]  ;;  %v8514_v52 = vld [vmem:[#allocation4 + $0x48] sm:$0x1]  ;;  %v8712_v51 = vmul.f32 %v8704_v28, %v17410_v48  ;;  %v8567_v47 = vrot.slane %v8541_v57, 1 }
 0x728   : > { %v8605_v63 = vld [vmem:[#allocation4 + $0x48] sm:$0x3]  ;;  %v8838_v27 = vmul.f32 %v18183_v19, %v8807_v9  ;;  %v8549_v5 = vmul.f32 %v18170_v37, %v8514_v52  ;;  %v8644_v43 = vmul.f32 %v18177_v44, %v8609_v14 }
 0x729   : > { %v8708_v11 = vld [vmem:[#allocation4 + $0x48] sm:$0xf]  ;;  %v8617_v41 = vmul.f32 %v8605_v63, %v19850_v62  ;;  %v8747_v9 = vmul.f32 %v18180_v25, %v8712_v51  ;;  %v8569_v2 = vsel %vm1855_vm4, %v8567_v47, %v8568_v42  ;;  %v8898_v63 = vld [vmem:[#allocation4 + $0x8] sm:$0xc0] }
 0x72a   : > { %v8811_v59 = vld [vmem:[#allocation4 + $0x48] sm:$0x1f]  ;;  %v8720_v28 = vmul.f32 %v8708_v11, %v17413_v10  ;;  %v8578_v16 = vrot.slane %v8549_v5, 1  ;;  %v8864_v36 = vrot.slane %v8838_v27, 5  ;;  %v8593_v13 = vadd.f32 %v8569_v2, %v8494_v18 }
 0x72b   : > { %v8846_v32 = vmul.f32 %v18183_v19, %v8811_v59  ;;  %v8652_v29 = vmul.f32 %v18177_v44, %v8617_v41  ;;  %v8670_v37 = vrot.slane %v8644_v43, 2  ;;  %v8773_v57 = vrot.slane %v8747_v9, 4  ;;  %v8902_v8 = vld [vmem:[#allocation4 + $0x48] sm:$0x3f] }
 0x72c   : > { %v8755_v52 = vmul.f32 %v18180_v25, %v8720_v28  ;;  %v8579_v14 = vsel %vm1855_vm4, %v8568_v42, %v8578_v16  ;;  %v8866_v11 = vsel %vm6984_vm15, %v8864_v36, %v8865_v50  ;;  %v9001_v27 = vld [vmem:[#allocation4 + $0x48] sm:$0xff]  ;;  %v8906_v42 = vmul.f32 %v8898_v63, %v17404_v35 }
 0x72d   : > { %v8681_v7 = vrot.slane %v8652_v29, 2  ;;  %v8875_v51 = vrot.slane %v8846_v32, 5  ;;  %v8597_v59 = vadd.f32 %v8579_v14, %v8498_v54  ;;  %v8672_v19 = vsel %vm2050_vm6, %v8670_v37, %v8671_v4  ;;  %v9052_v18 = vld [vmem:[#allocation4 + $0x28] sm:$0xfe]  ;;  %v8513_v37 = vld [vmem:[#allocation4 + $0x40] sm:$0x1] }
 0x72e   : > { %v8775_v47 = vsel %vm6827_vm8, %v8773_v57, %v8774_v0  ;;  %v8784_v44 = vrot.slane %v8755_v52, 4  ;;  %v8696_v25 = vadd.f32 %v8672_v19, %v8593_v13  ;;  %v9143_v29 = vld [vmem:[#allocation4 + $0x28] sm:$0xfc]  ;;  %v8914_v54 = vmul.f32 %v8902_v8, %v17400_v17 }
 0x72f   : > { %v8682_v43 = vsel %vm2050_vm6, %v8671_v4, %v8681_v7  ;;  %v8876_v5 = vsel %vm6984_vm15, %v8865_v50, %v8875_v51  ;;  %v8968_v9 = vrot.slane %v18481_v1, 6  ;;  %v8941_v2 = vmul.f32 %v18187_v56, %v8906_v42 }
 0x730   : > { %v8700_v41 = vadd.f32 %v8682_v43, %v8597_v59  ;;  %v8785_v28 = vsel %vm6827_vm8, %v8774_v0, %v8784_v44  ;;  %v8799_v32 = vadd.f32 %v8775_v47, %v8696_v25  ;;  %v9009_v16 = vmul.f32 %v9001_v27, %v17389_v31  ;;  %v8600_v47 = vld [vmem:[#allocation4] sm:$0xfc]  ;;  %v8604_v25 = vld [vmem:[#allocation4 + $0x40] sm:$0x3] }
 0x731   : > { %v9083_v7 = vmul.f32 %v18094_v23, %v9052_v18  ;;  %v8949_v50 = vmul.f32 %v18187_v56, %v8914_v54  ;;  %v9087_v36 = vmul.f32 %v18094_v23, %v9001_v27  ;;  %v9151_v13 = vmul.f32 %v9143_v29, %v17402_v38 }
 0x732   : > { %v8803_v4 = vadd.f32 %v8785_v28, %v8700_v41  ;;  %v8890_v0 = vadd.f32 %v8866_v11, %v8799_v32  ;;  %v8967_v52 = vrot.slane %v8941_v2, 6  ;;  %v9040_v8 = vmul.f32 %v18191_v61, %v9009_v16 }
 0x733   : > { %v9109_v1 = vrot.slane %v9083_v7, 1  ;;  %v8978_v63 = vrot.slane %v8949_v50, 6  ;;  %v9110_v14 = vrot.slane %v9087_v36, 1  ;;  %v9155_v51 = vmul.f32 %v9001_v27, %v17441_v46  ;;  %v8707_v36 = vld [vmem:[#allocation4 + $0x40] sm:$0xf] }
 0x734   : > { %v8894_v57 = vadd.f32 %v8876_v5, %v8803_v4  ;;  %v8969_v59 = vsel %vm20014_vm1, %v8967_v52, %v8968_v9  ;;  %v9186_v19 = vmul.f32 %v18067_v3, %v9151_v13  ;;  %v8548_v56 = vmul.f32 %v18198_v39, %v8513_v37  ;;  %v8806_v13 = vld [vmem:[#allocation4] sm:$0xe0] }
 0x735   : > { %v8564_v23 = vrot.slane %v18489_v34, 1  ;;  %v8979_v11 = vsel %vm20015_vm5, %v8968_v9, %v8978_v63  ;;  %v8993_v44 = vadd.f32 %v8969_v59, %v8890_v0  ;;  %v9111_v61 = vsel %vm1855_vm4, %v9109_v1, %v9110_v14  ;;  %v8703_v34 = vld [vmem:[#allocation4] sm:$0xf0] }
 0x736   : > { %v20016_v18 = vrot.slane %v18143_v45, 1  ;;  %v8997_v27 = vadd.f32 %v8979_v11, %v8894_v57  ;;  %v9190_v5 = vmul.f32 %v18067_v3, %v9155_v51  ;;  %v9212_v42 = vrot.slane %v9186_v19, 2  ;;  %v8810_v59 = vld [vmem:[#allocation4 + $0x40] sm:$0x1f] }
 0x737   : > { %v20017_v29 = vrot.slane %v18459_v12, 1  ;;  %v9044_v41 = vadd.f32 %v18484_v49, %v8993_v44  ;;  %v8576_v28 = vrot.slane %v8548_v56, 1  ;;  %v8608_v9 = vmul.f32 %v8600_v47, %v17402_v38  ;;  %v20020_v19 = vld [vmem:[#allocation59_spill] sm:$0xff] }
 0x738   : > { %v9121_v43 = vsel %vm1855_vm4, %v9110_v14, %v20016_v18  ;;  %v9048_v45 = vadd.f32 %v9040_v8, %v8997_v27  ;;  %v9213_v32 = vrot.slane %v9190_v5, 2  ;;  %v8616_v2 = vmul.f32 %v8604_v25, %v19850_v62  ;;  %v8897_v47 = vld [vmem:[#allocation4] sm:$0xc0] }
 0x739   : > { %v8566_v39 = vsel %vm1855_vm4, %v8564_v23, %v20017_v29  ;;  %v8668_v16 = vrot.slane %v18503_v22, 2  ;;  %v9135_v3 = vadd.f32 %v9111_v61, %v9044_v41  ;;  %v20018_v7 = vmov %v20017_v29 }
 0x73a   : > { %v8592_v54 = vadd.f32 %v8566_v39, %v18500_v55  ;;  %v8577_v4 = vsel %vm1855_vm4, %v20018_v7, %v8576_v28  ;;  %v8643_v50 = vmul.f32 %v18202_v15, %v8608_v9  ;;  %v8711_v49 = vmul.f32 %v8703_v34, %v17410_v48 }
 0x73b   : > { %v9139_v55 = vadd.f32 %v9121_v43, %v9048_v45  ;;  %v9214_v37 = vsel %vm2050_vm6, %v9212_v42, %v9213_v32  ;;  %v20019_v0 = vrot.slane %v18079_v33, 2  ;;  %v8596_v22 = vadd.f32 %v8577_v4, %v18472_v20  ;;  %v8901_v43 = vld [vmem:[#allocation4 + $0x40] sm:$0x3f] }
 0x73c   : > { %v9238_v8 = vadd.f32 %v9214_v37, %v9135_v3  ;;  %v8651_v12 = vmul.f32 %v18202_v15, %v8616_v2  ;;  %v8667_v1 = vrot.slane %v8643_v50, 2  ;;  %v8715_v57 = vmul.f32 %v18443_v40, %v17456_v30  ;;  %v9000_v45 = vld [vmem:[#allocation4 + $0x40] sm:$0xff]  ;;  %v20021_v3 = vld [vmem:[#allocation38_spill] sm:$0xff] }
 0x73d   : > { %v9224_v52 = vsel %vm2050_vm6, %v9213_v32, %v20019_v0  ;;  %v8719_v14 = vmul.f32 %v8707_v36, %v17413_v10  ;;  %v8746_v51 = vmul.f32 %v18205_v60, %v8711_v49  ;;  %v8837_v56 = vmul.f32 %v20020_v19, %v8806_v13  ;;  %v9051_v4 = vld [vmem:[#allocation4 + $0x20] sm:$0xfe] }
 0x73e   : > { %v9242_v63 = vadd.f32 %v9224_v52, %v9139_v55  ;;  %v8669_v33 = vsel %vm2050_vm6, %v8667_v1, %v8668_v16  ;;  %v8679_v23 = vrot.slane %v8651_v12, 2  ;;  %v8750_v20 = vmul.f32 %v18205_v60, %v8715_v57  ;;  %v9142_v55 = vld [vmem:[#allocation4 + $0x20] sm:$0xfc]  ;;  %v20022_v57 = vld [vmem:[#allocation49_spill] sm:$0xff] }
 0x73f   : > { %v8841_v15 = vmul.f32 %v20020_v19, %v18443_v40  ;;  %v8695_v44 = vadd.f32 %v8669_v33, %v8592_v54  ;;  %v8754_v61 = vmul.f32 %v18205_v60, %v8719_v14  ;;  %v8770_v18 = vrot.slane %v8746_v51, 4  ;;  %v20023_v14 = vld [vmem:[#allocation76_spill] sm:$0xff]  ;;  %v8458_v33 = vld [vmem:[#allocation4 + $0x18] sm:$0xff] }
 0x740   : > { %v18571_v11 = vpack.c.bf16 %v9242_v63, %v9238_v8  ;;  %v8680_v25 = vsel %vm2050_vm6, %v8668_v16, %v8679_v23  ;;  %v8771_v27 = vrot.slane %v8750_v20, 4  ;;  %v8845_v5 = vmul.f32 %v20020_v19, %v8810_v59  ;;  %v8512_v23 = vld [vmem:[#allocation4 + $0x18] sm:$0xfe] }
 0x741   : > { %v8861_v42 = vrot.slane %v8837_v56, 5  ;;  %v8699_v29 = vadd.f32 %v8680_v25, %v8596_v22  ;;  %v8782_v39 = vrot.slane %v8754_v61, 4  ;;  %v8862_v34 = vrot.slane %v8841_v15, 5 }
 0x742   : > { %10817 = vmatprep.mubr.bf16.mxu0 %v18571_v11  ;;  %10903 = vmatprep.mubr.bf16.mxu1 %v18571_v11  ;;  %v8905_v41 = vmul.f32 %v8897_v47, %v17404_v35  ;;  %v8772_v28 = vsel %vm6827_vm8, %v8770_v18, %v8771_v27  ;;  %v8873_v60 = vrot.slane %v8845_v5, 5  ;;  %v8909_v54 = vmul.f32 %v18443_v40, %v19932_v21 }
 0x743   : > { %v8913_v9 = vmul.f32 %v8901_v43, %v17400_v17  ;;  %v8783_v32 = vsel %vm6827_vm8, %v8771_v27, %v8782_v39  ;;  %v8798_v2 = vadd.f32 %v8772_v28, %v8695_v44  ;;  %v8863_v16 = vsel %vm6984_vm15, %v8861_v42, %v8862_v34  ;;  %v20026_v43 = vld [vmem:[#allocation33_spill] sm:$0xff] }
 0x744   : > { %v8940_v7 = vmul.f32 %v20021_v3, %v8905_v41  ;;  %v8802_v50 = vadd.f32 %v8783_v32, %v8699_v29  ;;  %v8874_v36 = vsel %vm6984_vm15, %v8862_v34, %v8873_v60  ;;  %v8944_v49 = vmul.f32 %v20021_v3, %v8909_v54  ;;  %v8516_v29 = vld [vmem:[#allocation4 + $0x58] sm:$0x1]  ;;  %v20027_v39 = vld [vmem:[#allocation29_spill] sm:$0xff]  ;;  %v20028_v54 = vld [vmem:[#allocation72_spill] sm:$0xff] }
 0x745   : > { %v8948_v13 = vmul.f32 %v20021_v3, %v8913_v9  ;;  %v8889_v37 = vadd.f32 %v8863_v16, %v8798_v2  ;;  %v9004_v52 = vmul.f32 %v18443_v40, %v19888_v58  ;;  %v9008_v22 = vmul.f32 %v9000_v45, %v17389_v31  ;;  %v8603_v32 = vld [vmem:[#allocation4 + $0x18] sm:$0xfc]  ;;  %v20030_v3 = vld [vmem:[#allocation52_spill] sm:$0xff] }
 0x746   : > { %v8964_v0 = vrot.slane %v8940_v7, 6  ;;  %v8893_v8 = vadd.f32 %v8874_v36, %v8802_v50  ;;  %v8965_v12 = vrot.slane %v8944_v49, 6  ;;  %v9082_v63 = vmul.f32 %v20022_v57, %v9051_v4 }
 0x747   : > { %v8976_v1 = vrot.slane %v8948_v13, 6  ;;  %v9035_v51 = vmul.f32 %v20023_v14, %v9004_v52  ;;  %v9039_v59 = vmul.f32 %v20023_v14, %v9008_v22  ;;  %v9086_v19 = vmul.f32 %v20022_v57, %v9000_v45  ;;  %v20031_v52 = vld [vmem:[#allocation74_spill] sm:$0xff] }
 0x748   : > { %v9150_v56 = vmul.f32 %v9142_v55, %v17402_v38  ;;  %v8966_v20 = vsel %vm20024_vm12, %v8964_v0, %v8965_v12  ;;  %v9106_v15 = vrot.slane %v9082_v63, 1  ;;  %v9154_v47 = vmul.f32 %v9000_v45, %v17441_v46  ;;  %v8607_v55 = vld [vmem:[#allocation4 + $0x58] sm:$0x3] }
 0x749   : > { %v8977_v40 = vsel %vm20025_vm14, %v8965_v12, %v8976_v1  ;;  %v8992_v44 = vadd.f32 %v8966_v20, %v8889_v37  ;;  %v9107_v18 = vrot.slane %v9086_v19, 1  ;;  %v8466_v5 = vmul.f32 %v8458_v33, %v19888_v58  ;;  %v8706_v37 = vld [vmem:[#allocation4 + $0x18] sm:$0xf0] }
 0x74a   : > { %v8996_v61 = vadd.f32 %v8977_v40, %v8893_v8  ;;  %v9185_v25 = vmul.f32 %v20026_v43, %v9150_v56  ;;  %v9189_v27 = vmul.f32 %v20026_v43, %v9154_v47  ;;  %v8470_v42 = vmul.f32 %v18453_v26, %v17389_v31  ;;  %v20033_v56 = vld [vmem:[#allocation77_spill] sm:$0xff] }
 0x74b   : > { %v8543_v34 = vmul.f32 %v20027_v39, %v8512_v23  ;;  %v9043_v41 = vadd.f32 %v9035_v51, %v8992_v44  ;;  %v9108_v60 = vsel %vm1855_vm4, %v9106_v15, %v9107_v18  ;;  %v20029_v9 = vrot.slane %v20028_v54, 1  ;;  %v8710_v23 = vld [vmem:[#allocation4 + $0x58] sm:$0xf] }
 0x74c   : > { %v9047_v28 = vadd.f32 %v9039_v59, %v8996_v61  ;;  %v9209_v2 = vrot.slane %v9185_v25, 2  ;;  %v9210_v16 = vrot.slane %v9189_v27, 2  ;;  %v8496_v7 = vmul.f32 %v20030_v3, %v8466_v5  ;;  %v8809_v61 = vld [vmem:[#allocation4 + $0x18] sm:$0xe0]  ;;  %v8813_v5 = vld [vmem:[#allocation4 + $0x58] sm:$0x1f] }
 0x74d   : > { %v9119_v45 = vsel %vm1855_vm4, %v9107_v18, %v20029_v9  ;;  %v8500_v4 = vmul.f32 %v20030_v3, %v8470_v42  ;;  %v9134_v50 = vadd.f32 %v9108_v60, %v9043_v41  ;;  %v8547_v49 = vmul.f32 %v20027_v39, %v18453_v26  ;;  %v20036_v60 = vld [vmem:[#allocation51_spill] sm:$0xff] }
 0x74e   : > { %v9138_v36 = vadd.f32 %v9119_v45, %v9047_v28  ;;  %v8551_v13 = vmul.f32 %v20027_v39, %v8516_v29  ;;  %v9211_v0 = vsel %vm2050_vm6, %v9209_v2, %v9210_v16  ;;  %v20032_v22 = vrot.slane %v20031_v52, 2  ;;  %v20034_v39 = vld [vmem:[#allocation36_spill] sm:$0xff]  ;;  %v20035_v28 = vld [vmem:[#allocation63_spill] sm:$0xff] }
 0x74f   : > { %v8573_v12 = vrot.slane %v8543_v34, 1  ;;  %v8611_v1 = vmul.f32 %v8603_v32, %v17402_v38  ;;  %v9237_v57 = vadd.f32 %v9211_v0, %v9134_v50  ;;  %v8574_v14 = vrot.slane %v8547_v49, 1  ;;  %v20038_v9 = vld [vmem:[#allocation75_spill] sm:$0xff]  ;;  %v20043_v0 = vld [vmem:[#allocation58_spill] sm:$0xff] }
 0x750   : > { %v9222_v8 = vsel %vm2050_vm6, %v9210_v16, %v20032_v22  ;;  %v8582_v51 = vrot.slane %v8551_v13, 1  ;;  %v8615_v59 = vmul.f32 %v18453_v26, %v17441_v46  ;;  %v8619_v19 = vmul.f32 %v8607_v55, %v19850_v62  ;;  %v20039_v45 = vld [vmem:[#allocation31_spill] sm:$0xff]  ;;  %v8900_v55 = vld [vmem:[#allocation4 + $0x18] sm:$0xc0] }
 0x751   : > { %v9241_v63 = vadd.f32 %v9222_v8, %v9138_v36  ;;  %v8646_v33 = vmul.f32 %v20033_v56, %v8611_v1  ;;  %v8714_v20 = vmul.f32 %v8706_v37, %v17410_v48  ;;  %v8575_v15 = vsel %vm1855_vm4, %v8573_v12, %v8574_v14  ;;  %v20041_v3 = vld [vmem:[#allocation79_spill] sm:$0xff] }
 0x752   : > { %v8583_v47 = vsel %vm1855_vm4, %v8574_v14, %v8582_v51  ;;  %v8718_v44 = vmul.f32 %v18453_v26, %v17456_v30  ;;  %v8595_v18 = vadd.f32 %v8575_v15, %v8496_v7  ;;  %v8650_v25 = vmul.f32 %v20033_v56, %v8615_v59 }
 0x753   : > { %v18625_v40 = vpack.c.bf16 %v9241_v63, %v9237_v57  ;;  %v8599_v43 = vadd.f32 %v8583_v47, %v8500_v4  ;;  %v8654_v27 = vmul.f32 %v20033_v56, %v8619_v19  ;;  %v8676_v42 = vrot.slane %v8646_v33, 2  ;;  %v8904_v57 = vld [vmem:[#allocation4 + $0x58] sm:$0x3f] }
 0x754   : > { %v8722_v29 = vmul.f32 %v8710_v23, %v17413_v10  ;;  %v8749_v34 = vmul.f32 %v20034_v39, %v8714_v20  ;;  %v8753_v41 = vmul.f32 %v20034_v39, %v8718_v44  ;;  %v20037_v54 = vcombine.low %v20035_v28, %v20036_v60  ;;  %v9003_v20 = vld [vmem:[#allocation4 + $0x58] sm:$0xff]  ;;  %v20052_v28 = vld [vmem:[#allocation55_spill] sm:$0xff] }
 0x755   : > { %10818 = vmatmul.mubr.bf16.vlgmr.msra.gmra.mrb[36].mxu0 %v18625_v40  ;;  %10904 = vmatmul.mubr.bf16.vlgmr.msra.gmra.mrb[40].mxu1 %v18625_v40  ;;  %v20040_v32 = vcombine.low %v20038_v9, %v20039_v45  ;;  %v8677_v2 = vrot.slane %v8650_v25, 2  ;;  %v8685_v16 = vrot.slane %v8654_v27, 2  ;;  %v8840_v7 = vmul.f32 %v20041_v3, %v8809_v61  ;;  %v9054_v25 = vld [vmem:[#allocation4 + $0x38] sm:$0xfe]  ;;  %v20047_v27 = vld [vmem:[#allocation65_spill] sm:$0xff]  ;;  %v20054_v45 = vld [vmem:[#allocation71_spill] sm:$0xff] }
 0x756   : > { %10829 = vmatpush1.bf16.msra.mxu0 %v20037_v54  ;;  %v8844_v4 = vmul.f32 %v20041_v3, %v18453_v26  ;;  %v8757_v50 = vmul.f32 %v20034_v39, %v8722_v29  ;;  %v8779_v36 = vrot.slane %v8749_v34, 4  ;;  %v8780_v49 = vrot.slane %v8753_v41, 4  ;;  %v9145_v34 = vld [vmem:[#allocation4 + $0x38] sm:$0xfc]  ;;  %v20051_v41 = vld [vmem:[#allocation47_spill] sm:$0xff] }
 0x757   : > { %10915 = vmatpush1.bf16.msra.mxu1 %v20040_v32  ;;  %v8848_v13 = vmul.f32 %v20041_v3, %v8813_v5  ;;  %v20042_v37 = vcombine.high %v18213_v24, %v18215_v6  ;;  %v20044_v52 = vcombine.high %v18217_v53, %v20043_v0  ;;  %v8678_v22 = vsel %vm2050_vm6, %v8676_v42, %v8677_v2  ;;  %v20048_v5 = vld [vmem:[#allocation50_spill] sm:$0xff] }
 0x758   : > { %v8686_v8 = vsel %vm2050_vm6, %v8677_v2, %v8685_v16  ;;  %v8870_v12 = vrot.slane %v8840_v7, 5  ;;  %v8871_v1 = vrot.slane %v8844_v4, 5  ;;  %v8698_v63 = vadd.f32 %v8678_v22, %v8595_v18  ;;  %v8457_v2 = vld [vmem:[#allocation4 + $0x10] sm:$0xff]  ;;  %v20055_v4 = vld [vmem:[#allocation43_spill] sm:$0xff]  ;;  %v20059_v22 = vld [vmem:[#allocation64_spill] sm:$0xff] }
 0x759   : > { %10830 = vmatprep.subr.bf16.mxu0 %v20042_v37  ;;  %10916 = vmatprep.subr.bf16.mxu1 %v20044_v52  ;;  %v8702_v14 = vadd.f32 %v8686_v8, %v8599_v43  ;;  %v8781_v51 = vsel %vm6827_vm8, %v8779_v36, %v8780_v49  ;;  %v8788_v59 = vrot.slane %v8757_v50, 4  ;;  %v8879_v56 = vrot.slane %v8848_v13, 5  ;;  %v20058_v52 = vld [vmem:[#allocation69_spill] sm:$0xff] }
 0x75a   : > { %v8872_v19 = vsel %vm6984_vm15, %v8870_v12, %v8871_v1  ;;  %v8908_v33 = vmul.f32 %v8900_v55, %v17404_v35  ;;  %v8912_v23 = vmul.f32 %v18453_v26, %v19932_v21  ;;  %v20045_v15 = vcombine.low %v18213_v24, %v18215_v6  ;;  %v20050_v6 = vld [vmem:[#allocation60_spill] sm:$0xff]  ;;  %v20061_v12 = vld [vmem:[#allocation73_spill] sm:$0xff] }
 0x75b   : > { %v20046_v47 = vcombine.low %v18217_v53, %v20043_v0  ;;  %v8789_v44 = vsel %vm6827_vm8, %v8780_v49, %v8788_v59  ;;  %v8801_v61 = vadd.f32 %v8781_v51, %v8698_v63  ;;  %v8916_v18 = vmul.f32 %v8904_v57, %v17400_v17  ;;  %v18700_v63 = vld [vmem:[#allocation4 + $0x30] sm:$0xff] }
 0x75c   : > { %10831 = vmatpush1.bf16.msra.mxu0 %v20045_v15  ;;  %v9007_v43 = vmul.f32 %v18453_v26, %v19888_v58  ;;  %v20049_v42 = vcombine.high %v20047_v27, %v20048_v5  ;;  %v8805_v29 = vadd.f32 %v8789_v44, %v8702_v14  ;;  %v8880_v24 = vsel %vm6984_vm15, %v8871_v1, %v8879_v56  ;;  %v20062_v1 = vld [vmem:[#allocation42_spill] sm:$0xff]  ;;  %v20066_v15 = vld [vmem:[#allocation44_spill] sm:$0xff] }
 0x75d   : > { %10917 = vmatpush1.bf16.msra.mxu1 %v20046_v47  ;;  %v8943_v39 = vmul.f32 %v20050_v6, %v8908_v33  ;;  %v8947_v53 = vmul.f32 %v20050_v6, %v8912_v23  ;;  %v20053_v60 = vcombine.high %v20051_v41, %v20052_v28  ;;  %v8892_v54 = vadd.f32 %v8872_v19, %v8801_v61 }
 0x75e   : > { %10832 = vmatprep.subr.bf16.mxu0 %v20049_v42  ;;  %v8951_v26 = vmul.f32 %v20050_v6, %v8916_v18  ;;  %v9011_v9 = vmul.f32 %v9003_v20, %v17389_v31  ;;  %v9038_v32 = vmul.f32 %v20054_v45, %v9007_v43  ;;  %v8896_v16 = vadd.f32 %v8880_v24, %v8805_v29  ;;  %v20067_v18 = vld [vmem:[#allocation48_spill] sm:$0xff]  ;;  %v8515_v42 = vld [vmem:[#allocation4 + $0x50] sm:$0x1]  ;;  %v20070_v6 = vld [vmem:[#allocation67_spill] sm:$0xff] }
 0x75f   : > { %10918 = vmatprep.subr.bf16.mxu1 %v20053_v60  ;;  %v8973_v3 = vrot.slane %v8943_v39, 6  ;;  %v8974_v7 = vrot.slane %v8947_v53, 6  ;;  %v9085_v50 = vmul.f32 %v20055_v4, %v9054_v25  ;;  %v20056_v36 = vcombine.low %v20047_v27, %v20048_v5  ;;  %v8511_v5 = vld [vmem:[#allocation4 + $0x10] sm:$0xfe] }
 0x760   : > { %v20057_v49 = vcombine.low %v20051_v41, %v20052_v28  ;;  %v8982_v13 = vrot.slane %v8951_v26, 6  ;;  %v9042_v55 = vmul.f32 %v20054_v45, %v9011_v9  ;;  %v9089_v37 = vmul.f32 %v20055_v4, %v9003_v20  ;;  %v20072_v41 = vld [vmem:[#allocation57_spill] sm:$0xff]  ;;  %v20073_v28 = vld [vmem:[#allocation62_spill] sm:$0xff]  ;;  %v20079_v4 = vld [vmem:[#allocation56_spill] sm:$0xff] }
 0x761   : > { %10833 = vmatpush1.bf16.msra.mxu0 %v20056_v36  ;;  %v9153_v0 = vmul.f32 %v9145_v34, %v17402_v38  ;;  %v20060_v8 = vcombine.high %v20058_v52, %v20059_v22  ;;  %v20063_v57 = vcombine.high %v20061_v12, %v20062_v1  ;;  %v8975_v14 = vsel %vm20064_vm2, %v8973_v3, %v8974_v7  ;;  %v20076_v26 = vld [vmem:[#allocation41_spill] sm:$0xff] }
 0x762   : > { %10919 = vmatpush1.bf16.msra.mxu1 %v20057_v49  ;;  %v9115_v51 = vrot.slane %v9085_v50, 1  ;;  %v9157_v59 = vmul.f32 %v9003_v20, %v17441_v46  ;;  %v8465_v19 = vmul.f32 %v8457_v2, %v19888_v58  ;;  %v8983_v56 = vsel %vm20065_vm3, %v8974_v7, %v8982_v13  ;;  %v8602_v13 = vld [vmem:[#allocation4 + $0x10] sm:$0xfc] }
 0x763   : > { %10834 = vmatprep.subr.bf16.mxu0 %v20060_v8  ;;  %10920 = vmatprep.subr.bf16.mxu1 %v20063_v57  ;;  %v8995_v33 = vadd.f32 %v8975_v14, %v8892_v54  ;;  %v9116_v23 = vrot.slane %v9089_v37, 1  ;;  %v9188_v47 = vmul.f32 %v20066_v15, %v9153_v0  ;;  %v8999_v44 = vadd.f32 %v8983_v56, %v8896_v16  ;;  %v20075_v54 = vld [vmem:[#allocation46_spill] sm:$0xff]  ;;  %v8606_v37 = vld [vmem:[#allocation4 + $0x50] sm:$0x3]  ;;  %v20083_v14 = vld [vmem:[#allocation68_spill] sm:$0xff] }
 0x764   : > { %v9192_v61 = vmul.f32 %v20066_v15, %v9157_v59  ;;  %v9227_v43 = vrot.slane %v20067_v18, 2  ;;  %v20068_v25 = vcombine.low %v20058_v52, %v20059_v22  ;;  %v20069_v20 = vcombine.low %v20061_v12, %v20062_v1  ;;  %v20078_v16 = vld [vmem:[#allocation30_spill] sm:$0xff]  ;;  %v8705_v12 = vld [vmem:[#allocation4 + $0x10] sm:$0xf0]  ;;  %v20085_v59 = vld [vmem:[#allocation35_spill] sm:$0xff] }
 0x765   : > { %v8469_v27 = vmul.f32 %v18700_v63, %v17389_v31  ;;  %v9046_v29 = vadd.f32 %v9038_v32, %v8995_v33  ;;  %v9117_v24 = vsel %vm1855_vm4, %v9115_v51, %v9116_v23  ;;  %v20071_v39 = vrot.slane %v20070_v6, 1  ;;  %v20082_v57 = vld [vmem:[#allocation34_spill] sm:$0xff] }
 0x766   : > { %10835 = vmatpush1.bf16.msra.mxu0 %v20068_v25  ;;  %10921 = vmatpush1.bf16.msra.mxu1 %v20069_v20  ;;  %v9218_v34 = vrot.slane %v9188_v47, 2  ;;  %v20074_v60 = vcombine.high %v20072_v41, %v20073_v28  ;;  %v20077_v9 = vcombine.high %v20075_v54, %v20076_v26  ;;  %v9050_v45 = vadd.f32 %v9042_v55, %v8999_v44  ;;  %v8709_v20 = vld [vmem:[#allocation4 + $0x50] sm:$0xf] }
 0x767   : > { %v9125_v53 = vsel %vm1855_vm4, %v9116_v23, %v20071_v39  ;;  %v9219_v2 = vrot.slane %v9192_v61, 2  ;;  %v8495_v3 = vmul.f32 %v20078_v16, %v8465_v19  ;;  %v8499_v32 = vmul.f32 %v20078_v16, %v8469_v27  ;;  %v20086_v19 = vld [vmem:[#allocation53_spill] sm:$0xff] }
 0x768   : > { %10836 = vmatprep.subr.bf16.mxu0 %v20074_v60  ;;  %10922 = vmatprep.subr.bf16.mxu1 %v20077_v9  ;;  %v9137_v7 = vadd.f32 %v9117_v24, %v9046_v29  ;;  %v8542_v50 = vmul.f32 %v20079_v4, %v8511_v5  ;;  %v8546_v36 = vmul.f32 %v20079_v4, %v18700_v63  ;;  %v8808_v39 = vld [vmem:[#allocation4 + $0x10] sm:$0xe0] }
 0x769   : > { %v8550_v49 = vmul.f32 %v20079_v4, %v8515_v42  ;;  %v9141_v0 = vadd.f32 %v9125_v53, %v9050_v45  ;;  %v9220_v52 = vsel %vm2050_vm6, %v9218_v34, %v9219_v2  ;;  %v9228_v55 = vsel %vm2050_vm6, %v9219_v2, %v9227_v43  ;;  %v20090_v53 = vld [vmem:[#allocation28_spill] sm:$0xff]  ;;  %v20091_v34 = vld [vmem:[#allocation61_spill] sm:$0xff]  ;;  %v20097_v2 = vld [vmem:[#allocation39_spill] sm:$0xff] }
 0x76a   : > { %v20080_v22 = vcombine.low %v20072_v41, %v20073_v28  ;;  %v20081_v8 = vcombine.low %v20075_v54, %v20076_v26  ;;  %v9240_v1 = vadd.f32 %v9220_v52, %v9137_v7  ;;  %v20084_v51 = vcombine.high %v20082_v57, %v20083_v14  ;;  %v20094_v28 = vld [vmem:[#allocation80_spill] sm:$0xff]  ;;  %v20096_v60 = vld [vmem:[#allocation45_spill] sm:$0xff] }
 0x76b   : > { %v20087_v56 = vcombine.high %v20085_v59, %v20086_v19  ;;  %v8570_v33 = vrot.slane %v8542_v50, 1  ;;  %v8571_v23 = vrot.slane %v8546_v36, 1  ;;  %v8580_v15 = vrot.slane %v8550_v49, 1  ;;  %v20098_v36 = vld [vmem:[#allocation66_spill] sm:$0xff] }
 0x76c   : > { %10837 = vmatpush1.bf16.msra.mxu0 %v20080_v22  ;;  %10923 = vmatpush1.bf16.msra.mxu1 %v20081_v8  ;;  %v9244_v47 = vadd.f32 %v9228_v55, %v9141_v0  ;;  %v8610_v44 = vmul.f32 %v8602_v13, %v17402_v38  ;;  %v8614_v61 = vmul.f32 %v18700_v63, %v17441_v46  ;;  %v8899_v22 = vld [vmem:[#allocation4 + $0x10] sm:$0xc0] }
 0x76d   : > { %10838 = vmatprep.subr.bf16.mxu0 %v20084_v51  ;;  %10924 = vmatprep.subr.bf16.mxu1 %v20087_v56  ;;  %v8618_v18 = vmul.f32 %v8606_v37, %v19850_v62  ;;  %v8572_v43 = vsel %vm1855_vm4, %v8570_v33, %v8571_v23  ;;  %v8581_v25 = vsel %vm1855_vm4, %v8571_v23, %v8580_v15  ;;  %v20101_v8 = vld [vmem:[#allocation81_spill] sm:$0xff] }
 0x76e   : > { %v8713_v27 = vmul.f32 %v8705_v12, %v17410_v48  ;;  %v8717_v5 = vmul.f32 %v18700_v63, %v17456_v30  ;;  %v18756_v42 = vpack.c.bf16 %v9244_v47, %v9240_v1  ;;  %v20088_v29 = vcombine.low %v20082_v57, %v20083_v14  ;;  %v20093_v48 = vld [vmem:[#allocation54_spill] sm:$0xff]  ;;  %v20104_v57 = vld [vmem:[#allocation83_spill] sm:$0xff]  ;;  %v20105_v14 = vld [vmem:[#allocation85_spill] sm:$0xff] }
 0x76f   : > { %v20089_v24 = vcombine.low %v20085_v59, %v20086_v19  ;;  %v8594_v62 = vadd.f32 %v8572_v43, %v8495_v3  ;;  %v8598_v6 = vadd.f32 %v8581_v25, %v8499_v32  ;;  %v20092_v41 = vcombine.high %v20090_v53, %v20091_v34  ;;  %v8812_v32 = vld [vmem:[#allocation4 + $0x50] sm:$0x1f]  ;;  %v20102_v12 = vld [vmem:[#allocation82_spill] sm:$0xff] }
 0x770   : > { %10839 = vmatpush1.bf16.msra.mxu0 %v20088_v29  ;;  %v20095_v30 = vcombine.high %v20093_v48, %v20094_v28  ;;  %v8645_v54 = vmul.f32 %v20096_v60, %v8610_v44  ;;  %v8649_v26 = vmul.f32 %v20096_v60, %v8614_v61  ;;  %v8653_v9 = vmul.f32 %v20096_v60, %v8618_v18  ;;  %v8903_v23 = vld [vmem:[#allocation4 + $0x50] sm:$0x3f] }
 0x771   : > { %10925 = vmatpush1.bf16.msra.mxu1 %v20089_v24  ;;  %10840 = vmatprep.subr.bf16.mxu0 %v20092_v41  ;;  %v8721_v45 = vmul.f32 %v8709_v20, %v17413_v10  ;;  %v8748_v16 = vmul.f32 %v20097_v2, %v8713_v27  ;;  %v8752_v3 = vmul.f32 %v20097_v2, %v8717_v5  ;;  %v20113_v41 = vld [vmem:[#allocation89_spill] sm:$0xff] }
 0x772   : > { %10926 = vmatprep.subr.bf16.mxu1 %v20095_v30  ;;  %10860 = vmatprep.mubr.bf16.mxu0 %v18756_v42  ;;  %v8673_v7 = vrot.slane %v8645_v54, 2  ;;  %v8674_v4 = vrot.slane %v8649_v26, 2  ;;  %v8683_v50 = vrot.slane %v8653_v9, 2  ;;  %v8839_v49 = vmul.f32 %v20098_v36, %v8808_v39  ;;  %v9053_v39 = vld [vmem:[#allocation4 + $0x30] sm:$0xfe]  ;;  %v20115_v54 = vld [vmem:[#allocation98_spill] sm:$0xff] }
 0x773   : > { %10946 = vmatprep.mubr.bf16.mxu1 %v18756_v42  ;;  %v20099_v13 = vcombine.low %v20090_v53, %v20091_v34  ;;  %v20100_v37 = vcombine.low %v20093_v48, %v20094_v28  ;;  %v8756_v10 = vmul.f32 %v20097_v2, %v8721_v45  ;;  %v8776_v0 = vrot.slane %v8748_v16, 4  ;;  %v20109_v53 = vld [vmem:[#allocation86_spill] sm:$0xff]  ;;  %v9458_v9 = vld [vmem:[#allocation17 + $0x688] sm:$0xff]  ;;  %v20116_v2 = vld [vmem:[#allocation84_spill] sm:$0xff] }
 0x774   : > { %v8777_v52 = vrot.slane %v8752_v3, 4  ;;  %v8843_v55 = vmul.f32 %v20098_v36, %v18700_v63  ;;  %v20103_v1 = vcombine.high %v20101_v8, %v20102_v12  ;;  %v20106_v51 = vcombine.high %v20104_v57, %v20105_v14  ;;  %v9462_v45 = vld [vmem:[#allocation17 + $0x6a8] sm:$0xff] }
 0x775   : > { %10841 = vmatpush1.bf16.msra.mxu0 %v20099_v13  ;;  %10927 = vmatpush1.bf16.msra.mxu1 %v20100_v37  ;;  %v8675_v59 = vsel %vm2050_vm6, %v8673_v7, %v8674_v4  ;;  %v8684_v19 = vsel %vm2050_vm6, %v8674_v4, %v8683_v50  ;;  %v8847_v56 = vmul.f32 %v20098_v36, %v8812_v32  ;;  %v8867_v33 = vrot.slane %v8839_v49, 5  ;;  %v9144_v7 = vld [vmem:[#allocation4 + $0x30] sm:$0xfc]  ;;  %v20117_v49 = vld [vmem:[#allocation90_spill] sm:$0xff] }
 0x776   : > { %10842 = vmatprep.subr.bf16.mxu0 %v20103_v1  ;;  %10928 = vmatprep.subr.bf16.mxu1 %v20106_v51  ;;  %v8697_v15 = vadd.f32 %v8675_v59, %v8594_v62  ;;  %v8701_v47 = vadd.f32 %v8684_v19, %v8598_v6  ;;  %v8778_v44 = vsel %vm6827_vm8, %v8776_v0, %v8777_v52  ;;  %v8786_v61 = vrot.slane %v8756_v10, 4  ;;  %v9002_v6 = vld [vmem:[#allocation4 + $0x50] sm:$0xff]  ;;  %v9469_v51 = vld [vmem:[#allocation17 + $0x6e0] sm:$0xff] }
 0x777   : > { %v8868_v18 = vrot.slane %v8843_v55, 5  ;;  %v8877_v43 = vrot.slane %v8847_v56, 5  ;;  %v8907_v25 = vmul.f32 %v8899_v22, %v17404_v35  ;;  %v8911_v20 = vmul.f32 %v18700_v63, %v19932_v21  ;;  %v20110_v35 = vld [vmem:[#allocation87_spill] sm:$0xff]  ;;  %v20112_v21 = vld [vmem:[#allocation88_spill] sm:$0xff]  ;;  %v20126_v59 = vld [vmem:[#allocation93_spill] sm:$0xff] }
 0x778   : > { %v20107_v27 = vcombine.low %v20101_v8, %v20102_v12  ;;  %v20108_v5 = vcombine.low %v20104_v57, %v20105_v14  ;;  %v8787_v29 = vsel %vm6827_vm8, %v8777_v52, %v8786_v61  ;;  %v8800_v24 = vadd.f32 %v8778_v44, %v8697_v15  ;;  %v20120_v8 = vld [vmem:[#allocation91_spill] sm:$0xff]  ;;  %v20121_v12 = vld [vmem:[#allocation92_spill] sm:$0xff]  ;;  %v9470_v15 = vld [vmem:[#allocation17 + $0x6e8] sm:$0xff] }
 0x779   : > { %v8915_v62 = vmul.f32 %v8903_v23, %v17400_v17  ;;  %v20111_v34 = vcombine.high %v20109_v53, %v20110_v35  ;;  %v20114_v48 = vcombine.high %v20112_v21, %v20113_v41  ;;  %v8804_v28 = vadd.f32 %v8787_v29, %v8701_v47  ;;  %v9465_v14 = vld [vmem:[#allocation17 + $0x6c0] sm:$0xff]  ;;  %v9466_v23 = vld [vmem:[#allocation17 + $0x6c8] sm:$0xff]  ;;  %vm20127_vm8 = vmmov %vm19893_vm0 }
 0x77a   : > { %10843 = vmatpush1.bf16.msra.mxu0 %v20107_v27  ;;  %10929 = vmatpush1.bf16.msra.mxu1 %v20108_v5  ;;  %v8869_v30 = vsel %vm6984_vm15, %v8867_v33, %v8868_v18  ;;  %v8878_v60 = vsel %vm6984_vm15, %v8868_v18, %v8877_v43  ;;  %v9122_v26 = vrot.slane %v20115_v54, 1  ;;  %v8942_v16 = vmul.f32 %v20116_v2, %v8907_v25  ;;  %vm20128_vm15 = vmmov %vm19893_vm0  ;;  %v20129_v27 = vld [vmem:[#allocation37_spill] sm:$0xff] }
 0x77b   : > { %10844 = vmatprep.subr.bf16.mxu0 %v20111_v34  ;;  %10930 = vmatprep.subr.bf16.mxu1 %v20114_v48  ;;  %v8891_v17 = vadd.f32 %v8869_v30, %v8800_v24  ;;  %v8946_v3 = vmul.f32 %v20116_v2, %v8911_v20  ;;  %v8950_v32 = vmul.f32 %v20116_v2, %v8915_v62  ;;  %v9473_v34 = vld [vmem:[#allocation17 + $0x700] sm:$0xff]  ;;  %v9474_v30 = vld [vmem:[#allocation17 + $0x708] sm:$0xff] }
 0x77c   : > { %v8895_v4 = vadd.f32 %v8878_v60, %v8804_v28  ;;  %v9006_v50 = vmul.f32 %v18700_v63, %v19888_v58  ;;  %v9010_v36 = vmul.f32 %v9002_v6, %v17389_v31  ;;  %v9084_v13 = vmul.f32 %v20117_v49, %v9053_v39  ;;  %v20123_v31 = vld [vmem:[#allocation94_spill] sm:$0xff]  ;;  %v20124_v63 = vld [vmem:[#allocation95_spill] sm:$0xff]  ;;  %v9478_v60 = vld [vmem:[#allocation17 + $0x728] sm:$0xff] }
 0x77d   : > { %v20118_v37 = vcombine.low %v20109_v53, %v20110_v35  ;;  %v20119_v10 = vcombine.low %v20112_v21, %v20113_v41  ;;  %v8970_v0 = vrot.slane %v8942_v16, 6  ;;  %v8971_v52 = vrot.slane %v8946_v3, 6  ;;  %v20132_v53 = vld [vmem:[#allocation96_spill] sm:$0xff] }
 0x77e   : > { %v8980_v55 = vrot.slane %v8950_v32, 6  ;;  %v9088_v22 = vmul.f32 %v20117_v49, %v9002_v6  ;;  %v20122_v58 = vcombine.high %v20120_v8, %v20121_v12  ;;  %v20125_v1 = vcombine.high %v20123_v31, %v20124_v63  ;;  %v9477_v21 = vld [vmem:[#allocation17 + $0x720] sm:$0xff] }
 0x77f   : > { %10845 = vmatpush1.bf16.msra.mxu0 %v20118_v37  ;;  %10931 = vmatpush1.bf16.msra.mxu1 %v20119_v10  ;;  %v12112_v57 = vcombine.high %v9458_v9, %v9462_v45  ;;  %v9037_v19 = vmul.f32 %v20126_v59, %v9006_v50  ;;  %v9112_v56 = vrot.slane %v9084_v13, 1  ;;  %v9152_v33 = vmul.f32 %v9144_v7, %v17402_v38  ;;  %v9481_v13 = vld [vmem:[#allocation17 + $0x740] sm:$0xff] }
 0x780   : > { %10846 = vmatprep.subr.bf16.mxu0 %v20122_v58  ;;  %10932 = vmatprep.subr.bf16.mxu1 %v20125_v1  ;;  %v8972_v47 = vsel %vm20127_vm8, %v8970_v0, %v8971_v52  ;;  %v8981_v44 = vsel %vm20128_vm15, %v8971_v52, %v8980_v55  ;;  %v9113_v61 = vrot.slane %v9088_v22, 1  ;;  %v9156_v18 = vmul.f32 %v9002_v6, %v17441_v46  ;;  %v20133_v46 = vld [vmem:[#allocation97_spill] sm:$0xff]  ;;  %v9485_v0 = vld [vmem:[#allocation17 + $0x760] sm:$0xff] }
 0x781   : > { %v8994_v43 = vadd.f32 %v8972_v47, %v8891_v17  ;;  %v8998_v25 = vadd.f32 %v8981_v44, %v8895_v4  ;;  %v9041_v20 = vmul.f32 %v20126_v59, %v9010_v36  ;;  %v9187_v5 = vmul.f32 %v20129_v27, %v9152_v33  ;;  %v20135_v17 = vld [vmem:[#allocation70_spill] sm:$0xff]  ;;  %v9482_v52 = vld [vmem:[#allocation17 + $0x748] sm:$0xff]  ;;  %v9493_v1 = vld [vmem:[#allocation17 + $0x7a0] sm:$0xff] }
 0x782   : > { %v20130_v29 = vcombine.low %v20120_v8, %v20121_v12  ;;  %v20131_v38 = vcombine.low %v20123_v31, %v20124_v63  ;;  %v12111_v24 = vcombine.low %v9458_v9, %v9462_v45  ;;  %v12118_v62 = vcombine.high %v9465_v14, %v9469_v51  ;;  %v9486_v55 = vld [vmem:[#allocation17 + $0x768] sm:$0xff]  ;;  %v9489_v63 = vld [vmem:[#allocation17 + $0x780] sm:$0xff] }
 0x783   : > { %v9191_v39 = vmul.f32 %v20129_v27, %v9156_v18  ;;  %v20134_v6 = vcombine.high %v20132_v53, %v20133_v46  ;;  %v12120_v35 = vcombine.high %v9466_v23, %v9470_v15  ;;  %v9045_v41 = vadd.f32 %v9037_v19, %v8994_v43  ;;  %v9497_v33 = vld [vmem:[#allocation17 + $0x7c0] sm:$0xff]  ;;  %v9502_v47 = vld [vmem:[#allocation17 + $0x7e8] sm:$0xff]  ;;  %v9252_v27 = vld [vmem:[#allocation17 + $0x18] sm:$0xff] }
 0x784   : > { %10847 = vmatpush1.bf16.msra.mxu0 %v20130_v29  ;;  %10933 = vmatpush1.bf16.msra.mxu1 %v20131_v38  ;;  %v9049_v48 = vadd.f32 %v9041_v20, %v8998_v25  ;;  %v9215_v28 = vrot.slane %v9187_v5, 2  ;;  %v9114_v54 = vsel %vm1855_vm4, %v9112_v56, %v9113_v61  ;;  %v9123_v9 = vsel %vm1855_vm4, %v9113_v61, %v9122_v26  ;;  %v9251_v25 = vld [vmem:[#allocation17 + $0x10] sm:$0xff]  ;;  %v9256_v5 = vld [vmem:[#allocation17 + $0x38] sm:$0xff] }
 0x785   : > { %10848 = vmatprep.subr.bf16.mxu0 %v20134_v6  ;;  %10934 = vmatprep.subr.bf16.mxu1 %v12112_v57  ;;  %v9216_v45 = vrot.slane %v9191_v39, 2  ;;  %v9225_v2 = vrot.slane %v20135_v17, 2  ;;  %v12117_v16 = vcombine.low %v9465_v14, %v9469_v51  ;;  %v12119_v3 = vcombine.low %v9466_v23, %v9470_v15  ;;  %v9490_v57 = vld [vmem:[#allocation17 + $0x788] sm:$0xff]  ;;  %v9501_v23 = vld [vmem:[#allocation17 + $0x7e0] sm:$0xff]  ;;  %v9255_v20 = vld [vmem:[#allocation17 + $0x30] sm:$0xff] }
 0x786   : > { %v9136_v32 = vadd.f32 %v9114_v54, %v9045_v41  ;;  %v9140_v7 = vadd.f32 %v9123_v9, %v9049_v48  ;;  %v20136_v4 = vcombine.low %v20132_v53, %v20133_v46  ;;  %v12126_v50 = vcombine.high %v9473_v34, %v9477_v21  ;;  %v9494_v14 = vld [vmem:[#allocation17 + $0x7a8] sm:$0xff]  ;;  %v9259_v39 = vld [vmem:[#allocation17 + $0x50] sm:$0xff]  ;;  %v9260_v46 = vld [vmem:[#allocation17 + $0x58] sm:$0xff] }
 0x787   : > { %v9217_v36 = vsel %vm2050_vm6, %v9215_v28, %v9216_v45  ;;  %v9226_v49 = vsel %vm2050_vm6, %v9216_v45, %v9225_v2  ;;  %v12128_v26 = vcombine.high %v9474_v30, %v9478_v60  ;;  %v12125_v8 = vcombine.low %v9473_v34, %v9477_v21  ;;  %v9498_v15 = vld [vmem:[#allocation17 + $0x7c8] sm:$0xff]  ;;  %v9263_v53 = vld [vmem:[#allocation17 + $0x70] sm:$0xff]  ;;  %v9264_v6 = vld [vmem:[#allocation17 + $0x78] sm:$0xff] }
 0x788   : > { %10849 = vmatpush1.bf16.msra.mxu0 %v20136_v4  ;;  %10935 = vmatpush1.bf16.msra.mxu1 %v12111_v24  ;;  %v9239_v37 = vadd.f32 %v9217_v36, %v9136_v32  ;;  %v9243_v10 = vadd.f32 %v9226_v49, %v9140_v7  ;;  %v12127_v12 = vcombine.low %v9474_v30, %v9478_v60  ;;  %v9267_v48 = vld [vmem:[#allocation17 + $0x90] sm:$0xff]  ;;  %v9268_v30 = vld [vmem:[#allocation17 + $0x98] sm:$0xff] }
 0x789   : > { %10850 = vmatprep.subr.bf16.mxu0 %v12118_v62  ;;  %10936 = vmatprep.subr.bf16.mxu1 %v12120_v35  ;;  %v12134_v58 = vcombine.high %v9481_v13, %v9485_v0  ;;  %v12136_v31 = vcombine.high %v9482_v52, %v9486_v55  ;;  %v12133_v51 = vcombine.low %v9481_v13, %v9485_v0  ;;  %v9271_v28 = vld [vmem:[#allocation17 + $0xb0] sm:$0xff]  ;;  %v9272_v60 = vld [vmem:[#allocation17 + $0xb8] sm:$0xff] }
 0x78a   : > { %v18863_v22 = vpack.c.bf16 %v9243_v10, %v9239_v37  ;;  %v12135_v59 = vcombine.low %v9482_v52, %v9486_v55  ;;  %v12142_v19 = vcombine.high %v9489_v63, %v9493_v1  ;;  %v12144_v56 = vcombine.high %v9490_v57, %v9494_v14  ;;  %v9275_v2 = vld [vmem:[#allocation17 + $0xd0] sm:$0xff]  ;;  %v9280_v32 = vld [vmem:[#allocation17 + $0xf8] sm:$0xff] }
 0x78b   : > { %v12141_v44 = vcombine.low %v9489_v63, %v9493_v1  ;;  %v12143_v61 = vcombine.low %v9490_v57, %v9494_v14  ;;  %v12150_v18 = vcombine.high %v9497_v33, %v9501_v23  ;;  %v12152_v43 = vcombine.high %v9498_v15, %v9502_v47  ;;  %v9283_v49 = vld [vmem:[#allocation17 + $0x110] sm:$0xff]  ;;  %v9288_v13 = vld [vmem:[#allocation17 + $0x138] sm:$0xff] }
 0x78c   : > { %10851 = vmatpush1.bf16.msra.mxu0 %v12117_v16  ;;  %10937 = vmatpush1.bf16.msra.mxu1 %v12119_v3  ;;  %v12149_v29 = vcombine.low %v9497_v33, %v9501_v23  ;;  %v12151_v38 = vcombine.low %v9498_v15, %v9502_v47  ;;  %v11906_v24 = vcombine.high %v9251_v25, %v9255_v20  ;;  %v9279_v16 = vld [vmem:[#allocation17 + $0xf0] sm:$0xff]  ;;  %v9276_v3 = vld [vmem:[#allocation17 + $0xd8] sm:$0xff] }
 0x78d   : > { %10852 = vmatprep.subr.bf16.mxu0 %v12126_v50  ;;  %10938 = vmatprep.subr.bf16.mxu1 %v12128_v26  ;;  %v11908_v62 = vcombine.high %v9252_v27, %v9256_v5  ;;  %v11905_v35 = vcombine.low %v9251_v25, %v9255_v20  ;;  %v11907_v34 = vcombine.low %v9252_v27, %v9256_v5  ;;  %v9287_v26 = vld [vmem:[#allocation17 + $0x130] sm:$0xff] }
 0x78e   : > { %v11914_v21 = vcombine.high %v9259_v39, %v9263_v53  ;;  %v11916_v41 = vcombine.high %v9260_v46, %v9264_v6  ;;  %v11913_v54 = vcombine.low %v9259_v39, %v9263_v53  ;;  %v11915_v9 = vcombine.low %v9260_v46, %v9264_v6  ;;  %v9291_v55 = vld [vmem:[#allocation17 + $0x150] sm:$0xff] }
 0x78f   : > { %v11922_v45 = vcombine.high %v9267_v48, %v9271_v28  ;;  %v11924_v17 = vcombine.high %v9268_v30, %v9272_v60  ;;  %v11921_v7 = vcombine.low %v9267_v48, %v9271_v28  ;;  %v11923_v4 = vcombine.low %v9268_v30, %v9272_v60  ;;  %v9299_v14 = vld [vmem:[#allocation17 + $0x190] sm:$0xff] }
 0x790   : > { %10853 = vmatpush1.bf16.msra.mxu0 %v12125_v8  ;;  %10939 = vmatpush1.bf16.msra.mxu1 %v12127_v12  ;;  %v11930_v50 = vcombine.high %v9275_v2, %v9279_v16  ;;  %v11932_v36 = vcombine.high %v9276_v3, %v9280_v32  ;;  %v11929_v37 = vcombine.low %v9275_v2, %v9279_v16  ;;  %v9295_v8 = vld [vmem:[#allocation17 + $0x170] sm:$0xff]  ;;  %v9292_v12 = vld [vmem:[#allocation17 + $0x158] sm:$0xff] }
 0x791   : > { %10854 = vmatprep.subr.bf16.mxu0 %v12134_v58  ;;  %10940 = vmatprep.subr.bf16.mxu1 %v12136_v31  ;;  %v11931_v10 = vcombine.low %v9276_v3, %v9280_v32  ;;  %v11938_v0 = vcombine.high %v9283_v49, %v9287_v26  ;;  %v9296_v58 = vld [vmem:[#allocation17 + $0x178] sm:$0xff]  ;;  %v11937_v31 = vcombine.low %v9283_v49, %v9287_v26  ;;  %v9307_v47 = vld [vmem:[#allocation17 + $0x1d0] sm:$0xff] }
 0x792   : > { %v11946_v1 = vcombine.high %v9291_v55, %v9295_v8  ;;  %v11948_v57 = vcombine.high %v9292_v12, %v9296_v58  ;;  %v11947_v33 = vcombine.low %v9292_v12, %v9296_v58  ;;  %v9315_v5 = vld [vmem:[#allocation17 + $0x210] sm:$0xff] }
 0x793   : > { %v9323_v6 = vld [vmem:[#allocation17 + $0x250] sm:$0xff] }
 0x794   : > { %10855 = vmatpush1.bf16.msra.mxu0 %v12133_v51  ;;  %10941 = vmatpush1.bf16.msra.mxu1 %v12135_v59  ;;  %v9303_v51 = vld [vmem:[#allocation17 + $0x1b0] sm:$0xff]  ;;  %v9300_v59 = vld [vmem:[#allocation17 + $0x198] sm:$0xff] }
 0x795   : > { %10856 = vmatprep.subr.bf16.mxu0 %v12142_v19  ;;  %10942 = vmatprep.subr.bf16.mxu1 %v12144_v56  ;;  %v9304_v19 = vld [vmem:[#allocation17 + $0x1b8] sm:$0xff]  ;;  %v11945_v56 = vcombine.low %v9291_v55, %v9295_v8  ;;  %v11954_v23 = vcombine.high %v9299_v14, %v9303_v51  ;;  %v9331_v60 = vld [vmem:[#allocation17 + $0x290] sm:$0xff] }
 0x796   : > { %v11956_v15 = vcombine.high %v9300_v59, %v9304_v19  ;;  %v11955_v25 = vcombine.low %v9300_v59, %v9304_v19  ;;  %v9339_v32 = vld [vmem:[#allocation17 + $0x2d0] sm:$0xff] }
 0x797   : > { %v9355_v58 = vld [vmem:[#allocation17 + $0x350] sm:$0xff] }
 0x798   : > { %10857 = vmatpush1.bf16.msra.mxu0 %v12141_v44  ;;  %10943 = vmatpush1.bf16.msra.mxu1 %v12143_v61  ;;  %v9311_v44 = vld [vmem:[#allocation17 + $0x1f0] sm:$0xff]  ;;  %v9308_v61 = vld [vmem:[#allocation17 + $0x1d8] sm:$0xff] }
 0x799   : > { %10858 = vmatprep.subr.bf16.mxu0 %v12150_v18  ;;  %10944 = vmatprep.subr.bf16.mxu1 %v12152_v43  ;;  %v9312_v18 = vld [vmem:[#allocation17 + $0x1f8] sm:$0xff]  ;;  %v11953_v43 = vcombine.low %v9299_v14, %v9303_v51  ;;  %v11962_v20 = vcombine.high %v9307_v47, %v9311_v44  ;;  %v9363_v19 = vld [vmem:[#allocation17 + $0x390] sm:$0xff] }
 0x79a   : > { %v11964_v27 = vcombine.high %v9308_v61, %v9312_v18  ;;  %v11963_v39 = vcombine.low %v9308_v61, %v9312_v18  ;;  %v9371_v18 = vld [vmem:[#allocation17 + $0x3d0] sm:$0xff] }
 0x79c   : > { %10859 = vmatpush1.bf16.msra.mxu0 %v12149_v29  ;;  %10945 = vmatpush1.bf16.msra.mxu1 %v12151_v38  ;;  %v9319_v29 = vld [vmem:[#allocation17 + $0x230] sm:$0xff]  ;;  %v9316_v38 = vld [vmem:[#allocation17 + $0x218] sm:$0xff] }
 0x79d   : > { %10957 = vmatprep.subr.bf16.mxu0 %v11906_v24  ;;  %11043 = vmatprep.subr.bf16.mxu1 %v11908_v62  ;;  %v9320_v24 = vld [vmem:[#allocation17 + $0x238] sm:$0xff]  ;;  %v11961_v62 = vcombine.low %v9307_v47, %v9311_v44  ;;  %v11970_v53 = vcombine.high %v9315_v5, %v9319_v29 }
 0x79e   : > { %v11972_v46 = vcombine.high %v9316_v38, %v9320_v24  ;;  %v11971_v48 = vcombine.low %v9316_v38, %v9320_v24  ;;  %v9379_v24 = vld [vmem:[#allocation17 + $0x410] sm:$0xff] }
 0x79f   : > { %10861 = vmatmul.mubr.bf16.vlgmr.msra.gmra.mrb[36].mxu0 %v18863_v22  ;;  %10947 = vmatmul.mubr.bf16.vlgmr.msra.gmra.mrb[40].mxu1 %v18863_v22 }
 0x7a0   : > { %10958 = vmatpush1.bf16.msra.mxu0 %v11905_v35  ;;  %10989 = vmatprep.mubr.bf16.mxu0 %v18571_v11  ;;  %v9327_v35 = vld [vmem:[#allocation17 + $0x270] sm:$0xff] }
 0x7a1   : > { %11044 = vmatpush1.bf16.msra.mxu1 %v11907_v34  ;;  %11075 = vmatprep.mubr.bf16.mxu1 %v18571_v11  ;;  %v9284_v11 = vld [vmem:[#allocation17 + $0x118] sm:$0xff]  ;;  %v11978_v28 = vcombine.high %v9323_v6, %v9327_v35 }
 0x7a2   : > { %10959 = vmatprep.subr.bf16.mxu0 %v11914_v21  ;;  %11045 = vmatprep.subr.bf16.mxu1 %v11916_v41  ;;  %v11940_v52 = vcombine.high %v9284_v11, %v9288_v13  ;;  %v11939_v63 = vcombine.low %v9284_v11, %v9288_v13  ;;  %v9324_v34 = vld [vmem:[#allocation17 + $0x258] sm:$0xff]  ;;  %v11969_v41 = vcombine.low %v9315_v5, %v9319_v29  ;;  %v9347_v13 = vld [vmem:[#allocation17 + $0x310] sm:$0xff] }
 0x7a3   : > { %v9328_v21 = vld [vmem:[#allocation17 + $0x278] sm:$0xff] }
 0x7a4   : > { %10960 = vmatpush1.bf16.msra.mxu0 %v11913_v54  ;;  %v11980_v30 = vcombine.high %v9324_v34, %v9328_v21  ;;  %v9335_v54 = vld [vmem:[#allocation17 + $0x2b0] sm:$0xff]  ;;  %v11979_v2 = vcombine.low %v9324_v34, %v9328_v21 }
 0x7a5   : > { %11046 = vmatpush1.bf16.msra.mxu1 %v11915_v9  ;;  %10961 = vmatprep.subr.bf16.mxu0 %v11922_v45  ;;  %v9332_v9 = vld [vmem:[#allocation17 + $0x298] sm:$0xff]  ;;  %v11986_v16 = vcombine.high %v9331_v60, %v9335_v54  ;;  %v9387_v21 = vld [vmem:[#allocation17 + $0x450] sm:$0xff] }
 0x7a6   : > { %11047 = vmatprep.subr.bf16.mxu1 %v11924_v17  ;;  %v9336_v45 = vld [vmem:[#allocation17 + $0x2b8] sm:$0xff]  ;;  %v11977_v17 = vcombine.low %v9323_v6, %v9327_v35 }
 0x7a7   : > { %v11988_v3 = vcombine.high %v9332_v9, %v9336_v45  ;;  %v11987_v49 = vcombine.low %v9332_v9, %v9336_v45  ;;  %v9395_v9 = vld [vmem:[#allocation17 + $0x490] sm:$0xff] }
 0x7a8   : > { %10962 = vmatpush1.bf16.msra.mxu0 %v11921_v7  ;;  %v9343_v7 = vld [vmem:[#allocation17 + $0x2f0] sm:$0xff] }
 0x7a9   : > { %11048 = vmatpush1.bf16.msra.mxu1 %v11923_v4  ;;  %10963 = vmatprep.subr.bf16.mxu0 %v11930_v50  ;;  %v9340_v4 = vld [vmem:[#allocation17 + $0x2d8] sm:$0xff]  ;;  %v11994_v26 = vcombine.high %v9339_v32, %v9343_v7  ;;  %v9399_v45 = vld [vmem:[#allocation17 + $0x4b0] sm:$0xff] }
 0x7aa   : > { %11049 = vmatprep.subr.bf16.mxu1 %v11932_v36  ;;  %v9344_v50 = vld [vmem:[#allocation17 + $0x2f8] sm:$0xff]  ;;  %v11985_v36 = vcombine.low %v9331_v60, %v9335_v54 }
 0x7ab   : > { %v11996_v11 = vcombine.high %v9340_v4, %v9344_v50  ;;  %v11995_v55 = vcombine.low %v9340_v4, %v9344_v50  ;;  %v9403_v50 = vld [vmem:[#allocation17 + $0x4d0] sm:$0xff] }
 0x7ac   : > { %10964 = vmatpush1.bf16.msra.mxu0 %v11929_v37  ;;  %v9351_v37 = vld [vmem:[#allocation17 + $0x330] sm:$0xff] }
 0x7ad   : > { %11050 = vmatpush1.bf16.msra.mxu1 %v11931_v10  ;;  %10965 = vmatprep.subr.bf16.mxu0 %v11938_v0  ;;  %v9348_v10 = vld [vmem:[#allocation17 + $0x318] sm:$0xff]  ;;  %v12002_v8 = vcombine.high %v9347_v13, %v9351_v37 }
 0x7ae   : > { %11051 = vmatprep.subr.bf16.mxu1 %v11940_v52  ;;  %v9352_v0 = vld [vmem:[#allocation17 + $0x338] sm:$0xff]  ;;  %v11993_v52 = vcombine.low %v9339_v32, %v9343_v7  ;;  %v12050_v7 = vcombine.high %v9395_v9, %v9399_v45 }
 0x7af   : > { %v12004_v12 = vcombine.high %v9348_v10, %v9352_v0  ;;  %v12003_v14 = vcombine.low %v9348_v10, %v9352_v0  ;;  %v9411_v10 = vld [vmem:[#allocation17 + $0x510] sm:$0xff] }
 0x7b0   : > { %10966 = vmatpush1.bf16.msra.mxu0 %v11937_v31  ;;  %v9359_v31 = vld [vmem:[#allocation17 + $0x370] sm:$0xff] }
 0x7b1   : > { %11052 = vmatpush1.bf16.msra.mxu1 %v11939_v63  ;;  %10967 = vmatprep.subr.bf16.mxu0 %v11946_v1  ;;  %v9356_v63 = vld [vmem:[#allocation17 + $0x358] sm:$0xff]  ;;  %v12010_v51 = vcombine.high %v9355_v58, %v9359_v31  ;;  %v9415_v0 = vld [vmem:[#allocation17 + $0x530] sm:$0xff] }
 0x7b2   : > { %11053 = vmatprep.subr.bf16.mxu1 %v11948_v57  ;;  %v9360_v1 = vld [vmem:[#allocation17 + $0x378] sm:$0xff]  ;;  %v12001_v57 = vcombine.low %v9347_v13, %v9351_v37 }
 0x7b3   : > { %v12012_v59 = vcombine.high %v9356_v63, %v9360_v1  ;;  %v12011_v47 = vcombine.low %v9356_v63, %v9360_v1  ;;  %v9423_v63 = vld [vmem:[#allocation17 + $0x570] sm:$0xff]  ;;  %v9420_v1 = vld [vmem:[#allocation17 + $0x558] sm:$0xff] }
 0x7b4   : > { %10968 = vmatpush1.bf16.msra.mxu0 %v11945_v56  ;;  %v9367_v56 = vld [vmem:[#allocation17 + $0x3b0] sm:$0xff] }
 0x7b5   : > { %11054 = vmatpush1.bf16.msra.mxu1 %v11947_v33  ;;  %10969 = vmatprep.subr.bf16.mxu0 %v11954_v23  ;;  %v9364_v33 = vld [vmem:[#allocation17 + $0x398] sm:$0xff]  ;;  %v12018_v44 = vcombine.high %v9363_v19, %v9367_v56 }
 0x7b6   : > { %11055 = vmatprep.subr.bf16.mxu1 %v11956_v15  ;;  %v9368_v23 = vld [vmem:[#allocation17 + $0x3b8] sm:$0xff]  ;;  %v12009_v15 = vcombine.low %v9355_v58, %v9359_v31  ;;  %v9419_v31 = vld [vmem:[#allocation17 + $0x550] sm:$0xff] }
 0x7b7   : > { %v12020_v61 = vcombine.high %v9364_v33, %v9368_v23  ;;  %v12019_v5 = vcombine.low %v9364_v33, %v9368_v23  ;;  %v9431_v33 = vld [vmem:[#allocation17 + $0x5b0] sm:$0xff]  ;;  %v9428_v23 = vld [vmem:[#allocation17 + $0x598] sm:$0xff] }
 0x7b8   : > { %10970 = vmatpush1.bf16.msra.mxu0 %v11953_v43  ;;  %v9375_v43 = vld [vmem:[#allocation17 + $0x3f0] sm:$0xff] }
 0x7b9   : > { %11056 = vmatpush1.bf16.msra.mxu1 %v11955_v25  ;;  %10971 = vmatprep.subr.bf16.mxu0 %v11962_v20  ;;  %v9372_v25 = vld [vmem:[#allocation17 + $0x3d8] sm:$0xff]  ;;  %v12026_v29 = vcombine.high %v9371_v18, %v9375_v43 }
 0x7ba   : > { %11057 = vmatprep.subr.bf16.mxu1 %v11964_v27  ;;  %v9376_v20 = vld [vmem:[#allocation17 + $0x3f8] sm:$0xff]  ;;  %v12017_v27 = vcombine.low %v9363_v19, %v9367_v56  ;;  %v9427_v56 = vld [vmem:[#allocation17 + $0x590] sm:$0xff] }
 0x7bb   : > { %v12028_v38 = vcombine.high %v9372_v25, %v9376_v20  ;;  %v12027_v6 = vcombine.low %v9372_v25, %v9376_v20  ;;  %v9439_v25 = vld [vmem:[#allocation17 + $0x5f0] sm:$0xff]  ;;  %v9436_v20 = vld [vmem:[#allocation17 + $0x5d8] sm:$0xff] }
 0x7bc   : > { %10972 = vmatpush1.bf16.msra.mxu0 %v11961_v62  ;;  %v9383_v62 = vld [vmem:[#allocation17 + $0x430] sm:$0xff] }
 0x7bd   : > { %11058 = vmatpush1.bf16.msra.mxu1 %v11963_v39  ;;  %10973 = vmatprep.subr.bf16.mxu0 %v11970_v53  ;;  %v9380_v39 = vld [vmem:[#allocation17 + $0x418] sm:$0xff]  ;;  %v12034_v35 = vcombine.high %v9379_v24, %v9383_v62 }
 0x7be   : > { %11059 = vmatprep.subr.bf16.mxu1 %v11972_v46  ;;  %v9384_v53 = vld [vmem:[#allocation17 + $0x438] sm:$0xff]  ;;  %v12025_v46 = vcombine.low %v9371_v18, %v9375_v43  ;;  %v9435_v43 = vld [vmem:[#allocation17 + $0x5d0] sm:$0xff] }
 0x7bf   : > { %v12036_v34 = vcombine.high %v9380_v39, %v9384_v53  ;;  %v12035_v60 = vcombine.low %v9380_v39, %v9384_v53  ;;  %v9447_v39 = vld [vmem:[#allocation17 + $0x630] sm:$0xff]  ;;  %v9444_v53 = vld [vmem:[#allocation17 + $0x618] sm:$0xff] }
 0x7c0   : > { %10974 = vmatpush1.bf16.msra.mxu0 %v11969_v41  ;;  %v9391_v41 = vld [vmem:[#allocation17 + $0x470] sm:$0xff] }
 0x7c1   : > { %11060 = vmatpush1.bf16.msra.mxu1 %v11971_v48  ;;  %10975 = vmatprep.subr.bf16.mxu0 %v11978_v28  ;;  %v12033_v48 = vcombine.low %v9379_v24, %v9383_v62  ;;  %v9388_v28 = vld [vmem:[#allocation17 + $0x458] sm:$0xff]  ;;  %v12042_v54 = vcombine.high %v9387_v21, %v9391_v41  ;;  %v9443_v62 = vld [vmem:[#allocation17 + $0x610] sm:$0xff] }
 0x7c2   : > { %11061 = vmatprep.subr.bf16.mxu1 %v11980_v30  ;;  %v9392_v30 = vld [vmem:[#allocation17 + $0x478] sm:$0xff] }
 0x7c3   : > { %v12043_v32 = vcombine.low %v9388_v28, %v9392_v30 }
 0x7c4   : > { %10976 = vmatpush1.bf16.msra.mxu0 %v11977_v17  ;;  %v12044_v17 = vcombine.high %v9388_v28, %v9392_v30  ;;  %v9452_v28 = vld [vmem:[#allocation17 + $0x658] sm:$0xff] }
 0x7c5   : > { %11062 = vmatpush1.bf16.msra.mxu1 %v11979_v2  ;;  %10977 = vmatprep.subr.bf16.mxu0 %v11986_v16  ;;  %v9396_v2 = vld [vmem:[#allocation17 + $0x498] sm:$0xff] }
 0x7c6   : > { %11063 = vmatprep.subr.bf16.mxu1 %v11988_v3  ;;  %v9400_v16 = vld [vmem:[#allocation17 + $0x4b8] sm:$0xff]  ;;  %v12041_v3 = vcombine.low %v9387_v21, %v9391_v41  ;;  %v9451_v41 = vld [vmem:[#allocation17 + $0x650] sm:$0xff] }
 0x7c7   : > { %v12052_v4 = vcombine.high %v9396_v2, %v9400_v16  ;;  %v9456_v30 = vld [vmem:[#allocation17 + $0x678] sm:$0xff] }
 0x7c8   : > { %10978 = vmatpush1.bf16.msra.mxu0 %v11985_v36  ;;  %v9407_v36 = vld [vmem:[#allocation17 + $0x4f0] sm:$0xff] }
 0x7c9   : > { %11064 = vmatpush1.bf16.msra.mxu1 %v11987_v49  ;;  %10979 = vmatprep.subr.bf16.mxu0 %v11994_v26  ;;  %v9404_v49 = vld [vmem:[#allocation17 + $0x4d8] sm:$0xff]  ;;  %v12058_v13 = vcombine.high %v9403_v50, %v9407_v36 }
 0x7ca   : > { %11065 = vmatprep.subr.bf16.mxu1 %v11996_v11  ;;  %v9408_v26 = vld [vmem:[#allocation17 + $0x4f8] sm:$0xff]  ;;  %v12049_v11 = vcombine.low %v9395_v9, %v9399_v45  ;;  %v12108_v45 = vcombine.high %v9452_v28, %v9456_v30 }
 0x7cb   : > { %v12060_v37 = vcombine.high %v9404_v49, %v9408_v26 }
 0x7cc   : > { %10980 = vmatpush1.bf16.msra.mxu0 %v11993_v52  ;;  %v9412_v52 = vld [vmem:[#allocation17 + $0x518] sm:$0xff] }
 0x7cd   : > { %11066 = vmatpush1.bf16.msra.mxu1 %v11995_v55  ;;  %10981 = vmatprep.subr.bf16.mxu0 %v12002_v8  ;;  %v9416_v55 = vld [vmem:[#allocation17 + $0x538] sm:$0xff]  ;;  %v12059_v8 = vcombine.low %v9404_v49, %v9408_v26  ;;  %v9471_v49 = vld [vmem:[#allocation17 + $0x6f0] sm:$0xff] }
 0x7ce   : > { %11067 = vmatprep.subr.bf16.mxu1 %v12004_v12  ;;  %v12066_v12 = vcombine.high %v9411_v10, %v9415_v0  ;;  %v12068_v58 = vcombine.high %v9412_v52, %v9416_v55  ;;  %v9468_v26 = vld [vmem:[#allocation17 + $0x6d8] sm:$0xff] }
 0x7d0   : > { %10982 = vmatpush1.bf16.msra.mxu0 %v12001_v57  ;;  %v9424_v57 = vld [vmem:[#allocation17 + $0x578] sm:$0xff] }
 0x7d1   : > { %11068 = vmatpush1.bf16.msra.mxu1 %v12003_v14  ;;  %10983 = vmatprep.subr.bf16.mxu0 %v12010_v51  ;;  %v12065_v14 = vcombine.low %v9411_v10, %v9415_v0  ;;  %v12067_v51 = vcombine.low %v9412_v52, %v9416_v55  ;;  %v12076_v19 = vcombine.high %v9420_v1, %v9424_v57  ;;  %v9475_v0 = vld [vmem:[#allocation17 + $0x710] sm:$0xff]  ;;  %v9476_v55 = vld [vmem:[#allocation17 + $0x718] sm:$0xff] }
 0x7d2   : > { %11069 = vmatprep.subr.bf16.mxu1 %v12012_v59  ;;  %v12074_v59 = vcombine.high %v9419_v31, %v9423_v63  ;;  %v9479_v52 = vld [vmem:[#allocation17 + $0x730] sm:$0xff] }
 0x7d4   : > { %10984 = vmatpush1.bf16.msra.mxu0 %v12009_v15  ;;  %v9432_v15 = vld [vmem:[#allocation17 + $0x5b8] sm:$0xff] }
 0x7d5   : > { %11070 = vmatpush1.bf16.msra.mxu1 %v12011_v47  ;;  %10985 = vmatprep.subr.bf16.mxu0 %v12018_v44  ;;  %v12073_v47 = vcombine.low %v9419_v31, %v9423_v63  ;;  %v12075_v44 = vcombine.low %v9420_v1, %v9424_v57  ;;  %v12084_v18 = vcombine.high %v9428_v23, %v9432_v15  ;;  %v9483_v63 = vld [vmem:[#allocation17 + $0x750] sm:$0xff]  ;;  %v9484_v57 = vld [vmem:[#allocation17 + $0x758] sm:$0xff] }
 0x7d6   : > { %11071 = vmatprep.subr.bf16.mxu1 %v12020_v61  ;;  %v12082_v61 = vcombine.high %v9427_v56, %v9431_v33  ;;  %v9487_v1 = vld [vmem:[#allocation17 + $0x770] sm:$0xff] }
 0x7d8   : > { %10986 = vmatpush1.bf16.msra.mxu0 %v12017_v27  ;;  %v9440_v27 = vld [vmem:[#allocation17 + $0x5f8] sm:$0xff] }
 0x7d9   : > { %11072 = vmatpush1.bf16.msra.mxu1 %v12019_v5  ;;  %10987 = vmatprep.subr.bf16.mxu0 %v12026_v29  ;;  %v12081_v5 = vcombine.low %v9427_v56, %v9431_v33  ;;  %v12083_v29 = vcombine.low %v9428_v23, %v9432_v15  ;;  %v12092_v24 = vcombine.high %v9436_v20, %v9440_v27  ;;  %v9491_v33 = vld [vmem:[#allocation17 + $0x790] sm:$0xff]  ;;  %v9492_v15 = vld [vmem:[#allocation17 + $0x798] sm:$0xff] }
 0x7da   : > { %11073 = vmatprep.subr.bf16.mxu1 %v12028_v38  ;;  %v12090_v38 = vcombine.high %v9435_v43, %v9439_v25  ;;  %v9495_v23 = vld [vmem:[#allocation17 + $0x7b0] sm:$0xff] }
 0x7dc   : > { %10988 = vmatpush1.bf16.msra.mxu0 %v12025_v46  ;;  %v9448_v46 = vld [vmem:[#allocation17 + $0x638] sm:$0xff] }
 0x7dd   : > { %11074 = vmatpush1.bf16.msra.mxu1 %v12027_v6  ;;  %11000 = vmatprep.subr.bf16.mxu0 %v12034_v35  ;;  %v12089_v6 = vcombine.low %v9435_v43, %v9439_v25  ;;  %v12091_v35 = vcombine.low %v9436_v20, %v9440_v27  ;;  %v12100_v21 = vcombine.high %v9444_v53, %v9448_v46  ;;  %v9499_v25 = vld [vmem:[#allocation17 + $0x7d0] sm:$0xff]  ;;  %v9500_v27 = vld [vmem:[#allocation17 + $0x7d8] sm:$0xff] }
 0x7de   : > { %11086 = vmatprep.subr.bf16.mxu1 %v12036_v34  ;;  %v12098_v34 = vcombine.high %v9443_v62, %v9447_v39  ;;  %v9503_v20 = vld [vmem:[#allocation17 + $0x7f0] sm:$0xff] }
 0x7df   : > { %10990 = vmatmul.mubr.bf16.vlgmr.msra.gmra.mrb[40].mxu0 %v18625_v40 }
 0x7e0   : > { %11076 = vmatmul.mubr.bf16.vlgmr.msra.gmra.mrb[44].mxu1 %v18625_v40  ;;  %11001 = vmatpush1.bf16.msra.mxu0 %v12033_v48  ;;  %v12051_v40 = vcombine.low %v9396_v2, %v9400_v16  ;;  %v9455_v48 = vld [vmem:[#allocation17 + $0x670] sm:$0xff]  ;;  %v9460_v16 = vld [vmem:[#allocation17 + $0x698] sm:$0xff] }
 0x7e1   : > { %11032 = vmatprep.mubr.bf16.mxu0 %v18756_v42  ;;  %11087 = vmatpush1.bf16.msra.mxu1 %v12035_v60  ;;  %v12097_v60 = vcombine.low %v9443_v62, %v9447_v39  ;;  %v12106_v9 = vcombine.high %v9451_v41, %v9455_v48  ;;  %v9463_v2 = vld [vmem:[#allocation17 + $0x6b0] sm:$0xff]  ;;  %v12153_v39 = vcombine.low %v9499_v25, %v9503_v20 }
 0x7e2   : > { %11118 = vmatprep.mubr.bf16.mxu1 %v18756_v42  ;;  %11002 = vmatprep.subr.bf16.mxu0 %v12042_v54  ;;  %v12057_v42 = vcombine.low %v9403_v50, %v9407_v36  ;;  %v12099_v54 = vcombine.low %v9444_v53, %v9448_v46  ;;  %v9467_v36 = vld [vmem:[#allocation17 + $0x6d0] sm:$0xff]  ;;  %v18878_v46 = vld [vmem:[%s20137_s8] sm:$0xff]  ;;  %s11415_s8 = sshll.u32 %s880_s11, 4  ;;  %s18938_s8 = int_to_ptr.vmem [resolvable:$true] %s11415_s8 }
 0x7e3   : > { %11088 = vmatprep.subr.bf16.mxu1 %v12044_v17  ;;  %v9459_v17 = vld [vmem:[#allocation17 + $0x690] sm:$0xff]  ;;  %s13034_s28 = scalar_lea.vmem %s18938_s8, 128  ;;  %p13041_p2 = scmp.lt.s32.totalorder %s18938_s8, %s13039_s4 }
 0x7e4   : > { %11003 = vmatpush1.bf16.msra.mxu0 %v12041_v3  ;;  %v9464_v3 = vld [vmem:[#allocation17 + $0x6b8] sm:$0xff]  ;;  %p13035_p12 = scmp.ne.s32.totalorder %s18938_s8, %s13034_s28  ;;  %p13042_p8 = scmp.lt.s32.totalorder %s13040_s7, %s13034_s28 }
 0x7e5   : > { %11089 = vmatpush1.bf16.msra.mxu1 %v12043_v32  ;;  %11004 = vmatprep.subr.bf16.mxu0 %v12050_v7  ;;  %v12105_v32 = vcombine.low %v9451_v41, %v9455_v48  ;;  %v12107_v7 = vcombine.low %v9452_v28, %v9456_v30  ;;  %v12116_v50 = vcombine.high %v9460_v16, %v9464_v3  ;;  %v20141_v48 = vld [vmem:[#allocation27_spill] sm:$0xff] }
 0x7e6   : > { %11090 = vmatprep.subr.bf16.mxu1 %v12052_v4  ;;  %v12114_v4 = vcombine.high %v9459_v17, %v9463_v2  ;;  %v11138_v28 = vrot.slane %v18878_v46, %v20141_v48  ;;  %p13036_p13 = pnand %p13035_p12, %p20145_p1  ;;  %p13043_p6 = por %p13042_p8, %p13041_p2 }
 0x7e8   : > { %11005 = vmatpush1.bf16.msra.mxu0 %v12049_v11  ;;  %v9472_v11 = vld [vmem:[#allocation17 + $0x6f8] sm:$0xff]  ;;  %p13037_p0 = pneg %p13036_p13 }
 0x7e9   : > { %11091 = vmatpush1.bf16.msra.mxu1 %v12051_v40  ;;  %11006 = vmatprep.subr.bf16.mxu0 %v12058_v13  ;;  %v12113_v40 = vcombine.low %v9459_v17, %v9463_v2  ;;  %v12115_v13 = vcombine.low %v9460_v16, %v9464_v3  ;;  %v12124_v10 = vcombine.high %v9468_v26, %v9472_v11 }
 0x7ea   : > { %11092 = vmatprep.subr.bf16.mxu1 %v12060_v37  ;;  %v12122_v37 = vcombine.high %v9467_v36, %v9471_v49  ;;  %p13044_p10 = pnand %p13043_p6, %p13037_p0 }
 0x7ec   : > { %11007 = vmatpush1.bf16.msra.mxu0 %v12057_v42  ;;  %v9480_v42 = vld [vmem:[#allocation17 + $0x738] sm:$0xff] }
 0x7ed   : > { %11093 = vmatpush1.bf16.msra.mxu1 %v12059_v8  ;;  %11008 = vmatprep.subr.bf16.mxu0 %v12066_v12  ;;  %v12121_v8 = vcombine.low %v9467_v36, %v9471_v49  ;;  %v12123_v12 = vcombine.low %v9468_v26, %v9472_v11  ;;  %v12132_v31 = vcombine.high %v9476_v55, %v9480_v42 }
 0x7ee   : > { %11094 = vmatprep.subr.bf16.mxu1 %v12068_v58  ;;  %v12130_v58 = vcombine.high %v9475_v0, %v9479_v52 }
 0x7f0   : > { %11009 = vmatpush1.bf16.msra.mxu0 %v12065_v14  ;;  %v9488_v14 = vld [vmem:[#allocation17 + $0x778] sm:$0xff] }
 0x7f1   : > { %11095 = vmatpush1.bf16.msra.mxu1 %v12067_v51  ;;  %11010 = vmatprep.subr.bf16.mxu0 %v12074_v59  ;;  %v12129_v51 = vcombine.low %v9475_v0, %v9479_v52  ;;  %v12131_v59 = vcombine.low %v9476_v55, %v9480_v42  ;;  %v12140_v56 = vcombine.high %v9484_v57, %v9488_v14 }
 0x7f2   : > { %11096 = vmatprep.subr.bf16.mxu1 %v12076_v19  ;;  %v12138_v19 = vcombine.high %v9483_v63, %v9487_v1 }
 0x7f4   : > { %11011 = vmatpush1.bf16.msra.mxu0 %v12073_v47  ;;  %v9496_v47 = vld [vmem:[#allocation17 + $0x7b8] sm:$0xff] }
 0x7f5   : > { %11097 = vmatpush1.bf16.msra.mxu1 %v12075_v44  ;;  %11012 = vmatprep.subr.bf16.mxu0 %v12082_v61  ;;  %v12137_v44 = vcombine.low %v9483_v63, %v9487_v1  ;;  %v12139_v61 = vcombine.low %v9484_v57, %v9488_v14  ;;  %v12148_v43 = vcombine.high %v9492_v15, %v9496_v47 }
 0x7f6   : > { %11098 = vmatprep.subr.bf16.mxu1 %v12084_v18  ;;  %v12146_v18 = vcombine.high %v9491_v33, %v9495_v23 }
 0x7f8   : > { %11013 = vmatpush1.bf16.msra.mxu0 %v12081_v5  ;;  %v9504_v5 = vld [vmem:[#allocation17 + $0x7f8] sm:$0xff] }
 0x7f9   : > { %11099 = vmatpush1.bf16.msra.mxu1 %v12083_v29  ;;  %11014 = vmatprep.subr.bf16.mxu0 %v12090_v38  ;;  %v12145_v29 = vcombine.low %v9491_v33, %v9495_v23  ;;  %v12147_v38 = vcombine.low %v9492_v15, %v9496_v47  ;;  %v12156_v62 = vcombine.high %v9500_v27, %v9504_v5 }
 0x7fa   : > { %11100 = vmatprep.subr.bf16.mxu1 %v12092_v24  ;;  %v12154_v24 = vcombine.high %v9499_v25, %v9503_v20  ;;  %v12155_v53 = vcombine.low %v9500_v27, %v9504_v5 }
 0x7fc   : > { %11015 = vmatpush1.bf16.msra.mxu0 %v12089_v6  ;;  %v18883_v6 = vld [vmem:[%s20138_s21] sm:$0xff]  ;;  %s20144_s21 = sld [smem:[#allocation118_spill]] }
 0x7fd   : > { %11101 = vmatpush1.bf16.msra.mxu1 %v12091_v35  ;;  %11016 = vmatprep.subr.bf16.mxu0 %v12098_v34  ;;  %v20139_v35 = vld [vmem:[#allocation32_spill] sm:$0xff]  ;;  %v11196_v17 = vrot.slane %v18883_v6, %v20141_v48 }
 0x7fe   : > { %11102 = vmatprep.subr.bf16.mxu1 %v12100_v21  ;;  %v11134_v34 = vrot.slane %v18878_v46, %v20139_v35  ;;  %v20140_v21 = vld [vmem:[#allocation40_spill] sm:$0xff] }
 0x7ff   : > { %v11142_v41 = vrot.slane %v18878_v46, %v20140_v21 }
 0x800   : > { %11017 = vmatpush1.bf16.msra.mxu0 %v12097_v60  ;;  %v11192_v60 = vrot.slane %v18883_v6, %v20139_v35 }
 0x801   : > { %11103 = vmatpush1.bf16.msra.mxu1 %v12099_v54  ;;  %11018 = vmatprep.subr.bf16.mxu0 %v12106_v9  ;;  %v11200_v54 = vrot.slane %v18883_v6, %v20140_v21 }
 0x802   : > { %11104 = vmatprep.subr.bf16.mxu1 %v12108_v45  ;;  %s18936_s0 = scalar_lea.hbm %s20144_s21, %s12163_s3 }
 0x804   : > { %11019 = vmatpush1.bf16.msra.mxu0 %v12105_v32 }
 0x805   : > { %11105 = vmatpush1.bf16.msra.mxu1 %v12107_v7  ;;  %11020 = vmatprep.subr.bf16.mxu0 %v12114_v4 }
 0x806   : > { %11106 = vmatprep.subr.bf16.mxu1 %v12116_v50 }
 0x808   : > { %11021 = vmatpush1.bf16.msra.mxu0 %v12113_v40 }
 0x809   : > { %11107 = vmatpush1.bf16.msra.mxu1 %v12115_v13  ;;  %11022 = vmatprep.subr.bf16.mxu0 %v12122_v37 }
 0x80a   : > { %11108 = vmatprep.subr.bf16.mxu1 %v12124_v10 }
 0x80c   : > { %11023 = vmatpush1.bf16.msra.mxu0 %v12121_v8 }
 0x80d   : > { %11109 = vmatpush1.bf16.msra.mxu1 %v12123_v12  ;;  %11024 = vmatprep.subr.bf16.mxu0 %v12130_v58 }
 0x80e   : > { %11110 = vmatprep.subr.bf16.mxu1 %v12132_v31 }
 0x810   : > { %11025 = vmatpush1.bf16.msra.mxu0 %v12129_v51 }
 0x811   : > { %11111 = vmatpush1.bf16.msra.mxu1 %v12131_v59  ;;  %11026 = vmatprep.subr.bf16.mxu0 %v12138_v19 }
 0x812   : > { %11112 = vmatprep.subr.bf16.mxu1 %v12140_v56 }
 0x814   : > { %11027 = vmatpush1.bf16.msra.mxu0 %v12137_v44 }
 0x815   : > { %11113 = vmatpush1.bf16.msra.mxu1 %v12139_v61  ;;  %11028 = vmatprep.subr.bf16.mxu0 %v12146_v18 }
 0x816   : > { %11114 = vmatprep.subr.bf16.mxu1 %v12148_v43 }
 0x818   : > { %11029 = vmatpush1.bf16.msra.mxu0 %v12145_v29 }
 0x819   : > { %11115 = vmatpush1.bf16.msra.mxu1 %v12147_v38  ;;  %11030 = vmatprep.subr.bf16.mxu0 %v12154_v24 }
 0x81a   : > { %11116 = vmatprep.subr.bf16.mxu1 %v12156_v62 }
 0x81c   : > { %11031 = vmatpush1.bf16.msra.mxu0 %v12153_v39 }
 0x81d   : > { %11117 = vmatpush1.bf16.msra.mxu1 %v12155_v53 }
 0x81f   : > { %11033 = vmatmul.mubr.bf16.vlgmr.msra.gmra.mrb[40].mxu0 %v18863_v22 }
 0x820   : > { %11119 = vmatmul.mubr.bf16.vlgmr.msra.gmra.mrb[44].mxu1 %v18863_v22  ;;  %v20142_v22 = vld [vmem:[#allocation78_spill] sm:$0xff] }
 0x821   : > { %v11146_v30 = vrot.slane %v18878_v46, %v20142_v22  ;;  %v11204_v2 = vrot.slane %v18883_v6, %v20142_v22  ;;  %v13135_v22 = vmov 1966171168  }
 0x872   : > { %v10862_v9 = vpop.f32.mrb[36].mxu0  ;;  %v10948_v45 = vpop.f32.mrb[40].mxu1 }
 0x873   : > { %v11171_v16 = vmul.f32 %v11134_v34, %v10862_v9  ;;  %v11173_v3 = vmul.f32 %v11142_v41, %v10948_v45  ;;  %v10864_v32 = vpop.f32.mrb[37].mxu0  ;;  %v10950_v7 = vpop.f32.mrb[41].mxu1 }
 0x874   : > { %v11172_v4 = vmul.f32 %v11138_v28, %v10864_v32  ;;  %v11174_v50 = vmul.f32 %v11146_v30, %v10950_v7  ;;  %v10866_v36 = vpop.f32.mrb[38].mxu0  ;;  %v10952_v49 = vpop.f32.mrb[42].mxu1 }
 0x875   : > { %v11229_v26 = vadd.f32 %v11192_v60, %v11171_v16  ;;  %v11231_v11 = vadd.f32 %v11200_v54, %v11173_v3  ;;  %v11179_v40 = vmul.f32 %v11134_v34, %v10866_v36  ;;  %v11181_v13 = vmul.f32 %v11142_v41, %v10952_v49  ;;  %v10868_v37 = vpop.f32.mrb[39].mxu0  ;;  %v10954_v10 = vpop.f32.mrb[43].mxu1 }
 0x876   : > { %v11230_v0 = vadd.f32 %v11196_v17, %v11172_v4  ;;  %v11232_v52 = vadd.f32 %v11204_v2, %v11174_v50  ;;  %v11180_v55 = vmul.f32 %v11138_v28, %v10868_v37  ;;  %v11182_v42 = vmul.f32 %v11146_v30, %v10954_v10 }
 0x877   : > { %v11245_v8 = vmul.f32 0.2, %v11229_v26  ;;  %v11247_v12 = vmul.f32 0.2, %v11231_v11  ;;  %v11237_v58 = vadd.f32 %v11192_v60, %v11179_v40  ;;  %v11239_v31 = vadd.f32 %v11200_v54, %v11181_v13  ;;  %v20143_v13 = vld [vmem:[#allocation26_spill] sm:$0xff] }
 0x878   : > { %v11246_v63 = vmul.f32 0.2, %v11230_v0  ;;  %v11248_v1 = vmul.f32 0.2, %v11232_v52  ;;  %v11238_v57 = vadd.f32 %v11196_v17, %v11180_v55  ;;  %v11240_v14 = vadd.f32 %v11204_v2, %v11182_v42 }
 0x879   : > { %v11253_v51 = vmul.f32 0.2, %v11237_v58  ;;  %v11255_v59 = vmul.f32 0.2, %v11239_v31  ;;  %v11261_v33 = vmax.f32 %v11229_v26, %v11245_v8  ;;  %v11263_v23 = vmax.f32 %v11231_v11, %v11247_v12 }
 0x87a   : > { %v11254_v19 = vmul.f32 0.2, %v11238_v57  ;;  %v11256_v56 = vmul.f32 0.2, %v11240_v14  ;;  %v11262_v44 = vmax.f32 %v11230_v0, %v11246_v63  ;;  %v11264_v61 = vmax.f32 %v11232_v52, %v11248_v1 }
 0x87b   : > { %v11269_v15 = vmax.f32 %v11237_v58, %v11253_v51  ;;  %v11271_v47 = vmax.f32 %v11239_v31, %v11255_v59  ;;  %v11354_v30 = vunpack.c.l.s4 %v13135_v22  ;;  %v11149_v8 = vsub.s32 4, %v20143_v13 }
 0x87c   : > { %v11270_v18 = vmax.f32 %v11238_v57, %v11254_v19  ;;  %v11272_v43 = vmax.f32 %v11240_v14, %v11256_v56  ;;  %v11157_v12 = vsub.s32 6, %v20143_v13  ;;  %v11153_v58 = vsub.s32 5, %v20143_v13 }
 0x87d   : > { %v11277_v25 = vadd.f32 %v11269_v15, %v11261_v33  ;;  %v11291_v20 = vadd.f32 %v11271_v47, %v11263_v23  ;;  %v11355_v32 = vunpack.c.0.s8 %v11354_v30  ;;  %v11161_v31 = vsub.s32 7, %v20143_v13 }
 0x87e   : > { %v11284_v27 = vadd.f32 %v11270_v18, %v11262_v44  ;;  %v11298_v5 = vadd.f32 %v11272_v43, %v11264_v61  ;;  %v11150_v63 = vrot.slane %v18878_v46, %v11149_v8  ;;  %v11158_v1 = vrot.slane %v18878_v46, %v11157_v12 }
 0x87f   : > { %v11278_v29 = vrot.slane %v11277_v25, 4  ;;  %v11292_v38 = vrot.slane %v11291_v20, 4  ;;  %v18902_v37 = vsub.s32 %v11355_v32, %v20143_v13  ;;  %v11154_v57 = vrot.slane %v18878_v46, %v11153_v58 }
 0x880   : > { %v11285_v24 = vrot.slane %v11284_v27, 4  ;;  %v11299_v62 = vrot.slane %v11298_v5, 4  ;;  %v11208_v14 = vrot.slane %v18883_v6, %v11149_v8  ;;  %v11162_v51 = vrot.slane %v18878_v46, %v11161_v31 }
 0x881   : > { %v11279_v39 = vadd.f32 %v11278_v29, %v11277_v25  ;;  %v11293_v53 = vadd.f32 %v11292_v38, %v11291_v20  ;;  %v11216_v19 = vrot.slane %v18883_v6, %v11157_v12  ;;  %v11212_v56 = vrot.slane %v18883_v6, %v11153_v58 }
 0x882   : > { %v11286_v35 = vadd.f32 %v11285_v24, %v11284_v27  ;;  %v11300_v34 = vadd.f32 %v11299_v62, %v11298_v5  ;;  %v11220_v47 = vrot.slane %v18883_v6, %v11161_v31 }
 0x883   : > { %v11280_v21 = vrot.slane %v11279_v39, 2  ;;  %v11294_v41 = vrot.slane %v11293_v53, 2 }
 0x884   : > { %v11287_v48 = vrot.slane %v11286_v35, 2  ;;  %v11301_v28 = vrot.slane %v11300_v34, 2 }
 0x885   : > { %v11281_v60 = vadd.f32 %v11280_v21, %v11279_v39  ;;  %v11295_v54 = vadd.f32 %v11294_v41, %v11293_v53 }
 0x886   : > { %v11288_v9 = vadd.f32 %v11287_v48, %v11286_v35  ;;  %v11302_v45 = vadd.f32 %v11301_v28, %v11300_v34 }
 0x887   : > { %v11282_v17 = vrot.slane %v11281_v60, 1  ;;  %v11296_v2 = vrot.slane %v11295_v54, 1 }
 0x888   : > { %v11289_v16 = vrot.slane %v11288_v9, 1  ;;  %v11303_v3 = vrot.slane %v11302_v45, 1 }
 0x889   : > { %v11283_v7 = vadd.f32 %v11282_v17, %v11281_v60  ;;  %v11297_v4 = vadd.f32 %v11296_v2, %v11295_v54 }
 0x88a   : > { %v11290_v50 = vadd.f32 %v11289_v16, %v11288_v9  ;;  %v11304_v36 = vadd.f32 %v11303_v3, %v11302_v45 }
 0x88b   : > { %v11333_v49 = vmul.f32 0.0625, %v11283_v7  ;;  %v11335_v26 = vmul.f32 0.0625, %v11297_v4 }
 0x88c   : > { %v11334_v11 = vmul.f32 0.0625, %v11290_v50  ;;  %v11336_v40 = vmul.f32 0.0625, %v11304_v36 }
 0x88e   : > { %v11349_v10 = vcombine.low %v11333_v49, %v11334_v11  ;;  %v11350_v0 = vcombine.low %v11335_v26, %v11336_v40 }
 0x890   : > { %v18905_v52 = vrot.slane %v11349_v10, %v18902_v37  ;;  %v18908_v55 = vrot.slane %v11350_v0, %v18902_v37 }
 0x892   : > { %v11381_v42 = vcombine.low %v18905_v52, %v18908_v55 }
 0x8f2   : > { %v11034_v59 = vpop.f32.mrb[40].mxu0 }
 0x8f3   : > { %v11175_v33 = vmul.f32 %v11150_v63, %v11034_v59  ;;  %v11120_v23 = vpop.f32.mrb[44].mxu1  ;;  %v11036_v15 = vpop.f32.mrb[41].mxu0 }
 0x8f4   : > { %v11177_v44 = vmul.f32 %v11158_v1, %v11120_v23  ;;  %v11176_v61 = vmul.f32 %v11154_v57, %v11036_v15  ;;  %v11122_v18 = vpop.f32.mrb[45].mxu1  ;;  %v11038_v43 = vpop.f32.mrb[42].mxu0 }
 0x8f5   : > { %v11233_v25 = vadd.f32 %v11208_v14, %v11175_v33  ;;  %v11178_v20 = vmul.f32 %v11162_v51, %v11122_v18  ;;  %v11183_v27 = vmul.f32 %v11150_v63, %v11038_v43  ;;  %v11124_v5 = vpop.f32.mrb[46].mxu1  ;;  %v11040_v29 = vpop.f32.mrb[43].mxu0 }
 0x8f6   : > { %v11235_v46 = vadd.f32 %v11216_v19, %v11177_v44  ;;  %v11234_v38 = vadd.f32 %v11212_v56, %v11176_v61  ;;  %v11185_v24 = vmul.f32 %v11158_v1, %v11124_v5  ;;  %v11184_v62 = vmul.f32 %v11154_v57, %v11040_v29  ;;  %v11126_v39 = vpop.f32.mrb[47].mxu1 }
 0x8f7   : > { %v11249_v53 = vmul.f32 0.2, %v11233_v25  ;;  %v11236_v35 = vadd.f32 %v11220_v47, %v11178_v20  ;;  %v11241_v34 = vadd.f32 %v11208_v14, %v11183_v27  ;;  %v11186_v21 = vmul.f32 %v11162_v51, %v11126_v39 }
 0x8f8   : > { %v11251_v41 = vmul.f32 0.2, %v11235_v46  ;;  %v11250_v6 = vmul.f32 0.2, %v11234_v38  ;;  %v11243_v48 = vadd.f32 %v11216_v19, %v11185_v24  ;;  %v11242_v28 = vadd.f32 %v11212_v56, %v11184_v62 }
 0x8f9   : > { %v11252_v22 = vmul.f32 0.2, %v11236_v35  ;;  %v11257_v30 = vmul.f32 0.2, %v11241_v34  ;;  %v11244_v60 = vadd.f32 %v11220_v47, %v11186_v21  ;;  %v11265_v45 = vmax.f32 %v11233_v25, %v11249_v53 }
 0x8fa   : > { %v11259_v54 = vmul.f32 0.2, %v11243_v48  ;;  %v11258_v9 = vmul.f32 0.2, %v11242_v28  ;;  %v11267_v16 = vmax.f32 %v11235_v46, %v11251_v41  ;;  %v11266_v3 = vmax.f32 %v11234_v38, %v11250_v6 }
 0x8fb   : > { %v11273_v17 = vmax.f32 %v11241_v34, %v11257_v30  ;;  %v11260_v2 = vmul.f32 0.2, %v11244_v60  ;;  %v11268_v4 = vmax.f32 %v11236_v35, %v11252_v22  ;;  %v11389_v39 = vrot.slane %v11381_v42, %v18902_v37 }
 0x8fc   : > { %v11275_v32 = vmax.f32 %v11243_v48, %v11259_v54  ;;  %v11274_v7 = vmax.f32 %v11242_v28, %v11258_v9 }
 0x8fd   : > { %v11305_v50 = vadd.f32 %v11273_v17, %v11265_v45  ;;  %v11276_v36 = vmax.f32 %v11244_v60, %v11260_v2 }
 0x8fe   : > { %v11319_v49 = vadd.f32 %v11275_v32, %v11267_v16  ;;  %v11312_v26 = vadd.f32 %v11274_v7, %v11266_v3 }
 0x8ff   : > { %v11306_v11 = vrot.slane %v11305_v50, 4  ;;  %v11326_v40 = vadd.f32 %v11276_v36, %v11268_v4 }
 0x900   : > { %v11320_v13 = vrot.slane %v11319_v49, 4  ;;  %v11313_v10 = vrot.slane %v11312_v26, 4 }
 0x901   : > { %v11307_v0 = vadd.f32 %v11306_v11, %v11305_v50  ;;  %v11327_v8 = vrot.slane %v11326_v40, 4 }
 0x902   : > { %v11321_v12 = vadd.f32 %v11320_v13, %v11319_v49  ;;  %v11314_v58 = vadd.f32 %v11313_v10, %v11312_v26 }
 0x903   : > { %v11308_v31 = vrot.slane %v11307_v0, 2  ;;  %v11328_v63 = vadd.f32 %v11327_v8, %v11326_v40 }
 0x904   : > { %v11322_v1 = vrot.slane %v11321_v12, 2  ;;  %v11315_v57 = vrot.slane %v11314_v58, 2 }
 0x905   : > { %v11309_v14 = vadd.f32 %v11308_v31, %v11307_v0  ;;  %v11329_v51 = vrot.slane %v11328_v63, 2 }
 0x906   : > { %v11323_v59 = vadd.f32 %v11322_v1, %v11321_v12  ;;  %v11316_v19 = vadd.f32 %v11315_v57, %v11314_v58 }
 0x907   : > { %v11310_v56 = vrot.slane %v11309_v14, 1  ;;  %v11330_v33 = vadd.f32 %v11329_v51, %v11328_v63 }
 0x908   : > { %v11324_v23 = vrot.slane %v11323_v59, 1  ;;  %v11317_v15 = vrot.slane %v11316_v19, 1 }
 0x909   : > { %v11311_v47 = vadd.f32 %v11310_v56, %v11309_v14  ;;  %v11331_v44 = vrot.slane %v11330_v33, 1 }
 0x90a   : > { %v11325_v61 = vadd.f32 %v11324_v23, %v11323_v59  ;;  %v11318_v18 = vadd.f32 %v11317_v15, %v11316_v19 }
 0x90b   : > { %v11337_v43 = vmul.f32 0.0625, %v11311_v47  ;;  %v11332_v25 = vadd.f32 %v11331_v44, %v11330_v33 }
 0x90c   : > { %v11339_v20 = vmul.f32 0.0625, %v11325_v61  ;;  %v11338_v27 = vmul.f32 0.0625, %v11318_v18 }
 0x90d   : > { %v11340_v5 = vmul.f32 0.0625, %v11332_v25 }
 0x90e   : > { %v11351_v29 = vcombine.low %v11337_v43, %v11338_v27 }
 0x90f   : > { %v11352_v46 = vcombine.low %v11339_v20, %v11340_v5 }
 0x910   : > { %v11373_v38 = vrot.slane %v11351_v29, %v18902_v37 }
 0x911   : > { %v11380_v24 = vrot.slane %v11352_v46, %v18902_v37 }
 0x913   : > { %v11382_v62 = vcombine.low %v11373_v38, %v11380_v24 }
 0x915   : > { %v11396_v53 = vrot.slane %v11382_v62, %v18902_v37 }
 0x917   : > { %v11397_v35 = vcombine.low %v11389_v39, %v11396_v53 }
 0x919   : > { %11399 = vst [vmem:[%s880_s11] sm:$0xff] %v11397_v35 }
 0x91a   : > { %13047 = shalt.err (!%p13044_p10)
}
 0x91b   : > { %s13048_s14 = scalar_lea.hbm %s18936_s0, 128  ;;  %s13052_s1 = scalar_lea.hbm %s20144_s21, 256 }
 0x91c   : > { %p13049_p11 = scmp.ne.s32.totalorder %s18936_s0, %s13048_s14  ;;  %p13053_p9 = scmp.lt.u32.totalorder %s18936_s0, %s20144_s21 }
 0x91d   : > { %p13054_p7 = scmp.lt.u32.totalorder %s13052_s1, %s13048_s14  ;;  %p13056_p12 = scmp.lt.u32.totalorder %s13048_s14, %s18936_s0 }
 0x91e   : > { %p13050_p3 = pnand %p13049_p11, %p20145_p1 }
 0x91f   : > { %p13055_p4 = por %p13054_p7, %p13053_p9 }
 0x920   : > { %p13051_p5 = pneg %p13050_p3 }
 0x921   : > { %p13057_p13 = por %p13056_p12, %p13055_p4 }
 0x923   : > { %p13058_p0 = pnand %p13057_p13, %p13051_p5 }
 0x925   : > { %13061 = shalt.err (!%p13058_p0)
}
 0x926   : > { %12266 = dma.vmem_to_hbm [thread:$0]  (%p20145_p1), %s18938_s8, 128, %s18936_s0, %s11401_s26  }
 0x927 PF: > { %s11427_s7 = sand.u32 1, %s13104_s29   ;;  %p20146_p2 = scmp.ne.s32.totalorder %s19439_s5, 0 }
 0x928   : > { %p20147_p8 = scmp.ge.s32.totalorder %s13116_s30, 2  ;;  %s11428_s10 = scalar_lea.sflag [#allocation7], %s11427_s7 }
 0x92a   : > { %p12295_p6 = pnand %p20147_p8, %p20146_p2 }
 0x92c   : > { %13099 = dma.done.wait (!%p12295_p6), %s11428_s10, 128  }
 0x92d   : > { %13101 = vsyncadd (!%p12295_p6), %s11428_s10, 4294967168  ;;  %p42_p10 = scmp.ge.s32.totalorder %s13477_s23, 4   ;;  %s20148_s29 = smov %s13108_s2 }
 0x92e   : > { %s20149_s2 = smov %s13112_s6  ;;  %s20150_s6 = smov %s13489_s12 }
 0x92f   : > { %s20151_s30 = smov %s13477_s23  ;;  %44 = sbr.rel (!%p42_p10) target bundleno = 30 (0x1e), region = 225 }
 0x936   :  { %11433 = vsyncpa [#allocation6], 1 }
 0x937   :  { %11435 = vsyncpa [#allocation6 + $0x1], 1 }
 0x938   :  { %11436 = vsyncpa [#allocation9], 1 }
 0x939   :  { %11437 = vsyncpa [#allocation12], 1 }
 0x93a   :  { %11438 = vsyncpa [#allocation15], 1 }
 0x93b   :  { %11439 = vsyncpa [#allocation18], 1 }
 0x93c   :  { %11440 = vsyncpa [#allocation7], 1 }
 0x93d   :  { %11442 = vsyncpa [#allocation7 + $0x1], 1 }

</bundles_post_ra>
